<compile_context>
chip_gen: v5e
topology: v5e:2x2
jax: 0.10.0
libtpu: 0.0.40
codegen_flags: <defaults>
</compile_context>

<pallas_src>
import jax
import jax.numpy as jnp
from jax import lax
from jax.experimental import pallas as pl
from jax.experimental.pallas import tpu as pltpu


def _bottleneck_kernel(x_ref, w1_ref, b1_ref, w2_ref, b2_ref, w3_ref, b3_ref, o_ref):
    Nb, H, W, Cin = x_ref.shape
    C = w1_ref.shape[1]
    Cout = w3_ref.shape[1]
    HW = H * W
    M = Nb * HW

    # ---- conv1 (1x1) + bn1 (scale folded into w1) + relu ----------------------------
    x = x_ref[...].reshape(M, Cin)                                    # bf16 (M, Cin)
    t1 = jnp.dot(x, w1_ref[...], preferred_element_type=jnp.float32)
    t1 = jnp.maximum(t1 + b1_ref[...], 0.0)                           # f32 (M, C)
    t1b = t1.astype(jnp.bfloat16)

    # One flat iota per step; per-image row index via mod HW so batching images into the
    # GEMM M dimension never lets the +-1 / +-W shifts bleed across image boundaries.
    r = lax.broadcasted_iota(jnp.int32, (M, 1), 0)
    col = (r & (W - 1)) if (W & (W - 1)) == 0 else (r % W)
    rin = (r & (HW - 1)) if (HW & (HW - 1)) == 0 else (r % HW)

    # ---- conv2 (3x3, stride 1, SAME) + bn2 + relu -----------------------------------
    # Column (width) shifts: zero the source column that would wrap across a row / image
    # boundary, then roll the flattened activation by +-1 sublane (XLU slot).
    #   cs_kw[n*HW + h*W + w] == t1[n, h, w + (kw-1)]   (0 where w+(kw-1) out of range)
    src_left = jnp.where(col == W - 1, 0.0, t1)       # source for kw=0 tap (reads w-1)
    src_right = jnp.where(col == 0, 0.0, t1)          # source for kw=2 tap (reads w+1)
    cs0 = pltpu.roll(src_left, 1, axis=0).astype(jnp.bfloat16)
    cs2 = pltpu.roll(src_right, M - 1, axis=0).astype(jnp.bfloat16)
    # K-concatenated taps: (M, 3C) bf16, matching w2 packed as (3, 3C, C) in fold_params.
    cs = jnp.concatenate([cs0, t1b, cs2], axis=1)

    # One fat K=3C MXU matmul per kernel row kh.  The row (height) shift commutes with
    # the channel contraction, so it is applied to the per-kh partial sums with
    # sublane-aligned rolls by +-W flattened rows + per-image row masks.  A single
    # running accumulator keeps at most two full-size f32 values live at once.
    acc = jnp.dot(cs, w2_ref[1], preferred_element_type=jnp.float32)           # kh=1
    p0 = jnp.dot(cs, w2_ref[0], preferred_element_type=jnp.float32)            # kh=0
    acc = acc + jnp.where(rin >= W, pltpu.roll(p0, W, axis=0), 0.0)            # row h-1
    p2 = jnp.dot(cs, w2_ref[2], preferred_element_type=jnp.float32)            # kh=2
    acc = acc + jnp.where(rin < HW - W, pltpu.roll(p2, M - W, axis=0), 0.0)    # row h+1
    t2 = jnp.maximum(acc + b2_ref[...], 0.0).astype(jnp.bfloat16)

    # ---- conv3 (1x1) + bn3 + residual add + relu ------------------------------------
    t3 = jnp.dot(t2, w3_ref[...], preferred_element_type=jnp.float32) + b3_ref[...]
    identity = x_ref[...].reshape(M, Cin).astype(jnp.float32)         # re-read from VMEM
    out = jnp.maximum(t3 + identity, 0.0)
    o_ref[...] = out.reshape(Nb, H, W, Cout).astype(o_ref.dtype)


def bottleneck_pallas(x, params, *, nb=None, vmem_limit_bytes=32 * 1024 * 1024):
    """x: (N, H, W, Cin) NHWC bf16.  Returns (N, H, W, Cout) in x.dtype."""
    N, H, W, Cin = x.shape
    w1, b1, w2, b2, w3, b3 = params
    C = w1.shape[1]
    Cout = w3.shape[1]
    assert Cin == Cout, "stride=1 / downsample=None requires in_channels == 4*out_channels"
    assert (H * W) % 8 == 0
    assert w2.shape == (3, 3 * C, C)

    if nb is None:
        # ~2 MiB of bf16 input per grid step (amortizes the ~0.35 us fixed step cost),
        # rounded down to a divisor of N.
        nb = max(1, min(N, (2 * 1024 * 1024) // max(1, H * W * Cin * x.dtype.itemsize)))
        while N % nb:
            nb -= 1
    assert N % nb == 0

    return pl.pallas_call(
        _bottleneck_kernel,
        out_shape=jax.ShapeDtypeStruct((N, H, W, Cout), x.dtype),
        grid_spec=pltpu.PrefetchScalarGridSpec(
            num_scalar_prefetch=0,
            grid=(N // nb,),
            in_specs=[
                pl.BlockSpec((nb, H, W, Cin), lambda n: (n, 0, 0, 0)),
                pl.BlockSpec((Cin, C), lambda n: (0, 0)),
                pl.BlockSpec((1, C), lambda n: (0, 0)),
                pl.BlockSpec((3, 3 * C, C), lambda n: (0, 0, 0)),
                pl.BlockSpec((1, C), lambda n: (0, 0)),
                pl.BlockSpec((C, Cout), lambda n: (0, 0)),
                pl.BlockSpec((1, Cout), lambda n: (0, 0)),
            ],
            out_specs=pl.BlockSpec((nb, H, W, Cout), lambda n: (n, 0, 0, 0)),
        ),
        compiler_params=pltpu.CompilerParams(
            dimension_semantics=("parallel",),
            vmem_limit_bytes=vmem_limit_bytes,
        ),
    )(x, w1, b1, w2, b2, w3, b3)


# ----------------------------- parameter preparation ---------------------------------

def _fold_bn(gamma, beta, mean, var, eps=1e-5):
    scale = gamma / jnp.sqrt(var + eps)
    bias = beta - mean * scale
    return scale, bias


def _make_params(key, in_channels, out_channels):
    """Deterministic synthetic parameters matching Bottleneck.__init__ shapes."""
    C = out_channels
    Cout = out_channels * 4  # expansion = 4
    ks = jax.random.split(key, 15)

    w1 = jax.random.normal(ks[0], (in_channels, C), jnp.float32) * 0.1   # conv1 1x1
    w2 = jax.random.normal(ks[1], (3, 3, C, C), jnp.float32) * 0.1       # conv2 3x3 (HWIO)
    w3 = jax.random.normal(ks[2], (C, Cout), jnp.float32) * 0.1          # conv3 1x1

    def bn(kg, kb, km, kv, c):
        gamma = 0.5 + jax.random.uniform(kg, (c,), jnp.float32)
        beta = jax.random.normal(kb, (c,), jnp.float32) * 0.1
        mean = jax.random.normal(km, (c,), jnp.float32) * 0.1
        var = 0.5 + jax.random.uniform(kv, (c,), jnp.float32)
        return _fold_bn(gamma, beta, mean, var)

    s1, b1 = bn(ks[3], ks[4], ks[5], ks[6], C)
    s2, b2 = bn(ks[7], ks[8], ks[9], ks[10], C)
    s3, b3 = bn(ks[11], ks[12], ks[13], ks[14], Cout)
    return (w1, s1, b1, w2, s2, b2, w3, s3, b3)


def fold_params(raw):
    """Fold BN scales into conv weights (bf16); pack w2 as (3, 3C, C); biases stay f32."""
    w1, s1, b1, w2, s2, b2, w3, s3, b3 = raw
    C = w1.shape[1]
    Cout = w3.shape[1]
    w1f = (w1 * s1[None, :]).astype(jnp.bfloat16)
    # (kh, kw, ci, co) -> (kh, kw*C + ci, co): K-concatenated per kernel row.
    w2f = (w2 * s2[None, None, None, :]).reshape(3, 3 * C, C).astype(jnp.bfloat16)
    w3f = (w3 * s3[None, :]).astype(jnp.bfloat16)
    return (w1f, b1.reshape(1, C).astype(jnp.float32),
            w2f, b2.reshape(1, C).astype(jnp.float32),
            w3f, b3.reshape(1, Cout).astype(jnp.float32))


# ----------------------------------- reference ----------------------------------------

def bottleneck_reference(x, params):
    """Pure-JAX NHWC reference using the same folded bf16 weights / f32 accumulation."""
    w1, b1, w2, b2, w3, b3 = params
    C = w1.shape[1]
    xb = x.astype(jnp.bfloat16)
    t1 = jnp.einsum("nhwc,cd->nhwd", xb, w1, preferred_element_type=jnp.float32)
    t1 = jnp.maximum(t1 + b1.reshape(1, 1, 1, -1), 0.0).astype(jnp.bfloat16)
    t2 = lax.conv_general_dilated(
        t1, w2.reshape(3, 3, C, C), window_strides=(1, 1), padding="SAME",
        dimension_numbers=("NHWC", "HWIO", "NHWC"),
        preferred_element_type=jnp.float32)
    t2 = jnp.maximum(t2 + b2.reshape(1, 1, 1, -1), 0.0).astype(jnp.bfloat16)
    t3 = jnp.einsum("nhwc,cd->nhwd", t2, w3, preferred_element_type=jnp.float32)
    out = t3 + b3.reshape(1, 1, 1, -1) + x.astype(jnp.float32)
    return jnp.maximum(out, 0.0)


if __name__ == "__main__":
    # Config consistent with the module: expansion=4, stride=1, downsample=None
    # => in_channels == out_channels * 4.  Channels chosen lane-dense (C = 128,
    # Cin = Cout = 512) so every intermediate is fully lane-occupied and the K-concat
    # offsets are vreg-aligned; spatial kept small (16x16, batch 2).
    N, H, W = 2, 16, 16
    out_channels = 128
    in_channels = out_channels * 4          # 512

    key = jax.random.PRNGKey(0)
    kx, kp = jax.random.split(key)
    x = jax.random.normal(kx, (N, H, W, in_channels), jnp.float32).astype(jnp.bfloat16)
    params = fold_params(_make_params(kp, in_channels, out_channels))

    y = bottleneck_pallas(x, params)
    y = jax.block_until_ready(y)

    y_ref = bottleneck_reference(x, params)
    assert y.shape == (N, H, W, out_channels * 4)
    assert y.dtype == x.dtype
    err = jnp.max(jnp.abs(y.astype(jnp.float32) - y_ref))
    assert jnp.allclose(y.astype(jnp.float32), y_ref, atol=5e-2, rtol=2e-2), (
        f"mismatch vs JAX reference, max abs err = {err}")

    print("KERNEL_OK")
</pallas_src>

<mosaic_0001>
module attributes {stable_mosaic.version = 11 : i64} {
  func.func @_bottleneck_kernel(%arg0: i32, %arg1: memref<2x16x16x512xbf16, #tpu.memory_space<vmem>>, %arg2: memref<512x128xbf16, #tpu.memory_space<vmem>>, %arg3: memref<1x128xf32, #tpu.memory_space<vmem>>, %arg4: memref<3x384x128xbf16, #tpu.memory_space<vmem>>, %arg5: memref<1x128xf32, #tpu.memory_space<vmem>>, %arg6: memref<128x512xbf16, #tpu.memory_space<vmem>>, %arg7: memref<1x512xf32, #tpu.memory_space<vmem>>, %arg8: memref<2x16x16x512xbf16, #tpu.memory_space<vmem>>) attributes {dimension_semantics = [#tpu.dimension_semantics<parallel>], iteration_bounds = array<i64: 1>, scalar_prefetch = 0 : i64, scratch_operands = 0 : i64, tpu.core_type = #tpu.core_type<tc>, window_params = [{transform_indices = @transform_0, window_bounds = array<i64: 2, 16, 16, 512>}, {pipeline_mode = #tpu.pipeline_mode<synchronous>, transform_indices = @transform_1, window_bounds = array<i64: 512, 128>}, {pipeline_mode = #tpu.pipeline_mode<synchronous>, transform_indices = @transform_2, window_bounds = array<i64: 1, 128>}, {pipeline_mode = #tpu.pipeline_mode<synchronous>, transform_indices = @transform_3, window_bounds = array<i64: 3, 384, 128>}, {pipeline_mode = #tpu.pipeline_mode<synchronous>, transform_indices = @transform_4, window_bounds = array<i64: 1, 128>}, {pipeline_mode = #tpu.pipeline_mode<synchronous>, transform_indices = @transform_5, window_bounds = array<i64: 128, 512>}, {pipeline_mode = #tpu.pipeline_mode<synchronous>, transform_indices = @transform_6, window_bounds = array<i64: 1, 512>}, {transform_indices = @transform_7, window_bounds = array<i64: 2, 16, 16, 512>}]} {
    %c0 = arith.constant 0 : index
    %c0_0 = arith.constant 0 : index
    %c0_1 = arith.constant 0 : index
    %c0_2 = arith.constant 0 : index
    %0 = vector.load %arg1[%c0, %c0_0, %c0_1, %c0_2] : memref<2x16x16x512xbf16, #tpu.memory_space<vmem>>, vector<2x16x16x512xbf16>
    %1 = vector.shape_cast %0 : vector<2x16x16x512xbf16> to vector<512x512xbf16>
    %c0_3 = arith.constant 0 : index
    %c0_4 = arith.constant 0 : index
    %2 = vector.load %arg2[%c0_3, %c0_4] : memref<512x128xbf16, #tpu.memory_space<vmem>>, vector<512x128xbf16>
    %cst = arith.constant dense<0.000000e+00> : vector<512x128xf32>
    %3 = tpu.matmul %1, %2, %cst {dimension_numbers = #tpu.dot_dimension_numbers<[1], [0], [0], [1], [0, 0, 1, 1], [], []>} : vector<512x512xbf16>, vector<512x128xbf16>, vector<512x128xf32> -> vector<512x128xf32>
    %c0_5 = arith.constant 0 : index
    %c0_6 = arith.constant 0 : index
    %4 = vector.load %arg3[%c0_5, %c0_6] : memref<1x128xf32, #tpu.memory_space<vmem>>, vector<1x128xf32>
    %5 = vector.broadcast %4 : vector<1x128xf32> to vector<512x128xf32>
    %6 = arith.addf %3, %5 : vector<512x128xf32>
    %cst_7 = arith.constant 0.000000e+00 : f32
    %7 = vector.broadcast %cst_7 : f32 to vector<512x128xf32>
    %8 = arith.maximumf %6, %7 : vector<512x128xf32>
    %9 = arith.truncf %8 : vector<512x128xf32> to vector<512x128xbf16>
    %10 = tpu.iota {dimensions = array<i32: 0>} : vector<512x1xi32>
    %c15_i32 = arith.constant 15 : i32
    %11 = vector.broadcast %c15_i32 : i32 to vector<512x1xi32>
    %12 = arith.andi %10, %11 : vector<512x1xi32>
    %c255_i32 = arith.constant 255 : i32
    %13 = vector.broadcast %c255_i32 : i32 to vector<512x1xi32>
    %14 = arith.andi %10, %13 : vector<512x1xi32>
    %c15_i32_8 = arith.constant 15 : i32
    %15 = vector.broadcast %c15_i32_8 : i32 to vector<512x1xi32>
    %16 = arith.cmpi eq, %12, %15 : vector<512x1xi32>
    %cst_9 = arith.constant 0.000000e+00 : f32
    %17 = vector.shape_cast %16 : vector<512x1xi1> to vector<512x1xi1>
    %18 = vector.broadcast %17 : vector<512x1xi1> to vector<512x128xi1>
    %19 = vector.broadcast %cst_9 : f32 to vector<512x128xf32>
    %20 = arith.select %18, %19, %8 : vector<512x128xi1>, vector<512x128xf32>
    %c0_i32 = arith.constant 0 : i32
    %21 = vector.broadcast %c0_i32 : i32 to vector<512x1xi32>
    %22 = arith.cmpi eq, %12, %21 : vector<512x1xi32>
    %cst_10 = arith.constant 0.000000e+00 : f32
    %23 = vector.shape_cast %22 : vector<512x1xi1> to vector<512x1xi1>
    %24 = vector.broadcast %23 : vector<512x1xi1> to vector<512x128xi1>
    %25 = vector.broadcast %cst_10 : f32 to vector<512x128xf32>
    %26 = arith.select %24, %25, %8 : vector<512x128xi1>, vector<512x128xf32>
    %c1_i32 = arith.constant 1 : i32
    %27 = tpu.dynamic_rotate %20 by %c1_i32 dim 0 : vector<512x128xf32>, i32 -> vector<512x128xf32>
    %28 = arith.truncf %27 : vector<512x128xf32> to vector<512x128xbf16>
    %c511_i32 = arith.constant 511 : i32
    %29 = tpu.dynamic_rotate %26 by %c511_i32 dim 0 : vector<512x128xf32>, i32 -> vector<512x128xf32>
    %30 = arith.truncf %29 : vector<512x128xf32> to vector<512x128xbf16>
    %31 = tpu.concatenate %28, %9, %30 in 1 : vector<512x128xbf16>, vector<512x128xbf16>, vector<512x128xbf16> -> vector<512x384xbf16>
    %c1 = arith.constant 1 : index
    %c0_11 = arith.constant 0 : index
    %c0_12 = arith.constant 0 : index
    %32 = vector.load %arg4[%c1, %c0_11, %c0_12] : memref<3x384x128xbf16, #tpu.memory_space<vmem>>, vector<1x384x128xbf16>
    %33 = vector.shape_cast %32 : vector<1x384x128xbf16> to vector<384x128xbf16>
    %cst_13 = arith.constant dense<0.000000e+00> : vector<512x128xf32>
    %34 = tpu.matmul %31, %33, %cst_13 {dimension_numbers = #tpu.dot_dimension_numbers<[1], [0], [0], [1], [0, 0, 1, 1], [], []>} : vector<512x384xbf16>, vector<384x128xbf16>, vector<512x128xf32> -> vector<512x128xf32>
    %c0_14 = arith.constant 0 : index
    %c0_15 = arith.constant 0 : index
    %c0_16 = arith.constant 0 : index
    %35 = vector.load %arg4[%c0_14, %c0_15, %c0_16] : memref<3x384x128xbf16, #tpu.memory_space<vmem>>, vector<1x384x128xbf16>
    %36 = vector.shape_cast %35 : vector<1x384x128xbf16> to vector<384x128xbf16>
    %cst_17 = arith.constant dense<0.000000e+00> : vector<512x128xf32>
    %37 = tpu.matmul %31, %36, %cst_17 {dimension_numbers = #tpu.dot_dimension_numbers<[1], [0], [0], [1], [0, 0, 1, 1], [], []>} : vector<512x384xbf16>, vector<384x128xbf16>, vector<512x128xf32> -> vector<512x128xf32>
    %c16_i32 = arith.constant 16 : i32
    %38 = vector.broadcast %c16_i32 : i32 to vector<512x1xi32>
    %39 = arith.cmpi sge, %14, %38 : vector<512x1xi32>
    %c16_i32_18 = arith.constant 16 : i32
    %40 = tpu.dynamic_rotate %37 by %c16_i32_18 dim 0 : vector<512x128xf32>, i32 -> vector<512x128xf32>
    %cst_19 = arith.constant 0.000000e+00 : f32
    %41 = vector.shape_cast %39 : vector<512x1xi1> to vector<512x1xi1>
    %42 = vector.broadcast %41 : vector<512x1xi1> to vector<512x128xi1>
    %43 = vector.broadcast %cst_19 : f32 to vector<512x128xf32>
    %44 = arith.select %42, %40, %43 : vector<512x128xi1>, vector<512x128xf32>
    %45 = arith.addf %34, %44 : vector<512x128xf32>
    %c2 = arith.constant 2 : index
    %c0_20 = arith.constant 0 : index
    %c0_21 = arith.constant 0 : index
    %46 = vector.load %arg4[%c2, %c0_20, %c0_21] : memref<3x384x128xbf16, #tpu.memory_space<vmem>>, vector<1x384x128xbf16>
    %47 = vector.shape_cast %46 : vector<1x384x128xbf16> to vector<384x128xbf16>
    %cst_22 = arith.constant dense<0.000000e+00> : vector<512x128xf32>
    %48 = tpu.matmul %31, %47, %cst_22 {dimension_numbers = #tpu.dot_dimension_numbers<[1], [0], [0], [1], [0, 0, 1, 1], [], []>} : vector<512x384xbf16>, vector<384x128xbf16>, vector<512x128xf32> -> vector<512x128xf32>
    %c240_i32 = arith.constant 240 : i32
    %49 = vector.broadcast %c240_i32 : i32 to vector<512x1xi32>
    %50 = arith.cmpi slt, %14, %49 : vector<512x1xi32>
    %c496_i32 = arith.constant 496 : i32
    %51 = tpu.dynamic_rotate %48 by %c496_i32 dim 0 : vector<512x128xf32>, i32 -> vector<512x128xf32>
    %cst_23 = arith.constant 0.000000e+00 : f32
    %52 = vector.shape_cast %50 : vector<512x1xi1> to vector<512x1xi1>
    %53 = vector.broadcast %52 : vector<512x1xi1> to vector<512x128xi1>
    %54 = vector.broadcast %cst_23 : f32 to vector<512x128xf32>
    %55 = arith.select %53, %51, %54 : vector<512x128xi1>, vector<512x128xf32>
    %56 = arith.addf %45, %55 : vector<512x128xf32>
    %c0_24 = arith.constant 0 : index
    %c0_25 = arith.constant 0 : index
    %57 = vector.load %arg5[%c0_24, %c0_25] : memref<1x128xf32, #tpu.memory_space<vmem>>, vector<1x128xf32>
    %58 = vector.broadcast %57 : vector<1x128xf32> to vector<512x128xf32>
    %59 = arith.addf %56, %58 : vector<512x128xf32>
    %cst_26 = arith.constant 0.000000e+00 : f32
    %60 = vector.broadcast %cst_26 : f32 to vector<512x128xf32>
    %61 = arith.maximumf %59, %60 : vector<512x128xf32>
    %62 = arith.truncf %61 : vector<512x128xf32> to vector<512x128xbf16>
    %c0_27 = arith.constant 0 : index
    %c0_28 = arith.constant 0 : index
    %63 = vector.load %arg6[%c0_27, %c0_28] : memref<128x512xbf16, #tpu.memory_space<vmem>>, vector<128x512xbf16>
    %cst_29 = arith.constant dense<0.000000e+00> : vector<512x512xf32>
    %64 = tpu.matmul %62, %63, %cst_29 {dimension_numbers = #tpu.dot_dimension_numbers<[1], [0], [0], [1], [0, 0, 1, 1], [], []>} : vector<512x128xbf16>, vector<128x512xbf16>, vector<512x512xf32> -> vector<512x512xf32>
    %c0_30 = arith.constant 0 : index
    %c0_31 = arith.constant 0 : index
    %65 = vector.load %arg7[%c0_30, %c0_31] : memref<1x512xf32, #tpu.memory_space<vmem>>, vector<1x512xf32>
    %66 = vector.broadcast %65 : vector<1x512xf32> to vector<512x512xf32>
    %67 = arith.addf %64, %66 : vector<512x512xf32>
    %c0_32 = arith.constant 0 : index
    %c0_33 = arith.constant 0 : index
    %c0_34 = arith.constant 0 : index
    %c0_35 = arith.constant 0 : index
    %68 = vector.load %arg1[%c0_32, %c0_33, %c0_34, %c0_35] : memref<2x16x16x512xbf16, #tpu.memory_space<vmem>>, vector<2x16x16x512xbf16>
    %69 = vector.shape_cast %68 : vector<2x16x16x512xbf16> to vector<512x512xbf16>
    %70 = arith.extf %69 : vector<512x512xbf16> to vector<512x512xf32>
    %71 = arith.addf %67, %70 : vector<512x512xf32>
    %cst_36 = arith.constant 0.000000e+00 : f32
    %72 = vector.broadcast %cst_36 : f32 to vector<512x512xf32>
    %73 = arith.maximumf %71, %72 : vector<512x512xf32>
    %74 = vector.shape_cast %73 : vector<512x512xf32> to vector<2x16x16x512xf32>
    %75 = arith.truncf %74 : vector<2x16x16x512xf32> to vector<2x16x16x512xbf16>
    %c0_37 = arith.constant 0 : index
    %c0_38 = arith.constant 0 : index
    %c0_39 = arith.constant 0 : index
    %c0_40 = arith.constant 0 : index
    %76 = vector.load %arg8[%c0_37, %c0_38, %c0_39, %c0_40] : memref<2x16x16x512xbf16, #tpu.memory_space<vmem>>, vector<2x16x16x512xbf16>
    tpu.vector_store %arg8[%c0_37, %c0_38, %c0_39, %c0_40], %75 {strides = array<i32>} : memref<2x16x16x512xbf16, #tpu.memory_space<vmem>>, vector<2x16x16x512xbf16>,
    return
  }
  func.func @transform_0(%arg0: i32) -> (i32, i32, i32, i32) {
    %c0_i32 = arith.constant 0 : i32
    %c0_i32_0 = arith.constant 0 : i32
    %c0_i32_1 = arith.constant 0 : i32
    %c0_i32_2 = arith.constant 0 : i32
    return %arg0, %c0_i32, %c0_i32_0, %c0_i32_1 : i32, i32, i32, i32
  }
  func.func @transform_1(%arg0: i32) -> (i32, i32) {
    %c0_i32 = arith.constant 0 : i32
    %c0_i32_0 = arith.constant 0 : i32
    %c0_i32_1 = arith.constant 0 : i32
    return %c0_i32, %c0_i32_0 : i32, i32
  }
  func.func @transform_2(%arg0: i32) -> (i32, i32) {
    %c0_i32 = arith.constant 0 : i32
    %c0_i32_0 = arith.constant 0 : i32
    %c0_i32_1 = arith.constant 0 : i32
    return %c0_i32, %c0_i32_0 : i32, i32
  }
  func.func @transform_3(%arg0: i32) -> (i32, i32, i32) {
    %c0_i32 = arith.constant 0 : i32
    %c0_i32_0 = arith.constant 0 : i32
    %c0_i32_1 = arith.constant 0 : i32
    %c0_i32_2 = arith.constant 0 : i32
    return %c0_i32, %c0_i32_0, %c0_i32_1 : i32, i32, i32
  }
  func.func @transform_4(%arg0: i32) -> (i32, i32) {
    %c0_i32 = arith.constant 0 : i32
    %c0_i32_0 = arith.constant 0 : i32
    %c0_i32_1 = arith.constant 0 : i32
    return %c0_i32, %c0_i32_0 : i32, i32
  }
  func.func @transform_5(%arg0: i32) -> (i32, i32) {
    %c0_i32 = arith.constant 0 : i32
    %c0_i32_0 = arith.constant 0 : i32
    %c0_i32_1 = arith.constant 0 : i32
    return %c0_i32, %c0_i32_0 : i32, i32
  }
  func.func @transform_6(%arg0: i32) -> (i32, i32) {
    %c0_i32 = arith.constant 0 : i32
    %c0_i32_0 = arith.constant 0 : i32
    %c0_i32_1 = arith.constant 0 : i32
    return %c0_i32, %c0_i32_0 : i32, i32
  }
  func.func @transform_7(%arg0: i32) -> (i32, i32, i32, i32) {
    %c0_i32 = arith.constant 0 : i32
    %c0_i32_0 = arith.constant 0 : i32
    %c0_i32_1 = arith.constant 0 : i32
    %c0_i32_2 = arith.constant 0 : i32
    return %arg0, %c0_i32, %c0_i32_0, %c0_i32_1 : i32, i32, i32, i32
  }
}

</mosaic_0001>

<bundles_post_ra>
// kernel: tpu_custom_call.1
= control target key start
LH: loop header
LB: loop body
LE: loop exit
PB: predicated region body
PF: predicated region fallthrough
CT: control target
= control target key end

     0   :  { %12 = vsyncpa [#allocation3], 0  ;;  %s13052_s0 = inlined_call_operand.hbm [shape: bf16[2,16,16,512], index: 0, kind: input, shape index: {}]   ;;  %s13053_s1 = inlined_call_operand.hbm [shape: bf16[512,128], index: 1, kind: input, shape index: {}]   ;;  %s13054_s2 = inlined_call_operand.vmem [shape: f32[1,128], index: 2, kind: input, shape index: {}]   ;;  %s13055_s3 = inlined_call_operand.hbm [shape: bf16[3,384,128], index: 3, kind: input, shape index: {}]   ;;  %s13056_s4 = inlined_call_operand.hbm [shape: f32[1,128], index: 4, kind: input, shape index: {}]   ;;  %s13057_s5 = inlined_call_operand.hbm [shape: bf16[128,512], index: 5, kind: input, shape index: {}]   ;;  %s13058_s6 = inlined_call_operand.vmem [shape: f32[1,512], index: 6, kind: input, shape index: {}]   ;;  %s13059_s7 = inlined_call_operand.hbm [shape: bf16[2,16,16,512], index: 7, kind: output, shape index: {}]  }
   0x1   :  { %13 = vsyncpa [#allocation6], 0 }
   0x2   :  { %14 = vsyncpa [#allocation9], 0  ;;  %s33_s26 = sshll.u32 %s13053_s1, 4  ;;  %s34_s26 = int_to_ptr.hbm [resolvable:$true] %s33_s26 }
   0x3   :  { %15 = vsyncpa [#allocation4], 0  ;;  %s9878_s27 = smov [#allocation5]   ;;  %s62_s8 = sshll.u32 %s13056_s4, 4  ;;  %s63_s8 = int_to_ptr.hbm [resolvable:$true] %s62_s8 }
   0x4   :  { %s35_s28 = sshll.u32 %s9878_s27, 4  ;;  %s9879_s9 = smov 64   ;;  %s36_s28 = int_to_ptr.vmem [resolvable:$true] %s35_s28 }
   0x5   :  { %s9880_s10 = smov 4   ;;  %s9881_s11 = smov [#allocation8]  }
   0x6   :  { %41 = dma.hbm_to_vmem [thread:$0]  %s34_s26, 4096, %s36_s28, [#allocation6], %s9879_s9, %s9879_s9, %s9880_s10  }
   0x7   :  { %s64_s12 = sshll.u32 %s9881_s11, 4  ;;  %s20_s15 = sshll.u32 %s13052_s0, 4  ;;  %s65_s12 = int_to_ptr.vmem [resolvable:$true] %s64_s12  ;;  %s21_s15 = int_to_ptr.hbm [resolvable:$true] %s20_s15 }
   0x8   :  { %67 = dma.hbm_to_vmem [thread:$0]  %s63_s8, 16, %s65_s12, [#allocation9]  }
   0x9   :  { %s9882_s1 = smov [#allocation2]   ;;  %s48_s4 = sshll.u32 %s13055_s3, 4  ;;  %s49_s4 = int_to_ptr.hbm [resolvable:$true] %s48_s4 }
   0xa   :  { %s22_s16 = sshll.u32 %s9882_s1, 4  ;;  %s9883_s19 = smov 256   ;;  %s23_s16 = int_to_ptr.vmem [resolvable:$true] %s22_s16 }
   0xb   :  { %s9884_s20 = smov 16   ;;  %s9885_s21 = smov [#allocation7]  }
   0xc   :  { %28 = dma.hbm_to_vmem [thread:$0]  %s21_s15, 16384, %s23_s16, [#allocation3], %s9883_s19, %s9883_s19, %s9884_s20  }
   0xd   :  { %s50_s22 = sshll.u32 %s9885_s21, 4  ;;  %s72_s24 = sshll.u32 %s13057_s5, 4  ;;  %s51_s22 = int_to_ptr.vmem [resolvable:$true] %s50_s22  ;;  %s73_s24 = int_to_ptr.hbm [resolvable:$true] %s72_s24 }
   0xe   :  { %56 = dma.hbm_to_vmem [thread:$0]  %s49_s4, 9216, %s51_s22, [#allocation6], %s9879_s9, %s9879_s9, %s9880_s10  }
   0xf   :  { %s9886_s25 = smov [#allocation10]  }
  0x10   :  { %s74_s26 = sshll.u32 %s9886_s25, 4  ;;  %s75_s26 = int_to_ptr.vmem [resolvable:$true] %s74_s26 }
  0x11   :  { %80 = dma.hbm_to_vmem [thread:$0]  %s73_s24, 4096, %s75_s26, [#allocation9], %s9883_s19, %s9883_s19, %s9884_s20  }
  0x12   :  { %9870 = dma.done.wait [#allocation3], 16384  }
  0x13   :  { %9871 = vsyncadd [#allocation3], 4294950912 }
  0x14   :  { %9872 = dma.done.wait [#allocation6], 13312  }
  0x15   :  { %9873 = vsyncadd [#allocation6], 4294953984 }
  0x16   :  { %9874 = dma.done.wait [#allocation9], 4112  }
  0x17   :  { %9875 = vsyncadd [#allocation9], 4294963184  ;;  %v9555_v0 = vld [vmem:[#allocation5 + $0x38] sm:$0xff]  ;;  %v9554_v1 = vld [vmem:[#allocation5 + $0x30] sm:$0xff]  ;;  %s8349_s1 = sshll.u32 %s13059_s7, 4  ;;  %s8350_s1 = int_to_ptr.hbm [resolvable:$true] %s8349_s1 }
  0x18   :  { %9684 = vmatpush.bf16.msra.mxu1 %v9555_v0  ;;  %9685 = vmatpush.bf16.msra.mxu2 %v9555_v0  ;;  %v9553_v2 = vld [vmem:[#allocation5 + $0x28] sm:$0xff]  ;;  %v9552_v3 = vld [vmem:[#allocation5 + $0x20] sm:$0xff]  ;;  %v9551_v4 = vld [vmem:[#allocation5 + $0x18] sm:$0xff] }
  0x19   :  { %9686 = vmatpush.bf16.msra.mxu3 %v9555_v0  ;;  %1131 = vmatpush.bf16.msra.mxu0 %v9555_v0  ;;  %v9550_v5 = vld [vmem:[#allocation5 + $0x10] sm:$0xff]  ;;  %v9549_v6 = vld [vmem:[#allocation5 + $0x8] sm:$0xff]  ;;  %v9548_v7 = vld [vmem:[#allocation5] sm:$0xff] }
  0x1a   :  { %v8494_v8 = vld [vmem:[#allocation2 + $0x100] sm:$0xf]  ;;  %v9454_v9 = vld [vmem:[#allocation2 + $0x10c] sm:$0xf0]  ;;  %v9571_v14 = vld [vmem:[#allocation5 + $0xb8] sm:$0xff] }
  0x1b   :  { %v8622_v10 = vld [vmem:[#allocation2 + $0x200] sm:$0xf]  ;;  %v9486_v11 = vld [vmem:[#allocation2 + $0x20c] sm:$0xf0]  ;;  %v9579_v15 = vld [vmem:[#allocation5 + $0xf8] sm:$0xff]  ;;  %v8495_v17 = vor.u32 %v9454_v9, %v8494_v8 }
  0x1c   :  { %9687 = vmatpush.bf16.msra.mxu1 %v9554_v1  ;;  %9688 = vmatpush.bf16.msra.mxu2 %v9554_v1  ;;  %v8750_v12 = vld [vmem:[#allocation2 + $0x300] sm:$0xf]  ;;  %v9518_v13 = vld [vmem:[#allocation2 + $0x30c] sm:$0xf0]  ;;  %v9563_v16 = vld [vmem:[#allocation5 + $0x78] sm:$0xff]  ;;  %v8623_v18 = vor.u32 %v9486_v11, %v8622_v10 }
  0x1d   :  { %9689 = vmatpush.bf16.msra.mxu3 %v9554_v1  ;;  %1132 = vmatpush.bf16.msra.mxu0 %v9554_v1  ;;  %v8751_v19 = vor.u32 %v9518_v13, %v8750_v12  ;;  %v9570_v20 = vld [vmem:[#allocation5 + $0xb0] sm:$0xff]  ;;  %v9569_v23 = vld [vmem:[#allocation5 + $0xa8] sm:$0xff]  ;;  %v8510_v26 = vld [vmem:[#allocation2 + $0x120] sm:$0xf] }
  0x1e   :  { %v9578_v21 = vld [vmem:[#allocation5 + $0xf0] sm:$0xff]  ;;  %v9577_v24 = vld [vmem:[#allocation5 + $0xe8] sm:$0xff]  ;;  %v8638_v28 = vld [vmem:[#allocation2 + $0x220] sm:$0xf] }
  0x1f   :  { %v9562_v22 = vld [vmem:[#allocation5 + $0x70] sm:$0xff]  ;;  %v9561_v25 = vld [vmem:[#allocation5 + $0x68] sm:$0xff]  ;;  %v8766_v30 = vld [vmem:[#allocation2 + $0x320] sm:$0xf] }
  0x20   :  { %9690 = vmatpush.bf16.msra.mxu1 %v9553_v2  ;;  %9691 = vmatpush.bf16.msra.mxu2 %v9553_v2  ;;  %v9458_v27 = vld [vmem:[#allocation2 + $0x12c] sm:$0xf0]  ;;  %v9568_v35 = vld [vmem:[#allocation5 + $0xa0] sm:$0xff]  ;;  %v9567_v47 = vld [vmem:[#allocation5 + $0x98] sm:$0xff] }
  0x21   :  { %9692 = vmatpush.bf16.msra.mxu3 %v9553_v2  ;;  %1133 = vmatpush.bf16.msra.mxu0 %v9553_v2  ;;  %v9490_v29 = vld [vmem:[#allocation2 + $0x22c] sm:$0xf0]  ;;  %v8511_v32 = vor.u32 %v9458_v27, %v8510_v26  ;;  %v9576_v36 = vld [vmem:[#allocation5 + $0xe0] sm:$0xff]  ;;  %v9575_v48 = vld [vmem:[#allocation5 + $0xd8] sm:$0xff] }
  0x22   :  { %v9522_v31 = vld [vmem:[#allocation2 + $0x32c] sm:$0xf0]  ;;  %v8639_v33 = vor.u32 %v9490_v29, %v8638_v28  ;;  %v9560_v37 = vld [vmem:[#allocation5 + $0x60] sm:$0xff]  ;;  %v9559_v49 = vld [vmem:[#allocation5 + $0x58] sm:$0xff] }
  0x23   :  { %v8767_v34 = vor.u32 %v9522_v31, %v8766_v30  ;;  %v8526_v38 = vld [vmem:[#allocation2 + $0x140] sm:$0xf]  ;;  %v9462_v39 = vld [vmem:[#allocation2 + $0x14c] sm:$0xf0]  ;;  %v9573_v8 = vld [vmem:[#allocation5 + $0xc8] sm:$0xff] }
  0x24   :  { %9693 = vmatpush.bf16.msra.mxu1 %v9552_v3  ;;  %9694 = vmatpush.bf16.msra.mxu2 %v9552_v3  ;;  %v8654_v40 = vld [vmem:[#allocation2 + $0x240] sm:$0xf]  ;;  %v9494_v41 = vld [vmem:[#allocation2 + $0x24c] sm:$0xf0]  ;;  %v8527_v44 = vor.u32 %v9462_v39, %v8526_v38  ;;  %v9557_v9 = vld [vmem:[#allocation5 + $0x48] sm:$0xff] }
  0x25   :  { %9695 = vmatpush.bf16.msra.mxu3 %v9552_v3  ;;  %1134 = vmatpush.bf16.msra.mxu0 %v9552_v3  ;;  %v8782_v42 = vld [vmem:[#allocation2 + $0x340] sm:$0xf]  ;;  %v9526_v43 = vld [vmem:[#allocation2 + $0x34c] sm:$0xf0]  ;;  %v8655_v45 = vor.u32 %v9494_v41, %v8654_v40 }
  0x26   :  { %v8783_v46 = vor.u32 %v9526_v43, %v8782_v42  ;;  %v8542_v50 = vld [vmem:[#allocation2 + $0x160] sm:$0xf]  ;;  %v9466_v51 = vld [vmem:[#allocation2 + $0x16c] sm:$0xf0] }
  0x27   :  { %v8670_v52 = vld [vmem:[#allocation2 + $0x260] sm:$0xf]  ;;  %v9498_v53 = vld [vmem:[#allocation2 + $0x26c] sm:$0xf0]  ;;  %v8543_v56 = vor.u32 %v9466_v51, %v8542_v50  ;;  %v9421_v50 = vld [vmem:[#allocation2 + $0xc] sm:$0xf] }
  0x28   :  { %9696 = vmatpush.bf16.msra.mxu1 %v9551_v4  ;;  %9697 = vmatpush.bf16.msra.mxu2 %v9551_v4  ;;  %v8798_v54 = vld [vmem:[#allocation2 + $0x360] sm:$0xf]  ;;  %v9530_v55 = vld [vmem:[#allocation2 + $0x36c] sm:$0xf0]  ;;  %v8671_v57 = vor.u32 %v9498_v53, %v8670_v52  ;;  %v8376_v51 = vld [vmem:[#allocation2 + $0x18] sm:$0xf0] }
  0x29   :  { %9698 = vmatpush.bf16.msra.mxu3 %v9551_v4  ;;  %1135 = vmatpush.bf16.msra.mxu0 %v9551_v4  ;;  %v8799_v58 = vor.u32 %v9530_v55, %v8798_v54  ;;  %v9566_v59 = vld [vmem:[#allocation5 + $0x90] sm:$0xff]  ;;  %v8558_v62 = vld [vmem:[#allocation2 + $0x180] sm:$0xf] }
  0x2a   :  { %v9574_v60 = vld [vmem:[#allocation5 + $0xd0] sm:$0xff]  ;;  %v8686_v0 = vld [vmem:[#allocation2 + $0x280] sm:$0xf] }
  0x2b   :  { %v9558_v61 = vld [vmem:[#allocation5 + $0x50] sm:$0xff]  ;;  %v8814_v2 = vld [vmem:[#allocation2 + $0x380] sm:$0xf] }
  0x2c   :  { %9699 = vmatpush.bf16.msra.mxu1 %v9550_v5  ;;  %9700 = vmatpush.bf16.msra.mxu2 %v9550_v5  ;;  %v9470_v63 = vld [vmem:[#allocation2 + $0x18c] sm:$0xf0]  ;;  %v8574_v10 = vld [vmem:[#allocation2 + $0x1a0] sm:$0xf] }
  0x2d   :  { %9701 = vmatpush.bf16.msra.mxu3 %v9550_v5  ;;  %1136 = vmatpush.bf16.msra.mxu0 %v9550_v5  ;;  %v9502_v1 = vld [vmem:[#allocation2 + $0x28c] sm:$0xf0]  ;;  %v8559_v4 = vor.u32 %v9470_v63, %v8558_v62  ;;  %v8702_v12 = vld [vmem:[#allocation2 + $0x2a0] sm:$0xf]  ;;  %v9424_v62 = vld [vmem:[#allocation2 + $0x24] sm:$0xf] }
  0x2e   :  { %v9534_v3 = vld [vmem:[#allocation2 + $0x38c] sm:$0xf0]  ;;  %v8687_v5 = vor.u32 %v9502_v1, %v8686_v0  ;;  %v8846_v26 = vld [vmem:[#allocation2 + $0x3c0] sm:$0xf]  ;;  %v8384_v63 = vld [vmem:[#allocation2 + $0x30] sm:$0xf0] }
  0x2f   :  { %v9474_v11 = vld [vmem:[#allocation2 + $0x1ac] sm:$0xf0]  ;;  %v8366_v30 = vld [vmem:[#allocation2] sm:$0xf]  ;;  %v8390_v0 = vld [vmem:[#allocation2 + $0x28] sm:$0xf] }
  0x30   :  { %9702 = vmatpush.bf16.msra.mxu1 %v9549_v6  ;;  %9703 = vmatpush.bf16.msra.mxu2 %v9549_v6  ;;  %v9506_v13 = vld [vmem:[#allocation2 + $0x2ac] sm:$0xf0]  ;;  %v8862_v38 = vld [vmem:[#allocation2 + $0x3e0] sm:$0xf]  ;;  %v9427_v1 = vld [vmem:[#allocation2 + $0x34] sm:$0xf0] }
  0x31   :  { %9704 = vmatpush.bf16.msra.mxu3 %v9549_v6  ;;  %1137 = vmatpush.bf16.msra.mxu0 %v9549_v6  ;;  %v8815_v6 = vor.u32 %v9534_v3, %v8814_v2  ;;  %v9542_v27 = vld [vmem:[#allocation2 + $0x3cc] sm:$0xf0]  ;;  %v8382_v42 = vld [vmem:[#allocation2 + $0x20] sm:$0xf]  ;;  %v9425_v2 = vld [vmem:[#allocation2 + $0x2c] sm:$0xf] }
  0x32   :  { %v9422_v31 = vld [vmem:[#allocation2 + $0xc] sm:$0xf0]  ;;  %v8398_v54 = vld [vmem:[#allocation2 + $0x40] sm:$0xf]  ;;  %v8392_v3 = vld [vmem:[#allocation2 + $0x38] sm:$0xf0] }
  0x33   :  { %v9546_v39 = vld [vmem:[#allocation2 + $0x3ec] sm:$0xf0] }
  0x34   :  { %9705 = vmatpush.bf16.msra.mxu1 %v9548_v7  ;;  %9706 = vmatpush.bf16.msra.mxu2 %v9548_v7  ;;  %v9426_v43 = vld [vmem:[#allocation2 + $0x2c] sm:$0xf0] }
  0x35   :  { %9707 = vmatpush.bf16.msra.mxu3 %v9548_v7  ;;  %1138 = vmatpush.bf16.msra.mxu0 %v9548_v7  ;;  %v9565_v7 = vld [vmem:[#allocation5 + $0x88] sm:$0xff]  ;;  %v9430_v55 = vld [vmem:[#allocation2 + $0x4c] sm:$0xf0] }
  0x37   :  { %1179 = vmatmul.bf16.vlgmr.msra.gmra.mxu1 %v8495_v17  ;;  %1219 = vmatmul.bf16.vlgmr.msra.gmra.mxu2 %v8623_v18  ;;  %v8703_v17 = vor.u32 %v9506_v13, %v8702_v12 }
  0x38   :  { %1469 = vmatpush.bf16.msrb.mxu2 %v9571_v14  ;;  %1300 = vmatpush.bf16.msrb.mxu1 %v9563_v16  ;;  %v8830_v14 = vld [vmem:[#allocation2 + $0x3a0] sm:$0xf]  ;;  %v8575_v16 = vor.u32 %v9474_v11, %v8574_v10  ;;  %v8395_v11 = vor.u32 %v9425_v2, %v8392_v3  ;;  %v9446_v3 = vld [vmem:[#allocation2 + $0xcc] sm:$0xf0] }
  0x39   :  { %1638 = vmatpush.bf16.msrb.mxu3 %v9579_v15  ;;  %v9538_v15 = vld [vmem:[#allocation2 + $0x3ac] sm:$0xf0]  ;;  %v8462_v2 = vld [vmem:[#allocation2 + $0xc0] sm:$0xf] }
  0x3a   :  { %1259 = vmatmul.bf16.vlgmr.msra.gmra.mxu3 %v8751_v19  ;;  %v8831_v18 = vor.u32 %v9538_v15, %v8830_v14  ;;  %v9564_v19 = vld [vmem:[#allocation5 + $0x80] sm:$0xff] }
  0x3c   :  { %1470 = vmatpush.bf16.msrb.mxu2 %v9570_v20  ;;  %1301 = vmatpush.bf16.msrb.mxu1 %v9562_v22  ;;  %v9572_v20 = vld [vmem:[#allocation5 + $0xc0] sm:$0xff] }
  0x3d   :  { %1639 = vmatpush.bf16.msrb.mxu3 %v9578_v21  ;;  %v9556_v21 = vld [vmem:[#allocation5 + $0x40] sm:$0xff] }
  0x3e   :  { %v8590_v22 = vld [vmem:[#allocation2 + $0x1c0] sm:$0xf] }
  0x40   :  { %1471 = vmatpush.bf16.msrb.mxu2 %v9569_v23  ;;  %1302 = vmatpush.bf16.msrb.mxu1 %v9561_v25  ;;  %v9478_v23 = vld [vmem:[#allocation2 + $0x1cc] sm:$0xf0] }
  0x41   :  { %1640 = vmatpush.bf16.msrb.mxu3 %v9577_v24  ;;  %v8718_v24 = vld [vmem:[#allocation2 + $0x2c0] sm:$0xf]  ;;  %v9510_v25 = vld [vmem:[#allocation2 + $0x2cc] sm:$0xf0]  ;;  %v8591_v28 = vor.u32 %v9478_v23, %v8590_v22 }
  0x42   :  { %v8719_v29 = vor.u32 %v9510_v25, %v8718_v24 }
  0x44   :  { %1472 = vmatpush.bf16.msrb.mxu2 %v9568_v35  ;;  %1303 = vmatpush.bf16.msrb.mxu1 %v9560_v37  ;;  %v9482_v35 = vld [vmem:[#allocation2 + $0x1ec] sm:$0xf0] }
  0x45   :  { %1641 = vmatpush.bf16.msrb.mxu3 %v9576_v36  ;;  %v8734_v36 = vld [vmem:[#allocation2 + $0x2e0] sm:$0xf]  ;;  %v9514_v37 = vld [vmem:[#allocation2 + $0x2ec] sm:$0xf0] }
  0x46   :  { %v8735_v41 = vor.u32 %v9514_v37, %v8734_v36  ;;  %v8422_v36 = vld [vmem:[#allocation2 + $0x68] sm:$0xf]  ;;  %v9435_v37 = vld [vmem:[#allocation2 + $0x74] sm:$0xf0] }
  0x47   :  { %1184 = vmatmul.bf16.gmra.mxu1 %v8511_v32  ;;  %1224 = vmatmul.bf16.gmra.mxu2 %v8639_v33  ;;  %v8847_v32 = vor.u32 %v9542_v27, %v8846_v26  ;;  %v8367_v33 = vor.u32 %v9422_v31, %v8366_v30  ;;  %v8430_v26 = vld [vmem:[#allocation2 + $0x80] sm:$0xf]  ;;  %v9438_v27 = vld [vmem:[#allocation2 + $0x8c] sm:$0xf0] }
  0x48   :  { %1473 = vmatpush.bf16.msrb.mxu2 %v9567_v47  ;;  %1304 = vmatpush.bf16.msrb.mxu1 %v9559_v49  ;;  %v8368_v47 = vld [vmem:[#allocation2 + $0x10] sm:$0xf0]  ;;  %v9423_v49 = vld [vmem:[#allocation2 + $0x14] sm:$0xf0]  ;;  %v8431_v30 = vor.u32 %v9438_v27, %v8430_v26 }
  0x49   :  { %1642 = vmatpush.bf16.msrb.mxu3 %v9575_v48  ;;  %1139 = vmatmul.bf16.vlgmr.msra.gmra.mxu0 %v8367_v33  ;;  %v8374_v48 = vld [vmem:[#allocation2 + $0x8] sm:$0xf] }
  0x4a   :  { %1264 = vmatmul.bf16.gmra.mxu3 %v8767_v34  ;;  %v8606_v34 = vld [vmem:[#allocation2 + $0x1e0] sm:$0xf]  ;;  %v8375_v53 = vor.u32 %v9423_v49, %v8374_v48 }
  0x4b   :  { %v8607_v40 = vor.u32 %v9482_v35, %v8606_v34  ;;  %v9432_v34 = vld [vmem:[#allocation2 + $0x64] sm:$0xf]  ;;  %v8416_v35 = vld [vmem:[#allocation2 + $0x70] sm:$0xf0] }
  0x4c   :  { %1474 = vmatpush.bf16.msrb.mxu2 %v9566_v59  ;;  %1305 = vmatpush.bf16.msrb.mxu1 %v9558_v61 }
  0x4d   :  { %1643 = vmatpush.bf16.msrb.mxu3 %v9574_v60 }
  0x50   :  { %1475 = vmatpush.bf16.msrb.mxu2 %v9565_v7  ;;  %1306 = vmatpush.bf16.msrb.mxu1 %v9557_v9  ;;  %v8391_v7 = vor.u32 %v9427_v1, %v8390_v0  ;;  %v9434_v9 = vld [vmem:[#allocation2 + $0x6c] sm:$0xf0] }
  0x51   :  { %1644 = vmatpush.bf16.msrb.mxu3 %v9573_v8  ;;  %v8414_v8 = vld [vmem:[#allocation2 + $0x60] sm:$0xf] }
  0x52   :  { %v8415_v12 = vor.u32 %v9434_v9, %v8414_v8  ;;  %v8463_v8 = vor.u32 %v9446_v3, %v8462_v2 }
  0x54   :  { %1476 = vmatpush.bf16.msrb.mxu2 %v9564_v19  ;;  %1307 = vmatpush.bf16.msrb.mxu1 %v9556_v21  ;;  %v9431_v19 = vld [vmem:[#allocation2 + $0x54] sm:$0xf0]  ;;  %v8408_v21 = vld [vmem:[#allocation2 + $0x58] sm:$0xf0] }
  0x55   :  { %1645 = vmatpush.bf16.msrb.mxu3 %v9572_v20  ;;  %v9429_v20 = vld [vmem:[#allocation2 + $0x4c] sm:$0xf] }
  0x57   :  { %1189 = vmatmul.bf16.gmra.mxu1 %v8527_v44  ;;  %1229 = vmatmul.bf16.gmra.mxu2 %v8655_v45  ;;  %v8863_v44 = vor.u32 %v9546_v39, %v8862_v38  ;;  %v8383_v45 = vor.u32 %v9426_v43, %v8382_v42  ;;  %v9433_v38 = vld [vmem:[#allocation2 + $0x6c] sm:$0xf]  ;;  %v8424_v39 = vld [vmem:[#allocation2 + $0x78] sm:$0xf0]  ;;  %v8419_v42 = vor.u32 %v9432_v34, %v8416_v35 }
  0x58   :  { %v8423_v43 = vor.u32 %v9435_v37, %v8422_v36 }
  0x59   :  { %1144 = vmatmul.bf16.gmra.mxu0 %v8383_v45  ;;  %v9442_v45 = vld [vmem:[#allocation2 + $0xac] sm:$0xf0] }
  0x5a   :  { %1269 = vmatmul.bf16.gmra.mxu3 %v8783_v46  ;;  %v9420_v46 = vld [vmem:[#allocation2 + $0x4] sm:$0xf] }
  0x5b   :  { %v8371_v52 = vor.u32 %v9420_v46, %v8368_v47  ;;  %v8427_v47 = vor.u32 %v9433_v38, %v8424_v39 }
  0x67   :  { %1194 = vmatmul.bf16.gmra.mxu1 %v8543_v56  ;;  %1234 = vmatmul.bf16.gmra.mxu2 %v8671_v57  ;;  %v8379_v57 = vor.u32 %v9421_v50, %v8376_v51 }
  0x6a   :  { %1274 = vmatmul.bf16.gmra.mxu3 %v8799_v58  ;;  %v8399_v58 = vor.u32 %v9430_v55, %v8398_v54  ;;  %v8438_v54 = vld [vmem:[#allocation2 + $0x88] sm:$0xf]  ;;  %v9439_v55 = vld [vmem:[#allocation2 + $0x94] sm:$0xf0] }
  0x6b   :  { %v8439_v1 = vor.u32 %v9439_v55, %v8438_v54 }
  0x6c   :  { %1149 = vmatmul.bf16.gmra.mxu0 %v8399_v58  ;;  %v8440_v58 = vld [vmem:[#allocation2 + $0x98] sm:$0xf0] }
  0x77   :  { %1199 = vmatmul.bf16.gmra.mxu1 %v8559_v4  ;;  %1239 = vmatmul.bf16.gmra.mxu2 %v8687_v5 }
  0x7a   :  { %1279 = vmatmul.bf16.gmra.mxu3 %v8815_v6  ;;  %v8387_v6 = vor.u32 %v9424_v62, %v8384_v63 }
  0x7c   :  { %1154 = vmatmul.bf16.gmra.mxu0 %v8415_v12 }
  0x87   :  { %1204 = vmatmul.bf16.gmra.mxu1 %v8575_v16  ;;  %1244 = vmatmul.bf16.gmra.mxu2 %v8703_v17  ;;  %v9428_v16 = vld [vmem:[#allocation2 + $0x44] sm:$0xf]  ;;  %v8400_v17 = vld [vmem:[#allocation2 + $0x50] sm:$0xf0] }
  0x88   :  { %v8403_v24 = vor.u32 %v9428_v16, %v8400_v17  ;;  %v9440_v16 = vld [vmem:[#allocation2 + $0xa4] sm:$0xf]  ;;  %v8448_v17 = vld [vmem:[#allocation2 + $0xb0] sm:$0xf0] }
  0x89   :  { %v8451_v26 = vor.u32 %v9440_v16, %v8448_v17  ;;  %v8480_v16 = vld [vmem:[#allocation2 + $0xf0] sm:$0xf0]  ;;  %v8486_v17 = vld [vmem:[#allocation2 + $0xe8] sm:$0xf] }
  0x8a   :  { %1284 = vmatmul.bf16.gmra.mxu3 %v8831_v18  ;;  %v8406_v18 = vld [vmem:[#allocation2 + $0x48] sm:$0xf] }
  0x8b   :  { %v8407_v25 = vor.u32 %v9431_v19, %v8406_v18  ;;  %v8454_v18 = vld [vmem:[#allocation2 + $0xa8] sm:$0xf]  ;;  %v9443_v19 = vld [vmem:[#allocation2 + $0xb4] sm:$0xf0] }
  0x8c   :  { %1159 = vmatmul.bf16.gmra.mxu0 %v8431_v30  ;;  %v8455_v27 = vor.u32 %v9443_v19, %v8454_v18  ;;  %v9450_v30 = vld [vmem:[#allocation2 + $0xec] sm:$0xf0]  ;;  %v9451_v18 = vld [vmem:[#allocation2 + $0xf4] sm:$0xf0]  ;;  %v9449_v19 = vld [vmem:[#allocation2 + $0xec] sm:$0xf] }
  0x97   :  { %1209 = vmatmul.bf16.gmra.mxu1 %v8591_v28  ;;  %1249 = vmatmul.bf16.gmra.mxu2 %v8719_v29  ;;  %v8411_v29 = vor.u32 %v9429_v20, %v8408_v21  ;;  %v9441_v20 = vld [vmem:[#allocation2 + $0xac] sm:$0xf]  ;;  %v8456_v21 = vld [vmem:[#allocation2 + $0xb8] sm:$0xf0] }
  0x98   :  { %v8459_v35 = vor.u32 %v9441_v20, %v8456_v21  ;;  %v8488_v20 = vld [vmem:[#allocation2 + $0xf8] sm:$0xf0] }
  0x9a   :  { %1289 = vmatmul.bf16.gmra.mxu3 %v8847_v32 }
  0xa7   :  { %1214 = vmatmul.bf16.gmra.mxu1 %v8607_v40  ;;  %1254 = vmatmul.bf16.gmra.mxu2 %v8735_v41 }
  0xaa   :  { %1294 = vmatmul.bf16.gmra.mxu3 %v8863_v44  ;;  %v8446_v44 = vld [vmem:[#allocation2 + $0xa0] sm:$0xf] }
  0xab   :  { %v8447_v48 = vor.u32 %v9442_v45, %v8446_v44  ;;  %v8470_v44 = vld [vmem:[#allocation2 + $0xc8] sm:$0xf]  ;;  %v9447_v45 = vld [vmem:[#allocation2 + $0xd4] sm:$0xf0] }
  0xac   :  { %v8471_v55 = vor.u32 %v9447_v45, %v8470_v44  ;;  %v9452_v45 = vld [vmem:[#allocation2 + $0x104] sm:$0xf] }
  0xad   :  { %1164 = vmatmul.bf16.gmra.mxu0 %v8447_v48  ;;  %v8472_v48 = vld [vmem:[#allocation2 + $0xd8] sm:$0xf0] }
  0xb4   :  { %v9949_v56 = vpop.f32.mrf.mxu1 }
  0xb7   :  { %1308 = vmatmul.bf16.vlgmr.msrb.gmra.mxu1 %v8371_v52  ;;  %1477 = vmatmul.bf16.vlgmr.msrb.gmra.mxu2 %v8375_v53  ;;  %v9436_v52 = vld [vmem:[#allocation2 + $0x84] sm:$0xf]  ;;  %v8432_v53 = vld [vmem:[#allocation2 + $0x90] sm:$0xf0] }
  0xb8   :  { %v8435_v0 = vor.u32 %v9436_v52, %v8432_v53 }
  0xba   :  { %1646 = vmatmul.bf16.vlgmr.msrb.gmra.mxu3 %v8379_v57  ;;  %v9951_v59 = vpop.f32.mrf.mxu2  ;;  %v9437_v57 = vld [vmem:[#allocation2 + $0x8c] sm:$0xf] }
  0xbc   :  { %v9955_v61 = vpop.f32.mrf.mxu1 }
  0xbd   :  { %v9953_v60 = vpop.f32.mrf.mxu3  ;;  %1169 = vmatmul.bf16.gmra.mxu0 %v8463_v8  ;;  %v9448_v8 = vld [vmem:[#allocation2 + $0xe4] sm:$0xf] }
  0xbe   :  { %13237 = vst [vmem:[#allocation16_spill] sm:$0xff] %v9953_v60 }
  0xc2   :  { %v9957_v4 = vpop.f32.mrf.mxu2 }
  0xc4   :  { %v9961_v10 = vpop.f32.mrf.mxu1 }
  0xc5   :  { %v9959_v5 = vpop.f32.mrf.mxu3 }
  0xc6   :  { %13238 = vst [vmem:[#allocation17_spill] sm:$0xff] %v9959_v5 }
  0xc7   :  { %1313 = vmatmul.bf16.gmra.mxu1 %v8387_v6  ;;  %1482 = vmatmul.bf16.gmra.mxu2 %v8391_v7  ;;  %v8443_v7 = vor.u32 %v9437_v57, %v8440_v58 }
  0xca   :  { %1651 = vmatmul.bf16.gmra.mxu3 %v8395_v11  ;;  %v9963_v13 = vpop.f32.mrf.mxu2 }
  0xcc   :  { %v9967_v15 = vpop.f32.mrf.mxu1 }
  0xcd   :  { %v9965_v14 = vpop.f32.mrf.mxu3 }
  0xce   :  { %13239 = vst [vmem:[#allocation18_spill] sm:$0xff] %v9965_v14 }
  0xd2   :  { %v9969_v22 = vpop.f32.mrf.mxu2 }
  0xd4   :  { %v9973_v28 = vpop.f32.mrf.mxu1 }
  0xd5   :  { %v9971_v23 = vpop.f32.mrf.mxu3 }
  0xd6   :  { %13240 = vst [vmem:[#allocation19_spill] sm:$0xff] %v9971_v23 }
  0xd7   :  { %1318 = vmatmul.bf16.gmra.mxu1 %v8403_v24  ;;  %1487 = vmatmul.bf16.gmra.mxu2 %v8407_v25 }
  0xda   :  { %1656 = vmatmul.bf16.gmra.mxu3 %v8411_v29  ;;  %v9975_v31 = vpop.f32.mrf.mxu2  ;;  %v8478_v29 = vld [vmem:[#allocation2 + $0xe0] sm:$0xf] }
  0xdb   :  { %v8479_v36 = vor.u32 %v9450_v30, %v8478_v29  ;;  %v8487_v29 = vor.u32 %v9451_v18, %v8486_v17 }
  0xdc   :  { %v9979_v33 = vpop.f32.mrf.mxu1 }
  0xdd   :  { %v9977_v32 = vpop.f32.mrf.mxu3  ;;  %1174 = vmatmul.bf16.gmra.mxu0 %v8479_v36 }
  0xde   :  { %13241 = vst [vmem:[#allocation20_spill] sm:$0xff] %v9977_v32 }
  0xe2   :  { %v9981_v40 = vpop.f32.mrf.mxu2 }
  0xe4   :  { %v9985_v46 = vpop.f32.mrf.mxu1 }
  0xe5   :  { %v9983_v41 = vpop.f32.mrf.mxu3 }
  0xe6   :  { %13242 = vst [vmem:[#allocation21_spill] sm:$0xff] %v9983_v41 }
  0xe7   :  { %1323 = vmatmul.bf16.gmra.mxu1 %v8419_v42  ;;  %1492 = vmatmul.bf16.gmra.mxu2 %v8423_v43  ;;  %v9444_v42 = vld [vmem:[#allocation2 + $0xc4] sm:$0xf]  ;;  %v8464_v43 = vld [vmem:[#allocation2 + $0xd0] sm:$0xf0] }
  0xe8   :  { %v8467_v54 = vor.u32 %v9444_v42, %v8464_v43 }
  0xea   :  { %1661 = vmatmul.bf16.gmra.mxu3 %v8427_v47  ;;  %v9987_v49 = vpop.f32.mrf.mxu2  ;;  %v9445_v47 = vld [vmem:[#allocation2 + $0xcc] sm:$0xf] }
  0xeb   :  { %v8475_v58 = vor.u32 %v9445_v47, %v8472_v48  ;;  %v8496_v47 = vld [vmem:[#allocation2 + $0x110] sm:$0xf0]  ;;  %v8502_v48 = vld [vmem:[#allocation2 + $0x108] sm:$0xf] }
  0xec   :  { %v9991_v51 = vpop.f32.mrf.mxu1 }
  0xed   :  { %v9989_v50 = vpop.f32.mrf.mxu3 }
  0xee   :  { %13243 = vst [vmem:[#allocation22_spill] sm:$0xff] %v9989_v50 }
  0xf2   :  { %v9993_v62 = vpop.f32.mrf.mxu2 }
  0xf4   :  { %v9997_v6 = vpop.f32.mrf.mxu1 }
  0xf5   :  { %v9995_v63 = vpop.f32.mrf.mxu3 }
  0xf6   :  { %13244 = vst [vmem:[#allocation23_spill] sm:$0xff] %v9995_v63 }
  0xf7   :  { %1328 = vmatmul.bf16.gmra.mxu1 %v8435_v0  ;;  %1497 = vmatmul.bf16.gmra.mxu2 %v8439_v1  ;;  %v1140_v0 = vpop.f32.mrf.mxu0 }
  0xfa   :  { %1666 = vmatmul.bf16.gmra.mxu3 %v8443_v7  ;;  %v9999_v9 = vpop.f32.mrf.mxu2 }
  0xfc   :  { %v10003_v12 = vpop.f32.mrf.mxu1 }
  0xfd   :  { %v10001_v11 = vpop.f32.mrf.mxu3 }
  0xfe   :  { %13245 = vst [vmem:[#allocation24_spill] sm:$0xff] %v10001_v11 }
  0xff   :  { %v1142_v7 = vpop.f32.mrf.mxu0 }
 0x102   :  { %v10005_v24 = vpop.f32.mrf.mxu2 }
 0x104   :  { %v10009_v34 = vpop.f32.mrf.mxu1 }
 0x105   :  { %v10007_v25 = vpop.f32.mrf.mxu3 }
 0x106   :  { %13246 = vst [vmem:[#allocation25_spill] sm:$0xff] %v10007_v25 }
 0x107   :  { %1333 = vmatmul.bf16.gmra.mxu1 %v8451_v26  ;;  %1502 = vmatmul.bf16.gmra.mxu2 %v8455_v27  ;;  %v8483_v27 = vor.u32 %v9448_v8, %v8480_v16  ;;  %v1145_v36 = vpop.f32.mrf.mxu0  ;;  %v8504_v8 = vld [vmem:[#allocation2 + $0x118] sm:$0xf0] }
 0x10a   :  { %1671 = vmatmul.bf16.gmra.mxu3 %v8459_v35  ;;  %v10011_v37 = vpop.f32.mrf.mxu2  ;;  %v8491_v35 = vor.u32 %v9449_v19, %v8488_v20  ;;  %v8499_v20 = vor.u32 %v9452_v45, %v8496_v47  ;;  %v9456_v47 = vld [vmem:[#allocation2 + $0x124] sm:$0xf] }
 0x10c   :  { %v10015_v39 = vpop.f32.mrf.mxu1 }
 0x10d   :  { %v10013_v38 = vpop.f32.mrf.mxu3 }
 0x10e   :  { %13247 = vst [vmem:[#allocation26_spill] sm:$0xff] %v10013_v38 }
 0x10f   :  { %v10048_v17 = vpop.f32.mrf.mxu0 }
 0x112   :  { %v10017_v52 = vpop.f32.mrf.mxu2 }
 0x114   :  { %v10021_v57 = vpop.f32.mrf.mxu1 }
 0x115   :  { %v10019_v53 = vpop.f32.mrf.mxu3 }
 0x116   :  { %13248 = vst [vmem:[#allocation27_spill] sm:$0xff] %v10019_v53 }
 0x117   :  { %1338 = vmatmul.bf16.gmra.mxu1 %v8467_v54  ;;  %1507 = vmatmul.bf16.gmra.mxu2 %v8471_v55  ;;  %v9455_v54 = vld [vmem:[#allocation2 + $0x114] sm:$0xf0]  ;;  %v10044_v55 = vld [vmem:[%s13054_s2] ss:$0 sm:$0xff]  ;;  %v10055_v63 = vpop.f32.mrf.mxu0 }
 0x118   :  { %v1141_v18 = vadd.f32 %v10044_v55, %v1140_v0  ;;  %v1143_v0 = vadd.f32 %v10044_v55, %v1142_v7 }
 0x11a   :  { %1676 = vmatmul.bf16.gmra.mxu3 %v8475_v58  ;;  %v10023_v1 = vpop.f32.mrf.mxu2  ;;  %v9453_v58 = vld [vmem:[#allocation2 + $0x10c] sm:$0xf] }
 0x11c   :  { %v10027_v3 = vpop.f32.mrf.mxu1 }
 0x11d   :  { %v10025_v2 = vpop.f32.mrf.mxu3 }
 0x11e   :  { %13249 = vst [vmem:[#allocation28_spill] sm:$0xff] %v10025_v2 }
 0x122   :  { %v10029_v21 = vpop.f32.mrf.mxu2 }
 0x123   :  { %13250 = vst [vmem:[#allocation29_spill] sm:$0xff] %v10029_v21 }
 0x124   :  { %v10033_v30 = vpop.f32.mrf.mxu1 }
 0x125   :  { %v10031_v26 = vpop.f32.mrf.mxu3 }
 0x126   :  { %13251 = vst [vmem:[#allocation30_spill] sm:$0xff] %v10031_v26  ;;  %v1935_v26 = vlaneseq }
 0x127   :  { %1343 = vmatmul.bf16.gmra.mxu1 %v8483_v27  ;;  %1512 = vmatmul.bf16.gmra.mxu2 %v8487_v29  ;;  %v8503_v27 = vor.u32 %v9455_v54, %v8502_v48  ;;  %v8512_v48 = vld [vmem:[#allocation2 + $0x130] sm:$0xf0]  ;;  %v8518_v54 = vld [vmem:[#allocation2 + $0x128] sm:$0xf] }
 0x128   :  { %v10053_v25 = vshrl.u32 %v1935_v26, 7  ;;  %v8515_v50 = vor.u32 %v9456_v47, %v8512_v48  ;;  %v8528_v47 = vld [vmem:[#allocation2 + $0x150] sm:$0xf0] }
 0x12a   :  { %1681 = vmatmul.bf16.gmra.mxu3 %v8491_v35  ;;  %v10035_v42 = vpop.f32.mrf.mxu2  ;;  %v8507_v35 = vor.u32 %v9453_v58, %v8504_v8  ;;  %v1937_v45 = vadd.s32 8, %v10053_v25  ;;  %v9459_v58 = vld [vmem:[#allocation2 + $0x134] sm:$0xf0]  ;;  %vm2704_vm2 = vcmp.lt.s32.totalorder %v10053_v25, 1  ;;  %vm2897_vm3 = vcmp.lt.s32.totalorder %v10053_v25, 7 }
 0x12b   :  { %13252 = vst [vmem:[#allocation31_spill] sm:$0xff] %v10035_v42  ;;  %v8519_v7 = vor.u32 %v9459_v58, %v8518_v54 }
 0x12c   :  { %v10039_v44 = vpop.f32.mrf.mxu1  ;;  %v2001_v26 = vand.u32 15, %v1937_v45 }
 0x12d   :  { %v10037_v43 = vpop.f32.mrf.mxu3 }
 0x12e   :  { %13253 = vst [vmem:[#allocation32_spill] sm:$0xff] %v10037_v43  ;;  %vm2129_vm0 = vcmp.eq.s32.totalorder %v2001_v26, 15 }
 0x132   :  { %v10046_v16 = vpop.f32.mrf.mxu2 }
 0x133   :  { %13254 = vst [vmem:[#allocation33_spill] sm:$0xff] %v10046_v16 }
 0x134   :  { %v1309_v29 = vpop.f32.mrf.mxu1 }
 0x135   :  { %v10051_v19 = vpop.f32.mrf.mxu3  ;;  %v1310_v43 = vadd.f32 %v1309_v29, %v1141_v18  ;;  %v9457_v18 = vld [vmem:[#allocation2 + $0x12c] sm:$0xf] }
 0x136   :  { %13255 = vst [vmem:[#allocation34_spill] sm:$0xff] %v10051_v19 }
 0x137   :  { %1348 = vmatmul.bf16.gmra.mxu1 %v8499_v20  ;;  %1517 = vmatmul.bf16.gmra.mxu2 %v8503_v27  ;;  %v8520_v20 = vld [vmem:[#allocation2 + $0x138] sm:$0xf0] }
 0x138   :  { %v8523_v41 = vor.u32 %v9457_v18, %v8520_v20 }
 0x13a   :  { %1686 = vmatmul.bf16.gmra.mxu3 %v8507_v35  ;;  %v1478_v2 = vpop.f32.mrf.mxu2 }
 0x13b   :  { %v1479_v53 = vadd.f32 %v1478_v2, %v1310_v43  ;;  %v1146_v2 = vadd.f32 %v10044_v55, %v1145_v36 }
 0x13c   :  { %v1311_v11 = vpop.f32.mrf.mxu1 }
 0x13d   :  { %v1647_v38 = vpop.f32.mrf.mxu3  ;;  %v1312_v8 = vadd.f32 %v1311_v11, %v1143_v0  ;;  %v1938_v11 = vadd.s32 16, %v10053_v25  ;;  %v10064_v0 = vpop.f32.mrf.mxu0 }
 0x13e   :  { %v1648_v19 = vadd.f32 %v1647_v38, %v1479_v53  ;;  %v2000_v38 = vand.u32 15, %v10053_v25 }
 0x13f   :  { %v2002_v20 = vand.u32 15, %v1938_v11 }
 0x140   :  { %v10060_v27 = vmax.f32 %v1648_v19, 0.0  ;;  %vm10068_vm1 = vcmp.eq.s32.totalorder %v2000_v38, 0  ;;  %v1148_v38 = vadd.f32 %v10044_v55, %v10048_v17 }
 0x141   :  { %vm2386_vm4 = vcmp.eq.s32.totalorder %v2002_v20, 0  ;;  %v1151_v20 = vadd.f32 %v10044_v55, %v10055_v63  ;;  %v1940_v63 = vadd.s32 32, %v10053_v25 }
 0x142   :  { %v1480_v43 = vpop.f32.mrf.mxu2  ;;  %13256 = vst [vmem:[#allocation35_spill] sm:$0xff] %v10060_v27  ;;  %v1871_v36 = vpack.c.bf16 %v10060_v27, %v10060_v27  ;;  %v13060_v58 = vrot.slane %v10060_v27, 7 }
 0x143   :  { %v1481_v29 = vadd.f32 %v1480_v43, %v1312_v8 }
 0x144   :  { %v1314_v53 = vpop.f32.mrf.mxu1 }
 0x145   :  { %v1649_v35 = vpop.f32.mrf.mxu3  ;;  %v1315_v19 = vadd.f32 %v1314_v53, %v1146_v2 }
 0x146   :  { %v1650_v32 = vadd.f32 %v1649_v35, %v1481_v29 }
 0x147   :  { %1353 = vmatmul.bf16.gmra.mxu1 %v8515_v50  ;;  %1522 = vmatmul.bf16.gmra.mxu2 %v8519_v7  ;;  %v3282_v50 = vunpack.c.l.b16 %v1871_v36  ;;  %v1939_v36 = vadd.s32 24, %v10053_v25 }
 0x148   :  { %v1808_v45 = vmax.f32 %v1650_v32, 0.0  ;;  %v2576_v32 = vsel %vm10068_vm1, 0.0, %v10060_v27 }
 0x149   :  { %v10088_v11 = vrot.slane %v2576_v32, 1  ;;  %v8536_v32 = vld [vmem:[#allocation2 + $0x158] sm:$0xf0]  ;;  %v2003_v27 = vand.u32 15, %v1939_v36 }
 0x14a   :  { %1691 = vmatmul.bf16.gmra.mxu3 %v8523_v41  ;;  %v1872_v48 = vpack.c.bf16 %v1808_v45, %v1808_v45  ;;  %v2321_v54 = vsel %vm2129_vm0, 0.0, %v1808_v45  ;;  %v1483_v18 = vpop.f32.mrf.mxu2  ;;  %v2834_v29 = vrot.slane %v1808_v45, 1 }
 0x14b   :  { %v2641_v8 = vrot.slane %v2321_v54, 7  ;;  %v1484_v43 = vadd.f32 %v1483_v18, %v1315_v19  ;;  %13261 = vst [vmem:[#allocation38_spill] sm:$0xff] %v10088_v11  ;;  %v9460_v19 = vld [vmem:[#allocation2 + $0x144] sm:$0xf]  ;;  %v8534_v54 = vld [vmem:[#allocation2 + $0x148] sm:$0xf] }
 0x14c   :  { %v3283_v2 = vunpack.c.l.b16 %v1872_v48  ;;  %v1316_v35 = vpop.f32.mrf.mxu1  ;;  %v2960_v48 = vsel %vm2897_vm3, %v10088_v11, %v2834_v29  ;;  %v9463_v18 = vld [vmem:[#allocation2 + $0x154] sm:$0xf0]  ;;  %vm2131_vm5 = vcmp.eq.s32.totalorder %v2003_v27, 15 }
 0x14d   :  { %v1652_v26 = vpop.f32.mrf.mxu3  ;;  %v10081_v41 = vsel %vm2704_vm2, %v13060_v58, %v2641_v8  ;;  %v1317_v17 = vadd.f32 %v1316_v35, %v1148_v38  ;;  %v2962_v23 = vpack.c.bf16 %v2960_v48, %v2960_v48  ;;  %v8535_v11 = vor.u32 %v9463_v18, %v8534_v54 }
 0x14e   :  { %13259 = vst [vmem:[#allocation36_spill] sm:$0xff] %v10081_v41  ;;  %v10084_v7 = vpack.c.b16 %v3283_v2, %v3282_v50  ;;  %v1653_v53 = vadd.f32 %v1652_v26, %v1484_v43  ;;  %v10094_v50 = vpop.f32.mrf.mxu0  ;;  %v9461_v43 = vld [vmem:[#allocation2 + $0x14c] sm:$0xf]  ;;  %v8531_v41 = vor.u32 %v9460_v19, %v8528_v47 }
 0x14f   :  { %v8539_v38 = vor.u32 %v9461_v43, %v8536_v32  ;;  %v3474_v42 = vunpack.c.l.b16 %v2962_v23  ;;  %v2004_v43 = vand.u32 15, %v1940_v63  ;;  %v9464_v63 = vld [vmem:[#allocation2 + $0x164] sm:$0xf] }
 0x150   :  { %13260 = vst [vmem:[#allocation37_spill] sm:$0xff] %v10084_v7  ;;  %v1809_v45 = vmax.f32 %v1653_v53, 0.0 }
 0x151   :  { %vm10113_vm6 = vcmp.eq.s32.totalorder %v2004_v43, 0  ;;  %v9465_v43 = vld [vmem:[#allocation2 + $0x16c] sm:$0xf] }
 0x152   :  { %v2578_v2 = vsel %vm2386_vm4, 0.0, %v1809_v45  ;;  %v2642_v58 = vrot.slane %v1809_v45, 7  ;;  %v1485_v53 = vpop.f32.mrf.mxu2  ;;  %v1873_v48 = vpack.c.bf16 %v1809_v45, %v1809_v45 }
 0x153   :  { %v2835_v26 = vrot.slane %v2578_v2, 1  ;;  %v1486_v14 = vadd.f32 %v1485_v53, %v1317_v17 }
 0x154   :  { %v2766_v7 = vsel %vm2704_vm2, %v2641_v8, %v2642_v58  ;;  %v1319_v35 = vpop.f32.mrf.mxu1 }
 0x155   :  { %v1654_v5 = vpop.f32.mrf.mxu3  ;;  %v2959_v60 = vsel %vm2897_vm3, %v2834_v29, %v2835_v26  ;;  %v1320_v47 = vadd.f32 %v1319_v35, %v1151_v20  ;;  %v2771_v32 = vpack.c.bf16 %v2766_v7, %v2766_v7 }
 0x156   :  { %v2963_v16 = vpack.c.bf16 %v2959_v60, %v2959_v60  ;;  %v1655_v2 = vadd.f32 %v1654_v5, %v1486_v14  ;;  %v10105_v60 = vpop.f32.mrf.mxu0 }
 0x157   :  { %1358 = vmatmul.bf16.gmra.mxu1 %v8531_v41  ;;  %1527 = vmatmul.bf16.gmra.mxu2 %v8535_v11  ;;  %v3284_v41 = vunpack.c.l.b16 %v1873_v48  ;;  %v3092_v7 = vunpack.c.l.b16 %v2771_v32 }
 0x158   :  { %v3475_v36 = vunpack.c.l.b16 %v2963_v16  ;;  %v1810_v19 = vmax.f32 %v1655_v2, 0.0 }
 0x15a   :  { %1696 = vmatmul.bf16.gmra.mxu3 %v8539_v38  ;;  %v2323_v54 = vsel %vm2131_vm5, 0.0, %v1810_v19  ;;  %v2836_v8 = vrot.slane %v1810_v19, 1  ;;  %v10103_v18 = vpack.c.b16 %v3475_v36, %v3474_v42  ;;  %v1488_v17 = vpop.f32.mrf.mxu2  ;;  %v1874_v5 = vpack.c.bf16 %v1810_v19, %v1810_v19  ;;  %v8544_v36 = vld [vmem:[#allocation2 + $0x170] sm:$0xf0] }
 0x15b   :  { %v2643_v29 = vrot.slane %v2323_v54, 7  ;;  %v1489_v14 = vadd.f32 %v1488_v17, %v1320_v47  ;;  %v1153_v42 = vadd.f32 %v10044_v55, %v10064_v0  ;;  %v1941_v38 = vadd.s32 40, %v10053_v25  ;;  %v8550_v47 = vld [vmem:[#allocation2 + $0x168] sm:$0xf] }
 0x15c   :  { %13262 = vst [vmem:[#allocation39_spill] sm:$0xff] %v10103_v18  ;;  %v2958_v23 = vsel %vm2897_vm3, %v2835_v26, %v2836_v8  ;;  %v1321_v16 = vpop.f32.mrf.mxu1  ;;  %v3285_v11 = vunpack.c.l.b16 %v1874_v5  ;;  %v1156_v17 = vadd.f32 %v10044_v55, %v10094_v50  ;;  %v8552_v5 = vld [vmem:[#allocation2 + $0x178] sm:$0xf0] }
 0x15d   :  { %v1657_v27 = vpop.f32.mrf.mxu3  ;;  %v2765_v45 = vsel %vm2704_vm2, %v2642_v58, %v2643_v29  ;;  %v9467_v58 = vld [vmem:[#allocation2 + $0x174] sm:$0xf0]  ;;  %v1322_v54 = vadd.f32 %v1321_v16, %v1153_v42  ;;  %v2964_v32 = vpack.c.bf16 %v2958_v23, %v2958_v23  ;;  %v8555_v16 = vor.u32 %v9465_v43, %v8552_v5 }
 0x15e   :  { %v1658_v20 = vadd.f32 %v1657_v27, %v1489_v14  ;;  %v2772_v53 = vpack.c.bf16 %v2765_v45, %v2765_v45  ;;  %v10118_v2 = vpack.c.b16 %v3285_v11, %v3284_v41  ;;  %v2005_v41 = vand.u32 15, %v1941_v38  ;;  %v1160_v42 = vpop.f32.mrf.mxu0 }
 0x15f   :  { %v8547_v11 = vor.u32 %v9464_v63, %v8544_v36  ;;  %v1942_v38 = vadd.s32 48, %v10053_v25 }
 0x160   :  { %13265 = vst [vmem:[#allocation40_spill] sm:$0xff] %v10118_v2  ;;  %v1811_v26 = vmax.f32 %v1658_v20, 0.0  ;;  %v3093_v19 = vunpack.c.l.b16 %v2772_v53  ;;  %v8551_v2 = vor.u32 %v9467_v58, %v8550_v47  ;;  %vm2133_vm7 = vcmp.eq.s32.totalorder %v2005_v41, 15 }
 0x162   :  { %v2580_v0 = vsel %vm10113_vm6, 0.0, %v1811_v26  ;;  %v2644_v48 = vrot.slane %v1811_v26, 7  ;;  %v1490_v27 = vpop.f32.mrf.mxu2  ;;  %v10124_v45 = vpack.c.b16 %v3093_v19, %v3092_v7  ;;  %v3476_v19 = vunpack.c.l.b16 %v2964_v32 }
 0x163   :  { %v2837_v14 = vrot.slane %v2580_v0, 1  ;;  %v1491_v20 = vadd.f32 %v1490_v27, %v1322_v54  ;;  %v1875_v47 = vpack.c.bf16 %v1811_v26, %v1811_v26 }
 0x164   :  { %13266 = vst [vmem:[#allocation41_spill] sm:$0xff] %v10124_v45  ;;  %v2764_v35 = vsel %vm2704_vm2, %v2643_v29, %v2644_v48  ;;  %v1324_v18 = vpop.f32.mrf.mxu1 }
 0x165   :  { %v1659_v53 = vpop.f32.mrf.mxu3  ;;  %v2957_v50 = vsel %vm2897_vm3, %v2836_v8, %v2837_v14  ;;  %v1325_v36 = vadd.f32 %v1324_v18, %v1156_v17  ;;  %v2006_v8 = vand.u32 15, %v1942_v38  ;;  %v3286_v17 = vunpack.c.l.b16 %v1875_v47 }
 0x166   :  { %v1660_v21 = vadd.f32 %v1659_v53, %v1491_v20  ;;  %v2965_v0 = vpack.c.bf16 %v2957_v50, %v2957_v50  ;;  %v1158_v20 = vadd.f32 %v10044_v55, %v10105_v60  ;;  %v1943_v50 = vadd.s32 56, %v10053_v25 }
 0x167   :  { %1363 = vmatmul.bf16.gmra.mxu1 %v8547_v11  ;;  %1532 = vmatmul.bf16.gmra.mxu2 %v8551_v2  ;;  %v2773_v11 = vpack.c.bf16 %v2764_v35, %v2764_v35  ;;  %vm10139_vm8 = vcmp.eq.s32.totalorder %v2006_v8, 0  ;;  %v9471_v35 = vld [vmem:[#allocation2 + $0x194] sm:$0xf0]  ;;  %v9469_v8 = vld [vmem:[#allocation2 + $0x18c] sm:$0xf] }
 0x168   :  { %v1812_v63 = vmax.f32 %v1660_v21, 0.0  ;;  %v3477_v23 = vunpack.c.l.b16 %v2965_v0  ;;  %v1162_v0 = vpop.f32.mrf.mxu0 }
 0x16a   :  { %1701 = vmatmul.bf16.gmra.mxu3 %v8555_v16  ;;  %v2325_v29 = vsel %vm2133_vm7, 0.0, %v1812_v63  ;;  %v2838_v58 = vrot.slane %v1812_v63, 1  ;;  %v10131_v7 = vpack.c.b16 %v3477_v23, %v3476_v19  ;;  %v1493_v43 = vpop.f32.mrf.mxu2  ;;  %v1876_v5 = vpack.c.bf16 %v1812_v63, %v1812_v63  ;;  %v9468_v63 = vld [vmem:[#allocation2 + $0x184] sm:$0xf] }
 0x16b   :  { %v2645_v54 = vrot.slane %v2325_v29, 7  ;;  %v1494_v27 = vadd.f32 %v1493_v43, %v1325_v36  ;;  %v8560_v36 = vld [vmem:[#allocation2 + $0x190] sm:$0xf0]  ;;  %v3094_v23 = vunpack.c.l.b16 %v2773_v11  ;;  %v1161_v43 = vadd.f32 %v10044_v55, %v1160_v42 }
 0x16c   :  { %13267 = vst [vmem:[#allocation42_spill] sm:$0xff] %v10131_v7  ;;  %v2956_v21 = vsel %vm2897_vm3, %v2837_v14, %v2838_v58  ;;  %v1326_v18 = vpop.f32.mrf.mxu1  ;;  %v3287_v2 = vunpack.c.l.b16 %v1876_v5  ;;  %v8568_v5 = vld [vmem:[#allocation2 + $0x198] sm:$0xf0] }
 0x16d   :  { %v1662_v41 = vpop.f32.mrf.mxu3  ;;  %v2763_v26 = vsel %vm2704_vm2, %v2644_v48, %v2645_v54  ;;  %v8566_v48 = vld [vmem:[#allocation2 + $0x188] sm:$0xf]  ;;  %v1327_v29 = vadd.f32 %v1326_v18, %v1158_v20  ;;  %v8571_v7 = vor.u32 %v9469_v8, %v8568_v5 }
 0x16e   :  { %v1663_v53 = vadd.f32 %v1662_v41, %v1494_v27  ;;  %v2774_v32 = vpack.c.bf16 %v2763_v26, %v2763_v26  ;;  %v10144_v14 = vpack.c.b16 %v3287_v2, %v3286_v17  ;;  %v2007_v17 = vand.u32 15, %v1943_v50 }
 0x16f   :  { %v8563_v2 = vor.u32 %v9468_v63, %v8560_v36  ;;  %v8567_v45 = vor.u32 %v9471_v35, %v8566_v48  ;;  %v1944_v50 = vadd.s32 64, %v10053_v25 }
 0x170   :  { %13270 = vst [vmem:[#allocation43_spill] sm:$0xff] %v10144_v14  ;;  %v1813_v38 = vmax.f32 %v1663_v53, 0.0  ;;  %v3095_v19 = vunpack.c.l.b16 %v2774_v32  ;;  %v2966_v14 = vpack.c.bf16 %v2956_v21, %v2956_v21  ;;  %vm2135_vm9 = vcmp.eq.s32.totalorder %v2007_v17, 15  ;;  %v1165_v35 = vpop.f32.mrf.mxu0 }
 0x171   :  { %v2008_v8 = vand.u32 15, %v1944_v50  ;;  %v9472_v50 = vld [vmem:[#allocation2 + $0x1a4] sm:$0xf] }
 0x172   :  { %v2582_v60 = vsel %vm10139_vm8, 0.0, %v1813_v38  ;;  %v2646_v47 = vrot.slane %v1813_v38, 7  ;;  %v1495_v41 = vpop.f32.mrf.mxu2  ;;  %v10149_v26 = vpack.c.b16 %v3095_v19, %v3094_v23  ;;  %v3478_v19 = vunpack.c.l.b16 %v2966_v14 }
 0x173   :  { %v2839_v27 = vrot.slane %v2582_v60, 1  ;;  %v1496_v53 = vadd.f32 %v1495_v41, %v1327_v29  ;;  %v1877_v21 = vpack.c.bf16 %v1813_v38, %v1813_v38  ;;  %vm10163_vm10 = vcmp.eq.s32.totalorder %v2008_v8, 0  ;;  %v8584_v8 = vld [vmem:[#allocation2 + $0x1b8] sm:$0xf0] }
 0x174   :  { %13271 = vst [vmem:[#allocation44_spill] sm:$0xff] %v10149_v26  ;;  %v2762_v11 = vsel %vm2704_vm2, %v2645_v54, %v2646_v47  ;;  %v1329_v16 = vpop.f32.mrf.mxu1 }
 0x175   :  { %v1664_v32 = vpop.f32.mrf.mxu3  ;;  %v2955_v42 = vsel %vm2897_vm3, %v2838_v58, %v2839_v27  ;;  %v1330_v36 = vadd.f32 %v1329_v16, %v1161_v43  ;;  %v2775_v38 = vpack.c.bf16 %v2762_v11, %v2762_v11 }
 0x176   :  { %v1665_v18 = vadd.f32 %v1664_v32, %v1496_v53  ;;  %v2967_v20 = vpack.c.bf16 %v2955_v42, %v2955_v42  ;;  %v1163_v53 = vadd.f32 %v10044_v55, %v1162_v0 }
 0x177   :  { %1368 = vmatmul.bf16.gmra.mxu1 %v8563_v2  ;;  %1537 = vmatmul.bf16.gmra.mxu2 %v8567_v45  ;;  %v3288_v45 = vunpack.c.l.b16 %v1877_v21 }
 0x178   :  { %v1814_v63 = vmax.f32 %v1665_v18, 0.0  ;;  %v3479_v48 = vunpack.c.l.b16 %v2967_v20  ;;  %v1945_v18 = vadd.s32 72, %v10053_v25 }
 0x17a   :  { %1706 = vmatmul.bf16.gmra.mxu3 %v8571_v7  ;;  %v2327_v54 = vsel %vm2135_vm9, 0.0, %v1814_v63  ;;  %v2840_v23 = vrot.slane %v1814_v63, 1  ;;  %v10156_v60 = vpack.c.b16 %v3479_v48, %v3478_v19  ;;  %v1498_v58 = vpop.f32.mrf.mxu2  ;;  %v1878_v5 = vpack.c.bf16 %v1814_v63, %v1814_v63  ;;  %v8576_v63 = vld [vmem:[#allocation2 + $0x1b0] sm:$0xf0]  ;;  %v8582_v19 = vld [vmem:[#allocation2 + $0x1a8] sm:$0xf] }
 0x17b   :  { %v2647_v29 = vrot.slane %v2327_v54, 7  ;;  %v1499_v41 = vadd.f32 %v1498_v58, %v1330_v36  ;;  %v9475_v48 = vld [vmem:[#allocation2 + $0x1b4] sm:$0xf0]  ;;  %v1166_v54 = vadd.f32 %v10044_v55, %v1165_v35  ;;  %v9473_v58 = vld [vmem:[#allocation2 + $0x1ac] sm:$0xf] }
 0x17c   :  { %13272 = vst [vmem:[#allocation45_spill] sm:$0xff] %v10156_v60  ;;  %v2954_v43 = vsel %vm2897_vm3, %v2839_v27, %v2840_v23  ;;  %v1331_v2 = vpop.f32.mrf.mxu1  ;;  %v3289_v14 = vunpack.c.l.b16 %v1878_v5  ;;  %v8583_v26 = vor.u32 %v9475_v48, %v8582_v19 }
 0x17d   :  { %v1667_v17 = vpop.f32.mrf.mxu3  ;;  %v2761_v7 = vsel %vm2704_vm2, %v2646_v47, %v2647_v29  ;;  %v3096_v47 = vunpack.c.l.b16 %v2775_v38  ;;  %v1332_v21 = vadd.f32 %v1331_v2, %v1163_v53  ;;  %v2968_v38 = vpack.c.bf16 %v2954_v43, %v2954_v43 }
 0x17e   :  { %v1668_v32 = vadd.f32 %v1667_v17, %v1499_v41  ;;  %v2776_v16 = vpack.c.bf16 %v2761_v7, %v2761_v7  ;;  %v10168_v20 = vpack.c.b16 %v3289_v14, %v3288_v45  ;;  %v2009_v17 = vand.u32 15, %v1945_v18  ;;  %v1167_v14 = vpop.f32.mrf.mxu0 }
 0x17f   :  { %v8579_v45 = vor.u32 %v9472_v50, %v8576_v63  ;;  %v8587_v2 = vor.u32 %v9473_v58, %v8584_v8  ;;  %v1946_v18 = vadd.s32 80, %v10053_v25 }
 0x180   :  { %13275 = vst [vmem:[#allocation46_spill] sm:$0xff] %v10168_v20  ;;  %v1815_v27 = vmax.f32 %v1668_v32, 0.0  ;;  %v3097_v36 = vunpack.c.l.b16 %v2776_v16  ;;  %vm2137_vm11 = vcmp.eq.s32.totalorder %v2009_v17, 15 }
 0x182   :  { %v2584_v0 = vsel %vm10163_vm10, 0.0, %v1815_v27  ;;  %v2648_v11 = vrot.slane %v1815_v27, 7  ;;  %v1500_v41 = vpop.f32.mrf.mxu2  ;;  %v10173_v7 = vpack.c.b16 %v3097_v36, %v3096_v47  ;;  %v3480_v36 = vunpack.c.l.b16 %v2968_v38 }
 0x183   :  { %v2841_v5 = vrot.slane %v2584_v0, 1  ;;  %v1501_v32 = vadd.f32 %v1500_v41, %v1332_v21  ;;  %v1879_v43 = vpack.c.bf16 %v1815_v27, %v1815_v27  ;;  %v1168_v38 = vadd.f32 %v10044_v55, %v1167_v14 }
 0x184   :  { %13276 = vst [vmem:[#allocation47_spill] sm:$0xff] %v10173_v7  ;;  %v2760_v42 = vsel %vm2704_vm2, %v2647_v29, %v2648_v11  ;;  %v1334_v20 = vpop.f32.mrf.mxu1 }
 0x185   :  { %v1669_v16 = vpop.f32.mrf.mxu3  ;;  %v2953_v35 = vsel %vm2897_vm3, %v2840_v23, %v2841_v5  ;;  %v1335_v63 = vadd.f32 %v1334_v20, %v1166_v54  ;;  %v2010_v23 = vand.u32 15, %v1946_v18 }
 0x186   :  { %v1670_v53 = vadd.f32 %v1669_v16, %v1501_v32  ;;  %v2969_v0 = vpack.c.bf16 %v2953_v35, %v2953_v35  ;;  %v1170_v54 = vpop.f32.mrf.mxu0  ;;  %v2777_v16 = vpack.c.bf16 %v2760_v42, %v2760_v42 }
 0x187   :  { %1373 = vmatmul.bf16.gmra.mxu1 %v8579_v45  ;;  %1542 = vmatmul.bf16.gmra.mxu2 %v8583_v26  ;;  %v3290_v26 = vunpack.c.l.b16 %v1879_v43  ;;  %vm10187_vm12 = vcmp.eq.s32.totalorder %v2010_v23, 0  ;;  %v9479_v43 = vld [vmem:[#allocation2 + $0x1d4] sm:$0xf0]  ;;  %v9477_v23 = vld [vmem:[#allocation2 + $0x1cc] sm:$0xf] }
 0x188   :  { %v1816_v50 = vmax.f32 %v1670_v53, 0.0  ;;  %v3481_v19 = vunpack.c.l.b16 %v2969_v0  ;;  %v1947_v0 = vadd.s32 88, %v10053_v25 }
 0x18a   :  { %1711 = vmatmul.bf16.gmra.mxu3 %v8587_v2  ;;  %v2329_v48 = vsel %vm2137_vm11, 0.0, %v1816_v50  ;;  %v2842_v29 = vrot.slane %v1816_v50, 1  ;;  %v10180_v47 = vpack.c.b16 %v3481_v19, %v3480_v36  ;;  %v1503_v58 = vpop.f32.mrf.mxu2  ;;  %v1880_v8 = vpack.c.bf16 %v1816_v50, %v1816_v50  ;;  %v9476_v50 = vld [vmem:[#allocation2 + $0x1c4] sm:$0xf]  ;;  %v8598_v19 = vld [vmem:[#allocation2 + $0x1c8] sm:$0xf] }
 0x18b   :  { %v2649_v21 = vrot.slane %v2329_v48, 7  ;;  %v1504_v41 = vadd.f32 %v1503_v58, %v1335_v63  ;;  %v8592_v63 = vld [vmem:[#allocation2 + $0x1d0] sm:$0xf0]  ;;  %v1171_v58 = vadd.f32 %v10044_v55, %v1170_v54  ;;  %v8599_v7 = vor.u32 %v9479_v43, %v8598_v19 }
 0x18c   :  { %13277 = vst [vmem:[#allocation48_spill] sm:$0xff] %v10180_v47  ;;  %v2952_v32 = vsel %vm2897_vm3, %v2841_v5, %v2842_v29  ;;  %v1336_v20 = vpop.f32.mrf.mxu1  ;;  %v3291_v45 = vunpack.c.l.b16 %v1880_v8  ;;  %v8600_v8 = vld [vmem:[#allocation2 + $0x1d8] sm:$0xf0] }
 0x18d   :  { %v1672_v17 = vpop.f32.mrf.mxu3  ;;  %v2759_v27 = vsel %vm2704_vm2, %v2648_v11, %v2649_v21  ;;  %v3098_v11 = vunpack.c.l.b16 %v2777_v16  ;;  %v1337_v48 = vadd.f32 %v1336_v20, %v1168_v38  ;;  %v8603_v47 = vor.u32 %v9477_v23, %v8600_v8 }
 0x18e   :  { %v1673_v2 = vadd.f32 %v1672_v17, %v1504_v41  ;;  %v2778_v35 = vpack.c.bf16 %v2759_v27, %v2759_v27  ;;  %v10192_v18 = vpack.c.b16 %v3291_v45, %v3290_v26  ;;  %v2011_v26 = vand.u32 15, %v1947_v0 }
 0x18f   :  { %v8595_v45 = vor.u32 %v9476_v50, %v8592_v63  ;;  %v1948_v0 = vadd.s32 96, %v10053_v25 }
 0x190   :  { %13280 = vst [vmem:[#allocation49_spill] sm:$0xff] %v10192_v18  ;;  %v1817_v5 = vmax.f32 %v1673_v2, 0.0  ;;  %v3099_v36 = vunpack.c.l.b16 %v2778_v35  ;;  %v2970_v18 = vpack.c.bf16 %v2952_v32, %v2952_v32  ;;  %vm2139_vm13 = vcmp.eq.s32.totalorder %v2011_v26, 15 }
 0x191   :  { %v2012_v23 = vand.u32 15, %v1948_v0  ;;  %v9480_v0 = vld [vmem:[#allocation2 + $0x1e4] sm:$0xf] }
 0x192   :  { %v2586_v14 = vsel %vm10187_vm12, 0.0, %v1817_v5  ;;  %v2650_v42 = vrot.slane %v1817_v5, 7  ;;  %v1505_v17 = vpop.f32.mrf.mxu2  ;;  %v10197_v27 = vpack.c.b16 %v3099_v36, %v3098_v11  ;;  %v3482_v36 = vunpack.c.l.b16 %v2970_v18 }
 0x193   :  { %v2843_v41 = vrot.slane %v2586_v14, 1  ;;  %v1506_v2 = vadd.f32 %v1505_v17, %v1337_v48  ;;  %v1172_v14 = vpop.f32.mrf.mxu0  ;;  %v1881_v19 = vpack.c.bf16 %v1817_v5, %v1817_v5  ;;  %vm10211_vm14 = vcmp.eq.s32.totalorder %v2012_v23, 0  ;;  %v9481_v23 = vld [vmem:[#allocation2 + $0x1ec] sm:$0xf] }
 0x194   :  { %13281 = vst [vmem:[#allocation50_spill] sm:$0xff] %v10197_v27  ;;  %v2758_v16 = vsel %vm2704_vm2, %v2649_v21, %v2650_v42  ;;  %v1339_v53 = vpop.f32.mrf.mxu1  ;;  %v1173_v5 = vadd.f32 %v10044_v55, %v1172_v14 }
 0x195   :  { %v1674_v35 = vpop.f32.mrf.mxu3  ;;  %v2951_v20 = vsel %vm2897_vm3, %v2842_v29, %v2843_v41  ;;  %v1340_v63 = vadd.f32 %v1339_v53, %v1171_v58 }
 0x196   :  { %v1675_v54 = vadd.f32 %v1674_v35, %v1506_v2  ;;  %v2971_v38 = vpack.c.bf16 %v2951_v20, %v2951_v20 }
 0x197   :  { %1378 = vmatmul.bf16.gmra.mxu1 %v8595_v45  ;;  %1547 = vmatmul.bf16.gmra.mxu2 %v8599_v7  ;;  %v3292_v45 = vunpack.c.l.b16 %v1881_v19 }
 0x198   :  { %v1818_v50 = vmax.f32 %v1675_v54, 0.0  ;;  %v3483_v32 = vunpack.c.l.b16 %v2971_v38  ;;  %v1949_v54 = vadd.s32 104, %v10053_v25 }
 0x19a   :  { %1716 = vmatmul.bf16.gmra.mxu3 %v8603_v47  ;;  %v2331_v21 = vsel %vm2139_vm13, 0.0, %v1818_v50  ;;  %v2844_v43 = vrot.slane %v1818_v50, 1  ;;  %v10204_v11 = vpack.c.b16 %v3483_v32, %v3482_v36  ;;  %v1508_v29 = vpop.f32.mrf.mxu2  ;;  %v1882_v8 = vpack.c.bf16 %v1818_v50, %v1818_v50  ;;  %v8608_v50 = vld [vmem:[#allocation2 + $0x1f0] sm:$0xf0]  ;;  %v8614_v32 = vld [vmem:[#allocation2 + $0x1e8] sm:$0xf] }
 0x19b   :  { %v2651_v48 = vrot.slane %v2331_v21, 7  ;;  %v1509_v17 = vadd.f32 %v1508_v29, %v1340_v63  ;;  %v2779_v47 = vpack.c.bf16 %v2758_v16, %v2758_v16  ;;  %v1175_v36 = vpop.f32.mrf.mxu0 }
 0x19c   :  { %13282 = vst [vmem:[#allocation51_spill] sm:$0xff] %v10204_v11  ;;  %v2950_v2 = vsel %vm2897_vm3, %v2843_v41, %v2844_v43  ;;  %v1341_v58 = vpop.f32.mrf.mxu1  ;;  %v3293_v7 = vunpack.c.l.b16 %v1882_v8  ;;  %v1176_v29 = vadd.f32 %v10044_v55, %v1175_v36  ;;  %v8616_v8 = vld [vmem:[#allocation2 + $0x1f8] sm:$0xf0] }
 0x19d   :  { %v1677_v26 = vpop.f32.mrf.mxu3  ;;  %v2757_v18 = vsel %vm2704_vm2, %v2650_v42, %v2651_v48  ;;  %v9483_v42 = vld [vmem:[#allocation2 + $0x1f4] sm:$0xf0]  ;;  %v3100_v16 = vunpack.c.l.b16 %v2779_v47  ;;  %v1342_v21 = vadd.f32 %v1341_v58, %v1173_v5  ;;  %v8619_v11 = vor.u32 %v9481_v23, %v8616_v8 }
 0x19e   :  { %v1678_v35 = vadd.f32 %v1677_v26, %v1509_v17  ;;  %v2780_v53 = vpack.c.bf16 %v2757_v18, %v2757_v18  ;;  %v10216_v38 = vpack.c.b16 %v3293_v7, %v3292_v45  ;;  %v2013_v45 = vand.u32 15, %v1949_v54 }
 0x19f   :  { %v8611_v7 = vor.u32 %v9480_v0, %v8608_v50  ;;  %v8615_v27 = vor.u32 %v9483_v42, %v8614_v32  ;;  %v1950_v54 = vadd.s32 112, %v10053_v25 }
 0x1a0   :  { %13285 = vst [vmem:[#allocation52_spill] sm:$0xff] %v10216_v38  ;;  %v1819_v41 = vmax.f32 %v1678_v35, 0.0  ;;  %v3101_v63 = vunpack.c.l.b16 %v2780_v53  ;;  %v2972_v38 = vpack.c.bf16 %v2950_v2, %v2950_v2  ;;  %vm2141_vm15 = vcmp.eq.s32.totalorder %v2013_v45, 15 }
 0x1a1   :  { %v2014_v23 = vand.u32 15, %v1950_v54  ;;  %v9484_v54 = vld [vmem:[#allocation2 + $0x204] sm:$0xf] }
 0x1a2   :  { %v2588_v14 = vsel %vm10211_vm14, 0.0, %v1819_v41  ;;  %v2652_v19 = vrot.slane %v1819_v41, 7  ;;  %v1510_v26 = vpop.f32.mrf.mxu2  ;;  %v10221_v18 = vpack.c.b16 %v3101_v63, %v3100_v16  ;;  %v3484_v63 = vunpack.c.l.b16 %v2972_v38 }
 0x1a3   :  { %v2845_v17 = vrot.slane %v2588_v14, 1  ;;  %v1511_v35 = vadd.f32 %v1510_v26, %v1342_v21  ;;  %v1883_v2 = vpack.c.bf16 %v1819_v41, %v1819_v41  ;;  %v1177_v21 = vpop.f32.mrf.mxu0  ;;  %vm10235_vm0 = vcmp.eq.s32.totalorder %v2014_v23, 0  ;;  %v8632_v23 = vld [vmem:[#allocation2 + $0x218] sm:$0xf0] }
 0x1a4   :  { %13286 = vst [vmem:[#allocation53_spill] sm:$0xff] %v10221_v18  ;;  %v2756_v47 = vsel %vm2704_vm2, %v2651_v48, %v2652_v19  ;;  %v1344_v20 = vpop.f32.mrf.mxu1 }
 0x1a5   :  { %v1679_v53 = vpop.f32.mrf.mxu3  ;;  %v2949_v58 = vsel %vm2897_vm3, %v2844_v43, %v2845_v17  ;;  %v1345_v50 = vadd.f32 %v1344_v20, %v1176_v29  ;;  %v2781_v41 = vpack.c.bf16 %v2756_v47, %v2756_v47  ;;  %v1181_v47 = vadd.f32 %v10044_v55, %v9949_v56 }
 0x1a6   :  { %v1680_v5 = vadd.f32 %v1679_v53, %v1511_v35  ;;  %v2973_v36 = vpack.c.bf16 %v2949_v58, %v2949_v58  ;;  %v1178_v35 = vadd.f32 %v10044_v55, %v1177_v21 }
 0x1a7   :  { %1383 = vmatmul.bf16.gmra.mxu1 %v8611_v7  ;;  %1552 = vmatmul.bf16.gmra.mxu2 %v8615_v27  ;;  %v3294_v27 = vunpack.c.l.b16 %v1883_v2 }
 0x1a8   :  { %v1820_v0 = vmax.f32 %v1680_v5, 0.0  ;;  %v3485_v32 = vunpack.c.l.b16 %v2973_v36  ;;  %v1951_v5 = vadd.s32 120, %v10053_v25 }
 0x1aa   :  { %1721 = vmatmul.bf16.gmra.mxu3 %v8619_v11  ;;  %v2333_v42 = vsel %vm2141_vm15, 0.0, %v1820_v0  ;;  %v2846_v48 = vrot.slane %v1820_v0, 1  ;;  %v10228_v16 = vpack.c.b16 %v3485_v32, %v3484_v63  ;;  %v1513_v43 = vpop.f32.mrf.mxu2  ;;  %v1884_v8 = vpack.c.bf16 %v1820_v0, %v1820_v0  ;;  %v8624_v0 = vld [vmem:[#allocation2 + $0x210] sm:$0xf0]  ;;  %v8630_v63 = vld [vmem:[#allocation2 + $0x208] sm:$0xf] }
 0x1ab   :  { %v2653_v14 = vrot.slane %v2333_v42, 7  ;;  %v1514_v26 = vadd.f32 %v1513_v43, %v1345_v50  ;;  %v9487_v32 = vld [vmem:[#allocation2 + $0x214] sm:$0xf0]  ;;  %v9485_v43 = vld [vmem:[#allocation2 + $0x20c] sm:$0xf] }
 0x1ac   :  { %13287 = vst [vmem:[#allocation54_spill] sm:$0xff] %v10228_v16  ;;  %v2948_v29 = vsel %vm2897_vm3, %v2845_v17, %v2846_v48  ;;  %v1346_v7 = vpop.f32.mrf.mxu1  ;;  %v3295_v38 = vunpack.c.l.b16 %v1884_v8  ;;  %v8635_v58 = vor.u32 %v9485_v43, %v8632_v23 }
 0x1ad   :  { %v1682_v45 = vpop.f32.mrf.mxu3  ;;  %v2755_v11 = vsel %vm2704_vm2, %v2652_v19, %v2653_v14  ;;  %v3102_v19 = vunpack.c.l.b16 %v2781_v41  ;;  %v1347_v21 = vadd.f32 %v1346_v7, %v1178_v35  ;;  %v2974_v41 = vpack.c.bf16 %v2948_v29, %v2948_v29 }
 0x1ae   :  { %v1683_v53 = vadd.f32 %v1682_v45, %v1514_v26  ;;  %v2782_v20 = vpack.c.bf16 %v2755_v11, %v2755_v11  ;;  %v10240_v36 = vpack.c.b16 %v3295_v38, %v3294_v27  ;;  %v2015_v45 = vand.u32 15, %v1951_v5 }
 0x1af   :  { %v8627_v27 = vor.u32 %v9484_v54, %v8624_v0  ;;  %v1952_v5 = vadd.s32 128, %v10053_v25  ;;  %v3486_v0 = vunpack.c.l.b16 %v2974_v41 }
 0x1b0   :  { %13290 = vst [vmem:[#allocation55_spill] sm:$0xff] %v10240_v36  ;;  %v1821_v17 = vmax.f32 %v1683_v53, 0.0  ;;  %v3103_v50 = vunpack.c.l.b16 %v2782_v20  ;;  %v8631_v20 = vor.u32 %v9487_v32, %v8630_v63  ;;  %vm2143_vm1 = vcmp.eq.s32.totalorder %v2015_v45, 15 }
 0x1b2   :  { %v2590_v2 = vsel %vm10235_vm0, 0.0, %v1821_v17  ;;  %v2654_v42 = vrot.slane %v1821_v17, 7  ;;  %v1515_v26 = vpop.f32.mrf.mxu2  ;;  %v10246_v38 = vpack.c.b16 %v3103_v50, %v3102_v19  ;;  %v1885_v29 = vpack.c.bf16 %v1821_v17, %v1821_v17 }
 0x1b3   :  { %v2847_v8 = vrot.slane %v2590_v2, 1  ;;  %v1516_v11 = vadd.f32 %v1515_v26, %v1347_v21 }
 0x1b4   :  { %13291 = vst [vmem:[#allocation56_spill] sm:$0xff] %v10246_v38  ;;  %v2754_v56 = vsel %vm2704_vm2, %v2653_v14, %v2654_v42  ;;  %v1349_v18 = vpop.f32.mrf.mxu1 }
 0x1b5   :  { %v1684_v53 = vpop.f32.mrf.mxu3  ;;  %v2947_v7 = vsel %vm2897_vm3, %v2846_v48, %v2847_v8  ;;  %v1350_v36 = vadd.f32 %v1349_v18, %v1181_v47  ;;  %v2016_v48 = vand.u32 15, %v1952_v5  ;;  %v1183_v18 = vadd.f32 %v10044_v55, %v9955_v61 }
 0x1b6   :  { %v1685_v35 = vadd.f32 %v1684_v53, %v1516_v11  ;;  %v2975_v2 = vpack.c.bf16 %v2947_v7, %v2947_v7  ;;  %v2783_v53 = vpack.c.bf16 %v2754_v56, %v2754_v56  ;;  %v1953_v7 = vadd.s32 136, %v10053_v25 }
 0x1b7   :  { %1388 = vmatmul.bf16.gmra.mxu1 %v8627_v27  ;;  %1557 = vmatmul.bf16.gmra.mxu2 %v8631_v20  ;;  %v3296_v27 = vunpack.c.l.b16 %v1885_v29  ;;  %vm2400_vm4 = vcmp.eq.s32.totalorder %v2016_v48, 0  ;;  %v9489_v29 = vld [vmem:[#allocation2 + $0x22c] sm:$0xf] }
 0x1b8   :  { %v1822_v54 = vmax.f32 %v1685_v35, 0.0  ;;  %v3487_v50 = vunpack.c.l.b16 %v2975_v2  ;;  %v8640_v2 = vld [vmem:[#allocation2 + $0x230] sm:$0xf0] }
 0x1ba   :  { %1726 = vmatmul.bf16.gmra.mxu3 %v8635_v58  ;;  %v2335_v63 = vsel %vm2143_vm1, 0.0, %v1822_v54  ;;  %v2848_v14 = vrot.slane %v1822_v54, 1  ;;  %v10253_v32 = vpack.c.b16 %v3487_v50, %v3486_v0  ;;  %v1518_v21 = vpop.f32.mrf.mxu2  ;;  %v1886_v43 = vpack.c.bf16 %v1822_v54, %v1822_v54  ;;  %v9491_v54 = vld [vmem:[#allocation2 + $0x234] sm:$0xf0] }
 0x1bb   :  { %v2655_v19 = vrot.slane %v2335_v63, 7  ;;  %v1519_v47 = vadd.f32 %v1518_v21, %v1350_v36  ;;  %v9488_v36 = vld [vmem:[#allocation2 + $0x224] sm:$0xf]  ;;  %v3104_v0 = vunpack.c.l.b16 %v2783_v53  ;;  %v1186_v50 = vadd.f32 %v10044_v55, %v9961_v10  ;;  %v8648_v63 = vld [vmem:[#allocation2 + $0x238] sm:$0xf0] }
 0x1bc   :  { %13292 = vst [vmem:[#allocation57_spill] sm:$0xff] %v10253_v32  ;;  %v2946_v26 = vsel %vm2897_vm3, %v2847_v8, %v2848_v14  ;;  %v1351_v45 = vpop.f32.mrf.mxu1  ;;  %v3297_v17 = vunpack.c.l.b16 %v1886_v43  ;;  %v8646_v8 = vld [vmem:[#allocation2 + $0x228] sm:$0xf]  ;;  %v2017_v43 = vand.u32 15, %v1953_v7  ;;  %v1954_v7 = vadd.s32 144, %v10053_v25 }
 0x1bd   :  { %v1687_v23 = vpop.f32.mrf.mxu3  ;;  %v2753_v11 = vsel %vm2704_vm2, %v2654_v42, %v2655_v19  ;;  %v1352_v41 = vadd.f32 %v1351_v45, %v1183_v18  ;;  %v8643_v18 = vor.u32 %v9488_v36, %v8640_v2 }
 0x1be   :  { %v1688_v20 = vadd.f32 %v1687_v23, %v1519_v47  ;;  %v2784_v58 = vpack.c.bf16 %v2753_v11, %v2753_v11  ;;  %v10262_v35 = vpack.c.b16 %v3297_v17, %v3296_v27  ;;  %v8647_v27 = vor.u32 %v9491_v54, %v8646_v8 }
 0x1bf   :  { %v2976_v17 = vpack.c.bf16 %v2946_v26, %v2946_v26  ;;  %vm2145_vm5 = vcmp.eq.s32.totalorder %v2017_v43, 15 }
 0x1c0   :  { %13293 = vst [vmem:[#allocation58_spill] sm:$0xff] %v10262_v35  ;;  %v1823_v61 = vmax.f32 %v1688_v20, 0.0  ;;  %v3105_v5 = vunpack.c.l.b16 %v2784_v58  ;;  %v8651_v20 = vor.u32 %v9489_v29, %v8648_v63 }
 0x1c2   :  { %v2592_v42 = vsel %vm2400_vm4, 0.0, %v1823_v61  ;;  %v2656_v56 = vrot.slane %v1823_v61, 7  ;;  %v1520_v48 = vpop.f32.mrf.mxu2  ;;  %v10266_v47 = vpack.c.b16 %v3105_v5, %v3104_v0  ;;  %v1887_v26 = vpack.c.bf16 %v1823_v61, %v1823_v61 }
 0x1c3   :  { %v2849_v21 = vrot.slane %v2592_v42, 1  ;;  %v1521_v23 = vadd.f32 %v1520_v48, %v1352_v41  ;;  %v3488_v41 = vunpack.c.l.b16 %v2976_v17 }
 0x1c4   :  { %13294 = vst [vmem:[#allocation59_spill] sm:$0xff] %v10266_v47  ;;  %v2752_v11 = vsel %vm2704_vm2, %v2655_v19, %v2656_v56  ;;  %v1354_v53 = vpop.f32.mrf.mxu1 }
 0x1c5   :  { %v1689_v45 = vpop.f32.mrf.mxu3  ;;  %v2945_v10 = vsel %vm2897_vm3, %v2848_v14, %v2849_v21  ;;  %v1355_v58 = vadd.f32 %v1354_v53, %v1186_v50  ;;  %v2018_v14 = vand.u32 15, %v1954_v7  ;;  %v10278_v50 = vld [vmem:[%s13054_s2] ss:$0 sm:$0xff]  ;;  %v2785_v17 = vpack.c.bf16 %v2752_v11, %v2752_v11  ;;  %v8656_v7 = vld [vmem:[#allocation2 + $0x250] sm:$0xf0] }
 0x1c6   :  { %v1690_v55 = vadd.f32 %v1689_v45, %v1521_v23  ;;  %v2977_v42 = vpack.c.bf16 %v2945_v10, %v2945_v10  ;;  %v1188_v63 = vadd.f32 %v10278_v50, %v9967_v15  ;;  %v3298_v23 = vunpack.c.l.b16 %v1887_v26 }
 0x1c7   :  { %1393 = vmatmul.bf16.gmra.mxu1 %v8643_v18  ;;  %1562 = vmatmul.bf16.gmra.mxu2 %v8647_v27  ;;  %vm2402_vm6 = vcmp.eq.s32.totalorder %v2018_v14, 0  ;;  %v1191_v26 = vadd.f32 %v10278_v50, %v9973_v28 }
 0x1c8   :  { %v1824_v36 = vmax.f32 %v1690_v55, 0.0  ;;  %v3489_v2 = vunpack.c.l.b16 %v2977_v42  ;;  %v1955_v55 = vadd.s32 152, %v10053_v25 }
 0x1ca   :  { %1731 = vmatmul.bf16.gmra.mxu3 %v8651_v20  ;;  %v2337_v5 = vsel %vm2145_vm5, 0.0, %v1824_v36  ;;  %v2850_v19 = vrot.slane %v1824_v36, 1  ;;  %v10273_v8 = vpack.c.b16 %v3489_v2, %v3488_v41  ;;  %v1523_v0 = vpop.f32.mrf.mxu2  ;;  %v1888_v29 = vpack.c.bf16 %v1824_v36, %v1824_v36  ;;  %v9495_v41 = vld [vmem:[#allocation2 + $0x254] sm:$0xf0] }
 0x1cb   :  { %v2657_v54 = vrot.slane %v2337_v5, 7  ;;  %v1524_v48 = vadd.f32 %v1523_v0, %v1355_v58  ;;  %v9492_v58 = vld [vmem:[#allocation2 + $0x244] sm:$0xf]  ;;  %v3106_v2 = vunpack.c.l.b16 %v2785_v17  ;;  %v9493_v5 = vld [vmem:[#allocation2 + $0x24c] sm:$0xf] }
 0x1cc   :  { %13295 = vst [vmem:[#allocation60_spill] sm:$0xff] %v10273_v8  ;;  %v2944_v61 = vsel %vm2897_vm3, %v2849_v21, %v2850_v19  ;;  %v1356_v18 = vpop.f32.mrf.mxu1  ;;  %v3299_v45 = vunpack.c.l.b16 %v1888_v29  ;;  %v8662_v21 = vld [vmem:[#allocation2 + $0x248] sm:$0xf]  ;;  %v8664_v0 = vld [vmem:[#allocation2 + $0x258] sm:$0xf0] }
 0x1cd   :  { %v1692_v43 = vpop.f32.mrf.mxu3  ;;  %v2751_v27 = vsel %vm2704_vm2, %v2656_v56, %v2657_v54  ;;  %v1357_v20 = vadd.f32 %v1356_v18, %v1188_v63  ;;  %v2019_v63 = vand.u32 15, %v1955_v55  ;;  %v1956_v55 = vadd.s32 160, %v10053_v25 }
 0x1ce   :  { %v1693_v53 = vadd.f32 %v1692_v43, %v1524_v48  ;;  %v2786_v10 = vpack.c.bf16 %v2751_v27, %v2751_v27  ;;  %v10287_v42 = vpack.c.b16 %v3299_v45, %v3298_v23  ;;  %v8659_v48 = vor.u32 %v9492_v58, %v8656_v7 }
 0x1cf   :  { %v8663_v45 = vor.u32 %v9495_v41, %v8662_v21  ;;  %v2978_v27 = vpack.c.bf16 %v2944_v61, %v2944_v61  ;;  %vm2147_vm7 = vcmp.eq.s32.totalorder %v2019_v63, 15 }
 0x1d0   :  { %13296 = vst [vmem:[#allocation61_spill] sm:$0xff] %v10287_v42  ;;  %v1825_v15 = vmax.f32 %v1693_v53, 0.0  ;;  %v3107_v36 = vunpack.c.l.b16 %v2786_v10  ;;  %v8667_v10 = vor.u32 %v9493_v5, %v8664_v0 }
 0x1d2   :  { %v2594_v56 = vsel %vm2402_vm6, 0.0, %v1825_v15  ;;  %v2658_v11 = vrot.slane %v1825_v15, 7  ;;  %v1525_v14 = vpop.f32.mrf.mxu2  ;;  %v10291_v43 = vpack.c.b16 %v3107_v36, %v3106_v2  ;;  %v1889_v61 = vpack.c.bf16 %v1825_v15, %v1825_v15 }
 0x1d3   :  { %v2851_v29 = vrot.slane %v2594_v56, 1  ;;  %v1526_v18 = vadd.f32 %v1525_v14, %v1357_v20  ;;  %v3490_v20 = vunpack.c.l.b16 %v2978_v27 }
 0x1d4   :  { %13297 = vst [vmem:[#allocation62_spill] sm:$0xff] %v10291_v43  ;;  %v2750_v17 = vsel %vm2704_vm2, %v2657_v54, %v2658_v11  ;;  %v1359_v53 = vpop.f32.mrf.mxu1 }
 0x1d5   :  { %v1694_v23 = vpop.f32.mrf.mxu3  ;;  %v2943_v28 = vsel %vm2897_vm3, %v2850_v19, %v2851_v29  ;;  %v1360_v38 = vadd.f32 %v1359_v53, %v1191_v26  ;;  %v2020_v19 = vand.u32 15, %v1956_v55  ;;  %v1193_v26 = vadd.f32 %v10278_v50, %v9979_v33 }
 0x1d6   :  { %v1695_v47 = vadd.f32 %v1694_v23, %v1526_v18  ;;  %v2979_v56 = vpack.c.bf16 %v2943_v28, %v2943_v28  ;;  %v2787_v23 = vpack.c.bf16 %v2750_v17, %v2750_v17 }
 0x1d7   :  { %1398 = vmatmul.bf16.gmra.mxu1 %v8659_v48  ;;  %1567 = vmatmul.bf16.gmra.mxu2 %v8663_v45  ;;  %v3300_v48 = vunpack.c.l.b16 %v1889_v61  ;;  %vm2404_vm8 = vcmp.eq.s32.totalorder %v2020_v19, 0  ;;  %v9497_v61 = vld [vmem:[#allocation2 + $0x26c] sm:$0xf] }
 0x1d8   :  { %v1826_v58 = vmax.f32 %v1695_v47, 0.0  ;;  %v3491_v7 = vunpack.c.l.b16 %v2979_v56  ;;  %v8672_v56 = vld [vmem:[#allocation2 + $0x270] sm:$0xf0] }
 0x1da   :  { %1736 = vmatmul.bf16.gmra.mxu3 %v8667_v10  ;;  %v2339_v36 = vsel %vm2147_vm7, 0.0, %v1826_v58  ;;  %v2852_v54 = vrot.slane %v1826_v58, 1  ;;  %v10298_v21 = vpack.c.b16 %v3491_v7, %v3490_v20  ;;  %v1528_v2 = vpop.f32.mrf.mxu2  ;;  %v1890_v5 = vpack.c.bf16 %v1826_v58, %v1826_v58  ;;  %v9499_v58 = vld [vmem:[#allocation2 + $0x274] sm:$0xf0] }
 0x1db   :  { %v2659_v41 = vrot.slane %v2339_v36, 7  ;;  %v1529_v0 = vadd.f32 %v1528_v2, %v1360_v38  ;;  %v1957_v10 = vadd.s32 168, %v10053_v25  ;;  %v9496_v38 = vld [vmem:[#allocation2 + $0x264] sm:$0xf]  ;;  %v3108_v20 = vunpack.c.l.b16 %v2787_v23  ;;  %v8680_v36 = vld [vmem:[#allocation2 + $0x278] sm:$0xf0] }
 0x1dc   :  { %13298 = vst [vmem:[#allocation63_spill] sm:$0xff] %v10298_v21  ;;  %v2942_v47 = vsel %vm2897_vm3, %v2851_v29, %v2852_v54  ;;  %v1361_v63 = vpop.f32.mrf.mxu1  ;;  %v3301_v15 = vunpack.c.l.b16 %v1890_v5  ;;  %v8678_v29 = vld [vmem:[#allocation2 + $0x268] sm:$0xf]  ;;  %v1196_v7 = vadd.f32 %v10278_v50, %v9985_v46 }
 0x1dd   :  { %v1697_v14 = vpop.f32.mrf.mxu3  ;;  %v2749_v18 = vsel %vm2704_vm2, %v2658_v11, %v2659_v41  ;;  %v1362_v27 = vadd.f32 %v1361_v63, %v1193_v26  ;;  %v2021_v5 = vand.u32 15, %v1957_v10  ;;  %v8675_v26 = vor.u32 %v9496_v38, %v8672_v56 }
 0x1de   :  { %v1698_v45 = vadd.f32 %v1697_v14, %v1529_v0  ;;  %v2788_v53 = vpack.c.bf16 %v2749_v18, %v2749_v18  ;;  %v10307_v28 = vpack.c.b16 %v3301_v15, %v3300_v48  ;;  %v8679_v48 = vor.u32 %v9499_v58, %v8678_v29 }
 0x1df   :  { %v2980_v15 = vpack.c.bf16 %v2942_v47, %v2942_v47  ;;  %vm2149_vm9 = vcmp.eq.s32.totalorder %v2021_v5, 15  ;;  %v1958_v10 = vadd.s32 176, %v10053_v25 }
 0x1e0   :  { %13299 = vst [vmem:[#allocation64_spill] sm:$0xff] %v10307_v28  ;;  %v1827_v33 = vmax.f32 %v1698_v45, 0.0  ;;  %v3109_v55 = vunpack.c.l.b16 %v2788_v53  ;;  %v8683_v45 = vor.u32 %v9497_v61, %v8680_v36 }
 0x1e2   :  { %v2596_v11 = vsel %vm2404_vm8, 0.0, %v1827_v33  ;;  %v2660_v17 = vrot.slane %v1827_v33, 7  ;;  %v1530_v19 = vpop.f32.mrf.mxu2  ;;  %v10311_v0 = vpack.c.b16 %v3109_v55, %v3108_v20  ;;  %v1891_v47 = vpack.c.bf16 %v1827_v33, %v1827_v33 }
 0x1e3   :  { %v2853_v2 = vrot.slane %v2596_v11, 1  ;;  %v1531_v14 = vadd.f32 %v1530_v19, %v1362_v27  ;;  %v3492_v27 = vunpack.c.l.b16 %v2980_v15 }
 0x1e4   :  { %13300 = vst [vmem:[#allocation65_spill] sm:$0xff] %v10311_v0  ;;  %v2748_v18 = vsel %vm2704_vm2, %v2659_v41, %v2660_v17  ;;  %v1364_v23 = vpop.f32.mrf.mxu1 }
 0x1e5   :  { %v1699_v63 = vpop.f32.mrf.mxu3  ;;  %v2941_v46 = vsel %vm2897_vm3, %v2852_v54, %v2853_v2  ;;  %v1365_v43 = vadd.f32 %v1364_v23, %v1196_v7  ;;  %v2022_v54 = vand.u32 15, %v1958_v10  ;;  %v1198_v7 = vadd.f32 %v10278_v50, %v9991_v51 }
 0x1e6   :  { %v1700_v53 = vadd.f32 %v1699_v63, %v1531_v14  ;;  %v2981_v11 = vpack.c.bf16 %v2941_v46, %v2941_v46  ;;  %v3302_v14 = vunpack.c.l.b16 %v1891_v47  ;;  %v1959_v46 = vadd.s32 184, %v10053_v25  ;;  %v9501_v47 = vld [vmem:[#allocation2 + $0x28c] sm:$0xf] }
 0x1e7   :  { %1403 = vmatmul.bf16.gmra.mxu1 %v8675_v26  ;;  %1572 = vmatmul.bf16.gmra.mxu2 %v8679_v48  ;;  %v2789_v48 = vpack.c.bf16 %v2748_v18, %v2748_v18  ;;  %vm2406_vm10 = vcmp.eq.s32.totalorder %v2022_v54, 0 }
 0x1e8   :  { %v1828_v38 = vmax.f32 %v1700_v53, 0.0  ;;  %v3493_v56 = vunpack.c.l.b16 %v2981_v11  ;;  %v8688_v11 = vld [vmem:[#allocation2 + $0x290] sm:$0xf0] }
 0x1ea   :  { %1741 = vmatmul.bf16.gmra.mxu3 %v8683_v45  ;;  %v2341_v55 = vsel %vm2149_vm9, 0.0, %v1828_v38  ;;  %v2854_v41 = vrot.slane %v1828_v38, 1  ;;  %v10318_v29 = vpack.c.b16 %v3493_v56, %v3492_v27  ;;  %v1533_v20 = vpop.f32.mrf.mxu2  ;;  %v1892_v61 = vpack.c.bf16 %v1828_v38, %v1828_v38  ;;  %v9503_v38 = vld [vmem:[#allocation2 + $0x294] sm:$0xf0] }
 0x1eb   :  { %v2661_v58 = vrot.slane %v2341_v55, 7  ;;  %v1534_v36 = vadd.f32 %v1533_v20, %v1365_v43  ;;  %v9500_v43 = vld [vmem:[#allocation2 + $0x284] sm:$0xf]  ;;  %v3110_v27 = vunpack.c.l.b16 %v2789_v48  ;;  %v1201_v56 = vadd.f32 %v10278_v50, %v9997_v6  ;;  %v8696_v55 = vld [vmem:[#allocation2 + $0x298] sm:$0xf0] }
 0x1ec   :  { %13301 = vst [vmem:[#allocation66_spill] sm:$0xff] %v10318_v29  ;;  %v2940_v5 = vsel %vm2897_vm3, %v2853_v2, %v2854_v41  ;;  %v1366_v26 = vpop.f32.mrf.mxu1  ;;  %v3303_v33 = vunpack.c.l.b16 %v1892_v61  ;;  %v8694_v2 = vld [vmem:[#allocation2 + $0x288] sm:$0xf]  ;;  %v2023_v61 = vand.u32 15, %v1959_v46  ;;  %v1960_v46 = vadd.s32 192, %v10053_v25 }
 0x1ed   :  { %v1702_v19 = vpop.f32.mrf.mxu3  ;;  %v2747_v63 = vsel %vm2704_vm2, %v2660_v17, %v2661_v58  ;;  %v1367_v23 = vadd.f32 %v1366_v26, %v1198_v7  ;;  %v8691_v7 = vor.u32 %v9500_v43, %v8688_v11 }
 0x1ee   :  { %v1703_v15 = vadd.f32 %v1702_v19, %v1534_v36  ;;  %v2790_v45 = vpack.c.bf16 %v2747_v63, %v2747_v63  ;;  %v10327_v53 = vpack.c.b16 %v3303_v33, %v3302_v14  ;;  %v8695_v14 = vor.u32 %v9503_v38, %v8694_v2 }
 0x1ef   :  { %v2982_v33 = vpack.c.bf16 %v2940_v5, %v2940_v5  ;;  %vm2151_vm11 = vcmp.eq.s32.totalorder %v2023_v61, 15 }
 0x1f0   :  { %13302 = vst [vmem:[#allocation67_spill] sm:$0xff] %v10327_v53  ;;  %v1829_v51 = vmax.f32 %v1703_v15, 0.0  ;;  %v3111_v10 = vunpack.c.l.b16 %v2790_v45  ;;  %v8699_v15 = vor.u32 %v9501_v47, %v8696_v55 }
 0x1f2   :  { %v2598_v17 = vsel %vm2406_vm10, 0.0, %v1829_v51  ;;  %v2662_v18 = vrot.slane %v1829_v51, 7  ;;  %v1535_v54 = vpop.f32.mrf.mxu2  ;;  %v10331_v36 = vpack.c.b16 %v3111_v10, %v3110_v27  ;;  %v1893_v5 = vpack.c.bf16 %v1829_v51, %v1829_v51 }
 0x1f3   :  { %v2855_v20 = vrot.slane %v2598_v17, 1  ;;  %v1536_v19 = vadd.f32 %v1535_v54, %v1367_v23  ;;  %v3494_v23 = vunpack.c.l.b16 %v2982_v33 }
 0x1f4   :  { %13303 = vst [vmem:[#allocation68_spill] sm:$0xff] %v10331_v36  ;;  %v2746_v63 = vsel %vm2704_vm2, %v2661_v58, %v2662_v18  ;;  %v1369_v48 = vpop.f32.mrf.mxu1 }
 0x1f5   :  { %v1704_v26 = vpop.f32.mrf.mxu3  ;;  %v2939_v6 = vsel %vm2897_vm3, %v2854_v41, %v2855_v20  ;;  %v1370_v0 = vadd.f32 %v1369_v48, %v1201_v56  ;;  %v2024_v41 = vand.u32 15, %v1960_v46  ;;  %v1203_v56 = vadd.f32 %v10278_v50, %v10003_v12 }
 0x1f6   :  { %v1705_v45 = vadd.f32 %v1704_v26, %v1536_v19  ;;  %v2983_v17 = vpack.c.bf16 %v2939_v6, %v2939_v6  ;;  %v3304_v19 = vunpack.c.l.b16 %v1893_v5  ;;  %v1961_v6 = vadd.s32 200, %v10053_v25  ;;  %v9505_v5 = vld [vmem:[#allocation2 + $0x2ac] sm:$0xf] }
 0x1f7   :  { %1408 = vmatmul.bf16.gmra.mxu1 %v8691_v7  ;;  %1577 = vmatmul.bf16.gmra.mxu2 %v8695_v14  ;;  %v2791_v14 = vpack.c.bf16 %v2746_v63, %v2746_v63  ;;  %vm2408_vm12 = vcmp.eq.s32.totalorder %v2024_v41, 0 }
 0x1f8   :  { %v1830_v43 = vmax.f32 %v1705_v45, 0.0  ;;  %v3495_v11 = vunpack.c.l.b16 %v2983_v17  ;;  %v8704_v17 = vld [vmem:[#allocation2 + $0x2b0] sm:$0xf0] }
 0x1fa   :  { %1746 = vmatmul.bf16.gmra.mxu3 %v8699_v15  ;;  %v2343_v10 = vsel %vm2151_vm11, 0.0, %v1830_v43  ;;  %v2856_v58 = vrot.slane %v1830_v43, 1  ;;  %v10338_v2 = vpack.c.b16 %v3495_v11, %v3494_v23  ;;  %v1538_v27 = vpop.f32.mrf.mxu2  ;;  %v1894_v47 = vpack.c.bf16 %v1830_v43, %v1830_v43  ;;  %v9507_v43 = vld [vmem:[#allocation2 + $0x2b4] sm:$0xf0] }
 0x1fb   :  { %v2663_v38 = vrot.slane %v2343_v10, 7  ;;  %v1539_v55 = vadd.f32 %v1538_v27, %v1370_v0  ;;  %v9504_v0 = vld [vmem:[#allocation2 + $0x2a4] sm:$0xf]  ;;  %v3112_v23 = vunpack.c.l.b16 %v2791_v14  ;;  %v1206_v11 = vadd.f32 %v10278_v50, %v10009_v34  ;;  %v8712_v10 = vld [vmem:[#allocation2 + $0x2b8] sm:$0xf0] }
 0x1fc   :  { %13304 = vst [vmem:[#allocation69_spill] sm:$0xff] %v10338_v2  ;;  %v2938_v61 = vsel %vm2897_vm3, %v2855_v20, %v2856_v58  ;;  %v1371_v7 = vpop.f32.mrf.mxu1  ;;  %v3305_v51 = vunpack.c.l.b16 %v1894_v47  ;;  %v8710_v20 = vld [vmem:[#allocation2 + $0x2a8] sm:$0xf]  ;;  %v2025_v47 = vand.u32 15, %v1961_v6  ;;  %v1962_v6 = vadd.s32 208, %v10053_v25 }
 0x1fd   :  { %v1707_v54 = vpop.f32.mrf.mxu3  ;;  %v2745_v26 = vsel %vm2704_vm2, %v2662_v18, %v2663_v38  ;;  %v1372_v48 = vadd.f32 %v1371_v7, %v1203_v56  ;;  %v8707_v56 = vor.u32 %v9504_v0, %v8704_v17 }
 0x1fe   :  { %v1708_v33 = vadd.f32 %v1707_v54, %v1539_v55  ;;  %v2792_v15 = vpack.c.bf16 %v2745_v26, %v2745_v26  ;;  %v10347_v45 = vpack.c.b16 %v3305_v51, %v3304_v19  ;;  %v8711_v19 = vor.u32 %v9507_v43, %v8710_v20 }
 0x1ff   :  { %v2984_v51 = vpack.c.bf16 %v2938_v61, %v2938_v61  ;;  %vm2153_vm13 = vcmp.eq.s32.totalorder %v2025_v47, 15 }
 0x200   :  { %13305 = vst [vmem:[#allocation70_spill] sm:$0xff] %v10347_v45  ;;  %v1831_v12 = vmax.f32 %v1708_v33, 0.0  ;;  %v3113_v46 = vunpack.c.l.b16 %v2792_v15  ;;  %v8715_v33 = vor.u32 %v9505_v5, %v8712_v10 }
 0x202   :  { %v2600_v18 = vsel %vm2408_vm12, 0.0, %v1831_v12  ;;  %v2664_v63 = vrot.slane %v1831_v12, 7  ;;  %v1540_v41 = vpop.f32.mrf.mxu2  ;;  %v10351_v55 = vpack.c.b16 %v3113_v46, %v3112_v23  ;;  %v1895_v61 = vpack.c.bf16 %v1831_v12, %v1831_v12 }
 0x203   :  { %v2857_v27 = vrot.slane %v2600_v18, 1  ;;  %v1541_v54 = vadd.f32 %v1540_v41, %v1372_v48  ;;  %v3496_v48 = vunpack.c.l.b16 %v2984_v51 }
 0x204   :  { %13306 = vst [vmem:[#allocation71_spill] sm:$0xff] %v10351_v55  ;;  %v2744_v26 = vsel %vm2704_vm2, %v2663_v38, %v2664_v63  ;;  %v1374_v14 = vpop.f32.mrf.mxu1 }
 0x205   :  { %v1709_v7 = vpop.f32.mrf.mxu3  ;;  %v2937_v34 = vsel %vm2897_vm3, %v2856_v58, %v2857_v27  ;;  %v1375_v36 = vadd.f32 %v1374_v14, %v1206_v11  ;;  %v2026_v58 = vand.u32 15, %v1962_v6  ;;  %v1208_v11 = vadd.f32 %v10278_v50, %v10015_v39 }
 0x206   :  { %v1710_v15 = vadd.f32 %v1709_v7, %v1541_v54  ;;  %v2985_v18 = vpack.c.bf16 %v2937_v34, %v2937_v34  ;;  %v3306_v54 = vunpack.c.l.b16 %v1895_v61  ;;  %v1963_v34 = vadd.s32 216, %v10053_v25  ;;  %v9509_v61 = vld [vmem:[#allocation2 + $0x2cc] sm:$0xf] }
 0x207   :  { %1413 = vmatmul.bf16.gmra.mxu1 %v8707_v56  ;;  %1582 = vmatmul.bf16.gmra.mxu2 %v8711_v19  ;;  %v2793_v19 = vpack.c.bf16 %v2744_v26, %v2744_v26  ;;  %vm2410_vm14 = vcmp.eq.s32.totalorder %v2026_v58, 0 }
 0x208   :  { %v1832_v0 = vmax.f32 %v1710_v15, 0.0  ;;  %v3497_v17 = vunpack.c.l.b16 %v2985_v18  ;;  %v8720_v18 = vld [vmem:[#allocation2 + $0x2d0] sm:$0xf0] }
 0x20a   :  { %1751 = vmatmul.bf16.gmra.mxu3 %v8715_v33  ;;  %v2345_v46 = vsel %vm2153_vm13, 0.0, %v1832_v0  ;;  %v2858_v38 = vrot.slane %v1832_v0, 1  ;;  %v10358_v20 = vpack.c.b16 %v3497_v17, %v3496_v48  ;;  %v1543_v23 = vpop.f32.mrf.mxu2  ;;  %v1896_v5 = vpack.c.bf16 %v1832_v0, %v1832_v0  ;;  %v9511_v0 = vld [vmem:[#allocation2 + $0x2d4] sm:$0xf0] }
 0x20b   :  { %v2665_v43 = vrot.slane %v2345_v46, 7  ;;  %v1544_v10 = vadd.f32 %v1543_v23, %v1375_v36  ;;  %v9508_v36 = vld [vmem:[#allocation2 + $0x2c4] sm:$0xf]  ;;  %v3114_v48 = vunpack.c.l.b16 %v2793_v19  ;;  %v1211_v17 = vadd.f32 %v10278_v50, %v10021_v57  ;;  %v8728_v46 = vld [vmem:[#allocation2 + $0x2d8] sm:$0xf0] }
 0x20c   :  { %13307 = vst [vmem:[#allocation72_spill] sm:$0xff] %v10358_v20  ;;  %v2936_v47 = vsel %vm2897_vm3, %v2857_v27, %v2858_v38  ;;  %v1376_v56 = vpop.f32.mrf.mxu1  ;;  %v3307_v12 = vunpack.c.l.b16 %v1896_v5  ;;  %v8726_v27 = vld [vmem:[#allocation2 + $0x2c8] sm:$0xf]  ;;  %v2027_v5 = vand.u32 15, %v1963_v34  ;;  %v1964_v34 = vadd.s32 224, %v10053_v25 }
 0x20d   :  { %v1712_v41 = vpop.f32.mrf.mxu3  ;;  %v2743_v7 = vsel %vm2704_vm2, %v2664_v63, %v2665_v43  ;;  %v1377_v14 = vadd.f32 %v1376_v56, %v1208_v11  ;;  %v8723_v11 = vor.u32 %v9508_v36, %v8720_v18 }
 0x20e   :  { %v1713_v51 = vadd.f32 %v1712_v41, %v1544_v10  ;;  %v2794_v33 = vpack.c.bf16 %v2743_v7, %v2743_v7  ;;  %v10367_v15 = vpack.c.b16 %v3307_v12, %v3306_v54  ;;  %v8727_v54 = vor.u32 %v9511_v0, %v8726_v27 }
 0x20f   :  { %v2986_v12 = vpack.c.bf16 %v2936_v47, %v2936_v47  ;;  %vm2155_vm15 = vcmp.eq.s32.totalorder %v2027_v5, 15 }
 0x210   :  { %13308 = vst [vmem:[#allocation73_spill] sm:$0xff] %v10367_v15  ;;  %v1833_v39 = vmax.f32 %v1713_v51, 0.0  ;;  %v3115_v6 = vunpack.c.l.b16 %v2794_v33  ;;  %v8731_v51 = vor.u32 %v9509_v61, %v8728_v46 }
 0x212   :  { %v2602_v63 = vsel %vm2410_vm14, 0.0, %v1833_v39  ;;  %v2666_v26 = vrot.slane %v1833_v39, 7  ;;  %v1545_v58 = vpop.f32.mrf.mxu2  ;;  %v10371_v10 = vpack.c.b16 %v3115_v6, %v3114_v48  ;;  %v1897_v47 = vpack.c.bf16 %v1833_v39, %v1833_v39 }
 0x213   :  { %v2859_v23 = vrot.slane %v2602_v63, 1  ;;  %v1546_v41 = vadd.f32 %v1545_v58, %v1377_v14  ;;  %v3498_v14 = vunpack.c.l.b16 %v2986_v12 }
 0x214   :  { %13309 = vst [vmem:[#allocation74_spill] sm:$0xff] %v10371_v10  ;;  %v2742_v7 = vsel %vm2704_vm2, %v2665_v43, %v2666_v26  ;;  %v1379_v19 = vpop.f32.mrf.mxu1 }
 0x215   :  { %v1714_v56 = vpop.f32.mrf.mxu3  ;;  %v2935_v57 = vsel %vm2897_vm3, %v2858_v38, %v2859_v23  ;;  %v1380_v55 = vadd.f32 %v1379_v19, %v1211_v17  ;;  %v2028_v38 = vand.u32 15, %v1964_v34  ;;  %v1213_v17 = vadd.f32 %v10278_v50, %v10027_v3 }
 0x216   :  { %v1715_v33 = vadd.f32 %v1714_v56, %v1546_v41  ;;  %v2987_v63 = vpack.c.bf16 %v2935_v57, %v2935_v57  ;;  %v3308_v41 = vunpack.c.l.b16 %v1897_v47  ;;  %v1965_v57 = vadd.s32 232, %v10053_v25  ;;  %v9513_v47 = vld [vmem:[#allocation2 + $0x2ec] sm:$0xf] }
 0x217   :  { %1418 = vmatmul.bf16.gmra.mxu1 %v8723_v11  ;;  %1587 = vmatmul.bf16.gmra.mxu2 %v8727_v54  ;;  %v2795_v54 = vpack.c.bf16 %v2742_v7, %v2742_v7  ;;  %vm2412_vm0 = vcmp.eq.s32.totalorder %v2028_v38, 0 }
 0x218   :  { %v1834_v36 = vmax.f32 %v1715_v33, 0.0  ;;  %v3499_v18 = vunpack.c.l.b16 %v2987_v63  ;;  %v8736_v63 = vld [vmem:[#allocation2 + $0x2f0] sm:$0xf0] }
 0x21a   :  { %1756 = vmatmul.bf16.gmra.mxu3 %v8731_v51  ;;  %v2347_v6 = vsel %vm2155_vm15, 0.0, %v1834_v36  ;;  %v2860_v43 = vrot.slane %v1834_v36, 1  ;;  %v10378_v27 = vpack.c.b16 %v3499_v18, %v3498_v14  ;;  %v1548_v48 = vpop.f32.mrf.mxu2  ;;  %v1898_v61 = vpack.c.bf16 %v1834_v36, %v1834_v36  ;;  %v9515_v36 = vld [vmem:[#allocation2 + $0x2f4] sm:$0xf0] }
 0x21b   :  { %v2667_v0 = vrot.slane %v2347_v6, 7  ;;  %v1549_v46 = vadd.f32 %v1548_v48, %v1380_v55  ;;  %v9512_v55 = vld [vmem:[#allocation2 + $0x2e4] sm:$0xf]  ;;  %v3116_v14 = vunpack.c.l.b16 %v2795_v54  ;;  %v1216_v18 = vadd.f32 %v10278_v50, %v10033_v30  ;;  %v8744_v6 = vld [vmem:[#allocation2 + $0x2f8] sm:$0xf0] }
 0x21c   :  { %13310 = vst [vmem:[#allocation75_spill] sm:$0xff] %v10378_v27  ;;  %v2934_v5 = vsel %vm2897_vm3, %v2859_v23, %v2860_v43  ;;  %v1381_v11 = vpop.f32.mrf.mxu1  ;;  %v3309_v39 = vunpack.c.l.b16 %v1898_v61  ;;  %v8742_v23 = vld [vmem:[#allocation2 + $0x2e8] sm:$0xf]  ;;  %v2029_v61 = vand.u32 15, %v1965_v57  ;;  %v1966_v57 = vadd.s32 240, %v10053_v25 }
 0x21d   :  { %v1717_v58 = vpop.f32.mrf.mxu3  ;;  %v2741_v56 = vsel %vm2704_vm2, %v2666_v26, %v2667_v0  ;;  %v1382_v19 = vadd.f32 %v1381_v11, %v1213_v17  ;;  %v8739_v17 = vor.u32 %v9512_v55, %v8736_v63 }
 0x21e   :  { %v1718_v12 = vadd.f32 %v1717_v58, %v1549_v46  ;;  %v2796_v51 = vpack.c.bf16 %v2741_v56, %v2741_v56  ;;  %v10387_v33 = vpack.c.b16 %v3309_v39, %v3308_v41  ;;  %v8743_v41 = vor.u32 %v9515_v36, %v8742_v23 }
 0x21f   :  { %v2988_v39 = vpack.c.bf16 %v2934_v5, %v2934_v5  ;;  %vm2157_vm1 = vcmp.eq.s32.totalorder %v2029_v61, 15 }
 0x220   :  { %13311 = vst [vmem:[#allocation76_spill] sm:$0xff] %v10387_v33  ;;  %v1835_v3 = vmax.f32 %v1718_v12, 0.0  ;;  %v3117_v34 = vunpack.c.l.b16 %v2796_v51  ;;  %v8747_v12 = vor.u32 %v9513_v47, %v8744_v6 }
 0x222   :  { %v2604_v26 = vsel %vm2412_vm0, 0.0, %v1835_v3  ;;  %v2668_v7 = vrot.slane %v1835_v3, 7  ;;  %v1550_v38 = vpop.f32.mrf.mxu2  ;;  %v10391_v46 = vpack.c.b16 %v3117_v34, %v3116_v14  ;;  %v1899_v5 = vpack.c.bf16 %v1835_v3, %v1835_v3 }
 0x223   :  { %v2861_v48 = vrot.slane %v2604_v26, 1  ;;  %v1551_v58 = vadd.f32 %v1550_v38, %v1382_v19  ;;  %v3500_v19 = vunpack.c.l.b16 %v2988_v39 }
 0x224   :  { %13312 = vst [vmem:[#allocation77_spill] sm:$0xff] %v10391_v46  ;;  %v2740_v56 = vsel %vm2704_vm2, %v2667_v0, %v2668_v7  ;;  %v1384_v54 = vpop.f32.mrf.mxu1 }
 0x225   :  { %v1719_v11 = vpop.f32.mrf.mxu3  ;;  %v2933_v30 = vsel %vm2897_vm3, %v2860_v43, %v2861_v48  ;;  %v1385_v10 = vadd.f32 %v1384_v54, %v1216_v18  ;;  %v2030_v43 = vand.u32 15, %v1966_v57  ;;  %v1218_v18 = vadd.f32 %v10278_v50, %v10039_v44 }
 0x226   :  { %v1720_v51 = vadd.f32 %v1719_v11, %v1551_v58  ;;  %v2989_v26 = vpack.c.bf16 %v2933_v30, %v2933_v30  ;;  %v3310_v58 = vunpack.c.l.b16 %v1899_v5  ;;  %v1967_v30 = vadd.s32 248, %v10053_v25  ;;  %v9517_v5 = vld [vmem:[#allocation2 + $0x30c] sm:$0xf] }
 0x227   :  { %1423 = vmatmul.bf16.gmra.mxu1 %v8739_v17  ;;  %1592 = vmatmul.bf16.gmra.mxu2 %v8743_v41  ;;  %v2797_v41 = vpack.c.bf16 %v2740_v56, %v2740_v56  ;;  %vm2414_vm4 = vcmp.eq.s32.totalorder %v2030_v43, 0 }
 0x228   :  { %v1836_v55 = vmax.f32 %v1720_v51, 0.0  ;;  %v3501_v63 = vunpack.c.l.b16 %v2989_v26  ;;  %v8752_v26 = vld [vmem:[#allocation2 + $0x310] sm:$0xf0] }
 0x22a   :  { %1761 = vmatmul.bf16.gmra.mxu3 %v8747_v12  ;;  %v2349_v34 = vsel %vm2157_vm1, 0.0, %v1836_v55  ;;  %v2862_v0 = vrot.slane %v1836_v55, 1  ;;  %v10398_v23 = vpack.c.b16 %v3501_v63, %v3500_v19  ;;  %v1553_v14 = vpop.f32.mrf.mxu2  ;;  %v1900_v47 = vpack.c.bf16 %v1836_v55, %v1836_v55  ;;  %v9519_v55 = vld [vmem:[#allocation2 + $0x314] sm:$0xf0] }
 0x22b   :  { %v2669_v36 = vrot.slane %v2349_v34, 7  ;;  %v1554_v6 = vadd.f32 %v1553_v14, %v1385_v10  ;;  %v9516_v10 = vld [vmem:[#allocation2 + $0x304] sm:$0xf]  ;;  %v3118_v19 = vunpack.c.l.b16 %v2797_v41  ;;  %v1221_v63 = vadd.f32 %v10278_v50, %v9951_v59  ;;  %v8760_v34 = vld [vmem:[#allocation2 + $0x318] sm:$0xf0] }
 0x22c   :  { %13313 = vst [vmem:[#allocation78_spill] sm:$0xff] %v10398_v23  ;;  %v2932_v61 = vsel %vm2897_vm3, %v2861_v48, %v2862_v0  ;;  %v1386_v17 = vpop.f32.mrf.mxu1  ;;  %v3311_v3 = vunpack.c.l.b16 %v1900_v47  ;;  %v8758_v48 = vld [vmem:[#allocation2 + $0x308] sm:$0xf]  ;;  %v2031_v47 = vand.u32 15, %v1967_v30  ;;  %v1968_v30 = vadd.s32 256, %v10053_v25 }
 0x22d   :  { %v1722_v38 = vpop.f32.mrf.mxu3  ;;  %v2739_v11 = vsel %vm2704_vm2, %v2668_v7, %v2669_v36  ;;  %v1387_v54 = vadd.f32 %v1386_v17, %v1218_v18  ;;  %v8755_v18 = vor.u32 %v9516_v10, %v8752_v26 }
 0x22e   :  { %v1723_v39 = vadd.f32 %v1722_v38, %v1554_v6  ;;  %v2798_v12 = vpack.c.bf16 %v2739_v11, %v2739_v11  ;;  %v10407_v51 = vpack.c.b16 %v3311_v3, %v3310_v58  ;;  %v8759_v58 = vor.u32 %v9519_v55, %v8758_v48 }
 0x22f   :  { %v2990_v3 = vpack.c.bf16 %v2932_v61, %v2932_v61  ;;  %vm2159_vm5 = vcmp.eq.s32.totalorder %v2031_v47, 15 }
 0x230   :  { %13314 = vst [vmem:[#allocation79_spill] sm:$0xff] %v10407_v51  ;;  %v1837_v44 = vmax.f32 %v1723_v39, 0.0  ;;  %v3119_v57 = vunpack.c.l.b16 %v2798_v12  ;;  %v8763_v39 = vor.u32 %v9517_v5, %v8760_v34 }
 0x232   :  { %v2606_v7 = vsel %vm2414_vm4, 0.0, %v1837_v44  ;;  %v2670_v56 = vrot.slane %v1837_v44, 7  ;;  %v1555_v43 = vpop.f32.mrf.mxu2  ;;  %v10411_v6 = vpack.c.b16 %v3119_v57, %v3118_v19  ;;  %v1901_v61 = vpack.c.bf16 %v1837_v44, %v1837_v44 }
 0x233   :  { %v2863_v14 = vrot.slane %v2606_v7, 1  ;;  %v1556_v38 = vadd.f32 %v1555_v43, %v1387_v54  ;;  %v3502_v54 = vunpack.c.l.b16 %v2990_v3 }
 0x234   :  { %13315 = vst [vmem:[#allocation80_spill] sm:$0xff] %v10411_v6  ;;  %v2738_v11 = vsel %vm2704_vm2, %v2669_v36, %v2670_v56  ;;  %v1389_v41 = vpop.f32.mrf.mxu1 }
 0x235   :  { %v1724_v17 = vpop.f32.mrf.mxu3  ;;  %v2931_v59 = vsel %vm2897_vm3, %v2862_v0, %v2863_v14  ;;  %v1390_v46 = vadd.f32 %v1389_v41, %v1221_v63  ;;  %v2032_v0 = vand.u32 15, %v1968_v30  ;;  %v1223_v63 = vadd.f32 %v10278_v50, %v9957_v4 }
 0x236   :  { %v1725_v12 = vadd.f32 %v1724_v17, %v1556_v38  ;;  %v2991_v7 = vpack.c.bf16 %v2931_v59, %v2931_v59  ;;  %v3312_v38 = vunpack.c.l.b16 %v1901_v61  ;;  %v1969_v59 = vadd.s32 264, %v10053_v25  ;;  %v9521_v61 = vld [vmem:[#allocation2 + $0x32c] sm:$0xf] }
 0x237   :  { %1428 = vmatmul.bf16.gmra.mxu1 %v8755_v18  ;;  %1597 = vmatmul.bf16.gmra.mxu2 %v8759_v58  ;;  %v2799_v58 = vpack.c.bf16 %v2738_v11, %v2738_v11  ;;  %vm2416_vm6 = vcmp.eq.s32.totalorder %v2032_v0, 0 }
 0x238   :  { %v1838_v10 = vmax.f32 %v1725_v12, 0.0  ;;  %v3503_v26 = vunpack.c.l.b16 %v2991_v7  ;;  %v8768_v7 = vld [vmem:[#allocation2 + $0x330] sm:$0xf0] }
 0x23a   :  { %1766 = vmatmul.bf16.gmra.mxu3 %v8763_v39  ;;  %v2351_v57 = vsel %vm2159_vm5, 0.0, %v1838_v10  ;;  %v2864_v36 = vrot.slane %v1838_v10, 1  ;;  %v10418_v48 = vpack.c.b16 %v3503_v26, %v3502_v54  ;;  %v1558_v19 = vpop.f32.mrf.mxu2  ;;  %v1902_v5 = vpack.c.bf16 %v1838_v10, %v1838_v10  ;;  %v9523_v10 = vld [vmem:[#allocation2 + $0x334] sm:$0xf0] }
 0x23b   :  { %v2671_v55 = vrot.slane %v2351_v57, 7  ;;  %v1559_v34 = vadd.f32 %v1558_v19, %v1390_v46  ;;  %v9520_v46 = vld [vmem:[#allocation2 + $0x324] sm:$0xf]  ;;  %v3120_v54 = vunpack.c.l.b16 %v2799_v58  ;;  %v1226_v26 = vadd.f32 %v10278_v50, %v9963_v13  ;;  %v8776_v57 = vld [vmem:[#allocation2 + $0x338] sm:$0xf0] }
 0x23c   :  { %13316 = vst [vmem:[#allocation81_spill] sm:$0xff] %v10418_v48  ;;  %v2930_v47 = vsel %vm2897_vm3, %v2863_v14, %v2864_v36  ;;  %v1391_v18 = vpop.f32.mrf.mxu1  ;;  %v3313_v44 = vunpack.c.l.b16 %v1902_v5  ;;  %v8774_v14 = vld [vmem:[#allocation2 + $0x328] sm:$0xf]  ;;  %v2033_v5 = vand.u32 15, %v1969_v59  ;;  %v1970_v59 = vadd.s32 272, %v10053_v25 }
 0x23d   :  { %v1727_v43 = vpop.f32.mrf.mxu3  ;;  %v2737_v17 = vsel %vm2704_vm2, %v2670_v56, %v2671_v55  ;;  %v1392_v41 = vadd.f32 %v1391_v18, %v1223_v63  ;;  %v8771_v63 = vor.u32 %v9520_v46, %v8768_v7 }
 0x23e   :  { %v1728_v3 = vadd.f32 %v1727_v43, %v1559_v34  ;;  %v2800_v39 = vpack.c.bf16 %v2737_v17, %v2737_v17  ;;  %v10427_v12 = vpack.c.b16 %v3313_v44, %v3312_v38  ;;  %v8775_v38 = vor.u32 %v9523_v10, %v8774_v14 }
 0x23f   :  { %v2992_v44 = vpack.c.bf16 %v2930_v47, %v2930_v47  ;;  %vm2161_vm7 = vcmp.eq.s32.totalorder %v2033_v5, 15 }
 0x240   :  { %13317 = vst [vmem:[#allocation82_spill] sm:$0xff] %v10427_v12  ;;  %v1839_v4 = vmax.f32 %v1728_v3, 0.0  ;;  %v3121_v30 = vunpack.c.l.b16 %v2800_v39  ;;  %v8779_v3 = vor.u32 %v9521_v61, %v8776_v57 }
 0x242   :  { %v2608_v56 = vsel %vm2416_vm6, 0.0, %v1839_v4  ;;  %v2672_v11 = vrot.slane %v1839_v4, 7  ;;  %v1560_v0 = vpop.f32.mrf.mxu2  ;;  %v10431_v34 = vpack.c.b16 %v3121_v30, %v3120_v54  ;;  %v1903_v47 = vpack.c.bf16 %v1839_v4, %v1839_v4 }
 0x243   :  { %v2865_v19 = vrot.slane %v2608_v56, 1  ;;  %v1561_v43 = vadd.f32 %v1560_v0, %v1392_v41  ;;  %v3504_v41 = vunpack.c.l.b16 %v2992_v44 }
 0x244   :  { %13318 = vst [vmem:[#allocation83_spill] sm:$0xff] %v10431_v34  ;;  %v2736_v17 = vsel %vm2704_vm2, %v2671_v55, %v2672_v11  ;;  %v1394_v58 = vpop.f32.mrf.mxu1 }
 0x245   :  { %v1729_v18 = vpop.f32.mrf.mxu3  ;;  %v2929_v13 = vsel %vm2897_vm3, %v2864_v36, %v2865_v19  ;;  %v1395_v6 = vadd.f32 %v1394_v58, %v1226_v26  ;;  %v2034_v36 = vand.u32 15, %v1970_v59  ;;  %v1228_v26 = vadd.f32 %v10278_v50, %v9969_v22 }
 0x246   :  { %v1730_v39 = vadd.f32 %v1729_v18, %v1561_v43  ;;  %v2993_v56 = vpack.c.bf16 %v2929_v13, %v2929_v13  ;;  %v3314_v43 = vunpack.c.l.b16 %v1903_v47  ;;  %v1971_v13 = vadd.s32 280, %v10053_v25  ;;  %v9525_v47 = vld [vmem:[#allocation2 + $0x34c] sm:$0xf] }
 0x247   :  { %1433 = vmatmul.bf16.gmra.mxu1 %v8771_v63  ;;  %1602 = vmatmul.bf16.gmra.mxu2 %v8775_v38  ;;  %v2801_v38 = vpack.c.bf16 %v2736_v17, %v2736_v17  ;;  %vm2418_vm8 = vcmp.eq.s32.totalorder %v2034_v36, 0 }
 0x248   :  { %v1840_v46 = vmax.f32 %v1730_v39, 0.0  ;;  %v3505_v7 = vunpack.c.l.b16 %v2993_v56  ;;  %v8784_v56 = vld [vmem:[#allocation2 + $0x350] sm:$0xf0] }
 0x24a   :  { %1771 = vmatmul.bf16.gmra.mxu3 %v8779_v3  ;;  %v2353_v30 = vsel %vm2161_vm7, 0.0, %v1840_v46  ;;  %v2866_v55 = vrot.slane %v1840_v46, 1  ;;  %v10438_v14 = vpack.c.b16 %v3505_v7, %v3504_v41  ;;  %v1563_v54 = vpop.f32.mrf.mxu2  ;;  %v1904_v61 = vpack.c.bf16 %v1840_v46, %v1840_v46  ;;  %v9527_v46 = vld [vmem:[#allocation2 + $0x354] sm:$0xf0] }
 0x24b   :  { %v2673_v10 = vrot.slane %v2353_v30, 7  ;;  %v1564_v57 = vadd.f32 %v1563_v54, %v1395_v6  ;;  %v9524_v6 = vld [vmem:[#allocation2 + $0x344] sm:$0xf]  ;;  %v3122_v41 = vunpack.c.l.b16 %v2801_v38  ;;  %v1231_v7 = vadd.f32 %v10278_v50, %v9975_v31  ;;  %v8792_v30 = vld [vmem:[#allocation2 + $0x358] sm:$0xf0] }
 0x24c   :  { %13319 = vst [vmem:[#allocation84_spill] sm:$0xff] %v10438_v14  ;;  %v2928_v5 = vsel %vm2897_vm3, %v2865_v19, %v2866_v55  ;;  %v1396_v63 = vpop.f32.mrf.mxu1  ;;  %v3315_v4 = vunpack.c.l.b16 %v1904_v61  ;;  %v8790_v19 = vld [vmem:[#allocation2 + $0x348] sm:$0xf]  ;;  %v2035_v61 = vand.u32 15, %v1971_v13  ;;  %v1972_v13 = vadd.s32 288, %v10053_v25 }
 0x24d   :  { %v1732_v0 = vpop.f32.mrf.mxu3  ;;  %v2735_v18 = vsel %vm2704_vm2, %v2672_v11, %v2673_v10  ;;  %v1397_v58 = vadd.f32 %v1396_v63, %v1228_v26  ;;  %v8787_v26 = vor.u32 %v9524_v6, %v8784_v56 }
 0x24e   :  { %v1733_v44 = vadd.f32 %v1732_v0, %v1564_v57  ;;  %v2802_v3 = vpack.c.bf16 %v2735_v18, %v2735_v18  ;;  %v10447_v39 = vpack.c.b16 %v3315_v4, %v3314_v43  ;;  %v8791_v43 = vor.u32 %v9527_v46, %v8790_v19 }
 0x24f   :  { %v2994_v4 = vpack.c.bf16 %v2928_v5, %v2928_v5  ;;  %vm2163_vm9 = vcmp.eq.s32.totalorder %v2035_v61, 15 }
 0x250   :  { %13320 = vst [vmem:[#allocation85_spill] sm:$0xff] %v10447_v39  ;;  %v1841_v22 = vmax.f32 %v1733_v44, 0.0  ;;  %v3123_v59 = vunpack.c.l.b16 %v2802_v3  ;;  %v8795_v44 = vor.u32 %v9525_v47, %v8792_v30 }
 0x252   :  { %v2610_v11 = vsel %vm2418_vm8, 0.0, %v1841_v22  ;;  %v2674_v17 = vrot.slane %v1841_v22, 7  ;;  %v1565_v36 = vpop.f32.mrf.mxu2  ;;  %v10451_v57 = vpack.c.b16 %v3123_v59, %v3122_v41  ;;  %v1905_v5 = vpack.c.bf16 %v1841_v22, %v1841_v22 }
 0x253   :  { %v2867_v54 = vrot.slane %v2610_v11, 1  ;;  %v1566_v0 = vadd.f32 %v1565_v36, %v1397_v58  ;;  %v3506_v58 = vunpack.c.l.b16 %v2994_v4 }
 0x254   :  { %13321 = vst [vmem:[#allocation86_spill] sm:$0xff] %v10451_v57  ;;  %v2734_v18 = vsel %vm2704_vm2, %v2673_v10, %v2674_v17  ;;  %v1399_v38 = vpop.f32.mrf.mxu1 }
 0x255   :  { %v1734_v63 = vpop.f32.mrf.mxu3  ;;  %v2927_v31 = vsel %vm2897_vm3, %v2866_v55, %v2867_v54  ;;  %v1400_v3 = vadd.f32 %v1399_v38, %v1231_v7  ;;  %v2036_v55 = vand.u32 15, %v1972_v13  ;;  %v10463_v7 = vld [vmem:[%s13054_s2] ss:$0 sm:$0xff]  ;;  %v2803_v4 = vpack.c.bf16 %v2734_v18, %v2734_v18  ;;  %v8800_v13 = vld [vmem:[#allocation2 + $0x370] sm:$0xf0] }
 0x256   :  { %v1735_v50 = vadd.f32 %v1734_v63, %v1566_v0  ;;  %v2995_v11 = vpack.c.bf16 %v2927_v31, %v2927_v31  ;;  %v1233_v30 = vadd.f32 %v10463_v7, %v9981_v40  ;;  %v3316_v0 = vunpack.c.l.b16 %v1905_v5 }
 0x257   :  { %1438 = vmatmul.bf16.gmra.mxu1 %v8787_v26  ;;  %1607 = vmatmul.bf16.gmra.mxu2 %v8791_v43  ;;  %vm2420_vm10 = vcmp.eq.s32.totalorder %v2036_v55, 0  ;;  %v1236_v5 = vadd.f32 %v10463_v7, %v9987_v49 }
 0x258   :  { %v1842_v6 = vmax.f32 %v1735_v50, 0.0  ;;  %v3507_v56 = vunpack.c.l.b16 %v2995_v11  ;;  %v1973_v50 = vadd.s32 296, %v10053_v25 }
 0x25a   :  { %1776 = vmatmul.bf16.gmra.mxu3 %v8795_v44  ;;  %v2355_v59 = vsel %vm2163_vm9, 0.0, %v1842_v6  ;;  %v2868_v10 = vrot.slane %v1842_v6, 1  ;;  %v10458_v19 = vpack.c.b16 %v3507_v56, %v3506_v58  ;;  %v1568_v41 = vpop.f32.mrf.mxu2  ;;  %v1906_v47 = vpack.c.bf16 %v1842_v6, %v1842_v6  ;;  %v9531_v58 = vld [vmem:[#allocation2 + $0x374] sm:$0xf0] }
 0x25b   :  { %v2675_v46 = vrot.slane %v2355_v59, 7  ;;  %v1569_v36 = vadd.f32 %v1568_v41, %v1400_v3  ;;  %v9528_v3 = vld [vmem:[#allocation2 + $0x364] sm:$0xf]  ;;  %v3124_v56 = vunpack.c.l.b16 %v2803_v4  ;;  %v9529_v59 = vld [vmem:[#allocation2 + $0x36c] sm:$0xf] }
 0x25c   :  { %13322 = vst [vmem:[#allocation87_spill] sm:$0xff] %v10458_v19  ;;  %v2926_v22 = vsel %vm2897_vm3, %v2867_v54, %v2868_v10  ;;  %v1401_v26 = vpop.f32.mrf.mxu1  ;;  %v3317_v63 = vunpack.c.l.b16 %v1906_v47  ;;  %v8806_v54 = vld [vmem:[#allocation2 + $0x368] sm:$0xf]  ;;  %v8808_v41 = vld [vmem:[#allocation2 + $0x378] sm:$0xf0] }
 0x25d   :  { %v1737_v61 = vpop.f32.mrf.mxu3  ;;  %v2733_v43 = vsel %vm2704_vm2, %v2674_v17, %v2675_v46  ;;  %v1402_v44 = vadd.f32 %v1401_v26, %v1233_v30  ;;  %v2037_v30 = vand.u32 15, %v1973_v50  ;;  %v1974_v50 = vadd.s32 304, %v10053_v25 }
 0x25e   :  { %v1738_v38 = vadd.f32 %v1737_v61, %v1569_v36  ;;  %v2804_v31 = vpack.c.bf16 %v2733_v43, %v2733_v43  ;;  %v10472_v11 = vpack.c.b16 %v3317_v63, %v3316_v0  ;;  %v8803_v36 = vor.u32 %v9528_v3, %v8800_v13 }
 0x25f   :  { %v8807_v63 = vor.u32 %v9531_v58, %v8806_v54  ;;  %v2996_v43 = vpack.c.bf16 %v2926_v22, %v2926_v22  ;;  %vm2165_vm11 = vcmp.eq.s32.totalorder %v2037_v30, 15 }
 0x260   :  { %13323 = vst [vmem:[#allocation88_spill] sm:$0xff] %v10472_v11  ;;  %v1843_v40 = vmax.f32 %v1738_v38, 0.0  ;;  %v3125_v6 = vunpack.c.l.b16 %v2804_v31  ;;  %v8811_v31 = vor.u32 %v9529_v59, %v8808_v41 }
 0x262   :  { %v2612_v17 = vsel %vm2420_vm10, 0.0, %v1843_v40  ;;  %v2676_v18 = vrot.slane %v1843_v40, 7  ;;  %v1570_v55 = vpop.f32.mrf.mxu2  ;;  %v10476_v61 = vpack.c.b16 %v3125_v6, %v3124_v56  ;;  %v1907_v22 = vpack.c.bf16 %v1843_v40, %v1843_v40 }
 0x263   :  { %v2869_v47 = vrot.slane %v2612_v17, 1  ;;  %v1571_v26 = vadd.f32 %v1570_v55, %v1402_v44  ;;  %v3508_v44 = vunpack.c.l.b16 %v2996_v43 }
 0x264   :  { %13324 = vst [vmem:[#allocation89_spill] sm:$0xff] %v10476_v61  ;;  %v2732_v4 = vsel %vm2704_vm2, %v2675_v46, %v2676_v18  ;;  %v1404_v38 = vpop.f32.mrf.mxu1 }
 0x265   :  { %v1739_v0 = vpop.f32.mrf.mxu3  ;;  %v2925_v49 = vsel %vm2897_vm3, %v2868_v10, %v2869_v47  ;;  %v1405_v34 = vadd.f32 %v1404_v38, %v1236_v5  ;;  %v2038_v10 = vand.u32 15, %v1974_v50  ;;  %v1238_v5 = vadd.f32 %v10463_v7, %v9993_v62 }
 0x266   :  { %v1740_v57 = vadd.f32 %v1739_v0, %v1571_v26  ;;  %v2997_v17 = vpack.c.bf16 %v2925_v49, %v2925_v49  ;;  %v2805_v0 = vpack.c.bf16 %v2732_v4, %v2732_v4 }
 0x267   :  { %1443 = vmatmul.bf16.gmra.mxu1 %v8803_v36  ;;  %1612 = vmatmul.bf16.gmra.mxu2 %v8807_v63  ;;  %v3318_v36 = vunpack.c.l.b16 %v1907_v22  ;;  %vm2422_vm12 = vcmp.eq.s32.totalorder %v2038_v10, 0  ;;  %v9533_v22 = vld [vmem:[#allocation2 + $0x38c] sm:$0xf] }
 0x268   :  { %v1844_v3 = vmax.f32 %v1740_v57, 0.0  ;;  %v3509_v13 = vunpack.c.l.b16 %v2997_v17  ;;  %v8816_v17 = vld [vmem:[#allocation2 + $0x390] sm:$0xf0] }
 0x26a   :  { %1781 = vmatmul.bf16.gmra.mxu3 %v8811_v31  ;;  %v2357_v6 = vsel %vm2165_vm11, 0.0, %v1844_v3  ;;  %v2870_v46 = vrot.slane %v1844_v3, 1  ;;  %v10483_v54 = vpack.c.b16 %v3509_v13, %v3508_v44  ;;  %v1573_v56 = vpop.f32.mrf.mxu2  ;;  %v1908_v59 = vpack.c.bf16 %v1844_v3, %v1844_v3  ;;  %v9535_v3 = vld [vmem:[#allocation2 + $0x394] sm:$0xf0] }
 0x26b   :  { %v2677_v58 = vrot.slane %v2357_v6, 7  ;;  %v1574_v41 = vadd.f32 %v1573_v56, %v1405_v34  ;;  %v1975_v31 = vadd.s32 312, %v10053_v25  ;;  %v9532_v34 = vld [vmem:[#allocation2 + $0x384] sm:$0xf]  ;;  %v3126_v44 = vunpack.c.l.b16 %v2805_v0  ;;  %v8824_v6 = vld [vmem:[#allocation2 + $0x398] sm:$0xf0] }
 0x26c   :  { %13325 = vst [vmem:[#allocation90_spill] sm:$0xff] %v10483_v54  ;;  %v2924_v57 = vsel %vm2897_vm3, %v2869_v47, %v2870_v46  ;;  %v1406_v30 = vpop.f32.mrf.mxu1  ;;  %v3319_v40 = vunpack.c.l.b16 %v1908_v59  ;;  %v8822_v47 = vld [vmem:[#allocation2 + $0x388] sm:$0xf]  ;;  %v1241_v13 = vadd.f32 %v10463_v7, %v9999_v9 }
 0x26d   :  { %v1742_v55 = vpop.f32.mrf.mxu3  ;;  %v2731_v26 = vsel %vm2704_vm2, %v2676_v18, %v2677_v58  ;;  %v1407_v43 = vadd.f32 %v1406_v30, %v1238_v5  ;;  %v2039_v59 = vand.u32 15, %v1975_v31  ;;  %v8819_v5 = vor.u32 %v9532_v34, %v8816_v17 }
 0x26e   :  { %v1743_v63 = vadd.f32 %v1742_v55, %v1574_v41  ;;  %v2806_v38 = vpack.c.bf16 %v2731_v26, %v2731_v26  ;;  %v10492_v49 = vpack.c.b16 %v3319_v40, %v3318_v36  ;;  %v8823_v36 = vor.u32 %v9535_v3, %v8822_v47 }
 0x26f   :  { %v2998_v40 = vpack.c.bf16 %v2924_v57, %v2924_v57  ;;  %vm10502_vm13 = vcmp.eq.s32.totalorder %v2039_v59, 15  ;;  %v9619_v57 = vld [vmem:[#allocation7 + $0x78] sm:$0xff] }
 0x270   :  { %13326 = vst [vmem:[#allocation91_spill] sm:$0xff] %v10492_v49  ;;  %v1845_v62 = vmax.f32 %v1743_v63, 0.0  ;;  %v3127_v50 = vunpack.c.l.b16 %v2806_v38  ;;  %v8827_v63 = vor.u32 %v9533_v22, %v8824_v6  ;;  %4012 = vmatpush.bf16.msra.mxu1 %v9619_v57 }
 0x271   :  { %v3510_v17 = vunpack.c.l.b16 %v2998_v40 }
 0x272   :  { %v2614_v18 = vsel %vm2422_vm12, 0.0, %v1845_v62  ;;  %v2678_v4 = vrot.slane %v1845_v62, 7  ;;  %v1575_v10 = vpop.f32.mrf.mxu2  ;;  %v10496_v41 = vpack.c.b16 %v3127_v50, %v3126_v44  ;;  %v1909_v47 = vpack.c.bf16 %v1845_v62, %v1845_v62 }
 0x273   :  { %v2871_v56 = vrot.slane %v2614_v18, 1  ;;  %v1576_v55 = vadd.f32 %v1575_v10, %v1407_v43  ;;  %v1976_v43 = vadd.s32 320, %v10053_v25  ;;  %v1243_v62 = vadd.f32 %v10463_v7, %v10005_v24 }
 0x274   :  { %13327 = vst [vmem:[#allocation92_spill] sm:$0xff] %v10496_v41  ;;  %v2730_v26 = vsel %vm2704_vm2, %v2677_v58, %v2678_v4  ;;  %v1409_v0 = vpop.f32.mrf.mxu1  ;;  %v9627_v58 = vld [vmem:[#allocation7 + $0xb8] sm:$0xff] }
 0x275   :  { %v1744_v30 = vpop.f32.mrf.mxu3  ;;  %v2923_v9 = vsel %vm2897_vm3, %v2870_v46, %v2871_v56  ;;  %v1410_v61 = vadd.f32 %v1409_v0, %v1241_v13  ;;  %4181 = vmatpush.bf16.msra.mxu2 %v9627_v58  ;;  %v2040_v6 = vand.u32 15, %v1976_v43  ;;  %v3320_v0 = vunpack.c.l.b16 %v1909_v47  ;;  %v8832_v58 = vld [vmem:[#allocation2 + $0x3b0] sm:$0xf0]  ;;  %v9539_v47 = vld [vmem:[#allocation2 + $0x3b4] sm:$0xf0] }
 0x276   :  { %v1745_v38 = vadd.f32 %v1744_v30, %v1576_v55  ;;  %v2999_v18 = vpack.c.bf16 %v2923_v9, %v2923_v9  ;;  %v9618_v55 = vld [vmem:[#allocation7 + $0x70] sm:$0xff] }
 0x277   :  { %1448 = vmatmul.bf16.gmra.mxu1 %v8819_v5  ;;  %1617 = vmatmul.bf16.gmra.mxu2 %v8823_v36  ;;  %v9626_v30 = vld [vmem:[#allocation7 + $0xb0] sm:$0xff]  ;;  %vm10523_vm14 = vcmp.eq.s32.totalorder %v2040_v6, 0 }
 0x278   :  { %v10507_v34 = vmax.f32 %v1745_v38, 0.0  ;;  %v3511_v50 = vunpack.c.l.b16 %v2999_v18  ;;  %v2807_v38 = vpack.c.bf16 %v2730_v26, %v2730_v26  ;;  %4013 = vmatpush.bf16.msra.mxu1 %v9618_v55 }
 0x279   :  { %4182 = vmatpush.bf16.msra.mxu2 %v9626_v30 }
 0x27a   :  { %1786 = vmatmul.bf16.gmra.mxu3 %v8827_v63  ;;  %v2359_v46 = vsel %vm10502_vm13, 0.0, %v10507_v34  ;;  %v2872_v3 = vrot.slane %v10507_v34, 1  ;;  %v10513_v44 = vpack.c.b16 %v3511_v50, %v3510_v17  ;;  %v1578_v22 = vpop.f32.mrf.mxu2  ;;  %v1910_v10 = vpack.c.bf16 %v10507_v34, %v10507_v34  ;;  %v9536_v34 = vld [vmem:[#allocation2 + $0x3a4] sm:$0xf]  ;;  %v9617_v17 = vld [vmem:[#allocation7 + $0x68] sm:$0xff] }
 0x27b   :  { %v2679_v13 = vrot.slane %v2359_v46, 7  ;;  %v1579_v59 = vadd.f32 %v1578_v22, %v1410_v61  ;;  %v1977_v61 = vadd.s32 328, %v10053_v25  ;;  %v8838_v50 = vld [vmem:[#allocation2 + $0x3a8] sm:$0xf]  ;;  %v3128_v46 = vunpack.c.l.b16 %v2807_v38 }
 0x27c   :  { %13330 = vst [vmem:[#allocation93_spill] sm:$0xff] %v10513_v44  ;;  %v2922_v36 = vsel %vm2897_vm3, %v2871_v56, %v2872_v3  ;;  %v1411_v40 = vpop.f32.mrf.mxu1  ;;  %v3321_v63 = vunpack.c.l.b16 %v1910_v10  ;;  %v1246_v22 = vadd.f32 %v10463_v7, %v10011_v37  ;;  %4014 = vmatpush.bf16.msra.mxu1 %v9617_v17  ;;  %v8839_v38 = vor.u32 %v9539_v47, %v8838_v50  ;;  %v9616_v37 = vld [vmem:[#allocation7 + $0x60] sm:$0xff] }
 0x27d   :  { %v1747_v5 = vpop.f32.mrf.mxu3  ;;  %v2729_v9 = vsel %vm2704_vm2, %v2678_v4, %v2679_v13  ;;  %v1412_v31 = vadd.f32 %v1411_v40, %v1243_v62  ;;  %v9625_v4 = vld [vmem:[#allocation7 + $0xa8] sm:$0xff]  ;;  %v2041_v30 = vand.u32 15, %v1977_v61  ;;  %v8835_v40 = vor.u32 %v9536_v34, %v8832_v58  ;;  %v9623_v58 = vld [vmem:[#allocation7 + $0x98] sm:$0xff] }
 0x27e   :  { %v1748_v18 = vadd.f32 %v1747_v5, %v1579_v59  ;;  %v2808_v43 = vpack.c.bf16 %v2729_v9, %v2729_v9  ;;  %v10528_v56 = vpack.c.b16 %v3321_v63, %v3320_v0  ;;  %v9537_v62 = vld [vmem:[#allocation2 + $0x3ac] sm:$0xf]  ;;  %v8840_v59 = vld [vmem:[#allocation2 + $0x3b8] sm:$0xf0]  ;;  %4183 = vmatpush.bf16.msra.mxu2 %v9625_v4  ;;  %v1978_v34 = vadd.s32 336, %v10053_v25 }
 0x27f   :  { %vm10544_vm15 = vcmp.eq.s32.totalorder %v2041_v30, 15 }
 0x280   :  { %13333 = vst [vmem:[#allocation94_spill] sm:$0xff] %v10528_v56  ;;  %v10530_v57 = vmax.f32 %v1748_v18, 0.0  ;;  %v3129_v26 = vunpack.c.l.b16 %v2808_v43  ;;  %v9624_v18 = vld [vmem:[#allocation7 + $0xa0] sm:$0xff]  ;;  %v3000_v43 = vpack.c.bf16 %v2922_v36, %v2922_v36  ;;  %v8843_v56 = vor.u32 %v9537_v62, %v8840_v59  ;;  %4015 = vmatpush.bf16.msra.mxu1 %v9616_v37 }
 0x281   :  { %v2042_v59 = vand.u32 15, %v1978_v34  ;;  %v9540_v34 = vld [vmem:[#allocation2 + $0x3c4] sm:$0xf] }
 0x282   :  { %v2616_v6 = vsel %vm10523_vm14, 0.0, %v10530_v57  ;;  %v2680_v10 = vrot.slane %v10530_v57, 7  ;;  %v1580_v55 = vpop.f32.mrf.mxu2  ;;  %v10538_v0 = vpack.c.b16 %v3129_v26, %v3128_v46  ;;  %4184 = vmatpush.bf16.msra.mxu2 %v9624_v18  ;;  %v3512_v26 = vunpack.c.l.b16 %v3000_v43 }
 0x283   :  { %v2873_v5 = vrot.slane %v2616_v6, 1  ;;  %v1581_v63 = vadd.f32 %v1580_v55, %v1412_v31  ;;  %vm10567_vm0 = vcmp.eq.s32.totalorder %v2042_v59, 0 }
 0x284   :  { %13334 = vst [vmem:[#allocation95_spill] sm:$0xff] %v10538_v0  ;;  %v2728_v24 = vsel %vm2704_vm2, %v2679_v13, %v2680_v10  ;;  %v1414_v41 = vpop.f32.mrf.mxu1  ;;  %v9615_v13 = vld [vmem:[#allocation7 + $0x58] sm:$0xff] }
 0x285   :  { %v1749_v9 = vpop.f32.mrf.mxu3  ;;  %v2921_v17 = vsel %vm2897_vm3, %v2872_v3, %v2873_v5  ;;  %v1415_v6 = vadd.f32 %v1414_v41, %v1246_v22  ;;  %v1911_v41 = vpack.c.bf16 %v10530_v57, %v10530_v57  ;;  %4016 = vmatpush.bf16.msra.mxu1 %v9615_v13  ;;  %v1248_v57 = vadd.f32 %v10463_v7, %v10017_v52  ;;  %v8848_v13 = vld [vmem:[#allocation2 + $0x3d0] sm:$0xf0] }
 0x286   :  { %v1750_v4 = vadd.f32 %v1749_v9, %v1581_v63  ;;  %v3001_v61 = vpack.c.bf16 %v2921_v17, %v2921_v17  ;;  %4185 = vmatpush.bf16.msra.mxu2 %v9623_v58  ;;  %v9622_v63 = vld [vmem:[#allocation7 + $0x90] sm:$0xff]  ;;  %v2809_v17 = vpack.c.bf16 %v2728_v24, %v2728_v24  ;;  %v9613_v58 = vld [vmem:[#allocation7 + $0x48] sm:$0xff] }
 0x287   :  { %1453 = vmatmul.bf16.gmra.mxu1 %v8835_v40  ;;  %1622 = vmatmul.bf16.gmra.mxu2 %v8839_v38  ;;  %v9614_v40 = vld [vmem:[#allocation7 + $0x50] sm:$0xff]  ;;  %v3322_v37 = vunpack.c.l.b16 %v1911_v41  ;;  %v8854_v24 = vld [vmem:[#allocation2 + $0x3c8] sm:$0xf] }
 0x288   :  { %v10549_v36 = vmax.f32 %v1750_v4, 0.0  ;;  %v3513_v50 = vunpack.c.l.b16 %v3001_v61  ;;  %v3130_v41 = vunpack.c.l.b16 %v2809_v17  ;;  %v9612_v17 = vld [vmem:[#allocation7 + $0x40] sm:$0xff] }
 0x289   :  { %4017 = vmatpush.bf16.msra.mxu1 %v9614_v40 }
 0x28a   :  { %1791 = vmatmul.bf16.gmra.mxu3 %v8843_v56  ;;  %v2361_v3 = vsel %vm10544_vm15, 0.0, %v10549_v36  ;;  %v2874_v47 = vrot.slane %v10549_v36, 1  ;;  %v10557_v46 = vpack.c.b16 %v3513_v50, %v3512_v26  ;;  %v1583_v62 = vpop.f32.mrf.mxu2  ;;  %v1912_v55 = vpack.c.bf16 %v10549_v36, %v10549_v36  ;;  %4186 = vmatpush.bf16.msra.mxu2 %v9622_v63  ;;  %v9621_v26 = vld [vmem:[#allocation7 + $0x88] sm:$0xff]  ;;  %v9543_v50 = vld [vmem:[#allocation2 + $0x3d4] sm:$0xf0] }
 0x28b   :  { %v2681_v22 = vrot.slane %v2361_v3, 7  ;;  %v1584_v56 = vadd.f32 %v1583_v62, %v1415_v6  ;;  %v1979_v6 = vadd.s32 344, %v10053_v25  ;;  %v1251_v3 = vadd.f32 %v10463_v7, %v10023_v1 }
 0x28c   :  { %13337 = vst [vmem:[#allocation96_spill] sm:$0xff] %v10557_v46  ;;  %v2920_v9 = vsel %vm2897_vm3, %v2873_v5, %v2874_v47  ;;  %v1416_v38 = vpop.f32.mrf.mxu1  ;;  %v3323_v18 = vunpack.c.l.b16 %v1912_v55  ;;  %v9541_v55 = vld [vmem:[#allocation2 + $0x3cc] sm:$0xf]  ;;  %v8851_v63 = vor.u32 %v9540_v34, %v8848_v13 }
 0x28d   :  { %v1752_v30 = vpop.f32.mrf.mxu3  ;;  %v2727_v43 = vsel %vm2704_vm2, %v2680_v10, %v2681_v22  ;;  %v1417_v61 = vadd.f32 %v1416_v38, %v1248_v57  ;;  %v8856_v57 = vld [vmem:[#allocation2 + $0x3d8] sm:$0xf0]  ;;  %4018 = vmatpush.bf16.msra.mxu1 %v9613_v58  ;;  %v2043_v40 = vand.u32 15, %v1979_v6  ;;  %v3002_v1 = vpack.c.bf16 %v2920_v9, %v2920_v9 }
 0x28e   :  { %v1753_v4 = vadd.f32 %v1752_v30, %v1584_v56  ;;  %v2810_v31 = vpack.c.bf16 %v2727_v43, %v2727_v43  ;;  %v10572_v5 = vpack.c.b16 %v3323_v18, %v3322_v37  ;;  %4187 = vmatpush.bf16.msra.mxu2 %v9621_v26  ;;  %v8855_v43 = vor.u32 %v9543_v50, %v8854_v24 }
 0x28f   :  { %v8859_v0 = vor.u32 %v9541_v55, %v8856_v57  ;;  %vm2171_vm1 = vcmp.eq.s32.totalorder %v2043_v40, 15  ;;  %v3514_v9 = vunpack.c.l.b16 %v3002_v1  ;;  %v13343_v57 = vld [vmem:[#allocation29_spill] sm:$0xff] }
 0x290   :  { %13340 = vst [vmem:[#allocation97_spill] sm:$0xff] %v10572_v5  ;;  %v1849_v36 = vmax.f32 %v1753_v4, 0.0  ;;  %v3131_v10 = vunpack.c.l.b16 %v2810_v31  ;;  %v9620_v4 = vld [vmem:[#allocation7 + $0x80] sm:$0xff] }
 0x291   :  { %4019 = vmatpush.bf16.msra.mxu1 %v9612_v17 }
 0x292   :  { %v2618_v62 = vsel %vm10567_vm0, 0.0, %v1849_v36  ;;  %v2682_v59 = vrot.slane %v1849_v36, 7  ;;  %v1585_v30 = vpop.f32.mrf.mxu2  ;;  %v10578_v38 = vpack.c.b16 %v3131_v10, %v3130_v41  ;;  %4188 = vmatpush.bf16.msra.mxu2 %v9620_v4  ;;  %v1913_v10 = vpack.c.bf16 %v1849_v36, %v1849_v36 }
 0x293   :  { %v2875_v56 = vrot.slane %v2618_v62, 1  ;;  %v1586_v37 = vadd.f32 %v1585_v30, %v1417_v61  ;;  %v1980_v61 = vadd.s32 352, %v10053_v25  ;;  %v1253_v30 = vadd.f32 %v10463_v7, %v13343_v57 }
 0x294   :  { %13341 = vst [vmem:[#allocation98_spill] sm:$0xff] %v10578_v38  ;;  %v2726_v31 = vsel %vm2704_vm2, %v2681_v22, %v2682_v59  ;;  %v1419_v52 = vpop.f32.mrf.mxu1 }
 0x295   :  { %v1754_v18 = vpop.f32.mrf.mxu3  ;;  %v2919_v58 = vsel %vm2897_vm3, %v2874_v47, %v2875_v56  ;;  %v1420_v62 = vadd.f32 %v1419_v52, %v1251_v3  ;;  %v2044_v3 = vand.u32 15, %v1980_v61  ;;  %v2811_v17 = vpack.c.bf16 %v2726_v31, %v2726_v31  ;;  %v8864_v61 = vld [vmem:[#allocation2 + $0x3f0] sm:$0xf0] }
 0x296   :  { %v1755_v26 = vadd.f32 %v1754_v18, %v1586_v37  ;;  %v3003_v6 = vpack.c.bf16 %v2919_v58, %v2919_v58  ;;  %v1981_v58 = vadd.s32 360, %v10053_v25 }
 0x297   :  { %1458 = vmatmul.bf16.gmra.mxu1 %v8851_v63  ;;  %1627 = vmatmul.bf16.gmra.mxu2 %v8855_v43  ;;  %v3324_v43 = vunpack.c.l.b16 %v1913_v10  ;;  %vm2428_vm4 = vcmp.eq.s32.totalorder %v2044_v3, 0  ;;  %v13345_v10 = vld [vmem:[#allocation31_spill] sm:$0xff] }
 0x298   :  { %v1850_v34 = vmax.f32 %v1755_v26, 0.0  ;;  %v3515_v13 = vunpack.c.l.b16 %v3003_v6  ;;  %v9544_v6 = vld [vmem:[#allocation2 + $0x3e4] sm:$0xf] }
 0x29a   :  { %1796 = vmatmul.bf16.gmra.mxu3 %v8859_v0  ;;  %v2363_v22 = vsel %vm2171_vm1, 0.0, %v1850_v34  ;;  %v2876_v24 = vrot.slane %v1850_v34, 1  ;;  %v10585_v50 = vpack.c.b16 %v3515_v13, %v3514_v9  ;;  %v1588_v41 = vpop.f32.mrf.mxu2  ;;  %v1914_v55 = vpack.c.bf16 %v1850_v34, %v1850_v34  ;;  %v9547_v9 = vld [vmem:[#allocation2 + $0x3f4] sm:$0xf0] }
 0x29b   :  { %v2683_v47 = vrot.slane %v2363_v22, 7  ;;  %v1589_v40 = vadd.f32 %v1588_v41, %v1420_v62  ;;  %v3132_v13 = vunpack.c.l.b16 %v2811_v17  ;;  %v1256_v22 = vadd.f32 %v10463_v7, %v13345_v10  ;;  %v9545_v41 = vld [vmem:[#allocation2 + $0x3ec] sm:$0xf] }
 0x29c   :  { %13342 = vst [vmem:[#allocation99_spill] sm:$0xff] %v10585_v50  ;;  %v2918_v63 = vsel %vm2897_vm3, %v2875_v56, %v2876_v24  ;;  %v1421_v18 = vpop.f32.mrf.mxu1  ;;  %v3325_v36 = vunpack.c.l.b16 %v1914_v55  ;;  %v8870_v56 = vld [vmem:[#allocation2 + $0x3e8] sm:$0xf]  ;;  %v8872_v55 = vld [vmem:[#allocation2 + $0x3f8] sm:$0xf0] }
 0x29d   :  { %v1757_v37 = vpop.f32.mrf.mxu3  ;;  %v2725_v0 = vsel %vm2704_vm2, %v2682_v59, %v2683_v47  ;;  %v1422_v1 = vadd.f32 %v1421_v18, %v1253_v30  ;;  %v2045_v30 = vand.u32 15, %v1981_v58  ;;  %v1982_v58 = vadd.s32 368, %v10053_v25 }
 0x29e   :  { %v1758_v4 = vadd.f32 %v1757_v37, %v1589_v40  ;;  %v2812_v52 = vpack.c.bf16 %v2725_v0, %v2725_v0  ;;  %v10594_v26 = vpack.c.b16 %v3325_v36, %v3324_v43  ;;  %v8867_v40 = vor.u32 %v9544_v6, %v8864_v61 }
 0x29f   :  { %v8871_v36 = vor.u32 %v9547_v9, %v8870_v56  ;;  %v3004_v0 = vpack.c.bf16 %v2918_v63, %v2918_v63  ;;  %vm2173_vm5 = vcmp.eq.s32.totalorder %v2045_v30, 15 }
 0x2a0   :  { %13344 = vst [vmem:[#allocation29_spill] sm:$0xff] %v10594_v26  ;;  %v1851_v62 = vmax.f32 %v1758_v4, 0.0  ;;  %v3133_v34 = vunpack.c.l.b16 %v2812_v52  ;;  %v8875_v52 = vor.u32 %v9545_v41, %v8872_v55  ;;  %v9611_v41 = vld [vmem:[#allocation7 + $0x38] sm:$0xff]  ;;  %v13348_v55 = vld [vmem:[#allocation33_spill] sm:$0xff] }
 0x2a1   :  { %3843 = vmatpush.bf16.msrb.mxu0 %v9611_v41 }
 0x2a2   :  { %v2620_v59 = vsel %vm2428_vm4, 0.0, %v1851_v62  ;;  %v2684_v31 = vrot.slane %v1851_v62, 7  ;;  %v1590_v3 = vpop.f32.mrf.mxu2  ;;  %v10598_v37 = vpack.c.b16 %v3133_v34, %v3132_v13  ;;  %v1915_v63 = vpack.c.bf16 %v1851_v62, %v1851_v62 }
 0x2a3   :  { %v2877_v57 = vrot.slane %v2620_v59, 1  ;;  %v1591_v18 = vadd.f32 %v1590_v3, %v1422_v1  ;;  %v3516_v1 = vunpack.c.l.b16 %v3004_v0  ;;  %v1258_v3 = vadd.f32 %v10463_v7, %v13348_v55 }
 0x2a4   :  { %13346 = vst [vmem:[#allocation31_spill] sm:$0xff] %v10598_v37  ;;  %v2724_v17 = vsel %vm2704_vm2, %v2683_v47, %v2684_v31  ;;  %v1424_v4 = vpop.f32.mrf.mxu1  ;;  %v3326_v62 = vunpack.c.l.b16 %v1915_v63 }
 0x2a5   :  { %v1759_v43 = vpop.f32.mrf.mxu3  ;;  %v2917_v10 = vsel %vm2897_vm3, %v2876_v24, %v2877_v57  ;;  %v1425_v26 = vadd.f32 %v1424_v4, %v1256_v22  ;;  %v2046_v24 = vand.u32 15, %v1982_v58  ;;  %v2813_v0 = vpack.c.bf16 %v2724_v17, %v2724_v17 }
 0x2a6   :  { %v1760_v38 = vadd.f32 %v1759_v43, %v1591_v18  ;;  %v3005_v59 = vpack.c.bf16 %v2917_v10, %v2917_v10 }
 0x2a7   :  { %1463 = vmatmul.bf16.gmra.mxu1 %v8867_v40  ;;  %1632 = vmatmul.bf16.gmra.mxu2 %v8871_v36  ;;  %vm2430_vm6 = vcmp.eq.s32.totalorder %v2046_v24, 0 }
 0x2a8   :  { %v1852_v6 = vmax.f32 %v1760_v38, 0.0  ;;  %v3517_v61 = vunpack.c.l.b16 %v3005_v59  ;;  %v1983_v59 = vadd.s32 376, %v10053_v25 }
 0x2aa   :  { %1801 = vmatmul.bf16.gmra.mxu3 %v8875_v52  ;;  %v2365_v34 = vsel %vm2173_vm5, 0.0, %v1852_v6  ;;  %v2878_v47 = vrot.slane %v1852_v6, 1  ;;  %v10605_v56 = vpack.c.b16 %v3517_v61, %v3516_v1  ;;  %v1593_v13 = vpop.f32.mrf.mxu2  ;;  %v1916_v22 = vpack.c.bf16 %v1852_v6, %v1852_v6 }
 0x2ab   :  { %v2685_v9 = vrot.slane %v2365_v34, 7  ;;  %v1594_v30 = vadd.f32 %v1593_v13, %v1425_v26  ;;  %v3134_v1 = vunpack.c.l.b16 %v2813_v0  ;;  %v2047_v13 = vand.u32 15, %v1983_v59 }
 0x2ac   :  { %13347 = vst [vmem:[#allocation100_spill] sm:$0xff] %v10605_v56  ;;  %v2916_v40 = vsel %vm2897_vm3, %v2877_v57, %v2878_v47  ;;  %v1426_v18 = vpop.f32.mrf.mxu1  ;;  %v3327_v43 = vunpack.c.l.b16 %v1916_v22 }
 0x2ad   :  { %v1762_v38 = vpop.f32.mrf.mxu3  ;;  %v2723_v36 = vsel %vm2704_vm2, %v2684_v31, %v2685_v9  ;;  %v1427_v52 = vadd.f32 %v1426_v18, %v1258_v3  ;;  %v13351_v31 = vld [vmem:[#allocation16_spill] sm:$0xff]  ;;  %v3006_v24 = vpack.c.bf16 %v2916_v40, %v2916_v40  ;;  %vm2175_vm7 = vcmp.eq.s32.totalorder %v2047_v13, 15  ;;  %v13355_v13 = vld [vmem:[#allocation17_spill] sm:$0xff] }
 0x2ae   :  { %v1763_v4 = vadd.f32 %v1762_v38, %v1594_v30  ;;  %v2814_v10 = vpack.c.bf16 %v2723_v36, %v2723_v36  ;;  %v10614_v58 = vpack.c.b16 %v3327_v43, %v3326_v62  ;;  %v1261_v17 = vadd.f32 %v10463_v7, %v13351_v31  ;;  %v9610_v31 = vld [vmem:[#allocation7 + $0x30] sm:$0xff] }
 0x2af   :  { %v1984_v36 = vadd.s32 384, %v10053_v25  ;;  %3844 = vmatpush.bf16.msrb.mxu0 %v9610_v31 }
 0x2b0   :  { %13349 = vst [vmem:[#allocation33_spill] sm:$0xff] %v10614_v58  ;;  %v1853_v26 = vmax.f32 %v1763_v4, 0.0  ;;  %v3135_v6 = vunpack.c.l.b16 %v2814_v10  ;;  %v13352_v4 = vld [vmem:[#allocation37_spill] sm:$0xff]  ;;  %v13353_v10 = vld [vmem:[#allocation39_spill] sm:$0xff] }
 0x2b2   :  { %v2622_v57 = vsel %vm2430_vm6, 0.0, %v1853_v26  ;;  %v2686_v61 = vrot.slane %v1853_v26, 7  ;;  %v1595_v63 = vpop.f32.mrf.mxu2  ;;  %v10616_v41 = vpack.c.b16 %v3135_v6, %v3134_v1  ;;  %v1917_v59 = vpack.c.bf16 %v1853_v26, %v1853_v26 }
 0x2b3   :  { %v2879_v34 = vrot.slane %v2622_v57, 1  ;;  %v1596_v22 = vadd.f32 %v1595_v63, %v1427_v52  ;;  %v3518_v52 = vunpack.c.l.b16 %v3006_v24  ;;  %v2048_v63 = vand.u32 15, %v1984_v36 }
 0x2b4   :  { %13350 = vst [vmem:[#allocation101_spill] sm:$0xff] %v10616_v41  ;;  %v2722_v3 = vsel %vm2704_vm2, %v2685_v9, %v2686_v61  ;;  %v1429_v30 = vpop.f32.mrf.mxu1  ;;  %v3328_v26 = vunpack.c.l.b16 %v1917_v59 }
 0x2b5   :  { %v1764_v55 = vpop.f32.mrf.mxu3  ;;  %v2915_v38 = vsel %vm2897_vm3, %v2878_v47, %v2879_v34  ;;  %v1430_v62 = vadd.f32 %v1429_v30, %v1261_v17  ;;  %vm2432_vm8 = vcmp.eq.s32.totalorder %v2048_v63, 0 }
 0x2b6   :  { %v1765_v18 = vadd.f32 %v1764_v55, %v1596_v22  ;;  %v3007_v43 = vpack.c.bf16 %v2915_v38, %v2915_v38  ;;  %v1263_v22 = vadd.f32 %v10463_v7, %v13355_v13 }
 0x2b7   :  { %4020 = vmatmul.bf16.vlgmr.msra.gmra.mxu1 %v13352_v4  ;;  %4189 = vmatmul.bf16.vlgmr.msra.gmra.mxu2 %v13353_v10 }
 0x2b8   :  { %v1854_v0 = vmax.f32 %v1765_v18, 0.0  ;;  %v3519_v40 = vunpack.c.l.b16 %v3007_v43 }
 0x2ba   :  { %v2367_v6 = vsel %vm2175_vm7, 0.0, %v1854_v0  ;;  %v2880_v9 = vrot.slane %v1854_v0, 1  ;;  %v10627_v1 = vpack.c.b16 %v3519_v40, %v3518_v52  ;;  %v1598_v47 = vpop.f32.mrf.mxu2  ;;  %v1918_v17 = vpack.c.bf16 %v1854_v0, %v1854_v0 }
 0x2bb   :  { %v2687_v57 = vrot.slane %v2367_v6, 7  ;;  %v1599_v55 = vadd.f32 %v1598_v47, %v1430_v62  ;;  %v2815_v52 = vpack.c.bf16 %v2722_v3, %v2722_v3  ;;  %v1985_v0 = vadd.s32 392, %v10053_v25 }
 0x2bc   :  { %13354 = vst [vmem:[#allocation16_spill] sm:$0xff] %v10627_v1  ;;  %v2914_v38 = vsel %vm2897_vm3, %v2879_v34, %v2880_v9  ;;  %v1431_v24 = vpop.f32.mrf.mxu1  ;;  %v3329_v18 = vunpack.c.l.b16 %v1918_v17 }
 0x2bd   :  { %v1767_v30 = vpop.f32.mrf.mxu3  ;;  %v2721_v43 = vsel %vm2704_vm2, %v2686_v61, %v2687_v57  ;;  %v1432_v36 = vadd.f32 %v1431_v24, %v1263_v22  ;;  %v3136_v4 = vunpack.c.l.b16 %v2815_v52  ;;  %v2049_v17 = vand.u32 15, %v1985_v0  ;;  %v13358_v61 = vld [vmem:[#allocation18_spill] sm:$0xff] }
 0x2be   :  { %v1768_v40 = vadd.f32 %v1767_v30, %v1599_v55  ;;  %v2816_v6 = vpack.c.bf16 %v2721_v43, %v2721_v43  ;;  %v10636_v13 = vpack.c.b16 %v3329_v18, %v3328_v26  ;;  %v1266_v3 = vadd.f32 %v10463_v7, %v13358_v61  ;;  %v13360_v0 = vld [vmem:[#allocation42_spill] sm:$0xff] }
 0x2bf   :  { %v3008_v63 = vpack.c.bf16 %v2914_v38, %v2914_v38  ;;  %vm2177_vm9 = vcmp.eq.s32.totalorder %v2049_v17, 15  ;;  %v13362_v17 = vld [vmem:[#allocation19_spill] sm:$0xff] }
 0x2c0   :  { %13356 = vst [vmem:[#allocation17_spill] sm:$0xff] %v10636_v13  ;;  %v1855_v62 = vmax.f32 %v1768_v40, 0.0  ;;  %v3137_v47 = vunpack.c.l.b16 %v2816_v6  ;;  %v13359_v6 = vld [vmem:[#allocation40_spill] sm:$0xff] }
 0x2c2   :  { %v2624_v34 = vsel %vm2432_vm8, 0.0, %v1855_v62  ;;  %v2688_v10 = vrot.slane %v1855_v62, 7  ;;  %v1600_v59 = vpop.f32.mrf.mxu2  ;;  %v10638_v41 = vpack.c.b16 %v3137_v47, %v3136_v4  ;;  %v1986_v4 = vadd.s32 400, %v10053_v25 }
 0x2c3   :  { %v2881_v31 = vrot.slane %v2624_v34, 1  ;;  %v1601_v22 = vadd.f32 %v1600_v59, %v1432_v36  ;;  %v3520_v36 = vunpack.c.l.b16 %v3008_v63  ;;  %v1919_v47 = vpack.c.bf16 %v1855_v62, %v1855_v62 }
 0x2c4   :  { %13357 = vst [vmem:[#allocation102_spill] sm:$0xff] %v10638_v41  ;;  %v2720_v30 = vsel %vm2704_vm2, %v2687_v57, %v2688_v10  ;;  %v1434_v24 = vpop.f32.mrf.mxu1 }
 0x2c5   :  { %v1769_v55 = vpop.f32.mrf.mxu3  ;;  %v2913_v26 = vsel %vm2897_vm3, %v2880_v9, %v2881_v31  ;;  %v1435_v43 = vadd.f32 %v1434_v24, %v1266_v3  ;;  %v9609_v3 = vld [vmem:[#allocation7 + $0x28] sm:$0xff]  ;;  %v1268_v24 = vadd.f32 %v10463_v7, %v13362_v17  ;;  %v3330_v62 = vunpack.c.l.b16 %v1919_v47 }
 0x2c6   :  { %v1770_v18 = vadd.f32 %v1769_v55, %v1601_v22  ;;  %v3009_v52 = vpack.c.bf16 %v2913_v26, %v2913_v26  ;;  %v2050_v22 = vand.u32 15, %v1986_v4  ;;  %3845 = vmatpush.bf16.msrb.mxu0 %v9609_v3 }
 0x2c7   :  { %4025 = vmatmul.bf16.gmra.mxu1 %v13359_v6  ;;  %4194 = vmatmul.bf16.gmra.mxu2 %v13360_v0 }
 0x2c8   :  { %v1856_v40 = vmax.f32 %v1770_v18, 0.0  ;;  %v3521_v38 = vunpack.c.l.b16 %v3009_v52  ;;  %vm2434_vm10 = vcmp.eq.s32.totalorder %v2050_v22, 0 }
 0x2ca   :  { %v2369_v34 = vsel %vm2177_vm9, 0.0, %v1856_v40  ;;  %v2882_v57 = vrot.slane %v1856_v40, 1  ;;  %v10649_v59 = vpack.c.b16 %v3521_v38, %v3520_v36  ;;  %v1603_v9 = vpop.f32.mrf.mxu2  ;;  %v1920_v55 = vpack.c.bf16 %v1856_v40, %v1856_v40 }
 0x2cb   :  { %v2689_v61 = vrot.slane %v2369_v34, 7  ;;  %v1604_v26 = vadd.f32 %v1603_v9, %v1435_v43  ;;  %v2817_v38 = vpack.c.bf16 %v2720_v30, %v2720_v30  ;;  %v1987_v40 = vadd.s32 408, %v10053_v25 }
 0x2cc   :  { %13361 = vst [vmem:[#allocation18_spill] sm:$0xff] %v10649_v59  ;;  %v2912_v6 = vsel %vm2897_vm3, %v2881_v31, %v2882_v57  ;;  %v1436_v63 = vpop.f32.mrf.mxu1  ;;  %v3331_v52 = vunpack.c.l.b16 %v1920_v55 }
 0x2cd   :  { %v1772_v18 = vpop.f32.mrf.mxu3  ;;  %v2719_v36 = vsel %vm2704_vm2, %v2688_v10, %v2689_v61  ;;  %v1437_v4 = vadd.f32 %v1436_v63, %v1268_v24  ;;  %v3138_v41 = vunpack.c.l.b16 %v2817_v38  ;;  %v2051_v55 = vand.u32 15, %v1987_v40  ;;  %v13365_v10 = vld [vmem:[#allocation20_spill] sm:$0xff] }
 0x2ce   :  { %v1773_v34 = vadd.f32 %v1772_v18, %v1604_v26  ;;  %v2818_v0 = vpack.c.bf16 %v2719_v36, %v2719_v36  ;;  %v10658_v17 = vpack.c.b16 %v3331_v52, %v3330_v62  ;;  %v1271_v30 = vadd.f32 %v10463_v7, %v13365_v10 }
 0x2cf   :  { %v3010_v22 = vpack.c.bf16 %v2912_v6, %v2912_v6  ;;  %vm2179_vm11 = vcmp.eq.s32.totalorder %v2051_v55, 15  ;;  %v13368_v55 = vld [vmem:[#allocation21_spill] sm:$0xff] }
 0x2d0   :  { %13363 = vst [vmem:[#allocation19_spill] sm:$0xff] %v10658_v17  ;;  %v1857_v43 = vmax.f32 %v1773_v34, 0.0  ;;  %v3139_v9 = vunpack.c.l.b16 %v2818_v0  ;;  %v13366_v34 = vld [vmem:[#allocation43_spill] sm:$0xff] }
 0x2d2   :  { %v2626_v31 = vsel %vm2434_vm10, 0.0, %v1857_v43  ;;  %v2690_v37 = vrot.slane %v1857_v43, 7  ;;  %v1605_v47 = vpop.f32.mrf.mxu2  ;;  %v10660_v59 = vpack.c.b16 %v3139_v9, %v3138_v41  ;;  %v1988_v41 = vadd.s32 416, %v10053_v25 }
 0x2d3   :  { %v2883_v3 = vrot.slane %v2626_v31, 1  ;;  %v1606_v24 = vadd.f32 %v1605_v47, %v1437_v4  ;;  %v3522_v4 = vunpack.c.l.b16 %v3010_v22  ;;  %v1921_v40 = vpack.c.bf16 %v1857_v43, %v1857_v43 }
 0x2d4   :  { %13364 = vst [vmem:[#allocation103_spill] sm:$0xff] %v10660_v59  ;;  %v2718_v18 = vsel %vm2704_vm2, %v2689_v61, %v2690_v37  ;;  %v1439_v63 = vpop.f32.mrf.mxu1  ;;  %v2052_v10 = vand.u32 15, %v1988_v41 }
 0x2d5   :  { %v1774_v26 = vpop.f32.mrf.mxu3  ;;  %v2911_v0 = vsel %vm2897_vm3, %v2882_v57, %v2883_v3  ;;  %v1440_v52 = vadd.f32 %v1439_v63, %v1271_v30  ;;  %v9608_v30 = vld [vmem:[#allocation7 + $0x20] sm:$0xff]  ;;  %v3332_v43 = vunpack.c.l.b16 %v1921_v40 }
 0x2d6   :  { %v1775_v62 = vadd.f32 %v1774_v26, %v1606_v24  ;;  %v3011_v36 = vpack.c.bf16 %v2911_v0, %v2911_v0  ;;  %v1273_v26 = vadd.f32 %v10463_v7, %v13368_v55  ;;  %3846 = vmatpush.bf16.msrb.mxu0 %v9608_v30  ;;  %vm2436_vm12 = vcmp.eq.s32.totalorder %v2052_v10, 0 }
 0x2d7   :  { %4030 = vmatmul.bf16.gmra.mxu1 %v13366_v34  ;;  %4199 = vmatmul.bf16.gmra.mxu2 %v10156_v60 }
 0x2d8   :  { %v1858_v38 = vmax.f32 %v1775_v62, 0.0  ;;  %v3523_v6 = vunpack.c.l.b16 %v3011_v36 }
 0x2da   :  { %v2371_v9 = vsel %vm2179_vm11, 0.0, %v1858_v38  ;;  %v2884_v61 = vrot.slane %v1858_v38, 1  ;;  %v10671_v31 = vpack.c.b16 %v3523_v6, %v3522_v4  ;;  %v1608_v57 = vpop.f32.mrf.mxu2  ;;  %v1922_v24 = vpack.c.bf16 %v1858_v38, %v1858_v38 }
 0x2db   :  { %v2691_v47 = vrot.slane %v2371_v9, 7  ;;  %v1609_v63 = vadd.f32 %v1608_v57, %v1440_v52  ;;  %v2819_v6 = vpack.c.bf16 %v2718_v18, %v2718_v18  ;;  %v1989_v38 = vadd.s32 424, %v10053_v25 }
 0x2dc   :  { %13367 = vst [vmem:[#allocation20_spill] sm:$0xff] %v10671_v31  ;;  %v2910_v62 = vsel %vm2897_vm3, %v2883_v3, %v2884_v61  ;;  %v1441_v22 = vpop.f32.mrf.mxu1  ;;  %v3333_v36 = vunpack.c.l.b16 %v1922_v24 }
 0x2dd   :  { %v1777_v0 = vpop.f32.mrf.mxu3  ;;  %v2717_v4 = vsel %vm2704_vm2, %v2690_v37, %v2691_v47  ;;  %v1442_v41 = vadd.f32 %v1441_v22, %v1273_v26  ;;  %v3140_v60 = vunpack.c.l.b16 %v2819_v6  ;;  %v2053_v24 = vand.u32 15, %v1989_v38  ;;  %v13371_v37 = vld [vmem:[#allocation22_spill] sm:$0xff] }
 0x2de   :  { %v1778_v9 = vadd.f32 %v1777_v0, %v1609_v63  ;;  %v2820_v34 = vpack.c.bf16 %v2717_v4, %v2717_v4  ;;  %v10680_v55 = vpack.c.b16 %v3333_v36, %v3332_v43  ;;  %v1276_v18 = vadd.f32 %v10463_v7, %v13371_v37  ;;  %v13373_v7 = vld [vmem:[#allocation48_spill] sm:$0xff] }
 0x2df   :  { %v3012_v10 = vpack.c.bf16 %v2910_v62, %v2910_v62  ;;  %vm2181_vm13 = vcmp.eq.s32.totalorder %v2053_v24, 15  ;;  %v10698_v24 = vld [vmem:[%s13054_s2] ss:$0 sm:$0xff] }
 0x2e0   :  { %13369 = vst [vmem:[#allocation21_spill] sm:$0xff] %v10680_v55  ;;  %v1859_v52 = vmax.f32 %v1778_v9, 0.0  ;;  %v3141_v57 = vunpack.c.l.b16 %v2820_v34  ;;  %v13372_v9 = vld [vmem:[#allocation46_spill] sm:$0xff] }
 0x2e2   :  { %v2628_v3 = vsel %vm2436_vm12, 0.0, %v1859_v52  ;;  %v2692_v59 = vrot.slane %v1859_v52, 7  ;;  %v1610_v40 = vpop.f32.mrf.mxu2  ;;  %v10682_v31 = vpack.c.b16 %v3141_v57, %v3140_v60  ;;  %v1990_v60 = vadd.s32 432, %v10053_v25 }
 0x2e3   :  { %v2885_v30 = vrot.slane %v2628_v3, 1  ;;  %v1611_v26 = vadd.f32 %v1610_v40, %v1442_v41  ;;  %v3524_v41 = vunpack.c.l.b16 %v3012_v10  ;;  %v1923_v38 = vpack.c.bf16 %v1859_v52, %v1859_v52 }
 0x2e4   :  { %13370 = vst [vmem:[#allocation104_spill] sm:$0xff] %v10682_v31  ;;  %v2716_v0 = vsel %vm2704_vm2, %v2691_v47, %v2692_v59  ;;  %v1444_v22 = vpop.f32.mrf.mxu1  ;;  %v2054_v37 = vand.u32 15, %v1990_v60 }
 0x2e5   :  { %v1779_v63 = vpop.f32.mrf.mxu3  ;;  %v2909_v34 = vsel %vm2897_vm3, %v2884_v61, %v2885_v30  ;;  %v1445_v36 = vadd.f32 %v1444_v22, %v1276_v18  ;;  %v9607_v18 = vld [vmem:[#allocation7 + $0x18] sm:$0xff] }
 0x2e6   :  { %v1780_v43 = vadd.f32 %v1779_v63, %v1611_v26  ;;  %v3013_v4 = vpack.c.bf16 %v2909_v34, %v2909_v34  ;;  %v13375_v63 = vld [vmem:[#allocation23_spill] sm:$0xff]  ;;  %3847 = vmatpush.bf16.msrb.mxu0 %v9607_v18  ;;  %vm2438_vm14 = vcmp.eq.s32.totalorder %v2054_v37, 0 }
 0x2e7   :  { %4035 = vmatmul.bf16.gmra.mxu1 %v13372_v9  ;;  %4204 = vmatmul.bf16.gmra.mxu2 %v13373_v7  ;;  %v1278_v22 = vadd.f32 %v10698_v24, %v13375_v63  ;;  %v1991_v7 = vadd.s32 440, %v10053_v25 }
 0x2e8   :  { %v1860_v6 = vmax.f32 %v1780_v43, 0.0  ;;  %v3525_v62 = vunpack.c.l.b16 %v3013_v4  ;;  %v3334_v4 = vunpack.c.l.b16 %v1923_v38 }
 0x2ea   :  { %v2373_v57 = vsel %vm2181_vm13, 0.0, %v1860_v6  ;;  %v2886_v47 = vrot.slane %v1860_v6, 1  ;;  %v10693_v3 = vpack.c.b16 %v3525_v62, %v3524_v41  ;;  %v1613_v61 = vpop.f32.mrf.mxu2  ;;  %v1924_v26 = vpack.c.bf16 %v1860_v6, %v1860_v6 }
 0x2eb   :  { %v2693_v40 = vrot.slane %v2373_v57, 7  ;;  %v1614_v10 = vadd.f32 %v1613_v61, %v1445_v36  ;;  %v2821_v6 = vpack.c.bf16 %v2716_v0, %v2716_v0 }
 0x2ec   :  { %13374 = vst [vmem:[#allocation22_spill] sm:$0xff] %v10693_v3  ;;  %v2908_v52 = vsel %vm2897_vm3, %v2885_v30, %v2886_v47  ;;  %v1446_v43 = vpop.f32.mrf.mxu1  ;;  %v3335_v41 = vunpack.c.l.b16 %v1924_v26  ;;  %v2055_v26 = vand.u32 15, %v1991_v7 }
 0x2ed   :  { %v1782_v34 = vpop.f32.mrf.mxu3  ;;  %v2715_v60 = vsel %vm2704_vm2, %v2692_v59, %v2693_v40  ;;  %v1447_v57 = vadd.f32 %v1446_v43, %v1278_v22  ;;  %v3142_v31 = vunpack.c.l.b16 %v2821_v6  ;;  %v13378_v59 = vld [vmem:[#allocation24_spill] sm:$0xff]  ;;  %v3014_v37 = vpack.c.bf16 %v2908_v52, %v2908_v52  ;;  %v13379_v6 = vld [vmem:[#allocation49_spill] sm:$0xff] }
 0x2ee   :  { %v1783_v62 = vadd.f32 %v1782_v34, %v1614_v10  ;;  %v2822_v9 = vpack.c.bf16 %v2715_v60, %v2715_v60  ;;  %v10707_v63 = vpack.c.b16 %v3335_v41, %v3334_v4  ;;  %v1281_v0 = vadd.f32 %v10698_v24, %v13378_v59 }
 0x2ef   :  { %vm2183_vm15 = vcmp.eq.s32.totalorder %v2055_v26, 15  ;;  %v13382_v26 = vld [vmem:[#allocation25_spill] sm:$0xff] }
 0x2f0   :  { %13376 = vst [vmem:[#allocation23_spill] sm:$0xff] %v10707_v63  ;;  %v1861_v36 = vmax.f32 %v1783_v62, 0.0  ;;  %v3143_v61 = vunpack.c.l.b16 %v2822_v9  ;;  %v13380_v62 = vld [vmem:[#allocation51_spill] sm:$0xff] }
 0x2f2   :  { %v2630_v30 = vsel %vm2438_vm14, 0.0, %v1861_v36  ;;  %v2694_v3 = vrot.slane %v1861_v36, 7  ;;  %v1615_v38 = vpop.f32.mrf.mxu2  ;;  %v10709_v55 = vpack.c.b16 %v3143_v61, %v3142_v31  ;;  %v1992_v31 = vadd.s32 448, %v10053_v25 }
 0x2f3   :  { %v2887_v18 = vrot.slane %v2630_v30, 1  ;;  %v1616_v22 = vadd.f32 %v1615_v38, %v1447_v57  ;;  %v3526_v57 = vunpack.c.l.b16 %v3014_v37  ;;  %v1925_v61 = vpack.c.bf16 %v1861_v36, %v1861_v36 }
 0x2f4   :  { %13377 = vst [vmem:[#allocation105_spill] sm:$0xff] %v10709_v55  ;;  %v2714_v34 = vsel %vm2704_vm2, %v2693_v40, %v2694_v3  ;;  %v1449_v43 = vpop.f32.mrf.mxu1 }
 0x2f5   :  { %v1784_v10 = vpop.f32.mrf.mxu3  ;;  %v2907_v9 = vsel %vm2897_vm3, %v2886_v47, %v2887_v18  ;;  %v1450_v41 = vadd.f32 %v1449_v43, %v1281_v0  ;;  %v9606_v0 = vld [vmem:[#allocation7 + $0x10] sm:$0xff]  ;;  %v1283_v43 = vadd.f32 %v10698_v24, %v13382_v26  ;;  %v3336_v36 = vunpack.c.l.b16 %v1925_v61 }
 0x2f6   :  { %v1785_v4 = vadd.f32 %v1784_v10, %v1616_v22  ;;  %v3015_v60 = vpack.c.bf16 %v2907_v9, %v2907_v9  ;;  %v2056_v22 = vand.u32 15, %v1992_v31  ;;  %3848 = vmatpush.bf16.msrb.mxu0 %v9606_v0 }
 0x2f7   :  { %4040 = vmatmul.bf16.gmra.mxu1 %v13379_v6  ;;  %4209 = vmatmul.bf16.gmra.mxu2 %v13380_v62 }
 0x2f8   :  { %v1862_v7 = vmax.f32 %v1785_v4, 0.0  ;;  %v3527_v52 = vunpack.c.l.b16 %v3015_v60  ;;  %vm2440_vm0 = vcmp.eq.s32.totalorder %v2056_v22, 0  ;;  %v9587_v22 = vld [vmem:[#allocation7 + $0xf8] sm:$0xff] }
 0x2f9   :  { %4750 = vmatpush.bf16.msra.mxu3 %v9587_v22  ;;  %v13388_v22 = vld [vmem:[#allocation27_spill] sm:$0xff] }
 0x2fa   :  { %v2375_v30 = vsel %vm2183_vm15, 0.0, %v1862_v7  ;;  %v2888_v40 = vrot.slane %v1862_v7, 1  ;;  %v10720_v38 = vpack.c.b16 %v3527_v52, %v3526_v57  ;;  %v1618_v47 = vpop.f32.mrf.mxu2  ;;  %v1926_v10 = vpack.c.bf16 %v1862_v7, %v1862_v7 }
 0x2fb   :  { %v2695_v59 = vrot.slane %v2375_v30, 7  ;;  %v1619_v9 = vadd.f32 %v1618_v47, %v1450_v41  ;;  %v2823_v52 = vpack.c.bf16 %v2714_v34, %v2714_v34  ;;  %v1993_v7 = vadd.s32 456, %v10053_v25 }
 0x2fc   :  { %13381 = vst [vmem:[#allocation24_spill] sm:$0xff] %v10720_v38  ;;  %v2906_v6 = vsel %vm2897_vm3, %v2887_v18, %v2888_v40  ;;  %v1451_v37 = vpop.f32.mrf.mxu1  ;;  %v3337_v60 = vunpack.c.l.b16 %v1926_v10 }
 0x2fd   :  { %v1787_v4 = vpop.f32.mrf.mxu3  ;;  %v2713_v57 = vsel %vm2704_vm2, %v2694_v3, %v2695_v59  ;;  %v1452_v31 = vadd.f32 %v1451_v37, %v1283_v43  ;;  %v3144_v55 = vunpack.c.l.b16 %v2823_v52  ;;  %v2057_v10 = vand.u32 15, %v1993_v7  ;;  %v13385_v3 = vld [vmem:[#allocation26_spill] sm:$0xff]  ;;  %v13386_v7 = vld [vmem:[#allocation52_spill] sm:$0xff] }
 0x2fe   :  { %v1788_v30 = vadd.f32 %v1787_v4, %v1619_v9  ;;  %v2824_v62 = vpack.c.bf16 %v2713_v57, %v2713_v57  ;;  %v10729_v26 = vpack.c.b16 %v3337_v60, %v3336_v36  ;;  %v1286_v34 = vadd.f32 %v10698_v24, %v13385_v3 }
 0x2ff   :  { %v3016_v4 = vpack.c.bf16 %v2906_v6, %v2906_v6  ;;  %vm2185_vm1 = vcmp.eq.s32.totalorder %v2057_v10, 15  ;;  %v9586_v6 = vld [vmem:[#allocation7 + $0xf0] sm:$0xff]  ;;  %v9605_v10 = vld [vmem:[#allocation7 + $0x8] sm:$0xff] }
 0x300   :  { %13383 = vst [vmem:[#allocation25_spill] sm:$0xff] %v10729_v26  ;;  %v1863_v41 = vmax.f32 %v1788_v30, 0.0  ;;  %v3145_v47 = vunpack.c.l.b16 %v2824_v62  ;;  %4751 = vmatpush.bf16.msra.mxu3 %v9586_v6  ;;  %3849 = vmatpush.bf16.msrb.mxu0 %v9605_v10 }
 0x302   :  { %v2632_v18 = vsel %vm2440_vm0, 0.0, %v1863_v41  ;;  %v2696_v38 = vrot.slane %v1863_v41, 7  ;;  %v1620_v61 = vpop.f32.mrf.mxu2  ;;  %v10731_v63 = vpack.c.b16 %v3145_v47, %v3144_v55  ;;  %v1994_v55 = vadd.s32 464, %v10053_v25 }
 0x303   :  { %v2889_v0 = vrot.slane %v2632_v18, 1  ;;  %v1621_v43 = vadd.f32 %v1620_v61, %v1452_v31  ;;  %v3528_v31 = vunpack.c.l.b16 %v3016_v4 }
 0x304   :  { %13384 = vst [vmem:[#allocation106_spill] sm:$0xff] %v10731_v63  ;;  %v2712_v37 = vsel %vm2704_vm2, %v2695_v59, %v2696_v38  ;;  %v1454_v36 = vpop.f32.mrf.mxu1  ;;  %v1927_v59 = vpack.c.bf16 %v1863_v41, %v1863_v41 }
 0x305   :  { %v1789_v9 = vpop.f32.mrf.mxu3  ;;  %v2905_v62 = vsel %vm2897_vm3, %v2888_v40, %v2889_v0  ;;  %v1455_v57 = vadd.f32 %v1454_v36, %v1286_v34  ;;  %v1288_v36 = vadd.f32 %v10698_v24, %v13388_v22 }
 0x306   :  { %v1790_v60 = vadd.f32 %v1789_v9, %v1621_v43  ;;  %v3017_v52 = vpack.c.bf16 %v2905_v62, %v2905_v62  ;;  %v2058_v43 = vand.u32 15, %v1994_v55 }
 0x307   :  { %4045 = vmatmul.bf16.gmra.mxu1 %v13386_v7  ;;  %4214 = vmatmul.bf16.gmra.mxu2 %v10228_v16  ;;  %v9585_v7 = vld [vmem:[#allocation7 + $0xe8] sm:$0xff]  ;;  %v9584_v16 = vld [vmem:[#allocation7 + $0xe0] sm:$0xff] }
 0x308   :  { %v1864_v30 = vmax.f32 %v1790_v60, 0.0  ;;  %v3529_v47 = vunpack.c.l.b16 %v3017_v52  ;;  %v3338_v52 = vunpack.c.l.b16 %v1927_v59  ;;  %4752 = vmatpush.bf16.msra.mxu3 %v9585_v7  ;;  %vm2442_vm4 = vcmp.eq.s32.totalorder %v2058_v43, 0 }
 0x30a   :  { %v2377_v18 = vsel %vm2185_vm1, 0.0, %v1864_v30  ;;  %v2890_v61 = vrot.slane %v1864_v30, 1  ;;  %v10742_v40 = vpack.c.b16 %v3529_v47, %v3528_v31  ;;  %v1623_v34 = vpop.f32.mrf.mxu2  ;;  %v1928_v9 = vpack.c.bf16 %v1864_v30, %v1864_v30 }
 0x30b   :  { %v2697_v3 = vrot.slane %v2377_v18, 7  ;;  %v1624_v62 = vadd.f32 %v1623_v34, %v1455_v57  ;;  %v2825_v47 = vpack.c.bf16 %v2712_v37, %v2712_v37  ;;  %v1995_v57 = vadd.s32 472, %v10053_v25 }
 0x30c   :  { %13387 = vst [vmem:[#allocation26_spill] sm:$0xff] %v10742_v40  ;;  %v2904_v4 = vsel %vm2897_vm3, %v2889_v0, %v2890_v61  ;;  %v1456_v41 = vpop.f32.mrf.mxu1  ;;  %v3339_v6 = vunpack.c.l.b16 %v1928_v9  ;;  %4753 = vmatpush.bf16.msra.mxu3 %v9584_v16 }
 0x30d   :  { %v1792_v60 = vpop.f32.mrf.mxu3  ;;  %v2711_v31 = vsel %vm2704_vm2, %v2696_v38, %v2697_v3  ;;  %v1457_v18 = vadd.f32 %v1456_v41, %v1288_v36  ;;  %v3146_v63 = vunpack.c.l.b16 %v2825_v47  ;;  %v2059_v38 = vand.u32 15, %v1995_v57  ;;  %v13391_v36 = vld [vmem:[#allocation28_spill] sm:$0xff]  ;;  %v13392_v57 = vld [vmem:[#allocation55_spill] sm:$0xff] }
 0x30e   :  { %v1793_v55 = vadd.f32 %v1792_v60, %v1624_v62  ;;  %v2826_v30 = vpack.c.bf16 %v2711_v31, %v2711_v31  ;;  %v10751_v34 = vpack.c.b16 %v3339_v6, %v3338_v52  ;;  %v1291_v7 = vadd.f32 %v10698_v24, %v13391_v36  ;;  %v9583_v60 = vld [vmem:[#allocation7 + $0xd8] sm:$0xff] }
 0x30f   :  { %v3018_v41 = vpack.c.bf16 %v2904_v4, %v2904_v4  ;;  %vm2187_vm5 = vcmp.eq.s32.totalorder %v2059_v38, 15  ;;  %v9604_v38 = vld [vmem:[#allocation7] sm:$0xff] }
 0x310   :  { %13389 = vst [vmem:[#allocation27_spill] sm:$0xff] %v10751_v34  ;;  %v1865_v22 = vmax.f32 %v1793_v55, 0.0  ;;  %v3147_v0 = vunpack.c.l.b16 %v2826_v30  ;;  %4754 = vmatpush.bf16.msra.mxu3 %v9583_v60  ;;  %v13394_v60 = vld [vmem:[#allocation30_spill] sm:$0xff]  ;;  %3850 = vmatpush.bf16.msrb.mxu0 %v9604_v38 }
 0x311   :  { %v3530_v4 = vunpack.c.l.b16 %v3018_v41 }
 0x312   :  { %v2634_v10 = vsel %vm2442_vm4, 0.0, %v1865_v22  ;;  %v2698_v59 = vrot.slane %v1865_v22, 7  ;;  %v1625_v40 = vpop.f32.mrf.mxu2  ;;  %v10753_v37 = vpack.c.b16 %v3147_v0, %v3146_v63  ;;  %v1996_v63 = vadd.s32 480, %v10053_v25 }
 0x313   :  { %v2891_v9 = vrot.slane %v2634_v10, 1  ;;  %v1626_v43 = vadd.f32 %v1625_v40, %v1457_v18  ;;  %v9582_v40 = vld [vmem:[#allocation7 + $0xd0] sm:$0xff] }
 0x314   :  { %13390 = vst [vmem:[#allocation107_spill] sm:$0xff] %v10753_v37  ;;  %v2710_v52 = vsel %vm2704_vm2, %v2697_v3, %v2698_v59  ;;  %v1459_v6 = vpop.f32.mrf.mxu1  ;;  %v1929_v3 = vpack.c.bf16 %v1865_v22, %v1865_v22  ;;  %4755 = vmatpush.bf16.msra.mxu3 %v9582_v40 }
 0x315   :  { %v1794_v62 = vpop.f32.mrf.mxu3  ;;  %v2903_v31 = vsel %vm2897_vm3, %v2890_v61, %v2891_v9  ;;  %v1460_v47 = vadd.f32 %v1459_v6, %v1291_v7  ;;  %v1293_v6 = vadd.f32 %v10698_v24, %v13394_v60  ;;  %v2827_v22 = vpack.c.bf16 %v2710_v52, %v2710_v52 }
 0x316   :  { %v1795_v16 = vadd.f32 %v1794_v62, %v1626_v43  ;;  %v3019_v55 = vpack.c.bf16 %v2903_v31, %v2903_v31  ;;  %v2060_v43 = vand.u32 15, %v1996_v63  ;;  %v3340_v40 = vunpack.c.l.b16 %v1929_v3 }
 0x317   :  { %4050 = vmatmul.bf16.gmra.mxu1 %v13392_v57  ;;  %4219 = vmatmul.bf16.gmra.mxu2 %v10253_v32  ;;  %v9581_v57 = vld [vmem:[#allocation7 + $0xc8] sm:$0xff] }
 0x318   :  { %v1866_v30 = vmax.f32 %v1795_v16, 0.0  ;;  %v3531_v18 = vunpack.c.l.b16 %v3019_v55  ;;  %4756 = vmatpush.bf16.msra.mxu3 %v9581_v57  ;;  %vm2444_vm6 = vcmp.eq.s32.totalorder %v2060_v43, 0 }
 0x31a   :  { %v2379_v0 = vsel %vm2187_vm5, 0.0, %v1866_v30  ;;  %v2892_v10 = vrot.slane %v1866_v30, 1  ;;  %v10764_v61 = vpack.c.b16 %v3531_v18, %v3530_v4  ;;  %v1628_v7 = vpop.f32.mrf.mxu2  ;;  %v1930_v62 = vpack.c.bf16 %v1866_v30, %v1866_v30  ;;  %v9580_v30 = vld [vmem:[#allocation7 + $0xc0] sm:$0xff] }
 0x31b   :  { %v2699_v36 = vrot.slane %v2379_v0, 7  ;;  %v1629_v31 = vadd.f32 %v1628_v7, %v1460_v47  ;;  %v1997_v47 = vadd.s32 488, %v10053_v25 }
 0x31c   :  { %13393 = vst [vmem:[#allocation28_spill] sm:$0xff] %v10764_v61  ;;  %v2902_v41 = vsel %vm2897_vm3, %v2891_v9, %v2892_v10  ;;  %v1461_v55 = vpop.f32.mrf.mxu1  ;;  %v3341_v4 = vunpack.c.l.b16 %v1930_v62  ;;  %v3148_v9 = vunpack.c.l.b16 %v2827_v22  ;;  %4757 = vmatpush.bf16.msra.mxu3 %v9580_v30 }
 0x31d   :  { %v1797_v16 = vpop.f32.mrf.mxu3  ;;  %v2709_v18 = vsel %vm2704_vm2, %v2698_v59, %v2699_v36  ;;  %v1462_v0 = vadd.f32 %v1461_v55, %v1293_v6  ;;  %v13397_v6 = vld [vmem:[#allocation32_spill] sm:$0xff]  ;;  %v9595_v55 = vld [vmem:[#allocation7 + $0x138] sm:$0xff] }
 0x31e   :  { %v1798_v63 = vadd.f32 %v1797_v16, %v1629_v31  ;;  %v2828_v32 = vpack.c.bf16 %v2709_v18, %v2709_v18  ;;  %v10773_v7 = vpack.c.b16 %v3341_v4, %v3340_v40  ;;  %v2061_v31 = vand.u32 15, %v1997_v47  ;;  %4919 = vmatpush.bf16.msra.mxu0 %v9595_v55 }
 0x31f   :  { %v1296_v57 = vadd.f32 %v10698_v24, %v13397_v6  ;;  %v3020_v18 = vpack.c.bf16 %v2902_v41, %v2902_v41  ;;  %v1998_v47 = vadd.s32 496, %v10053_v25 }
 0x320   :  { %13395 = vst [vmem:[#allocation30_spill] sm:$0xff] %v10773_v7  ;;  %v1867_v60 = vmax.f32 %v1798_v63, 0.0  ;;  %v3149_v52 = vunpack.c.l.b16 %v2828_v32  ;;  %vm2189_vm7 = vcmp.eq.s32.totalorder %v2061_v31, 15 }
 0x321   :  { %v3532_v41 = vunpack.c.l.b16 %v3020_v18 }
 0x322   :  { %v2636_v37 = vsel %vm2444_vm6, 0.0, %v1867_v60  ;;  %v2700_v38 = vrot.slane %v1867_v60, 7  ;;  %v10775_v3 = vpack.c.b16 %v3149_v52, %v3148_v9  ;;  %v1630_v59 = vpop.f32.mrf.mxu2  ;;  %v1931_v30 = vpack.c.bf16 %v1867_v60, %v1867_v60 }
 0x323   :  { %v2893_v62 = vrot.slane %v2636_v37, 1  ;;  %v1631_v16 = vadd.f32 %v1630_v59, %v1462_v0 }
 0x324   :  { %13396 = vst [vmem:[#allocation108_spill] sm:$0xff] %v10775_v3  ;;  %v2708_v40 = vsel %vm2704_vm2, %v2699_v36, %v2700_v38  ;;  %v1464_v22 = vpop.f32.mrf.mxu1 }
 0x325   :  { %v1799_v43 = vpop.f32.mrf.mxu3  ;;  %v2901_v32 = vsel %vm2897_vm3, %v2892_v10, %v2893_v62  ;;  %v1465_v63 = vadd.f32 %v1464_v22, %v1296_v57 }
 0x326   :  { %v1800_v4 = vadd.f32 %v1799_v43, %v1631_v16  ;;  %v3021_v37 = vpack.c.bf16 %v2901_v32, %v2901_v32  ;;  %v2062_v16 = vand.u32 15, %v1998_v47  ;;  %v3342_v43 = vunpack.c.l.b16 %v1931_v30  ;;  %v13400_v47 = vld [vmem:[#allocation34_spill] sm:$0xff] }
 0x327   :  { %4055 = vmatmul.bf16.gmra.mxu1 %v10262_v35  ;;  %4224 = vmatmul.bf16.gmra.mxu2 %v10273_v8  ;;  %v2829_v32 = vpack.c.bf16 %v2708_v40, %v2708_v40 }
 0x328   :  { %v1868_v9 = vmax.f32 %v1800_v4, 0.0  ;;  %v3533_v0 = vunpack.c.l.b16 %v3021_v37  ;;  %vm2446_vm8 = vcmp.eq.s32.totalorder %v2062_v16, 0 }
 0x32a   :  { %v2381_v36 = vsel %vm2189_vm7, 0.0, %v1868_v9  ;;  %v2894_v52 = vrot.slane %v1868_v9, 1  ;;  %v10786_v59 = vpack.c.b16 %v3533_v0, %v3532_v41  ;;  %v1932_v10 = vpack.c.bf16 %v1868_v9, %v1868_v9  ;;  %v1633_v57 = vpop.f32.mrf.mxu2 }
 0x32b   :  { %v2701_v6 = vrot.slane %v2381_v36, 7  ;;  %v1634_v60 = vadd.f32 %v1633_v57, %v1465_v63  ;;  %v1999_v9 = vadd.s32 504, %v10053_v25  ;;  %v1298_v63 = vadd.f32 %v10698_v24, %v13400_v47 }
 0x32c   :  { %13398 = vst [vmem:[#allocation32_spill] sm:$0xff] %v10786_v59  ;;  %v3343_v55 = vunpack.c.l.b16 %v1932_v10  ;;  %v2900_v22 = vsel %vm2897_vm3, %v2893_v62, %v2894_v52  ;;  %v1466_v4 = vpop.f32.mrf.mxu1  ;;  %v3150_v0 = vunpack.c.l.b16 %v2829_v32 }
 0x32d   :  { %v1802_v31 = vpop.f32.mrf.mxu3  ;;  %v2707_v18 = vsel %vm2704_vm2, %v2700_v38, %v2701_v6  ;;  %v1467_v40 = vadd.f32 %v1466_v4, %v1298_v63 }
 0x32e   :  { %v1803_v37 = vadd.f32 %v1802_v31, %v1634_v60  ;;  %v10792_v35 = vpack.c.b16 %v3343_v55, %v3342_v43  ;;  %v2830_v41 = vpack.c.bf16 %v2707_v18, %v2707_v18  ;;  %v2063_v60 = vand.u32 15, %v1999_v9 }
 0x32f   :  { %v3022_v31 = vpack.c.bf16 %v2900_v22, %v2900_v22 }
 0x330   :  { %13399 = vst [vmem:[#allocation109_spill] sm:$0xff] %v10792_v35  ;;  %v1869_v30 = vmax.f32 %v1803_v37, 0.0  ;;  %v3151_v36 = vunpack.c.l.b16 %v2830_v41  ;;  %vm2191_vm9 = vcmp.eq.s32.totalorder %v2063_v60, 15 }
 0x331   :  { %v3534_v9 = vunpack.c.l.b16 %v3022_v31 }
 0x332   :  { %v2638_v10 = vsel %vm2446_vm8, 0.0, %v1869_v30  ;;  %v2702_v62 = vrot.slane %v1869_v30, 7  ;;  %v10797_v57 = vpack.c.b16 %v3151_v36, %v3150_v0  ;;  %v1635_v38 = vpop.f32.mrf.mxu2  ;;  %v1933_v41 = vpack.c.bf16 %v1869_v30, %v1869_v30 }
 0x333   :  { %v2895_v8 = vrot.slane %v2638_v10, 1  ;;  %v1636_v43 = vadd.f32 %v1635_v38, %v1467_v40 }
 0x334   :  { %13401 = vst [vmem:[#allocation34_spill] sm:$0xff] %v10797_v57  ;;  %v2706_v16 = vsel %vm2704_vm2, %v2701_v6, %v2702_v62  ;;  %v10801_v18 = vpop.f32.mrf.mxu1  ;;  %v3344_v30 = vunpack.c.l.b16 %v1933_v41 }
 0x335   :  { %v1804_v55 = vpop.f32.mrf.mxu3  ;;  %v2899_v24 = vsel %vm2897_vm3, %v2894_v52, %v2895_v8  ;;  %v13403_v52 = vld [vmem:[#allocation36_spill] sm:$0xff] }
 0x336   :  { %v1805_v32 = vadd.f32 %v1804_v55, %v1636_v43  ;;  %v3023_v37 = vpack.c.bf16 %v2899_v24, %v2899_v24  ;;  %v2770_v40 = vpack.c.bf16 %v13403_v52, %v13403_v52  ;;  %v13404_v43 = vld [vmem:[#allocation38_spill] sm:$0xff]  ;;  %v2831_v55 = vpack.c.bf16 %v2706_v16, %v2706_v16 }
 0x337   :  { %4060 = vmatmul.bf16.gmra.mxu1 %v10287_v42  ;;  %4229 = vmatmul.bf16.gmra.mxu2 %v10298_v21 }
 0x338   :  { %v1870_v4 = vmax.f32 %v1805_v32, 0.0  ;;  %v3535_v22 = vunpack.c.l.b16 %v3023_v37  ;;  %v13405_v32 = vld [vmem:[#allocation35_spill] sm:$0xff]  ;;  %v3091_v16 = vunpack.c.l.b16 %v2770_v40 }
 0x339   :  { %v13406_v37 = vrot.slane %v13405_v32, 7 }
 0x33a   :  { %v2383_v47 = vsel %vm2191_vm9, 0.0, %v1870_v4  ;;  %v2896_v63 = vrot.slane %v1870_v4, 1  ;;  %v10807_v6 = vpack.c.b16 %v3535_v22, %v3534_v9  ;;  %v1934_v0 = vpack.c.bf16 %v1870_v4, %v1870_v4  ;;  %v10809_v10 = vpop.f32.mrf.mxu2 }
 0x33b   :  { %v2703_v36 = vrot.slane %v2383_v47, 7 }
 0x33c   :  { %13402 = vst [vmem:[#allocation110_spill] sm:$0xff] %v10807_v6  ;;  %v3345_v38 = vunpack.c.l.b16 %v1934_v0  ;;  %v2898_v60 = vsel %vm2897_vm3, %v2895_v8, %v2896_v63  ;;  %v2961_v31 = vsel %vm2897_vm3, %v2896_v63, %v13404_v43  ;;  %v10818_v24 = vpop.f32.mrf.mxu1  ;;  %v3152_v43 = vunpack.c.l.b16 %v2831_v55  ;;  %v13412_v55 = vld [vmem:[#allocation44_spill] sm:$0xff] }
 0x33d   :  { %v2768_v4 = vsel %vm2704_vm2, %v2703_v36, %v13406_v37  ;;  %v3024_v9 = vpack.c.bf16 %v2898_v60, %v2898_v60  ;;  %v3025_v22 = vpack.c.bf16 %v2961_v31, %v2961_v31  ;;  %v2705_v41 = vsel %vm2704_vm2, %v2702_v62, %v2703_v36 }
 0x33e   :  { %v2769_v47 = vpack.c.bf16 %v2768_v4, %v2768_v4  ;;  %v10826_v0 = vpack.c.b16 %v3345_v38, %v3344_v30  ;;  %v2832_v8 = vpack.c.bf16 %v2705_v41, %v2705_v41  ;;  %v9594_v4 = vld [vmem:[#allocation7 + $0x130] sm:$0xff] }
 0x33f   :  { %v3536_v52 = vunpack.c.l.b16 %v3024_v9  ;;  %v3537_v42 = vunpack.c.l.b16 %v3025_v22  ;;  %4920 = vmatpush.bf16.msra.mxu0 %v9594_v4  ;;  %v13414_v4 = vld [vmem:[#allocation50_spill] sm:$0xff] }
 0x340   :  { %13407 = vst [vmem:[#allocation36_spill] sm:$0xff] %v10826_v0  ;;  %v3090_v63 = vunpack.c.l.b16 %v2769_v47  ;;  %v3153_v21 = vunpack.c.l.b16 %v2832_v8  ;;  %v13413_v8 = vld [vmem:[#allocation47_spill] sm:$0xff] }
 0x341   :  { %v10828_v57 = vpack.c.b16 %v3537_v42, %v3536_v52 }
 0x342   :  { %v10830_v32 = vpack.c.b16 %v3091_v16, %v3090_v63  ;;  %v10832_v37 = vpack.c.b16 %v3153_v21, %v3152_v43  ;;  %v10834_v60 = vpop.f32.mrf.mxu2  ;;  %v13411_v21 = vld [vmem:[#allocation41_spill] sm:$0xff] }
 0x343   :  { %13408 = vst [vmem:[#allocation38_spill] sm:$0xff] %v10828_v57 }
 0x344   :  { %13409 = vst [vmem:[#allocation35_spill] sm:$0xff] %v10830_v32  ;;  %3851 = vmatmul.bf16.vlgmr.msrb.gmra.mxu0 %v10830_v32  ;;  %4758 = vmatmul.bf16.vlgmr.msra.gmra.mxu3 %v10830_v32  ;;  %v10838_v25 = vpop.f32.mrf.mxu1 }
 0x345   :  { %13410 = vst [vmem:[#allocation111_spill] sm:$0xff] %v10832_v37  ;;  %v9593_v37 = vld [vmem:[#allocation7 + $0x128] sm:$0xff] }
 0x346   :  { %4921 = vmatpush.bf16.msra.mxu0 %v9593_v37 }
 0x347   :  { %4065 = vmatmul.bf16.gmra.mxu1 %v10307_v28  ;;  %4234 = vmatmul.bf16.gmra.mxu2 %v10318_v29  ;;  %v13416_v29 = vld [vmem:[#allocation56_spill] sm:$0xff] }
 0x34a   :  { %v10842_v62 = vpop.f32.mrf.mxu2 }
 0x34c   :  { %v10844_v42 = vpop.f32.mrf.mxu1 }
 0x352   :  { %v10846_v36 = vpop.f32.mrf.mxu2 }
 0x354   :  { %3856 = vmatmul.bf16.gmra.mxu0 %v13411_v21  ;;  %4763 = vmatmul.bf16.gmra.mxu3 %v13411_v21  ;;  %v10850_v40 = vpop.f32.mrf.mxu1 }
 0x357   :  { %4070 = vmatmul.bf16.gmra.mxu1 %v10327_v53  ;;  %4239 = vmatmul.bf16.gmra.mxu2 %v10338_v2 }
 0x35a   :  { %v10854_v30 = vpop.f32.mrf.mxu2 }
 0x35c   :  { %v10856_v38 = vpop.f32.mrf.mxu1 }
 0x362   :  { %v10858_v31 = vpop.f32.mrf.mxu2 }
 0x364   :  { %3861 = vmatmul.bf16.gmra.mxu0 %v13412_v55  ;;  %4768 = vmatmul.bf16.gmra.mxu3 %v13412_v55  ;;  %v10862_v9 = vpop.f32.mrf.mxu1  ;;  %v13418_v55 = vld [vmem:[#allocation62_spill] sm:$0xff] }
 0x367   :  { %4075 = vmatmul.bf16.gmra.mxu1 %v10347_v45  ;;  %4244 = vmatmul.bf16.gmra.mxu2 %v10358_v20 }
 0x36a   :  { %v10866_v22 = vpop.f32.mrf.mxu2 }
 0x36c   :  { %v10868_v41 = vpop.f32.mrf.mxu1 }
 0x372   :  { %v10870_v47 = vpop.f32.mrf.mxu2 }
 0x374   :  { %3866 = vmatmul.bf16.gmra.mxu0 %v13413_v8  ;;  %4773 = vmatmul.bf16.gmra.mxu3 %v13413_v8  ;;  %v10874_v52 = vpop.f32.mrf.mxu1 }
 0x377   :  { %4080 = vmatmul.bf16.gmra.mxu1 %v10367_v15  ;;  %4249 = vmatmul.bf16.gmra.mxu2 %v10378_v27  ;;  %v13415_v27 = vld [vmem:[#allocation53_spill] sm:$0xff] }
 0x37a   :  { %v10878_v63 = vpop.f32.mrf.mxu2 }
 0x37c   :  { %v10880_v16 = vpop.f32.mrf.mxu1 }
 0x382   :  { %v10882_v43 = vpop.f32.mrf.mxu2 }
 0x384   :  { %3871 = vmatmul.bf16.gmra.mxu0 %v13414_v4  ;;  %4778 = vmatmul.bf16.gmra.mxu3 %v13414_v4  ;;  %v10886_v45 = vpop.f32.mrf.mxu1  ;;  %v13417_v4 = vld [vmem:[#allocation59_spill] sm:$0xff] }
 0x387   :  { %4085 = vmatmul.bf16.gmra.mxu1 %v10387_v33  ;;  %4254 = vmatmul.bf16.gmra.mxu2 %v10398_v23 }
 0x38a   :  { %v10890_v53 = vpop.f32.mrf.mxu2 }
 0x38c   :  { %v10892_v15 = vpop.f32.mrf.mxu1 }
 0x392   :  { %v10894_v28 = vpop.f32.mrf.mxu2 }
 0x394   :  { %3876 = vmatmul.bf16.gmra.mxu0 %v13415_v27  ;;  %4783 = vmatmul.bf16.gmra.mxu3 %v13415_v27  ;;  %v10898_v20 = vpop.f32.mrf.mxu1 }
 0x397   :  { %4090 = vmatmul.bf16.gmra.mxu1 %v10407_v51  ;;  %4259 = vmatmul.bf16.gmra.mxu2 %v10418_v48 }
 0x39a   :  { %v10902_v2 = vpop.f32.mrf.mxu2 }
 0x39c   :  { %v10904_v33 = vpop.f32.mrf.mxu1 }
 0x3a2   :  { %v10906_v23 = vpop.f32.mrf.mxu2 }
 0x3a4   :  { %3881 = vmatmul.bf16.gmra.mxu0 %v13416_v29  ;;  %4788 = vmatmul.bf16.gmra.mxu3 %v13416_v29  ;;  %v10910_v3 = vpop.f32.mrf.mxu1 }
 0x3a7   :  { %4095 = vmatmul.bf16.gmra.mxu1 %v10427_v12  ;;  %4264 = vmatmul.bf16.gmra.mxu2 %v10438_v14 }
 0x3aa   :  { %v10914_v51 = vpop.f32.mrf.mxu2 }
 0x3ac   :  { %v10916_v48 = vpop.f32.mrf.mxu1 }
 0x3b2   :  { %v10918_v27 = vpop.f32.mrf.mxu2 }
 0x3b4   :  { %3886 = vmatmul.bf16.gmra.mxu0 %v13417_v4  ;;  %4793 = vmatmul.bf16.gmra.mxu3 %v13417_v4  ;;  %v10922_v8 = vpop.f32.mrf.mxu1 }
 0x3b7   :  { %4100 = vmatmul.bf16.gmra.mxu1 %v10447_v39  ;;  %4269 = vmatmul.bf16.gmra.mxu2 %v10458_v19 }
 0x3ba   :  { %v10926_v37 = vpop.f32.mrf.mxu2 }
 0x3bc   :  { %v10928_v12 = vpop.f32.mrf.mxu1 }
 0x3c1   :  { %v3852_v14 = vpop.f32.mrf.mxu0 }
 0x3c2   :  { %v10930_v29 = vpop.f32.mrf.mxu2  ;;  %v4022_v6 = vadd.f32 %v10801_v18, %v3852_v14 }
 0x3c4   :  { %3891 = vmatmul.bf16.gmra.mxu0 %v13418_v55  ;;  %4798 = vmatmul.bf16.gmra.mxu3 %v13418_v55  ;;  %v10934_v21 = vpop.f32.mrf.mxu1  ;;  %v13421_v55 = vld [vmem:[#allocation65_spill] sm:$0xff] }
 0x3c7   :  { %v10936_v4 = vpop.f32.mrf.mxu3  ;;  %4105 = vmatmul.bf16.gmra.mxu1 %v10472_v11  ;;  %4274 = vmatmul.bf16.gmra.mxu2 %v10483_v54  ;;  %v4191_v11 = vadd.f32 %v10809_v10, %v4022_v6  ;;  %v13424_v10 = vld [vmem:[#allocation68_spill] sm:$0xff] }
 0x3c8   :  { %13419 = vst [vmem:[#allocation112_spill] sm:$0xff] %v10936_v4 }
 0x3c9   :  { %v3854_v39 = vpop.f32.mrf.mxu0 }
 0x3ca   :  { %v10940_v19 = vpop.f32.mrf.mxu2  ;;  %v4024_v14 = vadd.f32 %v10818_v24, %v3854_v39 }
 0x3cc   :  { %v10942_v32 = vpop.f32.mrf.mxu1 }
 0x3cf   :  { %v10944_v57 = vpop.f32.mrf.mxu3 }
 0x3d0   :  { %13420 = vst [vmem:[#allocation113_spill] sm:$0xff] %v10944_v57 }
 0x3d1   :  { %v3857_v0 = vpop.f32.mrf.mxu0 }
 0x3d2   :  { %v10947_v35 = vpop.f32.mrf.mxu2 }
 0x3d4   :  { %3896 = vmatmul.bf16.gmra.mxu0 %v13421_v55  ;;  %4803 = vmatmul.bf16.gmra.mxu3 %v13421_v55  ;;  %v10951_v4 = vpop.f32.mrf.mxu1  ;;  %v4193_v55 = vadd.f32 %v10834_v60, %v4024_v14 }
 0x3d7   :  { %v4764_v54 = vpop.f32.mrf.mxu3  ;;  %4110 = vmatmul.bf16.gmra.mxu1 %v10492_v49  ;;  %4279 = vmatmul.bf16.gmra.mxu2 %v10513_v44  ;;  %v9592_v49 = vld [vmem:[#allocation7 + $0x120] sm:$0xff] }
 0x3d8   :  { %v10954_v59 = vadd.f32 %v4764_v54, %v4191_v11  ;;  %v4027_v11 = vadd.f32 %v10838_v25, %v3857_v0  ;;  %4922 = vmatpush.bf16.msra.mxu0 %v9592_v49 }
 0x3d9   :  { %v3859_v57 = vpop.f32.mrf.mxu0 }
 0x3da   :  { %13422 = vst [vmem:[#allocation114_spill] sm:$0xff] %v10954_v59  ;;  %v10959_v18 = vpop.f32.mrf.mxu2  ;;  %v4196_v24 = vadd.f32 %v10842_v62, %v4027_v11  ;;  %v4029_v25 = vadd.f32 %v10844_v42, %v3859_v57  ;;  %v13428_v11 = vld [vmem:[#allocation71_spill] sm:$0xff] }
 0x3dc   :  { %v10961_v7 = vpop.f32.mrf.mxu1 }
 0x3df   :  { %v4766_v61 = vpop.f32.mrf.mxu3 }
 0x3e0   :  { %v10964_v34 = vadd.f32 %v4766_v61, %v4193_v55  ;;  %v13426_v61 = vld [vmem:[#allocation94_spill] sm:$0xff] }
 0x3e1   :  { %v3862_v6 = vpop.f32.mrf.mxu0 }
 0x3e2   :  { %13423 = vst [vmem:[#allocation115_spill] sm:$0xff] %v10964_v34  ;;  %v10967_v54 = vpop.f32.mrf.mxu2  ;;  %v4198_v34 = vadd.f32 %v10846_v36, %v4029_v25 }
 0x3e4   :  { %3901 = vmatmul.bf16.gmra.mxu0 %v13424_v10  ;;  %4808 = vmatmul.bf16.gmra.mxu3 %v13424_v10  ;;  %v10971_v39 = vpop.f32.mrf.mxu1 }
 0x3e7   :  { %v4769_v44 = vpop.f32.mrf.mxu3  ;;  %4115 = vmatmul.bf16.gmra.mxu1 %v13426_v61  ;;  %4284 = vmatmul.bf16.gmra.mxu2 %v10557_v46 }
 0x3e8   :  { %v10974_v60 = vadd.f32 %v4769_v44, %v4196_v24  ;;  %v4032_v44 = vadd.f32 %v10850_v40, %v3862_v6 }
 0x3e9   :  { %v3864_v0 = vpop.f32.mrf.mxu0 }
 0x3ea   :  { %13425 = vst [vmem:[#allocation116_spill] sm:$0xff] %v10974_v60  ;;  %v10979_v55 = vpop.f32.mrf.mxu2  ;;  %v4201_v57 = vadd.f32 %v10854_v30, %v4032_v44 }
 0x3ec   :  { %v10981_v14 = vpop.f32.mrf.mxu1 }
 0x3ef   :  { %v4771_v59 = vpop.f32.mrf.mxu3 }
 0x3f0   :  { %v10984_v10 = vadd.f32 %v4771_v59, %v4198_v34  ;;  %v4034_v59 = vadd.f32 %v10856_v38, %v3864_v0 }
 0x3f1   :  { %v3867_v49 = vpop.f32.mrf.mxu0 }
 0x3f2   :  { %13427 = vst [vmem:[#allocation117_spill] sm:$0xff] %v10984_v10  ;;  %v10987_v62 = vpop.f32.mrf.mxu2  ;;  %v4203_v6 = vadd.f32 %v10858_v31, %v4034_v59  ;;  %v4037_v44 = vadd.f32 %v10862_v9, %v3867_v49  ;;  %v13433_v31 = vld [vmem:[#allocation29_spill] sm:$0xff] }
 0x3f4   :  { %3906 = vmatmul.bf16.gmra.mxu0 %v13428_v11  ;;  %4813 = vmatmul.bf16.gmra.mxu3 %v13428_v11  ;;  %v10991_v24 = vpop.f32.mrf.mxu1  ;;  %v4206_v38 = vadd.f32 %v10866_v22, %v4037_v44 }
 0x3f7   :  { %v4774_v42 = vpop.f32.mrf.mxu3  ;;  %4120 = vmatmul.bf16.gmra.mxu1 %v10572_v5  ;;  %4289 = vmatmul.bf16.gmra.mxu2 %v10585_v50 }
 0x3f8   :  { %v10994_v61 = vadd.f32 %v4774_v42, %v4201_v57  ;;  %v13431_v42 = vld [vmem:[#allocation74_spill] sm:$0xff] }
 0x3f9   :  { %v3869_v34 = vpop.f32.mrf.mxu0 }
 0x3fa   :  { %13429 = vst [vmem:[#allocation71_spill] sm:$0xff] %v10994_v61  ;;  %v10999_v36 = vpop.f32.mrf.mxu2  ;;  %v4039_v9 = vadd.f32 %v10868_v41, %v3869_v34 }
 0x3fc   :  { %v11001_v40 = vpop.f32.mrf.mxu1 }
 0x3ff   :  { %v4776_v25 = vpop.f32.mrf.mxu3 }
 0x400   :  { %v11004_v10 = vadd.f32 %v4776_v25, %v4203_v6  ;;  %v4208_v25 = vadd.f32 %v10870_v47, %v4039_v9 }
 0x401   :  { %v3872_v30 = vpop.f32.mrf.mxu0 }
 0x402   :  { %13430 = vst [vmem:[#allocation118_spill] sm:$0xff] %v11004_v10  ;;  %v11007_v57 = vpop.f32.mrf.mxu2  ;;  %v4042_v44 = vadd.f32 %v10874_v52, %v3872_v30 }
 0x404   :  { %3911 = vmatmul.bf16.gmra.mxu0 %v13431_v42  ;;  %4818 = vmatmul.bf16.gmra.mxu3 %v13431_v42  ;;  %v11011_v5 = vpop.f32.mrf.mxu1  ;;  %v4211_v41 = vadd.f32 %v10878_v63, %v4042_v44 }
 0x407   :  { %v4779_v0 = vpop.f32.mrf.mxu3  ;;  %4125 = vmatmul.bf16.gmra.mxu1 %v13433_v31  ;;  %4294 = vmatmul.bf16.gmra.mxu2 %v10605_v56 }
 0x408   :  { %v11014_v50 = vadd.f32 %v4779_v0, %v4206_v38  ;;  %v13435_v0 = vld [vmem:[#allocation77_spill] sm:$0xff] }
 0x409   :  { %v3874_v59 = vpop.f32.mrf.mxu0 }
 0x40a   :  { %13432 = vst [vmem:[#allocation74_spill] sm:$0xff] %v11014_v50  ;;  %v11019_v49 = vpop.f32.mrf.mxu2  ;;  %v4044_v52 = vadd.f32 %v10880_v16, %v3874_v59 }
 0x40c   :  { %v11021_v6 = vpop.f32.mrf.mxu1  ;;  %v4213_v9 = vadd.f32 %v10882_v43, %v4044_v52  ;;  %v13440_v43 = vld [vmem:[#allocation18_spill] sm:$0xff] }
 0x40f   :  { %v4781_v10 = vpop.f32.mrf.mxu3 }
 0x410   :  { %v11024_v61 = vadd.f32 %v4781_v10, %v4208_v25 }
 0x411   :  { %v3877_v22 = vpop.f32.mrf.mxu0 }
 0x412   :  { %13434 = vst [vmem:[#allocation119_spill] sm:$0xff] %v11024_v61  ;;  %v11027_v38 = vpop.f32.mrf.mxu2  ;;  %v4047_v44 = vadd.f32 %v10886_v45, %v3877_v22 }
 0x414   :  { %3916 = vmatmul.bf16.gmra.mxu0 %v13435_v0  ;;  %4823 = vmatmul.bf16.gmra.mxu3 %v13435_v0  ;;  %v11031_v31 = vpop.f32.mrf.mxu1  ;;  %v4216_v59 = vadd.f32 %v10890_v53, %v4047_v44 }
 0x417   :  { %v4784_v34 = vpop.f32.mrf.mxu3  ;;  %4130 = vmatmul.bf16.gmra.mxu1 %v10614_v58  ;;  %4299 = vmatmul.bf16.gmra.mxu2 %v10627_v1  ;;  %v9591_v58 = vld [vmem:[#allocation7 + $0x118] sm:$0xff] }
 0x418   :  { %v11034_v56 = vadd.f32 %v4784_v34, %v4211_v41  ;;  %v13438_v34 = vld [vmem:[#allocation80_spill] sm:$0xff]  ;;  %4923 = vmatpush.bf16.msra.mxu0 %v9591_v58 }
 0x419   :  { %v3879_v47 = vpop.f32.mrf.mxu0 }
 0x41a   :  { %13436 = vst [vmem:[#allocation77_spill] sm:$0xff] %v11034_v56  ;;  %v11039_v10 = vpop.f32.mrf.mxu2  ;;  %v4049_v45 = vadd.f32 %v10892_v15, %v3879_v47 }
 0x41c   :  { %v11041_v30 = vpop.f32.mrf.mxu1 }
 0x41f   :  { %v4786_v25 = vpop.f32.mrf.mxu3 }
 0x420   :  { %v11044_v61 = vadd.f32 %v4786_v25, %v4213_v9  ;;  %v4218_v25 = vadd.f32 %v10894_v28, %v4049_v45  ;;  %v13444_v28 = vld [vmem:[#allocation20_spill] sm:$0xff] }
 0x421   :  { %v3882_v63 = vpop.f32.mrf.mxu0 }
 0x422   :  { %13437 = vst [vmem:[#allocation120_spill] sm:$0xff] %v11044_v61  ;;  %v11047_v41 = vpop.f32.mrf.mxu2  ;;  %v4052_v53 = vadd.f32 %v10898_v20, %v3882_v63 }
 0x424   :  { %3921 = vmatmul.bf16.gmra.mxu0 %v13438_v34  ;;  %4828 = vmatmul.bf16.gmra.mxu3 %v13438_v34  ;;  %v4096_v16 = vpop.f32.mrf.mxu1 }
 0x427   :  { %v4789_v1 = vpop.f32.mrf.mxu3  ;;  %4135 = vmatmul.bf16.gmra.mxu1 %v10636_v13  ;;  %4304 = vmatmul.bf16.gmra.mxu2 %v13440_v43 }
 0x428   :  { %v11052_v56 = vadd.f32 %v4789_v1, %v4216_v59  ;;  %v13442_v1 = vld [vmem:[#allocation83_spill] sm:$0xff]  ;;  %v4221_v59 = vadd.f32 %v10902_v2, %v4052_v53 }
 0x429   :  { %v3884_v52 = vpop.f32.mrf.mxu0 }
 0x42a   :  { %13439 = vst [vmem:[#allocation80_spill] sm:$0xff] %v11052_v56  ;;  %v4265_v22 = vpop.f32.mrf.mxu2  ;;  %v4054_v45 = vadd.f32 %v10904_v33, %v3884_v52  ;;  %v9598_v56 = vld [vmem:[#allocation7 + $0x150] sm:$0xff] }
 0x42c   :  { %v4098_v9 = vpop.f32.mrf.mxu1  ;;  %v4223_v22 = vadd.f32 %v10906_v23, %v4054_v45  ;;  %v13448_v23 = vld [vmem:[#allocation21_spill] sm:$0xff]  ;;  %v13449_v45 = vld [vmem:[#allocation22_spill] sm:$0xff] }
 0x42f   :  { %v4791_v61 = vpop.f32.mrf.mxu3 }
 0x430   :  { %v11058_v50 = vadd.f32 %v4791_v61, %v4218_v25 }
 0x431   :  { %v3887_v16 = vpop.f32.mrf.mxu0 }
 0x432   :  { %13441 = vst [vmem:[#allocation121_spill] sm:$0xff] %v11058_v50  ;;  %v4267_v58 = vpop.f32.mrf.mxu2  ;;  %v4057_v53 = vadd.f32 %v10910_v3, %v3887_v16 }
 0x434   :  { %3926 = vmatmul.bf16.gmra.mxu0 %v13442_v1  ;;  %4833 = vmatmul.bf16.gmra.mxu3 %v13442_v1  ;;  %v11063_v44 = vpop.f32.mrf.mxu1  ;;  %v4226_v33 = vadd.f32 %v10914_v51, %v4057_v53 }
 0x437   :  { %v4794_v15 = vpop.f32.mrf.mxu3  ;;  %4140 = vmatmul.bf16.gmra.mxu1 %v10658_v17  ;;  %4309 = vmatmul.bf16.gmra.mxu2 %v13444_v28 }
 0x438   :  { %v11066_v47 = vadd.f32 %v4794_v15, %v4221_v59  ;;  %v13446_v59 = vld [vmem:[#allocation86_spill] sm:$0xff] }
 0x439   :  { %v3889_v61 = vpop.f32.mrf.mxu0 }
 0x43a   :  { %13443 = vst [vmem:[#allocation83_spill] sm:$0xff] %v11066_v47  ;;  %v11071_v20 = vpop.f32.mrf.mxu2  ;;  %v4059_v3 = vadd.f32 %v10916_v48, %v3889_v61 }
 0x43c   :  { %v11073_v63 = vpop.f32.mrf.mxu1  ;;  %v4228_v13 = vadd.f32 %v10918_v27, %v4059_v3  ;;  %v13453_v27 = vld [vmem:[#allocation23_spill] sm:$0xff] }
 0x43f   :  { %v4796_v9 = vpop.f32.mrf.mxu3 }
 0x440   :  { %v11076_v25 = vadd.f32 %v4796_v9, %v4223_v22 }
 0x441   :  { %v3892_v2 = vpop.f32.mrf.mxu0 }
 0x442   :  { %13445 = vst [vmem:[#allocation122_spill] sm:$0xff] %v11076_v25  ;;  %v11079_v58 = vpop.f32.mrf.mxu2  ;;  %v4062_v53 = vadd.f32 %v10922_v8, %v3892_v2 }
 0x444   :  { %3931 = vmatmul.bf16.gmra.mxu0 %v13446_v59  ;;  %4838 = vmatmul.bf16.gmra.mxu3 %v13446_v59  ;;  %v11083_v15 = vpop.f32.mrf.mxu1  ;;  %v4231_v48 = vadd.f32 %v10926_v37, %v4062_v53 }
 0x447   :  { %v4799_v52 = vpop.f32.mrf.mxu3  ;;  %4145 = vmatmul.bf16.gmra.mxu1 %v13448_v23  ;;  %4314 = vmatmul.bf16.gmra.mxu2 %v13449_v45 }
 0x448   :  { %v11086_v17 = vadd.f32 %v4799_v52, %v4226_v33  ;;  %v13451_v52 = vld [vmem:[#allocation89_spill] sm:$0xff] }
 0x449   :  { %v3894_v22 = vpop.f32.mrf.mxu0 }
 0x44a   :  { %13447 = vst [vmem:[#allocation86_spill] sm:$0xff] %v11086_v17  ;;  %v11091_v16 = vpop.f32.mrf.mxu2  ;;  %v4064_v8 = vadd.f32 %v10928_v12, %v3894_v22 }
 0x44c   :  { %v11093_v9 = vpop.f32.mrf.mxu1 }
 0x44f   :  { %v4801_v25 = vpop.f32.mrf.mxu3 }
 0x450   :  { %v11096_v28 = vadd.f32 %v4801_v25, %v4228_v13  ;;  %v13454_v13 = vld [vmem:[#allocation24_spill] sm:$0xff] }
 0x451   :  { %v3897_v51 = vpop.f32.mrf.mxu0 }
 0x452   :  { %13450 = vst [vmem:[#allocation123_spill] sm:$0xff] %v11096_v28  ;;  %v11099_v33 = vpop.f32.mrf.mxu2  ;;  %v4233_v28 = vadd.f32 %v10930_v29, %v4064_v8  ;;  %v4067_v53 = vadd.f32 %v10934_v21, %v3897_v51 }
 0x454   :  { %3936 = vmatmul.bf16.gmra.mxu0 %v13451_v52  ;;  %4843 = vmatmul.bf16.gmra.mxu3 %v13451_v52  ;;  %v11103_v23 = vpop.f32.mrf.mxu1  ;;  %v4236_v22 = vadd.f32 %v10940_v19, %v4067_v53  ;;  %v13460_v53 = vld [vmem:[#allocation95_spill] sm:$0xff] }
 0x457   :  { %v4804_v61 = vpop.f32.mrf.mxu3  ;;  %4150 = vmatmul.bf16.gmra.mxu1 %v13453_v27  ;;  %4319 = vmatmul.bf16.gmra.mxu2 %v13454_v13  ;;  %v9590_v27 = vld [vmem:[#allocation7 + $0x110] sm:$0xff] }
 0x458   :  { %v11106_v45 = vadd.f32 %v4804_v61, %v4231_v48  ;;  %v13456_v61 = vld [vmem:[#allocation92_spill] sm:$0xff]  ;;  %4924 = vmatpush.bf16.msra.mxu0 %v9590_v27 }
 0x459   :  { %v3899_v25 = vpop.f32.mrf.mxu0 }
 0x45a   :  { %13452 = vst [vmem:[#allocation89_spill] sm:$0xff] %v11106_v45  ;;  %v11111_v2 = vpop.f32.mrf.mxu2 }
 0x45c   :  { %v11113_v3 = vpop.f32.mrf.mxu1 }
 0x45f   :  { %v4806_v17 = vpop.f32.mrf.mxu3 }
 0x460   :  { %v11116_v47 = vadd.f32 %v4806_v17, %v4233_v28  ;;  %v13458_v17 = vld [vmem:[#allocation26_spill] sm:$0xff]  ;;  %v4069_v28 = vadd.f32 %v10942_v32, %v3899_v25 }
 0x461   :  { %v3902_v37 = vpop.f32.mrf.mxu0 }
 0x462   :  { %13455 = vst [vmem:[#allocation124_spill] sm:$0xff] %v11116_v47  ;;  %v11119_v48 = vpop.f32.mrf.mxu2  ;;  %v4238_v47 = vadd.f32 %v10947_v35, %v4069_v28  ;;  %v4072_v27 = vadd.f32 %v10951_v4, %v3902_v37  ;;  %v13462_v35 = vld [vmem:[#allocation27_spill] sm:$0xff] }
 0x463   :  { %v9635_v28 = vld [vmem:[#allocation7 + $0x1b8] sm:$0xff] }
 0x464   :  { %3941 = vmatmul.bf16.gmra.mxu0 %v13456_v61  ;;  %4848 = vmatmul.bf16.gmra.mxu3 %v13456_v61  ;;  %v11123_v12 = vpop.f32.mrf.mxu1  ;;  %v4241_v32 = vadd.f32 %v10959_v18, %v4072_v27 }
 0x465   :  { %5450 = vmatpush.bf16.msrb.mxu2 %v9635_v28  ;;  %v9600_v28 = vld [vmem:[#allocation7 + $0x160] sm:$0xff] }
 0x467   :  { %v4809_v13 = vpop.f32.mrf.mxu3  ;;  %4155 = vmatmul.bf16.gmra.mxu1 %v10729_v26  ;;  %4324 = vmatmul.bf16.gmra.mxu2 %v13458_v17  ;;  %v9602_v17 = vld [vmem:[#allocation7 + $0x170] sm:$0xff] }
 0x468   :  { %v11126_v29 = vadd.f32 %v4809_v13, %v4236_v22 }
 0x469   :  { %v3904_v21 = vpop.f32.mrf.mxu0 }
 0x46a   :  { %13457 = vst [vmem:[#allocation92_spill] sm:$0xff] %v11126_v29  ;;  %v11131_v51 = vpop.f32.mrf.mxu2  ;;  %v4074_v37 = vadd.f32 %v10961_v7, %v3904_v21  ;;  %v9634_v29 = vld [vmem:[#allocation7 + $0x1b0] sm:$0xff] }
 0x46b   :  { %5451 = vmatpush.bf16.msrb.mxu2 %v9634_v29 }
 0x46c   :  { %v11133_v8 = vpop.f32.mrf.mxu1  ;;  %v4243_v18 = vadd.f32 %v10967_v54, %v4074_v37  ;;  %v9632_v54 = vld [vmem:[#allocation7 + $0x1a0] sm:$0xff] }
 0x46f   :  { %v4811_v45 = vpop.f32.mrf.mxu3 }
 0x470   :  { %v11136_v50 = vadd.f32 %v4811_v45, %v4238_v47  ;;  %v13463_v47 = vld [vmem:[#allocation28_spill] sm:$0xff]  ;;  %v9603_v45 = vld [vmem:[#allocation7 + $0x178] sm:$0xff] }
 0x471   :  { %v3907_v19 = vpop.f32.mrf.mxu0  ;;  %5088 = vmatpush.bf16.msrb.mxu1 %v9603_v45  ;;  %v13465_v45 = vld [vmem:[#allocation98_spill] sm:$0xff] }
 0x472   :  { %13459 = vst [vmem:[#allocation125_spill] sm:$0xff] %v11136_v50  ;;  %v11139_v13 = vpop.f32.mrf.mxu2  ;;  %v4077_v7 = vadd.f32 %v10971_v39, %v3907_v19  ;;  %v13467_v39 = vld [vmem:[#allocation30_spill] sm:$0xff]  ;;  %v13468_v19 = vld [vmem:[#allocation32_spill] sm:$0xff] }
 0x474   :  { %3946 = vmatmul.bf16.gmra.mxu0 %v13460_v53  ;;  %4853 = vmatmul.bf16.gmra.mxu3 %v13460_v53  ;;  %v11143_v22 = vpop.f32.mrf.mxu1  ;;  %v4246_v29 = vadd.f32 %v10979_v55, %v4077_v7  ;;  %v9630_v55 = vld [vmem:[#allocation7 + $0x190] sm:$0xff] }
 0x475   :  { %5089 = vmatpush.bf16.msrb.mxu1 %v9602_v17 }
 0x477   :  { %v4814_v25 = vpop.f32.mrf.mxu3  ;;  %4160 = vmatmul.bf16.gmra.mxu1 %v13462_v35  ;;  %4329 = vmatmul.bf16.gmra.mxu2 %v13463_v47  ;;  %v9633_v35 = vld [vmem:[#allocation7 + $0x1a8] sm:$0xff] }
 0x478   :  { %v11146_v26 = vadd.f32 %v4814_v25, %v4241_v32  ;;  %v9601_v25 = vld [vmem:[#allocation7 + $0x168] sm:$0xff]  ;;  %5452 = vmatpush.bf16.msrb.mxu2 %v9633_v35  ;;  %v9599_v35 = vld [vmem:[#allocation7 + $0x158] sm:$0xff] }
 0x479   :  { %v3909_v4 = vpop.f32.mrf.mxu0  ;;  %5090 = vmatpush.bf16.msrb.mxu1 %v9601_v25 }
 0x47a   :  { %13461 = vst [vmem:[#allocation126_spill] sm:$0xff] %v11146_v26  ;;  %v11151_v50 = vpop.f32.mrf.mxu2 }
 0x47c   :  { %v11153_v43 = vpop.f32.mrf.mxu1  ;;  %5453 = vmatpush.bf16.msrb.mxu2 %v9632_v54 }
 0x47d   :  { %5091 = vmatpush.bf16.msrb.mxu1 %v9600_v28 }
 0x47f   :  { %v4816_v27 = vpop.f32.mrf.mxu3 }
 0x480   :  { %v11156_v32 = vadd.f32 %v4816_v27, %v4243_v18  ;;  %v9631_v27 = vld [vmem:[#allocation7 + $0x198] sm:$0xff] }
 0x481   :  { %v3912_v47 = vpop.f32.mrf.mxu0  ;;  %5092 = vmatpush.bf16.msrb.mxu1 %v9599_v35  ;;  %5454 = vmatpush.bf16.msrb.mxu2 %v9631_v27  ;;  %v13470_v35 = vld [vmem:[#allocation31_spill] sm:$0xff] }
 0x482   :  { %13464 = vst [vmem:[#allocation127_spill] sm:$0xff] %v11156_v32  ;;  %v11159_v21 = vpop.f32.mrf.mxu2  ;;  %v4079_v32 = vadd.f32 %v10981_v14, %v3909_v4  ;;  %v4082_v14 = vadd.f32 %v10991_v24, %v3912_v47  ;;  %v9596_v27 = vld [vmem:[#allocation7 + $0x140] sm:$0xff]  ;;  %v13472_v24 = vld [vmem:[#allocation109_spill] sm:$0xff]  ;;  %v13473_v47 = vld [vmem:[#allocation110_spill] sm:$0xff] }
 0x484   :  { %3951 = vmatmul.bf16.gmra.mxu0 %v13465_v45  ;;  %4858 = vmatmul.bf16.gmra.mxu3 %v13465_v45  ;;  %v11163_v17 = vpop.f32.mrf.mxu1  ;;  %v4248_v28 = vadd.f32 %v10987_v62, %v4079_v32  ;;  %v9628_v62 = vld [vmem:[#allocation7 + $0x180] sm:$0xff]  ;;  %v4251_v32 = vadd.f32 %v10999_v36, %v4082_v14 }
 0x485   :  { %5093 = vmatpush.bf16.msrb.mxu1 %v9598_v56  ;;  %5455 = vmatpush.bf16.msrb.mxu2 %v9630_v55 }
 0x487   :  { %v4819_v37 = vpop.f32.mrf.mxu3  ;;  %4165 = vmatmul.bf16.gmra.mxu1 %v13467_v39  ;;  %4334 = vmatmul.bf16.gmra.mxu2 %v13468_v19  ;;  %v9629_v39 = vld [vmem:[#allocation7 + $0x188] sm:$0xff] }
 0x488   :  { %v11166_v18 = vadd.f32 %v4819_v37, %v4246_v29  ;;  %v9597_v37 = vld [vmem:[#allocation7 + $0x148] sm:$0xff] }
 0x489   :  { %v3914_v25 = vpop.f32.mrf.mxu0  ;;  %5094 = vmatpush.bf16.msrb.mxu1 %v9597_v37  ;;  %5456 = vmatpush.bf16.msrb.mxu2 %v9629_v39 }
 0x48a   :  { %13466 = vst [vmem:[#allocation128_spill] sm:$0xff] %v11166_v18  ;;  %v11171_v26 = vpop.f32.mrf.mxu2 }
 0x48c   :  { %v11173_v7 = vpop.f32.mrf.mxu1 }
 0x48d   :  { %5095 = vmatpush.bf16.msrb.mxu1 %v9596_v27  ;;  %5457 = vmatpush.bf16.msrb.mxu2 %v9628_v62 }
 0x48f   :  { %v4821_v54 = vpop.f32.mrf.mxu3 }
 0x490   :  { %v11176_v29 = vadd.f32 %v4821_v54, %v4248_v28  ;;  %v4084_v54 = vadd.f32 %v11001_v40, %v3914_v25 }
 0x491   :  { %v3917_v19 = vpop.f32.mrf.mxu0 }
 0x492   :  { %13469 = vst [vmem:[#allocation129_spill] sm:$0xff] %v11176_v29  ;;  %v11179_v4 = vpop.f32.mrf.mxu2  ;;  %v4253_v18 = vadd.f32 %v11007_v57, %v4084_v54  ;;  %v4087_v27 = vadd.f32 %v11011_v5, %v3917_v19 }
 0x494   :  { %3956 = vmatmul.bf16.gmra.mxu0 %v13470_v35  ;;  %4863 = vmatmul.bf16.gmra.mxu3 %v13470_v35  ;;  %v11183_v56 = vpop.f32.mrf.mxu1  ;;  %v4256_v25 = vadd.f32 %v11019_v49, %v4087_v27 }
 0x497   :  { %v4824_v55 = vpop.f32.mrf.mxu3  ;;  %4170 = vmatmul.bf16.gmra.mxu1 %v13472_v24  ;;  %4339 = vmatmul.bf16.gmra.mxu2 %v13473_v47 }
 0x498   :  { %v11186_v28 = vadd.f32 %v4824_v55, %v4251_v32  ;;  %v13475_v32 = vld [vmem:[#allocation101_spill] sm:$0xff] }
 0x499   :  { %v3919_v39 = vpop.f32.mrf.mxu0  ;;  %v9589_v55 = vld [vmem:[#allocation7 + $0x108] sm:$0xff] }
 0x49a   :  { %13471 = vst [vmem:[#allocation130_spill] sm:$0xff] %v11186_v28  ;;  %v11191_v37 = vpop.f32.mrf.mxu2  ;;  %4925 = vmatpush.bf16.msra.mxu0 %v9589_v55  ;;  %v4089_v19 = vadd.f32 %v11021_v6, %v3919_v39  ;;  %v13480_v55 = vld [vmem:[#allocation102_spill] sm:$0xff] }
 0x49c   :  { %v11193_v29 = vpop.f32.mrf.mxu1  ;;  %v4258_v47 = vadd.f32 %v11027_v38, %v4089_v19  ;;  %v13482_v38 = vld [vmem:[#allocation39_spill] sm:$0xff] }
 0x49f   :  { %v4826_v35 = vpop.f32.mrf.mxu3 }
 0x4a0   :  { %v11196_v36 = vadd.f32 %v4826_v35, %v4253_v18  ;;  %v13477_v18 = vld [vmem:[#allocation36_spill] sm:$0xff]  ;;  %v13478_v35 = vld [vmem:[#allocation38_spill] sm:$0xff] }
 0x4a1   :  { %v3922_v14 = vpop.f32.mrf.mxu0 }
 0x4a2   :  { %13474 = vst [vmem:[#allocation131_spill] sm:$0xff] %v11196_v36  ;;  %v11199_v62 = vpop.f32.mrf.mxu2 }
 0x4a4   :  { %3961 = vmatmul.bf16.gmra.mxu0 %v13475_v32  ;;  %4868 = vmatmul.bf16.gmra.mxu3 %v13475_v32  ;;  %v11203_v40 = vpop.f32.mrf.mxu1 }
 0x4a7   :  { %v4829_v24 = vpop.f32.mrf.mxu3  ;;  %4175 = vmatmul.bf16.gmra.mxu1 %v13477_v18  ;;  %4344 = vmatmul.bf16.gmra.mxu2 %v13478_v35 }
 0x4a8   :  { %v11206_v57 = vadd.f32 %v4829_v24, %v4256_v25  ;;  %v4092_v24 = vadd.f32 %v11031_v31, %v3922_v14 }
 0x4a9   :  { %v3924_v5 = vpop.f32.mrf.mxu0 }
 0x4aa   :  { %13476 = vst [vmem:[#allocation132_spill] sm:$0xff] %v11206_v57  ;;  %v11211_v54 = vpop.f32.mrf.mxu2  ;;  %v4261_v6 = vadd.f32 %v11039_v10, %v4092_v24  ;;  %v4094_v31 = vadd.f32 %v11041_v30, %v3924_v5  ;;  %v13487_v30 = vld [vmem:[#allocation42_spill] sm:$0xff]  ;;  %v13488_v5 = vld [vmem:[#allocation41_spill] sm:$0xff] }
 0x4ac   :  { %v11213_v36 = vpop.f32.mrf.mxu1 }
 0x4af   :  { %v4831_v28 = vpop.f32.mrf.mxu3 }
 0x4b0   :  { %v11216_v32 = vadd.f32 %v4831_v28, %v4258_v47  ;;  %v13483_v28 = vld [vmem:[#allocation35_spill] sm:$0xff] }
 0x4b1   :  { %v3927_v49 = vpop.f32.mrf.mxu0 }
 0x4b2   :  { %13479 = vst [vmem:[#allocation133_spill] sm:$0xff] %v11216_v32  ;;  %v11219_v27 = vpop.f32.mrf.mxu2  ;;  %v4263_v49 = vadd.f32 %v11047_v41, %v4094_v31 }
 0x4b4   :  { %3966 = vmatmul.bf16.gmra.mxu0 %v13480_v55  ;;  %4873 = vmatmul.bf16.gmra.mxu3 %v13480_v55  ;;  %v11223_v25 = vpop.f32.mrf.mxu1  ;;  %v13493_v55 = vld [vmem:[#allocation44_spill] sm:$0xff] }
 0x4b7   :  { %v4834_v39 = vpop.f32.mrf.mxu3  ;;  %5096 = vmatmul.bf16.vlgmr.msrb.gmra.mxu1 %v13482_v38  ;;  %5458 = vmatmul.bf16.vlgmr.msrb.gmra.mxu2 %v13483_v28 }
 0x4b8   :  { %v11226_v18 = vadd.f32 %v4834_v39, %v4261_v6  ;;  %v13485_v6 = vld [vmem:[#allocation103_spill] sm:$0xff] }
 0x4b9   :  { %v3929_v47 = vpop.f32.mrf.mxu0 }
 0x4ba   :  { %13481 = vst [vmem:[#allocation134_spill] sm:$0xff] %v11226_v18  ;;  %v11231_v14 = vpop.f32.mrf.mxu2  ;;  %v13490_v18 = vld [vmem:[#allocation104_spill] sm:$0xff] }
 0x4bc   :  { %v11233_v19 = vpop.f32.mrf.mxu1 }
 0x4bf   :  { %v4836_v32 = vpop.f32.mrf.mxu3 }
 0x4c0   :  { %v11236_v35 = vadd.f32 %v4836_v32, %v4263_v49 }
 0x4c1   :  { %v3932_v10 = vpop.f32.mrf.mxu0 }
 0x4c2   :  { %13484 = vst [vmem:[#allocation35_spill] sm:$0xff] %v11236_v35  ;;  %v11238_v24 = vpop.f32.mrf.mxu2  ;;  %v4102_v38 = vadd.f32 %v11063_v44, %v3932_v10 }
 0x4c4   :  { %3971 = vmatmul.bf16.gmra.mxu0 %v13485_v6  ;;  %4878 = vmatmul.bf16.gmra.mxu3 %v13485_v6  ;;  %v11242_v39 = vpop.f32.mrf.mxu1  ;;  %v13492_v6 = vld [vmem:[#allocation45_spill] sm:$0xff] }
 0x4c7   :  { %v11244_v28 = vpop.f32.mrf.mxu3  ;;  %5101 = vmatmul.bf16.gmra.mxu1 %v13487_v30  ;;  %5463 = vmatmul.bf16.gmra.mxu2 %v13488_v5  ;;  %v4271_v5 = vadd.f32 %v11071_v20, %v4102_v38 }
 0x4c8   :  { %13486 = vst [vmem:[#allocation135_spill] sm:$0xff] %v11244_v28 }
 0x4c9   :  { %v3934_v47 = vpop.f32.mrf.mxu0 }
 0x4ca   :  { %v11248_v41 = vpop.f32.mrf.mxu2  ;;  %v4104_v44 = vadd.f32 %v11073_v63, %v3934_v47 }
 0x4cc   :  { %v11250_v32 = vpop.f32.mrf.mxu1 }
 0x4cf   :  { %v11252_v31 = vpop.f32.mrf.mxu3 }
 0x4d0   :  { %13489 = vst [vmem:[#allocation41_spill] sm:$0xff] %v11252_v31 }
 0x4d1   :  { %v3937_v49 = vpop.f32.mrf.mxu0 }
 0x4d2   :  { %v11255_v35 = vpop.f32.mrf.mxu2  ;;  %v4107_v38 = vadd.f32 %v11083_v15, %v3937_v49 }
 0x4d4   :  { %3976 = vmatmul.bf16.gmra.mxu0 %v13490_v18  ;;  %4883 = vmatmul.bf16.gmra.mxu3 %v13490_v18  ;;  %v11259_v28 = vpop.f32.mrf.mxu1  ;;  %v4273_v18 = vadd.f32 %v11079_v58, %v4104_v44  ;;  %v4276_v47 = vadd.f32 %v11091_v16, %v4107_v38 }
 0x4d7   :  { %v4844_v30 = vpop.f32.mrf.mxu3  ;;  %5106 = vmatmul.bf16.gmra.mxu1 %v13492_v6  ;;  %5468 = vmatmul.bf16.gmra.mxu2 %v13493_v55  ;;  %v9588_v55 = vld [vmem:[#allocation7 + $0x100] sm:$0xff] }
 0x4d8   :  { %v11262_v57 = vadd.f32 %v4844_v30, %v4271_v5  ;;  %v13495_v5 = vld [vmem:[#allocation105_spill] sm:$0xff]  ;;  %4926 = vmatpush.bf16.msra.mxu0 %v9588_v55  ;;  %v13500_v55 = vld [vmem:[#allocation106_spill] sm:$0xff] }
 0x4d9   :  { %v3939_v31 = vpop.f32.mrf.mxu0 }
 0x4da   :  { %13491 = vst [vmem:[#allocation136_spill] sm:$0xff] %v11262_v57  ;;  %v11267_v10 = vpop.f32.mrf.mxu2  ;;  %v4109_v49 = vadd.f32 %v11093_v9, %v3939_v31 }
 0x4dc   :  { %v11269_v45 = vpop.f32.mrf.mxu1  ;;  %v4278_v57 = vadd.f32 %v11099_v33, %v4109_v49  ;;  %v13502_v33 = vld [vmem:[#allocation51_spill] sm:$0xff] }
 0x4df   :  { %v4846_v53 = vpop.f32.mrf.mxu3 }
 0x4e0   :  { %v11272_v46 = vadd.f32 %v4846_v53, %v4273_v18  ;;  %v13497_v53 = vld [vmem:[#allocation48_spill] sm:$0xff]  ;;  %v13498_v18 = vld [vmem:[#allocation47_spill] sm:$0xff] }
 0x4e1   :  { %v3942_v20 = vpop.f32.mrf.mxu0 }
 0x4e2   :  { %13494 = vst [vmem:[#allocation44_spill] sm:$0xff] %v11272_v46  ;;  %v11275_v30 = vpop.f32.mrf.mxu2 }
 0x4e4   :  { %3981 = vmatmul.bf16.gmra.mxu0 %v13495_v5  ;;  %4888 = vmatmul.bf16.gmra.mxu3 %v13495_v5  ;;  %v11279_v63 = vpop.f32.mrf.mxu1 }
 0x4e7   :  { %v4849_v6 = vpop.f32.mrf.mxu3  ;;  %5111 = vmatmul.bf16.gmra.mxu1 %v13497_v53  ;;  %5473 = vmatmul.bf16.gmra.mxu2 %v13498_v18 }
 0x4e8   :  { %v11282_v58 = vadd.f32 %v4849_v6, %v4276_v47  ;;  %v4112_v6 = vadd.f32 %v11103_v23, %v3942_v20 }
 0x4e9   :  { %v3944_v15 = vpop.f32.mrf.mxu0 }
 0x4ea   :  { %13496 = vst [vmem:[#allocation137_spill] sm:$0xff] %v11282_v58  ;;  %v11287_v44 = vpop.f32.mrf.mxu2  ;;  %v4281_v9 = vadd.f32 %v11111_v2, %v4112_v6  ;;  %v4114_v23 = vadd.f32 %v11113_v3, %v3944_v15 }
 0x4ec   :  { %v11289_v46 = vpop.f32.mrf.mxu1  ;;  %v4283_v53 = vadd.f32 %v11119_v48, %v4114_v23 }
 0x4ef   :  { %v4851_v5 = vpop.f32.mrf.mxu3 }
 0x4f0   :  { %v11292_v60 = vadd.f32 %v4851_v5, %v4278_v57  ;;  %v13503_v57 = vld [vmem:[#allocation50_spill] sm:$0xff] }
 0x4f1   :  { %v3947_v16 = vpop.f32.mrf.mxu0 }
 0x4f2   :  { %13499 = vst [vmem:[#allocation47_spill] sm:$0xff] %v11292_v60  ;;  %v11295_v38 = vpop.f32.mrf.mxu2  ;;  %v4117_v6 = vadd.f32 %v11123_v12, %v3947_v16  ;;  %v9642_v12 = vld [vmem:[#allocation7 + $0x1f0] sm:$0xff] }
 0x4f4   :  { %3986 = vmatmul.bf16.gmra.mxu0 %v13500_v55  ;;  %4893 = vmatmul.bf16.gmra.mxu3 %v13500_v55  ;;  %v11299_v47 = vpop.f32.mrf.mxu1  ;;  %v4286_v15 = vadd.f32 %v11131_v51, %v4117_v6 }
 0x4f7   :  { %v4854_v31 = vpop.f32.mrf.mxu3  ;;  %5116 = vmatmul.bf16.gmra.mxu1 %v13502_v33  ;;  %5478 = vmatmul.bf16.gmra.mxu2 %v13503_v57  ;;  %v9643_v57 = vld [vmem:[#allocation7 + $0x1f8] sm:$0xff] }
 0x4f8   :  { %v11302_v18 = vadd.f32 %v4854_v31, %v4281_v9  ;;  %v13505_v31 = vld [vmem:[#allocation107_spill] sm:$0xff]  ;;  %5619 = vmatpush.bf16.msrb.mxu3 %v9643_v57 }
 0x4f9   :  { %v3949_v5 = vpop.f32.mrf.mxu0  ;;  %v9640_v57 = vld [vmem:[#allocation7 + $0x1e0] sm:$0xff] }
 0x4fa   :  { %13501 = vst [vmem:[#allocation138_spill] sm:$0xff] %v11302_v18  ;;  %v11307_v20 = vpop.f32.mrf.mxu2  ;;  %v4119_v23 = vadd.f32 %v11133_v8, %v3949_v5  ;;  %v9641_v18 = vld [vmem:[#allocation7 + $0x1e8] sm:$0xff]  ;;  %v9639_v5 = vld [vmem:[#allocation7 + $0x1d8] sm:$0xff] }
 0x4fb   :  { %v13510_v8 = vld [vmem:[#allocation108_spill] sm:$0xff] }
 0x4fc   :  { %v11309_v49 = vpop.f32.mrf.mxu1  ;;  %5620 = vmatpush.bf16.msrb.mxu3 %v9642_v12  ;;  %v4288_v51 = vadd.f32 %v11139_v13, %v4119_v23 }
 0x4ff   :  { %v4856_v60 = vpop.f32.mrf.mxu3 }
 0x500   :  { %v11312_v58 = vadd.f32 %v4856_v60, %v4283_v53  ;;  %v13507_v60 = vld [vmem:[#allocation54_spill] sm:$0xff]  ;;  %v13508_v53 = vld [vmem:[#allocation53_spill] sm:$0xff]  ;;  %5621 = vmatpush.bf16.msrb.mxu3 %v9641_v18 }
 0x501   :  { %v3952_v2 = vpop.f32.mrf.mxu0 }
 0x502   :  { %13504 = vst [vmem:[#allocation50_spill] sm:$0xff] %v11312_v58  ;;  %v11315_v9 = vpop.f32.mrf.mxu2 }
 0x504   :  { %3991 = vmatmul.bf16.gmra.mxu0 %v13505_v31  ;;  %4898 = vmatmul.bf16.gmra.mxu3 %v13505_v31  ;;  %v11319_v3 = vpop.f32.mrf.mxu1 }
 0x505   :  { %5622 = vmatpush.bf16.msrb.mxu3 %v9640_v57 }
 0x507   :  { %v4859_v33 = vpop.f32.mrf.mxu3  ;;  %5121 = vmatmul.bf16.gmra.mxu1 %v13507_v60  ;;  %5483 = vmatmul.bf16.gmra.mxu2 %v13508_v53  ;;  %v4122_v53 = vadd.f32 %v11143_v22, %v3952_v2  ;;  %v9638_v22 = vld [vmem:[#allocation7 + $0x1d0] sm:$0xff] }
 0x508   :  { %v11322_v48 = vadd.f32 %v4859_v33, %v4286_v15 }
 0x509   :  { %v3954_v16 = vpop.f32.mrf.mxu0  ;;  %v4291_v13 = vadd.f32 %v11151_v50, %v4122_v53  ;;  %5623 = vmatpush.bf16.msrb.mxu3 %v9639_v5 }
 0x50a   :  { %13506 = vst [vmem:[#allocation139_spill] sm:$0xff] %v11322_v48  ;;  %v11327_v58 = vpop.f32.mrf.mxu2  ;;  %v4124_v57 = vadd.f32 %v11153_v43, %v3954_v16  ;;  %v9637_v48 = vld [vmem:[#allocation7 + $0x1c8] sm:$0xff]  ;;  %v13515_v43 = vld [vmem:[#allocation34_spill] sm:$0xff] }
 0x50b   :  { %v9651_v16 = vld [vmem:[#allocation7 + $0x238] sm:$0xff] }
 0x50c   :  { %v11329_v31 = vpop.f32.mrf.mxu1  ;;  %v4293_v50 = vadd.f32 %v11159_v21, %v4124_v57  ;;  %5788 = vmatpush.bf16.msrb.mxu0 %v9651_v16  ;;  %v13516_v57 = vld [vmem:[#allocation60_spill] sm:$0xff] }
 0x50d   :  { %5624 = vmatpush.bf16.msrb.mxu3 %v9638_v22 }
 0x50f   :  { %v4861_v6 = vpop.f32.mrf.mxu3 }
 0x510   :  { %v11332_v33 = vadd.f32 %v4861_v6, %v4288_v51  ;;  %v13512_v51 = vld [vmem:[#allocation57_spill] sm:$0xff]  ;;  %v13513_v6 = vld [vmem:[#allocation56_spill] sm:$0xff] }
 0x511   :  { %v3957_v15 = vpop.f32.mrf.mxu0  ;;  %5625 = vmatpush.bf16.msrb.mxu3 %v9637_v48 }
 0x512   :  { %13509 = vst [vmem:[#allocation53_spill] sm:$0xff] %v11332_v33  ;;  %v11335_v60 = vpop.f32.mrf.mxu2 }
 0x514   :  { %3996 = vmatmul.bf16.gmra.mxu0 %v13510_v8  ;;  %4903 = vmatmul.bf16.gmra.mxu3 %v13510_v8  ;;  %v11339_v12 = vpop.f32.mrf.mxu1 }
 0x517   :  { %v4864_v18 = vpop.f32.mrf.mxu3  ;;  %5126 = vmatmul.bf16.gmra.mxu1 %v13512_v51  ;;  %5488 = vmatmul.bf16.gmra.mxu2 %v13513_v6  ;;  %v4127_v6 = vadd.f32 %v11163_v17, %v3957_v15 }
 0x518   :  { %v11342_v23 = vadd.f32 %v4864_v18, %v4291_v13  ;;  %v9636_v13 = vld [vmem:[#allocation7 + $0x1c0] sm:$0xff] }
 0x519   :  { %v3959_v2 = vpop.f32.mrf.mxu0  ;;  %5626 = vmatpush.bf16.msrb.mxu3 %v9636_v13 }
 0x51a   :  { %13511 = vst [vmem:[#allocation140_spill] sm:$0xff] %v11342_v23  ;;  %v11347_v33 = vpop.f32.mrf.mxu2  ;;  %v4296_v23 = vadd.f32 %v11171_v26, %v4127_v6  ;;  %v4129_v15 = vadd.f32 %v11173_v7, %v3959_v2 }
 0x51c   :  { %v11349_v8 = vpop.f32.mrf.mxu1 }
 0x51f   :  { %v4866_v53 = vpop.f32.mrf.mxu3 }
 0x520   :  { %v11352_v5 = vadd.f32 %v4866_v53, %v4293_v50  ;;  %v13517_v50 = vld [vmem:[#allocation59_spill] sm:$0xff] }
 0x521   :  { %v3962_v18 = vpop.f32.mrf.mxu0 }
 0x522   :  { %13514 = vst [vmem:[#allocation56_spill] sm:$0xff] %v11352_v5  ;;  %v11355_v51 = vpop.f32.mrf.mxu2  ;;  %v4298_v5 = vadd.f32 %v11179_v4, %v4129_v15  ;;  %v4132_v26 = vadd.f32 %v11183_v56, %v3962_v18  ;;  %v13520_v4 = vld [vmem:[#allocation62_spill] sm:$0xff] }
 0x524   :  { %4001 = vmatmul.bf16.gmra.mxu0 %v13515_v43  ;;  %4908 = vmatmul.bf16.gmra.mxu3 %v13515_v43  ;;  %v4176_v22 = vpop.f32.mrf.mxu1 }
 0x527   :  { %v4869_v21 = vpop.f32.mrf.mxu3  ;;  %5131 = vmatmul.bf16.gmra.mxu1 %v13516_v57  ;;  %5493 = vmatmul.bf16.gmra.mxu2 %v13517_v50  ;;  %v13519_v50 = vld [vmem:[#allocation63_spill] sm:$0xff] }
 0x528   :  { %v11360_v48 = vadd.f32 %v4869_v21, %v4296_v23  ;;  %v13518_v23 = vld [vmem:[#allocation111_spill] sm:$0xff]  ;;  %v4301_v21 = vadd.f32 %v11191_v37, %v4132_v26 }
 0x529   :  { %v3964_v17 = vpop.f32.mrf.mxu0 }
 0x52a   :  { %v4345_v53 = vpop.f32.mrf.mxu2 }
 0x52c   :  { %v4178_v13 = vpop.f32.mrf.mxu1 }
 0x52f   :  { %v4871_v43 = vpop.f32.mrf.mxu3 }
 0x530   :  { %v11366_v55 = vadd.f32 %v4871_v43, %v4298_v5  ;;  %v4134_v43 = vadd.f32 %v11193_v29, %v3964_v17 }
 0x531   :  { %v3967_v22 = vpop.f32.mrf.mxu0 }
 0x532   :  { %v4347_v6 = vpop.f32.mrf.mxu2  ;;  %v4303_v15 = vadd.f32 %v11199_v62, %v4134_v43  ;;  %v4137_v37 = vadd.f32 %v11203_v40, %v3967_v22  ;;  %v13524_v62 = vld [vmem:[#allocation65_spill] sm:$0xff] }
 0x534   :  { %4006 = vmatmul.bf16.gmra.mxu0 %v13518_v23  ;;  %4913 = vmatmul.bf16.gmra.mxu3 %v13518_v23  ;;  %v11371_v16 = vpop.f32.mrf.mxu1  ;;  %v4306_v29 = vadd.f32 %v11211_v54, %v4137_v37 }
 0x537   :  { %v4874_v7 = vpop.f32.mrf.mxu3  ;;  %5136 = vmatmul.bf16.gmra.mxu1 %v13519_v50  ;;  %5498 = vmatmul.bf16.gmra.mxu2 %v13520_v4 }
 0x538   :  { %v11374_v2 = vadd.f32 %v4874_v7, %v4301_v21  ;;  %v13521_v21 = vld [vmem:[#allocation37_spill] sm:$0xff] }
 0x539   :  { %v3969_v5 = vpop.f32.mrf.mxu0 }
 0x53a   :  { %v5459_v56 = vpop.f32.mrf.mxu2 }
 0x53b   :  { %v13523_v56 = vld [vmem:[#allocation66_spill] sm:$0xff] }
 0x53c   :  { %v11379_v18 = vpop.f32.mrf.mxu1 }
 0x53f   :  { %v4876_v53 = vpop.f32.mrf.mxu3 }
 0x540   :  { %v11382_v13 = vadd.f32 %v4876_v53, %v4303_v15  ;;  %v4139_v15 = vadd.f32 %v11213_v36, %v3969_v5 }
 0x541   :  { %v3972_v6 = vpop.f32.mrf.mxu0 }
 0x542   :  { %v5461_v26 = vpop.f32.mrf.mxu2  ;;  %v4308_v53 = vadd.f32 %v11219_v27, %v4139_v15  ;;  %v4142_v37 = vadd.f32 %v11223_v25, %v3972_v6  ;;  %v13528_v27 = vld [vmem:[#allocation69_spill] sm:$0xff]  ;;  %v13529_v15 = vld [vmem:[#allocation68_spill] sm:$0xff] }
 0x544   :  { %4927 = vmatmul.bf16.vlgmr.msra.gmra.mxu0 %v13521_v21  ;;  %5627 = vmatmul.bf16.vlgmr.msrb.gmra.mxu3 %v13521_v21  ;;  %v11387_v7 = vpop.f32.mrf.mxu1  ;;  %v4311_v36 = vadd.f32 %v11231_v14, %v4142_v37 }
 0x545   :  { %13522 = vst [vmem:[#allocation60_spill] sm:$0xff] %v11387_v7 }
 0x547   :  { %v4879_v17 = vpop.f32.mrf.mxu3  ;;  %5141 = vmatmul.bf16.gmra.mxu1 %v13523_v56  ;;  %5503 = vmatmul.bf16.gmra.mxu2 %v13524_v62 }
 0x548   :  { %v11390_v4 = vadd.f32 %v4879_v17, %v4306_v29  ;;  %v13526_v17 = vld [vmem:[#allocation40_spill] sm:$0xff] }
 0x549   :  { %v3974_v43 = vpop.f32.mrf.mxu0 }
 0x54a   :  { %v11395_v40 = vpop.f32.mrf.mxu2  ;;  %v4144_v25 = vadd.f32 %v11233_v19, %v3974_v43 }
 0x54c   :  { %v11397_v22 = vpop.f32.mrf.mxu1 }
 0x54d   :  { %13525 = vst [vmem:[#allocation59_spill] sm:$0xff] %v11397_v22 }
 0x54f   :  { %v4881_v26 = vpop.f32.mrf.mxu3 }
 0x550   :  { %v11400_v21 = vadd.f32 %v4881_v26, %v4308_v53 }
 0x551   :  { %v3977_v54 = vpop.f32.mrf.mxu0 }
 0x552   :  { %v11403_v29 = vpop.f32.mrf.mxu2  ;;  %v4147_v37 = vadd.f32 %v11242_v39, %v3977_v54 }
 0x554   :  { %4932 = vmatmul.bf16.gmra.mxu0 %v13526_v17  ;;  %5632 = vmatmul.bf16.gmra.mxu3 %v13526_v17  ;;  %v11407_v62 = vpop.f32.mrf.mxu1  ;;  %v4313_v17 = vadd.f32 %v11238_v24, %v4144_v25  ;;  %v4316_v43 = vadd.f32 %v11248_v41, %v4147_v37 }
 0x555   :  { %13527 = vst [vmem:[#allocation111_spill] sm:$0xff] %v11407_v62 }
 0x557   :  { %v4884_v5 = vpop.f32.mrf.mxu3  ;;  %5146 = vmatmul.bf16.gmra.mxu1 %v13528_v27  ;;  %5508 = vmatmul.bf16.gmra.mxu2 %v13529_v15  ;;  %v9650_v15 = vld [vmem:[#allocation7 + $0x230] sm:$0xff] }
 0x558   :  { %v11410_v22 = vadd.f32 %v4884_v5, %v4311_v36  ;;  %v13532_v5 = vld [vmem:[#allocation43_spill] sm:$0xff]  ;;  %5789 = vmatpush.bf16.msrb.mxu0 %v9650_v15  ;;  %v13536_v15 = vld [vmem:[#allocation46_spill] sm:$0xff] }
 0x559   :  { %v3979_v53 = vpop.f32.mrf.mxu0 }
 0x55a   :  { %v11415_v6 = vpop.f32.mrf.mxu2  ;;  %v4149_v54 = vadd.f32 %v11250_v32, %v3979_v53 }
 0x55c   :  { %v11417_v26 = vpop.f32.mrf.mxu1 }
 0x55d   :  { %13530 = vst [vmem:[#allocation63_spill] sm:$0xff] %v11417_v26 }
 0x55f   :  { %v4886_v7 = vpop.f32.mrf.mxu3 }
 0x560   :  { %v11420_v62 = vadd.f32 %v4886_v7, %v4313_v17  ;;  %v13534_v7 = vld [vmem:[#allocation72_spill] sm:$0xff] }
 0x561   :  { %v3982_v14 = vpop.f32.mrf.mxu0 }
 0x562   :  { %v11423_v36 = vpop.f32.mrf.mxu2 }
 0x563   :  { %13531 = vst [vmem:[#allocation62_spill] sm:$0xff] %v11423_v36 }
 0x564   :  { %4937 = vmatmul.bf16.gmra.mxu0 %v13532_v5  ;;  %5637 = vmatmul.bf16.gmra.mxu3 %v13532_v5  ;;  %v11427_v19 = vpop.f32.mrf.mxu1  ;;  %v4318_v5 = vadd.f32 %v11255_v35, %v4149_v54  ;;  %v13538_v35 = vld [vmem:[#allocation75_spill] sm:$0xff] }
 0x565   :  { %13533 = vst [vmem:[#allocation37_spill] sm:$0xff] %v11427_v19 }
 0x567   :  { %v4889_v26 = vpop.f32.mrf.mxu3  ;;  %5151 = vmatmul.bf16.gmra.mxu1 %v13534_v7  ;;  %5513 = vmatmul.bf16.gmra.mxu2 %v13428_v11 }
 0x568   :  { %v11430_v24 = vadd.f32 %v4889_v26, %v4316_v43  ;;  %v4152_v26 = vadd.f32 %v11259_v28, %v3982_v14 }
 0x569   :  { %v3984_v39 = vpop.f32.mrf.mxu0 }
 0x56a   :  { %v11435_v25 = vpop.f32.mrf.mxu2  ;;  %v4321_v32 = vadd.f32 %v11267_v10, %v4152_v26  ;;  %v4154_v28 = vadd.f32 %v11269_v45, %v3984_v39 }
 0x56c   :  { %v11437_v17 = vpop.f32.mrf.mxu1 }
 0x56d   :  { %13535 = vst [vmem:[#allocation66_spill] sm:$0xff] %v11437_v17 }
 0x56f   :  { %v4891_v19 = vpop.f32.mrf.mxu3 }
 0x570   :  { %v11440_v36 = vadd.f32 %v4891_v19, %v4318_v5  ;;  %v4323_v5 = vadd.f32 %v11275_v30, %v4154_v28  ;;  %v13543_v30 = vld [vmem:[#allocation78_spill] sm:$0xff] }
 0x571   :  { %v3987_v41 = vpop.f32.mrf.mxu0 }
 0x572   :  { %v11443_v37 = vpop.f32.mrf.mxu2  ;;  %v4157_v26 = vadd.f32 %v11279_v63, %v3987_v41 }
 0x574   :  { %4942 = vmatmul.bf16.gmra.mxu0 %v13536_v15  ;;  %5642 = vmatmul.bf16.gmra.mxu3 %v13536_v15  ;;  %v11447_v11 = vpop.f32.mrf.mxu1  ;;  %v4326_v45 = vadd.f32 %v11287_v44, %v4157_v26 }
 0x575   :  { %13537 = vst [vmem:[#allocation65_spill] sm:$0xff] %v11447_v11 }
 0x577   :  { %v4894_v53 = vpop.f32.mrf.mxu3  ;;  %5156 = vmatmul.bf16.gmra.mxu1 %v13538_v35  ;;  %5518 = vmatmul.bf16.gmra.mxu2 %v13431_v42 }
 0x578   :  { %v11450_v43 = vadd.f32 %v4894_v53, %v4321_v32  ;;  %v13541_v53 = vld [vmem:[#allocation49_spill] sm:$0xff] }
 0x579   :  { %v3989_v19 = vpop.f32.mrf.mxu0 }
 0x57a   :  { %v11455_v14 = vpop.f32.mrf.mxu2  ;;  %v4159_v63 = vadd.f32 %v11289_v46, %v3989_v19 }
 0x57c   :  { %v11457_v54 = vpop.f32.mrf.mxu1 }
 0x57d   :  { %13539 = vst [vmem:[#allocation40_spill] sm:$0xff] %v11457_v54 }
 0x57f   :  { %v4896_v15 = vpop.f32.mrf.mxu3 }
 0x580   :  { %v11460_v11 = vadd.f32 %v4896_v15, %v4323_v5  ;;  %v4328_v5 = vadd.f32 %v11295_v38, %v4159_v63  ;;  %v13548_v38 = vld [vmem:[#allocation81_spill] sm:$0xff] }
 0x581   :  { %v3992_v10 = vpop.f32.mrf.mxu0 }
 0x582   :  { %v11463_v32 = vpop.f32.mrf.mxu2  ;;  %v4162_v26 = vadd.f32 %v11299_v47, %v3992_v10 }
 0x583   :  { %13540 = vst [vmem:[#allocation69_spill] sm:$0xff] %v11463_v32 }
 0x584   :  { %4947 = vmatmul.bf16.gmra.mxu0 %v13541_v53  ;;  %5647 = vmatmul.bf16.gmra.mxu3 %v13541_v53  ;;  %v11467_v42 = vpop.f32.mrf.mxu1  ;;  %v4331_v46 = vadd.f32 %v11307_v20, %v4162_v26 }
 0x585   :  { %13542 = vst [vmem:[#allocation68_spill] sm:$0xff] %v11467_v42 }
 0x587   :  { %v4899_v39 = vpop.f32.mrf.mxu3  ;;  %5161 = vmatmul.bf16.gmra.mxu1 %v13543_v30  ;;  %5523 = vmatmul.bf16.gmra.mxu2 %v13435_v0 }
 0x588   :  { %v11470_v54 = vadd.f32 %v4899_v39, %v4326_v45  ;;  %v13547_v39 = vld [vmem:[#allocation52_spill] sm:$0xff] }
 0x589   :  { %v3994_v28 = vpop.f32.mrf.mxu0 }
 0x58a   :  { %v11475_v41 = vpop.f32.mrf.mxu2 }
 0x58b   :  { %13544 = vst [vmem:[#allocation43_spill] sm:$0xff] %v11475_v41 }
 0x58c   :  { %v11478_v53 = vpop.f32.mrf.mxu1 }
 0x58d   :  { %13545 = vst [vmem:[#allocation72_spill] sm:$0xff] %v11478_v53 }
 0x58f   :  { %v4901_v15 = vpop.f32.mrf.mxu3 }
 0x590   :  { %v11480_v42 = vadd.f32 %v4901_v15, %v4328_v5  ;;  %v4164_v5 = vadd.f32 %v11309_v49, %v3994_v28  ;;  %v9649_v49 = vld [vmem:[#allocation7 + $0x228] sm:$0xff] }
 0x591   :  { %v3997_v44 = vpop.f32.mrf.mxu0  ;;  %5790 = vmatpush.bf16.msrb.mxu0 %v9649_v49  ;;  %v13558_v49 = vld [vmem:[#allocation58_spill] sm:$0xff] }
 0x592   :  { %v11483_v45 = vpop.f32.mrf.mxu2  ;;  %v4333_v10 = vadd.f32 %v11315_v9, %v4164_v5  ;;  %v4167_v26 = vadd.f32 %v11319_v3, %v3997_v44 }
 0x593   :  { %13546 = vst [vmem:[#allocation46_spill] sm:$0xff] %v11483_v45  ;;  %v13597_v45 = vld [vmem:[#allocation73_spill] sm:$0xff] }
 0x594   :  { %4952 = vmatmul.bf16.gmra.mxu0 %v13547_v39  ;;  %5652 = vmatmul.bf16.gmra.mxu3 %v13547_v39  ;;  %v11493_v15 = vpop.f32.mrf.mxu1  ;;  %v4336_v28 = vadd.f32 %v11327_v58, %v4167_v26 }
 0x595   :  { %13549 = vst [vmem:[#allocation75_spill] sm:$0xff] %v11493_v15 }
 0x597   :  { %v4904_v0 = vpop.f32.mrf.mxu3  ;;  %5166 = vmatmul.bf16.gmra.mxu1 %v13548_v38  ;;  %5528 = vmatmul.bf16.gmra.mxu2 %v13438_v34  ;;  %v13553_v34 = vld [vmem:[#allocation55_spill] sm:$0xff]  ;;  %v13594_v38 = vld [vmem:[#allocation74_spill] sm:$0xff] }
 0x598   :  { %v11488_v19 = vadd.f32 %v4904_v0, %v4331_v46 }
 0x599   :  { %v3999_v63 = vpop.f32.mrf.mxu0 }
 0x59a   :  { %v11495_v47 = vpop.f32.mrf.mxu2  ;;  %v4169_v44 = vadd.f32 %v11329_v31, %v3999_v63 }
 0x59b   :  { %13550 = vst [vmem:[#allocation49_spill] sm:$0xff] %v11495_v47 }
 0x59c   :  { %v11503_v0 = vpop.f32.mrf.mxu1 }
 0x59d   :  { %13552 = vst [vmem:[#allocation141_spill] sm:$0xff] %v11503_v0 }
 0x59f   :  { %v4906_v53 = vpop.f32.mrf.mxu3 }
 0x5a0   :  { %v11498_v39 = vadd.f32 %v4906_v53, %v4333_v10  ;;  %v13554_v53 = vld [vmem:[#allocation84_spill] sm:$0xff] }
 0x5a1   :  { %v4002_v20 = vpop.f32.mrf.mxu0 }
 0x5a2   :  { %v11501_v46 = vpop.f32.mrf.mxu2 }
 0x5a3   :  { %13551 = vst [vmem:[#allocation52_spill] sm:$0xff] %v11501_v46 }
 0x5a4   :  { %4957 = vmatmul.bf16.gmra.mxu0 %v13553_v34  ;;  %5657 = vmatmul.bf16.gmra.mxu3 %v13553_v34  ;;  %v11515_v10 = vpop.f32.mrf.mxu1  ;;  %v4338_v34 = vadd.f32 %v11335_v60, %v4169_v44  ;;  %v13560_v60 = vld [vmem:[#allocation87_spill] sm:$0xff] }
 0x5a5   :  { %13556 = vst [vmem:[#allocation142_spill] sm:$0xff] %v11515_v10  ;;  %v13582_v10 = vld [vmem:[#allocation117_spill] sm:$0xff] }
 0x5a7   :  { %v4909_v15 = vpop.f32.mrf.mxu3  ;;  %5171 = vmatmul.bf16.gmra.mxu1 %v13554_v53  ;;  %5533 = vmatmul.bf16.gmra.mxu2 %v13442_v1 }
 0x5a8   :  { %v11508_v9 = vadd.f32 %v4909_v15, %v4336_v28  ;;  %v4172_v15 = vadd.f32 %v11339_v12, %v4002_v20 }
 0x5a9   :  { %v4004_v3 = vpop.f32.mrf.mxu0 }
 0x5aa   :  { %v11513_v5 = vpop.f32.mrf.mxu2  ;;  %v4341_v1 = vadd.f32 %v11347_v33, %v4172_v15  ;;  %v4174_v12 = vadd.f32 %v11349_v8, %v4004_v3 }
 0x5ab   :  { %13555 = vst [vmem:[#allocation55_spill] sm:$0xff] %v11513_v5 }
 0x5ac   :  { %v11526_v63 = vpop.f32.mrf.mxu1  ;;  %v4343_v44 = vadd.f32 %v11355_v51, %v4174_v12 }
 0x5ad   :  { %13559 = vst [vmem:[#allocation58_spill] sm:$0xff] %v11526_v63  ;;  %v13570_v63 = vld [vmem:[#allocation64_spill] sm:$0xff] }
 0x5af   :  { %v4911_v0 = vpop.f32.mrf.mxu3 }
 0x5b0   :  { %v11518_v46 = vadd.f32 %v4911_v0, %v4338_v34 }
 0x5b1   :  { %v4007_v58 = vpop.f32.mrf.mxu0 }
 0x5b2   :  { %v11521_v26 = vpop.f32.mrf.mxu2 }
 0x5b3   :  { %13557 = vst [vmem:[#allocation143_spill] sm:$0xff] %v11521_v26 }
 0x5b4   :  { %4962 = vmatmul.bf16.gmra.mxu0 %v13558_v49  ;;  %5662 = vmatmul.bf16.gmra.mxu3 %v13558_v49  ;;  %v11540_v15 = vpop.f32.mrf.mxu1 }
 0x5b5   :  { %13562 = vst [vmem:[#allocation145_spill] sm:$0xff] %v11540_v15 }
 0x5b7   :  { %v4914_v31 = vpop.f32.mrf.mxu3  ;;  %5176 = vmatmul.bf16.gmra.mxu1 %v13560_v60  ;;  %5538 = vmatmul.bf16.gmra.mxu2 %v13446_v59  ;;  %v13578_v60 = vld [vmem:[#allocation67_spill] sm:$0xff] }
 0x5b8   :  { %v11528_v28 = vadd.f32 %v4914_v31, %v4341_v1  ;;  %v13564_v1 = vld [vmem:[#allocation61_spill] sm:$0xff]  ;;  %v13565_v31 = vld [vmem:[#allocation90_spill] sm:$0xff] }
 0x5b9   :  { %v4009_v0 = vpop.f32.mrf.mxu0 }
 0x5ba   :  { %v11533_v20 = vpop.f32.mrf.mxu2 }
 0x5bb   :  { %13561 = vst [vmem:[#allocation144_spill] sm:$0xff] %v11533_v20 }
 0x5bc   :  { %v11552_v3 = vpop.f32.mrf.mxu1 }
 0x5bd   :  { %13567 = vst [vmem:[#allocation147_spill] sm:$0xff] %v11552_v3 }
 0x5bf   :  { %v4916_v34 = vpop.f32.mrf.mxu3 }
 0x5c0   :  { %v11536_v58 = vadd.f32 %v4916_v34, %v4343_v44  ;;  %v13568_v44 = vld [vmem:[#allocation114_spill] sm:$0xff] }
 0x5c1   :  { %v11538_v33 = vpop.f32.mrf.mxu0 }
 0x5c2   :  { %v11542_v49 = vpop.f32.mrf.mxu2 }
 0x5c3   :  { %13563 = vst [vmem:[#allocation146_spill] sm:$0xff] %v11542_v49 }
 0x5c4   :  { %4967 = vmatmul.bf16.gmra.mxu0 %v13564_v1  ;;  %5667 = vmatmul.bf16.gmra.mxu3 %v13564_v1  ;;  %v11561_v1 = vpop.f32.mrf.mxu1 }
 0x5c5   :  { %13571 = vst [vmem:[#allocation64_spill] sm:$0xff] %v11561_v1 }
 0x5c7   :  { %v5628_v59 = vpop.f32.mrf.mxu3  ;;  %5181 = vmatmul.bf16.gmra.mxu1 %v13565_v31  ;;  %5543 = vmatmul.bf16.gmra.mxu2 %v13451_v52 }
 0x5c8   :  { %v13572_v59 = vld [vmem:[#allocation93_spill] sm:$0xff] }
 0x5c9   :  { %v11548_v8 = vpop.f32.mrf.mxu0 }
 0x5ca   :  { %v11550_v51 = vpop.f32.mrf.mxu2 }
 0x5cb   :  { %13566 = vst [vmem:[#allocation61_spill] sm:$0xff] %v11550_v51 }
 0x5cf   :  { %v5630_v0 = vpop.f32.mrf.mxu3 }
 0x5d0   :  { %v13573_v0 = vld [vmem:[#allocation115_spill] sm:$0xff] }
 0x5d1   :  { %v4933_v12 = vpop.f32.mrf.mxu0 }
 0x5d2   :  { %v11555_v34 = vadd.f32 %v4933_v12, %v13568_v44  ;;  %v11557_v15 = vpop.f32.mrf.mxu2 }
 0x5d3   :  { %13569 = vst [vmem:[#allocation114_spill] sm:$0xff] %v11557_v15  ;;  %v11574_v15 = vpop.f32.mrf.mxu1 }
 0x5d4   :  { %4972 = vmatmul.bf16.gmra.mxu0 %v13570_v63  ;;  %5672 = vmatmul.bf16.gmra.mxu3 %v13570_v63  ;;  %13575 = vst [vmem:[#allocation148_spill] sm:$0xff] %v11574_v15  ;;  %v13576_v63 = vld [vmem:[#allocation116_spill] sm:$0xff] }
 0x5d7   :  { %v11563_v52 = vpop.f32.mrf.mxu3  ;;  %5186 = vmatmul.bf16.gmra.mxu1 %v13572_v59  ;;  %5548 = vmatmul.bf16.gmra.mxu2 %v13456_v61  ;;  %v9648_v61 = vld [vmem:[#allocation7 + $0x220] sm:$0xff] }
 0x5d8   :  { %5791 = vmatpush.bf16.msrb.mxu0 %v9648_v61  ;;  %v13580_v59 = vld [vmem:[#allocation95_spill] sm:$0xff] }
 0x5d9   :  { %v4935_v3 = vpop.f32.mrf.mxu0 }
 0x5da   :  { %v11568_v31 = vadd.f32 %v4935_v3, %v13573_v0  ;;  %v11570_v12 = vpop.f32.mrf.mxu2  ;;  %v13579_v0 = vld [vmem:[#allocation96_spill] sm:$0xff] }
 0x5db   :  { %13574 = vst [vmem:[#allocation115_spill] sm:$0xff] %v11570_v12  ;;  %v11587_v15 = vpop.f32.mrf.mxu1 }
 0x5dc   :  { %13581 = vst [vmem:[#allocation67_spill] sm:$0xff] %v11587_v15 }
 0x5df   :  { %v11572_v44 = vpop.f32.mrf.mxu3 }
 0x5e1   :  { %v4938_v51 = vpop.f32.mrf.mxu0 }
 0x5e2   :  { %v11577_v49 = vadd.f32 %v4938_v51, %v13576_v63  ;;  %v11579_v1 = vpop.f32.mrf.mxu2 }
 0x5e3   :  { %13577 = vst [vmem:[#allocation116_spill] sm:$0xff] %v11579_v1  ;;  %v11601_v53 = vpop.f32.mrf.mxu1 }
 0x5e4   :  { %4977 = vmatmul.bf16.gmra.mxu0 %v13578_v60  ;;  %5677 = vmatmul.bf16.gmra.mxu3 %v13578_v60  ;;  %v13584_v60 = vld [vmem:[#allocation71_spill] sm:$0xff] }
 0x5e5   :  { %13586 = vst [vmem:[#allocation71_spill] sm:$0xff] %v11601_v53 }
 0x5e7   :  { %v11583_v3 = vpop.f32.mrf.mxu3  ;;  %5191 = vmatmul.bf16.gmra.mxu1 %v13579_v0  ;;  %5553 = vmatmul.bf16.gmra.mxu2 %v13580_v59  ;;  %v13587_v0 = vld [vmem:[#allocation70_spill] sm:$0xff] }
 0x5e9   :  { %v4940_v12 = vpop.f32.mrf.mxu0 }
 0x5ea   :  { %v11590_v51 = vadd.f32 %v4940_v12, %v13582_v10  ;;  %v11592_v63 = vpop.f32.mrf.mxu2  ;;  %v13588_v10 = vld [vmem:[#allocation99_spill] sm:$0xff]  ;;  %v13589_v12 = vld [vmem:[#allocation98_spill] sm:$0xff] }
 0x5eb   :  { %13583 = vst [vmem:[#allocation95_spill] sm:$0xff] %v11592_v63  ;;  %v13590_v63 = vld [vmem:[#allocation118_spill] sm:$0xff] }
 0x5ef   :  { %v11594_v1 = vpop.f32.mrf.mxu3 }
 0x5f1   :  { %v4943_v20 = vpop.f32.mrf.mxu0 }
 0x5f2   :  { %v11597_v26 = vadd.f32 %v4943_v20, %v13584_v60  ;;  %v11599_v61 = vpop.f32.mrf.mxu2  ;;  %v11614_v60 = vpop.f32.mrf.mxu1 }
 0x5f3   :  { %13585 = vst [vmem:[#allocation117_spill] sm:$0xff] %v11599_v61 }
 0x5f4   :  { %4982 = vmatmul.bf16.gmra.mxu0 %v13587_v0  ;;  %5682 = vmatmul.bf16.gmra.mxu3 %v13587_v0  ;;  %13593 = vst [vmem:[#allocation118_spill] sm:$0xff] %v11614_v60 }
 0x5f7   :  { %v11605_v59 = vpop.f32.mrf.mxu3  ;;  %5196 = vmatmul.bf16.gmra.mxu1 %v13588_v10  ;;  %5558 = vmatmul.bf16.gmra.mxu2 %v13589_v12  ;;  %v13600_v10 = vld [vmem:[#allocation31_spill] sm:$0xff] }
 0x5f9   :  { %v4945_v15 = vpop.f32.mrf.mxu0 }
 0x5fa   :  { %v11610_v5 = vadd.f32 %v4945_v15, %v13590_v63  ;;  %v11612_v20 = vpop.f32.mrf.mxu2  ;;  %v11627_v15 = vpop.f32.mrf.mxu1  ;;  %v13599_v63 = vld [vmem:[#allocation100_spill] sm:$0xff] }
 0x5fb   :  { %13592 = vst [vmem:[#allocation98_spill] sm:$0xff] %v11612_v20  ;;  %v13601_v20 = vld [vmem:[#allocation119_spill] sm:$0xff] }
 0x5fc   :  { %13591 = vst [vmem:[#allocation70_spill] sm:$0xff] %v11610_v5 }
 0x5fd   :  { %13598 = vst [vmem:[#allocation73_spill] sm:$0xff] %v11627_v15  ;;  %v13609_v15 = vld [vmem:[#allocation76_spill] sm:$0xff] }
 0x5ff   :  { %v11616_v61 = vpop.f32.mrf.mxu3 }
 0x601   :  { %v4948_v53 = vpop.f32.mrf.mxu0 }
 0x602   :  { %v11619_v47 = vadd.f32 %v4948_v53, %v13594_v38  ;;  %v11621_v0 = vpop.f32.mrf.mxu2 }
 0x603   :  { %13596 = vst [vmem:[#allocation149_spill] sm:$0xff] %v11621_v0 }
 0x604   :  { %13595 = vst [vmem:[#allocation74_spill] sm:$0xff] %v11619_v47  ;;  %4987 = vmatmul.bf16.gmra.mxu0 %v13597_v45  ;;  %5687 = vmatmul.bf16.gmra.mxu3 %v13597_v45  ;;  %v11638_v47 = vpop.f32.mrf.mxu1  ;;  %v13606_v45 = vld [vmem:[#allocation77_spill] sm:$0xff] }
 0x605   :  { %13605 = vst [vmem:[#allocation151_spill] sm:$0xff] %v11638_v47 }
 0x607   :  { %v11625_v12 = vpop.f32.mrf.mxu3  ;;  %5201 = vmatmul.bf16.gmra.mxu1 %v13599_v63  ;;  %5563 = vmatmul.bf16.gmra.mxu2 %v13600_v10 }
 0x609   :  { %v4950_v60 = vpop.f32.mrf.mxu0 }
 0x60a   :  { %v11632_v30 = vadd.f32 %v4950_v60, %v13601_v20  ;;  %v11634_v38 = vpop.f32.mrf.mxu2  ;;  %v13611_v20 = vld [vmem:[#allocation16_spill] sm:$0xff]  ;;  %v13612_v60 = vld [vmem:[#allocation101_spill] sm:$0xff] }
 0x60b   :  { %13603 = vst [vmem:[#allocation119_spill] sm:$0xff] %v11634_v38  ;;  %v13613_v38 = vld [vmem:[#allocation120_spill] sm:$0xff] }
 0x60c   :  { %13602 = vst [vmem:[#allocation31_spill] sm:$0xff] %v11632_v30 }
 0x60f   :  { %v11636_v53 = vpop.f32.mrf.mxu3 }
 0x610   :  { %13604 = vst [vmem:[#allocation150_spill] sm:$0xff] %v11636_v53 }
 0x611   :  { %v4953_v0 = vpop.f32.mrf.mxu0 }
 0x612   :  { %v11641_v41 = vadd.f32 %v4953_v0, %v13606_v45  ;;  %v11643_v17 = vpop.f32.mrf.mxu2  ;;  %v11656_v0 = vpop.f32.mrf.mxu1 }
 0x613   :  { %13608 = vst [vmem:[#allocation152_spill] sm:$0xff] %v11643_v17 }
 0x614   :  { %13607 = vst [vmem:[#allocation77_spill] sm:$0xff] %v11641_v41  ;;  %4992 = vmatmul.bf16.gmra.mxu0 %v13609_v15  ;;  %5692 = vmatmul.bf16.gmra.mxu3 %v13609_v15  ;;  %v13618_v41 = vld [vmem:[#allocation80_spill] sm:$0xff] }
 0x615   :  { %13616 = vst [vmem:[#allocation153_spill] sm:$0xff] %v11656_v0 }
 0x617   :  { %v11647_v10 = vpop.f32.mrf.mxu3  ;;  %5206 = vmatmul.bf16.gmra.mxu1 %v13611_v20  ;;  %5568 = vmatmul.bf16.gmra.mxu2 %v13612_v60  ;;  %v9647_v60 = vld [vmem:[#allocation7 + $0x218] sm:$0xff] }
 0x618   :  { %13610 = vst [vmem:[#allocation76_spill] sm:$0xff] %v11647_v10  ;;  %v13621_v10 = vld [vmem:[#allocation79_spill] sm:$0xff]  ;;  %5792 = vmatpush.bf16.msrb.mxu0 %v9647_v60 }
 0x619   :  { %v4955_v63 = vpop.f32.mrf.mxu0 }
 0x61a   :  { %v11652_v30 = vadd.f32 %v4955_v63, %v13613_v38  ;;  %v11654_v47 = vpop.f32.mrf.mxu2  ;;  %v11667_v20 = vpop.f32.mrf.mxu1  ;;  %v13624_v38 = vld [vmem:[#allocation18_spill] sm:$0xff] }
 0x61b   :  { %13615 = vst [vmem:[#allocation120_spill] sm:$0xff] %v11654_v47  ;;  %v13625_v47 = vld [vmem:[#allocation102_spill] sm:$0xff] }
 0x61c   :  { %13614 = vst [vmem:[#allocation101_spill] sm:$0xff] %v11652_v30  ;;  %v13626_v30 = vld [vmem:[#allocation121_spill] sm:$0xff] }
 0x61d   :  { %13622 = vst [vmem:[#allocation79_spill] sm:$0xff] %v11667_v20 }
 0x61f   :  { %v11658_v45 = vpop.f32.mrf.mxu3 }
 0x620   :  { %13617 = vst [vmem:[#allocation154_spill] sm:$0xff] %v11658_v45  ;;  %v13631_v45 = vld [vmem:[#allocation83_spill] sm:$0xff] }
 0x621   :  { %v4958_v17 = vpop.f32.mrf.mxu0 }
 0x622   :  { %v11661_v5 = vadd.f32 %v4958_v17, %v13618_v41  ;;  %v11663_v15 = vpop.f32.mrf.mxu2 }
 0x623   :  { %13620 = vst [vmem:[#allocation155_spill] sm:$0xff] %v11663_v15 }
 0x624   :  { %13619 = vst [vmem:[#allocation80_spill] sm:$0xff] %v11661_v5  ;;  %4997 = vmatmul.bf16.gmra.mxu0 %v13621_v10  ;;  %5697 = vmatmul.bf16.gmra.mxu3 %v13621_v10  ;;  %v11680_v5 = vpop.f32.mrf.mxu1 }
 0x625   :  { %13630 = vst [vmem:[#allocation158_spill] sm:$0xff] %v11680_v5  ;;  %v13639_v5 = vld [vmem:[#allocation122_spill] sm:$0xff] }
 0x627   :  { %v11669_v63 = vpop.f32.mrf.mxu3  ;;  %5211 = vmatmul.bf16.gmra.mxu1 %v13624_v38  ;;  %5573 = vmatmul.bf16.gmra.mxu2 %v13625_v47 }
 0x628   :  { %13623 = vst [vmem:[#allocation156_spill] sm:$0xff] %v11669_v63  ;;  %v13634_v63 = vld [vmem:[#allocation82_spill] sm:$0xff] }
 0x629   :  { %v4960_v0 = vpop.f32.mrf.mxu0 }
 0x62a   :  { %v11674_v17 = vadd.f32 %v4960_v0, %v13626_v30  ;;  %v11676_v41 = vpop.f32.mrf.mxu2  ;;  %v13636_v30 = vld [vmem:[#allocation20_spill] sm:$0xff]  ;;  %v13637_v0 = vld [vmem:[#allocation103_spill] sm:$0xff] }
 0x62b   :  { %13628 = vst [vmem:[#allocation121_spill] sm:$0xff] %v11676_v41 }
 0x62c   :  { %13627 = vst [vmem:[#allocation102_spill] sm:$0xff] %v11674_v17  ;;  %v11693_v41 = vpop.f32.mrf.mxu1 }
 0x62d   :  { %13638 = vst [vmem:[#allocation103_spill] sm:$0xff] %v11693_v41 }
 0x62f   :  { %v11678_v15 = vpop.f32.mrf.mxu3 }
 0x630   :  { %13629 = vst [vmem:[#allocation157_spill] sm:$0xff] %v11678_v15 }
 0x631   :  { %v4963_v10 = vpop.f32.mrf.mxu0 }
 0x632   :  { %v11683_v20 = vadd.f32 %v4963_v10, %v13631_v45  ;;  %v11685_v60 = vpop.f32.mrf.mxu2 }
 0x633   :  { %13633 = vst [vmem:[#allocation159_spill] sm:$0xff] %v11685_v60 }
 0x634   :  { %13632 = vst [vmem:[#allocation83_spill] sm:$0xff] %v11683_v20  ;;  %5002 = vmatmul.bf16.gmra.mxu0 %v13634_v63  ;;  %5702 = vmatmul.bf16.gmra.mxu3 %v13634_v63  ;;  %v13642_v20 = vld [vmem:[#allocation86_spill] sm:$0xff]  ;;  %v11703_v53 = vpop.f32.mrf.mxu1 }
 0x635   :  { %13644 = vst [vmem:[#allocation161_spill] sm:$0xff] %v11703_v53 }
 0x637   :  { %v11689_v47 = vpop.f32.mrf.mxu3  ;;  %5216 = vmatmul.bf16.gmra.mxu1 %v13636_v30  ;;  %5578 = vmatmul.bf16.gmra.mxu2 %v13637_v0  ;;  %v13647_v30 = vld [vmem:[#allocation22_spill] sm:$0xff] }
 0x638   :  { %13635 = vst [vmem:[#allocation82_spill] sm:$0xff] %v11689_v47  ;;  %v13645_v47 = vld [vmem:[#allocation85_spill] sm:$0xff] }
 0x639   :  { %v4965_v38 = vpop.f32.mrf.mxu0 }
 0x63a   :  { %v11696_v17 = vadd.f32 %v4965_v38, %v13639_v5  ;;  %v5539_v45 = vpop.f32.mrf.mxu2  ;;  %v13648_v5 = vld [vmem:[#allocation104_spill] sm:$0xff] }
 0x63b   :  { %v13649_v45 = vld [vmem:[#allocation123_spill] sm:$0xff] }
 0x63c   :  { %13640 = vst [vmem:[#allocation122_spill] sm:$0xff] %v11696_v17  ;;  %v11714_v17 = vpop.f32.mrf.mxu1 }
 0x63f   :  { %v11698_v10 = vpop.f32.mrf.mxu3 }
 0x640   :  { %13641 = vst [vmem:[#allocation160_spill] sm:$0xff] %v11698_v10 }
 0x641   :  { %v4968_v60 = vpop.f32.mrf.mxu0 }
 0x642   :  { %v11701_v15 = vadd.f32 %v4968_v60, %v13642_v20  ;;  %v5541_v63 = vpop.f32.mrf.mxu2 }
 0x643   :  { %v13652_v63 = vld [vmem:[#allocation89_spill] sm:$0xff] }
 0x644   :  { %13643 = vst [vmem:[#allocation86_spill] sm:$0xff] %v11701_v15  ;;  %5007 = vmatmul.bf16.gmra.mxu0 %v13645_v47  ;;  %5707 = vmatmul.bf16.gmra.mxu3 %v13645_v47  ;;  %v13654_v15 = vld [vmem:[#allocation88_spill] sm:$0xff] }
 0x647   :  { %v11707_v0 = vpop.f32.mrf.mxu3  ;;  %5221 = vmatmul.bf16.gmra.mxu1 %v13647_v30  ;;  %5583 = vmatmul.bf16.gmra.mxu2 %v13648_v5  ;;  %v11725_v30 = vpop.f32.mrf.mxu1  ;;  %v13656_v5 = vld [vmem:[#allocation24_spill] sm:$0xff] }
 0x648   :  { %13646 = vst [vmem:[#allocation85_spill] sm:$0xff] %v11707_v0 }
 0x649   :  { %v4970_v38 = vpop.f32.mrf.mxu0 }
 0x64a   :  { %v11712_v41 = vadd.f32 %v4970_v38, %v13649_v45  ;;  %v13657_v38 = vld [vmem:[#allocation105_spill] sm:$0xff] }
 0x64c   :  { %13650 = vst [vmem:[#allocation104_spill] sm:$0xff] %v11712_v41  ;;  %v13658_v41 = vld [vmem:[#allocation124_spill] sm:$0xff] }
 0x64f   :  { %v11716_v20 = vpop.f32.mrf.mxu3 }
 0x650   :  { %13651 = vst [vmem:[#allocation123_spill] sm:$0xff] %v11716_v20 }
 0x651   :  { %v4973_v60 = vpop.f32.mrf.mxu0 }
 0x652   :  { %v11719_v53 = vadd.f32 %v4973_v60, %v13652_v63  ;;  %v11734_v63 = vpop.f32.mrf.mxu1 }
 0x653   :  { %13661 = vst [vmem:[#allocation162_spill] sm:$0xff] %v11734_v63 }
 0x654   :  { %13653 = vst [vmem:[#allocation89_spill] sm:$0xff] %v11719_v53  ;;  %5012 = vmatmul.bf16.gmra.mxu0 %v13654_v15  ;;  %5712 = vmatmul.bf16.gmra.mxu3 %v13654_v15  ;;  %v13662_v53 = vld [vmem:[#allocation92_spill] sm:$0xff]  ;;  %v13664_v15 = vld [vmem:[#allocation91_spill] sm:$0xff] }
 0x657   :  { %v11723_v47 = vpop.f32.mrf.mxu3  ;;  %5226 = vmatmul.bf16.gmra.mxu1 %v13656_v5  ;;  %5588 = vmatmul.bf16.gmra.mxu2 %v13657_v38  ;;  %v13666_v38 = vld [vmem:[#allocation26_spill] sm:$0xff] }
 0x658   :  { %13655 = vst [vmem:[#allocation88_spill] sm:$0xff] %v11723_v47  ;;  %v9646_v47 = vld [vmem:[#allocation7 + $0x210] sm:$0xff] }
 0x659   :  { %v4975_v45 = vpop.f32.mrf.mxu0  ;;  %5793 = vmatpush.bf16.msrb.mxu0 %v9646_v47 }
 0x65a   :  { %v11730_v0 = vadd.f32 %v4975_v45, %v13658_v41  ;;  %v13667_v41 = vld [vmem:[#allocation106_spill] sm:$0xff]  ;;  %v11748_v63 = vpop.f32.mrf.mxu1 }
 0x65c   :  { %13659 = vst [vmem:[#allocation105_spill] sm:$0xff] %v11730_v0  ;;  %v13668_v0 = vld [vmem:[#allocation125_spill] sm:$0xff] }
 0x65d   :  { %13670 = vst [vmem:[#allocation125_spill] sm:$0xff] %v11748_v63 }
 0x65f   :  { %v11732_v20 = vpop.f32.mrf.mxu3 }
 0x660   :  { %13660 = vst [vmem:[#allocation124_spill] sm:$0xff] %v11732_v20 }
 0x661   :  { %v4978_v60 = vpop.f32.mrf.mxu0 }
 0x662   :  { %v11737_v10 = vadd.f32 %v4978_v60, %v13662_v53  ;;  %v11757_v47 = vpop.f32.mrf.mxu1 }
 0x664   :  { %13663 = vst [vmem:[#allocation92_spill] sm:$0xff] %v11737_v10  ;;  %5017 = vmatmul.bf16.gmra.mxu0 %v13664_v15  ;;  %5717 = vmatmul.bf16.gmra.mxu3 %v13664_v15  ;;  %v13672_v10 = vld [vmem:[#allocation126_spill] sm:$0xff] }
 0x665   :  { %v13674_v15 = vld [vmem:[#allocation94_spill] sm:$0xff] }
 0x666   :  { %13675 = vst [vmem:[#allocation94_spill] sm:$0xff] %v11757_v47  ;;  %v13685_v47 = vld [vmem:[#allocation128_spill] sm:$0xff] }
 0x667   :  { %v11741_v5 = vpop.f32.mrf.mxu3  ;;  %5231 = vmatmul.bf16.gmra.mxu1 %v13666_v38  ;;  %5593 = vmatmul.bf16.gmra.mxu2 %v13667_v41  ;;  %v11759_v38 = vpop.f32.mrf.mxu2 }
 0x668   :  { %13665 = vst [vmem:[#allocation91_spill] sm:$0xff] %v11741_v5 }
 0x669   :  { %v4980_v45 = vpop.f32.mrf.mxu0  ;;  %13676 = vst [vmem:[#allocation164_spill] sm:$0xff] %v11759_v38  ;;  %v13687_v38 = vld [vmem:[#allocation97_spill] sm:$0xff] }
 0x66a   :  { %v11746_v20 = vadd.f32 %v4980_v45, %v13668_v0  ;;  %v13678_v0 = vld [vmem:[#allocation28_spill] sm:$0xff]  ;;  %v13679_v45 = vld [vmem:[#allocation107_spill] sm:$0xff] }
 0x66c   :  { %13669 = vst [vmem:[#allocation106_spill] sm:$0xff] %v11746_v20  ;;  %v13680_v20 = vld [vmem:[#allocation127_spill] sm:$0xff] }
 0x66f   :  { %v11750_v53 = vpop.f32.mrf.mxu3 }
 0x670   :  { %13671 = vst [vmem:[#allocation163_spill] sm:$0xff] %v11750_v53 }
 0x671   :  { %v4983_v60 = vpop.f32.mrf.mxu0 }
 0x672   :  { %v11753_v32 = vadd.f32 %v4983_v60, %v13672_v10  ;;  %v11770_v60 = vpop.f32.mrf.mxu1 }
 0x673   :  { %13683 = vst [vmem:[#allocation166_spill] sm:$0xff] %v11770_v60 }
 0x674   :  { %13673 = vst [vmem:[#allocation126_spill] sm:$0xff] %v11753_v32  ;;  %5022 = vmatmul.bf16.gmra.mxu0 %v13674_v15  ;;  %5722 = vmatmul.bf16.gmra.mxu3 %v13674_v15  ;;  %v11772_v32 = vpop.f32.mrf.mxu2 }
 0x675   :  { %13684 = vst [vmem:[#allocation167_spill] sm:$0xff] %v11772_v32  ;;  %v13693_v32 = vld [vmem:[#allocation129_spill] sm:$0xff] }
 0x677   :  { %v11761_v41 = vpop.f32.mrf.mxu3  ;;  %5236 = vmatmul.bf16.gmra.mxu1 %v13678_v0  ;;  %5598 = vmatmul.bf16.gmra.mxu2 %v13679_v45  ;;  %v13689_v45 = vld [vmem:[#allocation32_spill] sm:$0xff] }
 0x678   :  { %13677 = vst [vmem:[#allocation165_spill] sm:$0xff] %v11761_v41 }
 0x679   :  { %v4985_v63 = vpop.f32.mrf.mxu0 }
 0x67a   :  { %v11766_v53 = vadd.f32 %v4985_v63, %v13680_v20  ;;  %v13690_v20 = vld [vmem:[#allocation108_spill] sm:$0xff] }
 0x67c   :  { %13681 = vst [vmem:[#allocation107_spill] sm:$0xff] %v11766_v53  ;;  %v11783_v53 = vpop.f32.mrf.mxu1  ;;  %v11785_v60 = vpop.f32.mrf.mxu2 }
 0x67d   :  { %13691 = vst [vmem:[#allocation108_spill] sm:$0xff] %v11783_v53  ;;  %v13702_v53 = vld [vmem:[#allocation110_spill] sm:$0xff] }
 0x67e   :  { %13692 = vst [vmem:[#allocation168_spill] sm:$0xff] %v11785_v60  ;;  %v13704_v60 = vld [vmem:[#allocation131_spill] sm:$0xff] }
 0x67f   :  { %v11768_v10 = vpop.f32.mrf.mxu3 }
 0x680   :  { %13682 = vst [vmem:[#allocation127_spill] sm:$0xff] %v11768_v10 }
 0x681   :  { %v4988_v15 = vpop.f32.mrf.mxu0 }
 0x682   :  { %v11775_v5 = vadd.f32 %v4988_v15, %v13685_v47 }
 0x684   :  { %13686 = vst [vmem:[#allocation128_spill] sm:$0xff] %v11775_v5  ;;  %5027 = vmatmul.bf16.gmra.mxu0 %v13687_v38  ;;  %5727 = vmatmul.bf16.gmra.mxu3 %v13687_v38  ;;  %v13696_v5 = vld [vmem:[#allocation130_spill] sm:$0xff]  ;;  %v11795_v38 = vpop.f32.mrf.mxu1 }
 0x685   :  { %13698 = vst [vmem:[#allocation170_spill] sm:$0xff] %v11795_v38 }
 0x687   :  { %v11779_v0 = vpop.f32.mrf.mxu3  ;;  %5241 = vmatmul.bf16.gmra.mxu1 %v13689_v45  ;;  %5603 = vmatmul.bf16.gmra.mxu2 %v13690_v20  ;;  %v13700_v45 = vld [vmem:[#allocation29_spill] sm:$0xff] }
 0x688   :  { %13688 = vst [vmem:[#allocation97_spill] sm:$0xff] %v11779_v0  ;;  %v11797_v0 = vpop.f32.mrf.mxu2 }
 0x689   :  { %v4990_v63 = vpop.f32.mrf.mxu0  ;;  %13699 = vst [vmem:[#allocation171_spill] sm:$0xff] %v11797_v0 }
 0x68a   :  { %v11788_v10 = vadd.f32 %v4990_v63, %v13693_v32  ;;  %v13703_v32 = vld [vmem:[#allocation34_spill] sm:$0xff] }
 0x68c   :  { %13694 = vst [vmem:[#allocation129_spill] sm:$0xff] %v11788_v10 }
 0x68f   :  { %v11790_v47 = vpop.f32.mrf.mxu3 }
 0x690   :  { %13695 = vst [vmem:[#allocation169_spill] sm:$0xff] %v11790_v47 }
 0x691   :  { %v4993_v15 = vpop.f32.mrf.mxu0 }
 0x692   :  { %v11793_v41 = vadd.f32 %v4993_v15, %v13696_v5  ;;  %v11808_v5 = vpop.f32.mrf.mxu1  ;;  %v11810_v15 = vpop.f32.mrf.mxu2 }
 0x693   :  { %13706 = vst [vmem:[#allocation131_spill] sm:$0xff] %v11808_v5  ;;  %v13715_v5 = vld [vmem:[#allocation38_spill] sm:$0xff] }
 0x694   :  { %13697 = vst [vmem:[#allocation130_spill] sm:$0xff] %v11793_v41  ;;  %5032 = vmatmul.bf16.gmra.mxu0 %v13700_v45  ;;  %5732 = vmatmul.bf16.gmra.mxu3 %v13700_v45  ;;  %v13709_v41 = vld [vmem:[#allocation132_spill] sm:$0xff]  ;;  %v13711_v45 = vld [vmem:[#allocation33_spill] sm:$0xff] }
 0x695   :  { %13707 = vst [vmem:[#allocation172_spill] sm:$0xff] %v11810_v15 }
 0x697   :  { %v11801_v20 = vpop.f32.mrf.mxu3  ;;  %5246 = vmatmul.bf16.gmra.mxu1 %v13702_v53  ;;  %5608 = vmatmul.bf16.gmra.mxu2 %v13703_v32  ;;  %v9645_v53 = vld [vmem:[#allocation7 + $0x208] sm:$0xff] }
 0x698   :  { %13701 = vst [vmem:[#allocation29_spill] sm:$0xff] %v11801_v20  ;;  %5794 = vmatpush.bf16.msrb.mxu0 %v9645_v53  ;;  %v13720_v53 = vld [vmem:[#allocation17_spill] sm:$0xff] }
 0x699   :  { %v4995_v63 = vpop.f32.mrf.mxu0 }
 0x69a   :  { %v11806_v10 = vadd.f32 %v4995_v63, %v13704_v60  ;;  %v11821_v60 = vpop.f32.mrf.mxu1  ;;  %v11823_v63 = vpop.f32.mrf.mxu2 }
 0x69b   :  { %13713 = vst [vmem:[#allocation174_spill] sm:$0xff] %v11821_v60 }
 0x69c   :  { %13705 = vst [vmem:[#allocation34_spill] sm:$0xff] %v11806_v10  ;;  %v13716_v10 = vld [vmem:[#allocation133_spill] sm:$0xff] }
 0x69d   :  { %13714 = vst [vmem:[#allocation175_spill] sm:$0xff] %v11823_v63 }
 0x69f   :  { %v11812_v38 = vpop.f32.mrf.mxu3 }
 0x6a0   :  { %13708 = vst [vmem:[#allocation173_spill] sm:$0xff] %v11812_v38 }
 0x6a1   :  { %v4998_v0 = vpop.f32.mrf.mxu0 }
 0x6a2   :  { %v11815_v47 = vadd.f32 %v4998_v0, %v13709_v41 }
 0x6a4   :  { %13710 = vst [vmem:[#allocation132_spill] sm:$0xff] %v11815_v47  ;;  %5037 = vmatmul.bf16.gmra.mxu0 %v13711_v45  ;;  %5737 = vmatmul.bf16.gmra.mxu3 %v13711_v45  ;;  %v13719_v45 = vld [vmem:[#allocation134_spill] sm:$0xff] }
 0x6a7   :  { %v11819_v32 = vpop.f32.mrf.mxu3  ;;  %5251 = vmatmul.bf16.gmra.mxu1 %v13715_v5  ;;  %5613 = vmatmul.bf16.gmra.mxu2 %v13518_v23  ;;  %v11838_v5 = vld [vmem:[#allocation8] ss:$0 sm:$0xff] }
 0x6a8   :  { %13712 = vst [vmem:[#allocation33_spill] sm:$0xff] %v11819_v32  ;;  %v13722_v32 = vld [vmem:[#allocation35_spill] sm:$0xff] }
 0x6a9   :  { %v5000_v15 = vpop.f32.mrf.mxu0 }
 0x6aa   :  { %v11828_v41 = vadd.f32 %v5000_v15, %v13716_v10 }
 0x6ac   :  { %13717 = vst [vmem:[#allocation133_spill] sm:$0xff] %v11828_v41 }
 0x6af   :  { %v11830_v0 = vpop.f32.mrf.mxu3 }
 0x6b0   :  { %13718 = vst [vmem:[#allocation176_spill] sm:$0xff] %v11830_v0 }
 0x6b1   :  { %v5003_v47 = vpop.f32.mrf.mxu0 }
 0x6b2   :  { %v5004_v38 = vadd.f32 %v5003_v47, %v13719_v45 }
 0x6b4   :  { %5042 = vmatmul.bf16.gmra.mxu0 %v13720_v53  ;;  %5742 = vmatmul.bf16.gmra.mxu3 %v13720_v53  ;;  %v5173_v63 = vadd.f32 %v11714_v17, %v5004_v38  ;;  %v13726_v17 = vld [vmem:[#allocation19_spill] sm:$0xff] }
 0x6b6   :  { %v6311_v10 = vadd.f32 %v11838_v5, %v5173_v63 }
 0x6b7   :  { %v11835_v60 = vpop.f32.mrf.mxu3 }
 0x6b8   :  { %13721 = vst [vmem:[#allocation134_spill] sm:$0xff] %v11835_v60  ;;  %v6375_v45 = vmax.f32 %v6311_v10, 0.0  ;;  %v13732_v10 = vld [vmem:[#allocation44_spill] sm:$0xff] }
 0x6b9   :  { %v5005_v23 = vpop.f32.mrf.mxu0 }
 0x6ba   :  { %v5006_v20 = vadd.f32 %v5005_v23, %v13722_v32 }
 0x6bc   :  { %v5175_v15 = vadd.f32 %v11725_v30, %v5006_v20  ;;  %v13728_v30 = vld [vmem:[#allocation136_spill] sm:$0xff] }
 0x6be   :  { %v6312_v41 = vadd.f32 %v11838_v5, %v5175_v15  ;;  %v13730_v15 = vld [vmem:[#allocation21_spill] sm:$0xff] }
 0x6bf   :  { %v11844_v47 = vpop.f32.mrf.mxu3 }
 0x6c0   :  { %13723 = vst [vmem:[#allocation17_spill] sm:$0xff] %v11844_v47  ;;  %v6376_v0 = vmax.f32 %v6312_v41, 0.0  ;;  %v11859_v41 = vpop.f32.mrf.mxu1 }
 0x6c1   :  { %v11846_v53 = vpop.f32.mrf.mxu0  ;;  %13731 = vst [vmem:[#allocation21_spill] sm:$0xff] %v11859_v41  ;;  %v13739_v41 = vld [vmem:[#allocation47_spill] sm:$0xff] }
 0x6c2   :  { %13724 = vst [vmem:[#allocation35_spill] sm:$0xff] %v11846_v53  ;;  %v11848_v60 = vpack.c.bf16 %v6376_v0, %v6375_v45 }
 0x6c4   :  { %13725 = vst [vmem:[#allocation177_spill] sm:$0xff] %v11848_v60  ;;  %5047 = vmatmul.bf16.gmra.mxu0 %v13726_v17  ;;  %5747 = vmatmul.bf16.gmra.mxu3 %v13726_v17 }
 0x6c7   :  { %v5708_v38 = vpop.f32.mrf.mxu3 }
 0x6c8   :  { %v11864_v60 = vpop.f32.mrf.mxu1  ;;  %v13735_v38 = vld [vmem:[#allocation137_spill] sm:$0xff] }
 0x6c9   :  { %v11852_v32 = vpop.f32.mrf.mxu0  ;;  %13734 = vst [vmem:[#allocation178_spill] sm:$0xff] %v11864_v60 }
 0x6ca   :  { %13727 = vst [vmem:[#allocation19_spill] sm:$0xff] %v11852_v32 }
 0x6cf   :  { %v5710_v63 = vpop.f32.mrf.mxu3 }
 0x6d0   :  { %v13737_v63 = vld [vmem:[#allocation23_spill] sm:$0xff] }
 0x6d1   :  { %v5013_v23 = vpop.f32.mrf.mxu0 }
 0x6d2   :  { %v11855_v20 = vadd.f32 %v5013_v23, %v13728_v30  ;;  %v9644_v23 = vld [vmem:[#allocation7 + $0x200] sm:$0xff]  ;;  %v11871_v30 = vpop.f32.mrf.mxu1 }
 0x6d3   :  { %5795 = vmatpush.bf16.msrb.mxu0 %v9644_v23  ;;  %13738 = vst [vmem:[#allocation23_spill] sm:$0xff] %v11871_v30 }
 0x6d4   :  { %13729 = vst [vmem:[#allocation136_spill] sm:$0xff] %v11855_v20  ;;  %5052 = vmatmul.bf16.gmra.mxu0 %v13730_v15  ;;  %5752 = vmatmul.bf16.gmra.mxu3 %v13730_v15 }
 0x6d7   :  { %v11888_v53 = vpop.f32.mrf.mxu3 }
 0x6d8   :  { %13748 = vst [vmem:[#allocation180_spill] sm:$0xff] %v11888_v53  ;;  %v9683_v53 = vld [vmem:[#allocation10 + $0xf4] sm:$0xf0] }
 0x6d9   :  { %v5015_v0 = vpop.f32.mrf.mxu0 }
 0x6da   :  { %v11862_v45 = vadd.f32 %v5015_v0, %v13732_v10  ;;  %v13741_v10 = vld [vmem:[#allocation138_spill] sm:$0xff]  ;;  %v11879_v60 = vpop.f32.mrf.mxu1 }
 0x6db   :  { %13743 = vst [vmem:[#allocation179_spill] sm:$0xff] %v11879_v60 }
 0x6dc   :  { %13733 = vst [vmem:[#allocation44_spill] sm:$0xff] %v11862_v45 }
 0x6e1   :  { %v5018_v17 = vpop.f32.mrf.mxu0 }
 0x6e2   :  { %v11867_v32 = vadd.f32 %v5018_v17, %v13735_v38  ;;  %v13744_v17 = vld [vmem:[#allocation25_spill] sm:$0xff]  ;;  %v11886_v23 = vpop.f32.mrf.mxu1 }
 0x6e4   :  { %13736 = vst [vmem:[#allocation137_spill] sm:$0xff] %v11867_v32  ;;  %5057 = vmatmul.bf16.gmra.mxu0 %v13737_v63  ;;  %5757 = vmatmul.bf16.gmra.mxu3 %v13737_v63  ;;  %v13745_v63 = vld [vmem:[#allocation50_spill] sm:$0xff] }
 0x6e5   :  { %13747 = vst [vmem:[#allocation50_spill] sm:$0xff] %v11886_v23 }
 0x6e9   :  { %v5020_v15 = vpop.f32.mrf.mxu0 }
 0x6ea   :  { %v11874_v20 = vadd.f32 %v5020_v15, %v13739_v41  ;;  %v13749_v41 = vld [vmem:[#allocation139_spill] sm:$0xff] }
 0x6ec   :  { %13740 = vst [vmem:[#allocation47_spill] sm:$0xff] %v11874_v20 }
 0x6f1   :  { %v5023_v0 = vpop.f32.mrf.mxu0 }
 0x6f2   :  { %v11877_v45 = vadd.f32 %v5023_v0, %v13741_v10  ;;  %v13751_v0 = vld [vmem:[#allocation27_spill] sm:$0xff]  ;;  %v11895_v10 = vpop.f32.mrf.mxu1 }
 0x6f3   :  { %13752 = vst [vmem:[#allocation27_spill] sm:$0xff] %v11895_v10  ;;  %v13760_v10 = vld [vmem:[#allocation56_spill] sm:$0xff] }
 0x6f4   :  { %13742 = vst [vmem:[#allocation138_spill] sm:$0xff] %v11877_v45  ;;  %5062 = vmatmul.bf16.gmra.mxu0 %v13744_v17  ;;  %5762 = vmatmul.bf16.gmra.mxu3 %v13744_v17  ;;  %v13753_v17 = vld [vmem:[#allocation53_spill] sm:$0xff] }
 0x6f9   :  { %v5025_v38 = vpop.f32.mrf.mxu0 }
 0x6fa   :  { %v11884_v32 = vadd.f32 %v5025_v38, %v13745_v63  ;;  %v11900_v38 = vpop.f32.mrf.mxu3  ;;  %v11902_v63 = vpop.f32.mrf.mxu1 }
 0x6fb   :  { %13755 = vst [vmem:[#allocation181_spill] sm:$0xff] %v11900_v38  ;;  %v9414_v38 = vld [vmem:[#allocation10 + $0xe8] sm:$0xf] }
 0x6fc   :  { %13746 = vst [vmem:[#allocation25_spill] sm:$0xff] %v11884_v32  ;;  %v13757_v32 = vld [vmem:[#allocation140_spill] sm:$0xff]  ;;  %v9415_v47 = vor.u32 %v9683_v53, %v9414_v38 }
 0x6fd   :  { %13756 = vst [vmem:[#allocation182_spill] sm:$0xff] %v11902_v63 }
 0x6fe   :  { %6981 = vmatpush.bf16.msra.mxu3 %v9415_v47 }
 0x701   :  { %v5028_v30 = vpop.f32.mrf.mxu0 }
 0x702   :  { %v11891_v15 = vadd.f32 %v5028_v30, %v13749_v41  ;;  %v13759_v30 = vld [vmem:[#allocation30_spill] sm:$0xff]  ;;  %v11909_v41 = vpop.f32.mrf.mxu3 }
 0x704   :  { %13750 = vst [vmem:[#allocation139_spill] sm:$0xff] %v11891_v15  ;;  %5067 = vmatmul.bf16.gmra.mxu0 %v13751_v0  ;;  %5767 = vmatmul.bf16.gmra.mxu3 %v13751_v0 }
 0x709   :  { %v5030_v60 = vpop.f32.mrf.mxu0 }
 0x70a   :  { %v11898_v45 = vadd.f32 %v5030_v60, %v13753_v17  ;;  %v11914_v60 = vpop.f32.mrf.mxu1  ;;  %v9680_v17 = vld [vmem:[#allocation10 + $0xe4] sm:$0xf] }
 0x70b   :  { %13762 = vst [vmem:[#allocation56_spill] sm:$0xff] %v11914_v60  ;;  %v9681_v60 = vld [vmem:[#allocation10 + $0xec] sm:$0xf] }
 0x70c   :  { %13754 = vst [vmem:[#allocation53_spill] sm:$0xff] %v11898_v45  ;;  %v9408_v45 = vld [vmem:[#allocation10 + $0xf0] sm:$0xf0] }
 0x70d   :  { %v9411_v63 = vor.u32 %v9680_v17, %v9408_v45  ;;  %v9416_v17 = vld [vmem:[#allocation10 + $0xf8] sm:$0xf0] }
 0x70e   :  { %v9419_v53 = vor.u32 %v9681_v60, %v9416_v17 }
 0x70f   :  { %6812 = vmatpush.bf16.msra.mxu2 %v9411_v63 }
 0x710   :  { %7150 = vmatpush.bf16.msra.mxu0 %v9419_v53 }
 0x711   :  { %v5033_v23 = vpop.f32.mrf.mxu0 }
 0x712   :  { %v11905_v20 = vadd.f32 %v5033_v23, %v13757_v32  ;;  %v11916_v32 = vpop.f32.mrf.mxu3 }
 0x714   :  { %13758 = vst [vmem:[#allocation140_spill] sm:$0xff] %v11905_v20  ;;  %5072 = vmatmul.bf16.gmra.mxu0 %v13759_v30  ;;  %5772 = vmatmul.bf16.gmra.mxu3 %v13759_v30  ;;  %v13764_v20 = vld [vmem:[#allocation109_spill] sm:$0xff] }
 0x719   :  { %v5035_v0 = vpop.f32.mrf.mxu0 }
 0x71a   :  { %v11912_v15 = vadd.f32 %v5035_v0, %v13760_v10  ;;  %v9406_v10 = vld [vmem:[#allocation10 + $0xe0] sm:$0xf]  ;;  %v9682_v0 = vld [vmem:[#allocation10 + $0xec] sm:$0xf0]  ;;  %v11925_v47 = vpop.f32.mrf.mxu3 }
 0x71b   :  { %v9407_v45 = vor.u32 %v9682_v0, %v9406_v10 }
 0x71c   :  { %13761 = vst [vmem:[#allocation30_spill] sm:$0xff] %v11912_v15  ;;  %v11923_v15 = vpop.f32.mrf.mxu1 }
 0x71d   :  { %13765 = vst [vmem:[#allocation109_spill] sm:$0xff] %v11923_v15  ;;  %6643 = vmatpush.bf16.msra.mxu1 %v9407_v45  ;;  %v13769_v15 = vld [vmem:[#allocation36_spill] sm:$0xff] }
 0x721   :  { %v5038_v23 = vpop.f32.mrf.mxu0 }
 0x722   :  { %v11919_v30 = vadd.f32 %v5038_v23, %v11360_v48 }
 0x724   :  { %13763 = vst [vmem:[#allocation183_spill] sm:$0xff] %v11919_v30  ;;  %5077 = vmatmul.bf16.gmra.mxu0 %v13764_v20  ;;  %5777 = vmatmul.bf16.gmra.mxu3 %v13764_v20  ;;  %v11930_v63 = vpop.f32.mrf.mxu1  ;;  %v11935_v30 = vpop.f32.mrf.mxu3 }
 0x725   :  { %13767 = vst [vmem:[#allocation185_spill] sm:$0xff] %v11930_v63  ;;  %v9398_v63 = vld [vmem:[#allocation10 + $0xc8] sm:$0xf] }
 0x729   :  { %v5040_v38 = vpop.f32.mrf.mxu0 }
 0x72a   :  { %v11928_v48 = vadd.f32 %v5040_v38, %v11366_v55 }
 0x72c   :  { %13766 = vst [vmem:[#allocation184_spill] sm:$0xff] %v11928_v48  ;;  %v11939_v60 = vpop.f32.mrf.mxu1  ;;  %v9344_v48 = vld [vmem:[#allocation10 + $0x70] sm:$0xf0] }
 0x72d   :  { %13770 = vst [vmem:[#allocation36_spill] sm:$0xff] %v11939_v60 }
 0x731   :  { %v5043_v23 = vpop.f32.mrf.mxu0 }
 0x732   :  { %v11933_v20 = vadd.f32 %v5043_v23, %v11374_v2  ;;  %v13774_v2 = vld [vmem:[#allocation39_spill] sm:$0xff] }
 0x734   :  { %13768 = vst [vmem:[#allocation186_spill] sm:$0xff] %v11933_v20  ;;  %5082 = vmatmul.bf16.gmra.mxu0 %v13769_v15  ;;  %5782 = vmatmul.bf16.gmra.mxu3 %v13769_v15  ;;  %v11947_v17 = vpop.f32.mrf.mxu1 }
 0x735   :  { %13773 = vst [vmem:[#allocation189_spill] sm:$0xff] %v11947_v17  ;;  %v9676_v17 = vld [vmem:[#allocation10 + $0xc4] sm:$0xf] }
 0x739   :  { %v5045_v10 = vpop.f32.mrf.mxu0 }
 0x73a   :  { %v11942_v0 = vadd.f32 %v5045_v10, %v11382_v13  ;;  %v13778_v13 = vld [vmem:[#allocation42_spill] sm:$0xff] }
 0x73c   :  { %13771 = vst [vmem:[#allocation187_spill] sm:$0xff] %v11942_v0  ;;  %v11953_v23 = vpop.f32.mrf.mxu1 }
 0x73d   :  { %13776 = vst [vmem:[#allocation190_spill] sm:$0xff] %v11953_v23 }
 0x741   :  { %v5048_v55 = vpop.f32.mrf.mxu0 }
 0x742   :  { %v11945_v45 = vadd.f32 %v5048_v55, %v11390_v4 }
 0x744   :  { %13772 = vst [vmem:[#allocation188_spill] sm:$0xff] %v11945_v45  ;;  %5796 = vmatmul.bf16.vlgmr.msrb.gmra.mxu0 %v13774_v2  ;;  %v11959_v10 = vpop.f32.mrf.mxu1  ;;  %v9392_v2 = vld [vmem:[#allocation10 + $0xd0] sm:$0xf0] }
 0x745   :  { %13779 = vst [vmem:[#allocation42_spill] sm:$0xff] %v11959_v10  ;;  %v9395_v45 = vor.u32 %v9676_v17, %v9392_v2  ;;  %v9390_v10 = vld [vmem:[#allocation10 + $0xc0] sm:$0xf] }
 0x747   :  { %6813 = vmatpush.bf16.msra.mxu2 %v9395_v45 }
 0x749   :  { %v5050_v53 = vpop.f32.mrf.mxu0 }
 0x74a   :  { %v11951_v38 = vadd.f32 %v5050_v53, %v11400_v21  ;;  %v9679_v21 = vld [vmem:[#allocation10 + $0xd4] sm:$0xf0] }
 0x74b   :  { %v9399_v53 = vor.u32 %v9679_v21, %v9398_v63  ;;  %v13787_v21 = vld [vmem:[#allocation48_spill] sm:$0xff] }
 0x74c   :  { %13775 = vst [vmem:[#allocation39_spill] sm:$0xff] %v11951_v38  ;;  %v11964_v23 = vpop.f32.mrf.mxu1 }
 0x74d   :  { %6982 = vmatpush.bf16.msra.mxu3 %v9399_v53  ;;  %13781 = vst [vmem:[#allocation193_spill] sm:$0xff] %v11964_v23 }
 0x751   :  { %v5053_v15 = vpop.f32.mrf.mxu0 }
 0x752   :  { %v11956_v60 = vadd.f32 %v5053_v15, %v11410_v22 }
 0x754   :  { %13777 = vst [vmem:[#allocation191_spill] sm:$0xff] %v11956_v60  ;;  %5801 = vmatmul.bf16.gmra.mxu0 %v13778_v13  ;;  %v13783_v13 = vld [vmem:[#allocation45_spill] sm:$0xff]  ;;  %v9678_v60 = vld [vmem:[#allocation10 + $0xcc] sm:$0xf0]  ;;  %v11973_v45 = vpop.f32.mrf.mxu1 }
 0x755   :  { %13785 = vst [vmem:[#allocation195_spill] sm:$0xff] %v11973_v45  ;;  %v9376_v45 = vld [vmem:[#allocation10 + $0xb0] sm:$0xf0] }
 0x759   :  { %v5055_v4 = vpop.f32.mrf.mxu0 }
 0x75a   :  { %v11962_v55 = vadd.f32 %v5055_v4, %v11420_v62  ;;  %v9677_v62 = vld [vmem:[#allocation10 + $0xcc] sm:$0xf]  ;;  %v9391_v4 = vor.u32 %v9678_v60, %v9390_v10  ;;  %v11981_v60 = vpop.f32.mrf.mxu2  ;;  %v11983_v10 = vpop.f32.mrf.mxu3 }
 0x75c   :  { %13780 = vst [vmem:[#allocation192_spill] sm:$0xff] %v11962_v55  ;;  %v9400_v55 = vld [vmem:[#allocation10 + $0xd8] sm:$0xf0]  ;;  %6644 = vmatpush.bf16.msra.mxu1 %v9391_v4  ;;  %v11979_v53 = vpop.f32.mrf.mxu1 }
 0x75d   :  { %v9403_v38 = vor.u32 %v9677_v62, %v9400_v55  ;;  %13788 = vst [vmem:[#allocation48_spill] sm:$0xff] %v11979_v53  ;;  %v13792_v4 = vld [vmem:[#allocation51_spill] sm:$0xff]  ;;  %v13797_v53 = vld [vmem:[#allocation54_spill] sm:$0xff] }
 0x75f   :  { %7151 = vmatpush.bf16.msra.mxu0 %v9403_v38 }
 0x761   :  { %v5058_v22 = vpop.f32.mrf.mxu0 }
 0x762   :  { %v11967_v15 = vadd.f32 %v5058_v22, %v11430_v24  ;;  %v11995_v62 = vpop.f32.mrf.mxu3 }
 0x764   :  { %13782 = vst [vmem:[#allocation194_spill] sm:$0xff] %v11967_v15  ;;  %5806 = vmatmul.bf16.gmra.mxu0 %v13783_v13  ;;  %v9384_v15 = vld [vmem:[#allocation10 + $0xb8] sm:$0xf0] }
 0x769   :  { %v5060_v17 = vpop.f32.mrf.mxu0 }
 0x76a   :  { %v11971_v63 = vadd.f32 %v5060_v17, %v11440_v36  ;;  %v11988_v36 = vpop.f32.mrf.mxu1 }
 0x76b   :  { %13790 = vst [vmem:[#allocation198_spill] sm:$0xff] %v11988_v36 }
 0x76c   :  { %13784 = vst [vmem:[#allocation45_spill] sm:$0xff] %v11971_v63  ;;  %v13802_v63 = vld [vmem:[#allocation57_spill] sm:$0xff] }
 0x771   :  { %v5063_v2 = vpop.f32.mrf.mxu0 }
 0x772   :  { %v11976_v24 = vadd.f32 %v5063_v2, %v11450_v43  ;;  %v11993_v43 = vpop.f32.mrf.mxu2  ;;  %v11998_v17 = vpop.f32.mrf.mxu1 }
 0x773   :  { %13793 = vst [vmem:[#allocation51_spill] sm:$0xff] %v11998_v17 }
 0x774   :  { %13786 = vst [vmem:[#allocation196_spill] sm:$0xff] %v11976_v24  ;;  %5811 = vmatmul.bf16.gmra.mxu0 %v13787_v21 }
 0x779   :  { %v5065_v22 = vpop.f32.mrf.mxu0 }
 0x77a   :  { %v11986_v38 = vadd.f32 %v5065_v22, %v11460_v11  ;;  %v12003_v11 = vpop.f32.mrf.mxu2  ;;  %v12005_v22 = vpop.f32.mrf.mxu3 }
 0x77c   :  { %13789 = vst [vmem:[#allocation197_spill] sm:$0xff] %v11986_v38  ;;  %v9382_v38 = vld [vmem:[#allocation10 + $0xa8] sm:$0xf] }
 0x781   :  { %v5068_v55 = vpop.f32.mrf.mxu0 }
 0x782   :  { %v11991_v13 = vadd.f32 %v5068_v55, %v11470_v54  ;;  %v12010_v55 = vpop.f32.mrf.mxu1 }
 0x783   :  { %13796 = vst [vmem:[#allocation202_spill] sm:$0xff] %v12010_v55 }
 0x784   :  { %13791 = vst [vmem:[#allocation199_spill] sm:$0xff] %v11991_v13  ;;  %5816 = vmatmul.bf16.gmra.mxu0 %v13792_v4  ;;  %v12013_v13 = vpop.f32.mrf.mxu2  ;;  %v12015_v4 = vpop.f32.mrf.mxu3 }
 0x789   :  { %v5070_v2 = vpop.f32.mrf.mxu0 }
 0x78a   :  { %v12001_v21 = vadd.f32 %v5070_v2, %v11480_v42  ;;  %v12020_v2 = vpop.f32.mrf.mxu1 }
 0x78b   :  { %13799 = vst [vmem:[#allocation203_spill] sm:$0xff] %v12020_v2  ;;  %v9673_v2 = vld [vmem:[#allocation10 + $0xac] sm:$0xf] }
 0x78c   :  { %13794 = vst [vmem:[#allocation200_spill] sm:$0xff] %v12001_v21  ;;  %v9672_v21 = vld [vmem:[#allocation10 + $0xa4] sm:$0xf]  ;;  %v12024_v55 = vpop.f32.mrf.mxu3  ;;  %v9387_v0 = vor.u32 %v9673_v2, %v9384_v15 }
 0x78d   :  { %13800 = vst [vmem:[#allocation204_spill] sm:$0xff] %v12024_v55 }
 0x78e   :  { %7152 = vmatpush.bf16.msra.mxu0 %v9387_v0 }
 0x791   :  { %v5073_v36 = vpop.f32.mrf.mxu0 }
 0x792   :  { %v12008_v54 = vadd.f32 %v5073_v36, %v11488_v19  ;;  %v9379_v19 = vor.u32 %v9672_v21, %v9376_v45  ;;  %v9675_v36 = vld [vmem:[#allocation10 + $0xb4] sm:$0xf0]  ;;  %v12030_v45 = vpop.f32.mrf.mxu1 }
 0x793   :  { %v9383_v24 = vor.u32 %v9675_v36, %v9382_v38  ;;  %13803 = vst [vmem:[#allocation57_spill] sm:$0xff] %v12030_v45  ;;  %v9668_v38 = vld [vmem:[#allocation10 + $0x84] sm:$0xf]  ;;  %v9360_v36 = vld [vmem:[#allocation10 + $0x90] sm:$0xf0] }
 0x794   :  { %13795 = vst [vmem:[#allocation201_spill] sm:$0xff] %v12008_v54  ;;  %5821 = vmatmul.bf16.gmra.mxu0 %v13797_v53  ;;  %v12022_v54 = vpop.f32.mrf.mxu2  ;;  %6814 = vmatpush.bf16.msra.mxu2 %v9379_v19  ;;  %v9363_v45 = vor.u32 %v9668_v38, %v9360_v36 }
 0x795   :  { %6983 = vmatpush.bf16.msra.mxu3 %v9383_v24  ;;  %v9670_v24 = vld [vmem:[#allocation10 + $0x8c] sm:$0xf0] }
 0x798   :  { %6815 = vmatpush.bf16.msra.mxu2 %v9363_v45  ;;  %v9662_v45 = vld [vmem:[#allocation10 + $0x4c] sm:$0xf0] }
 0x799   :  { %v5075_v17 = vpop.f32.mrf.mxu0 }
 0x79a   :  { %v12018_v42 = vadd.f32 %v5075_v17, %v11498_v39  ;;  %v9374_v39 = vld [vmem:[#allocation10 + $0xa0] sm:$0xf]  ;;  %v9674_v17 = vld [vmem:[#allocation10 + $0xac] sm:$0xf0]  ;;  %v5252_v15 = vpop.f32.mrf.mxu1 }
 0x79c   :  { %13798 = vst [vmem:[#allocation54_spill] sm:$0xff] %v12018_v42  ;;  %v9375_v42 = vor.u32 %v9674_v17, %v9374_v39  ;;  %v9366_v39 = vld [vmem:[#allocation10 + $0x88] sm:$0xf]  ;;  %v9671_v17 = vld [vmem:[#allocation10 + $0x94] sm:$0xf0] }
 0x79e   :  { %6645 = vmatpush.bf16.msra.mxu1 %v9375_v42  ;;  %v9367_v42 = vor.u32 %v9671_v17, %v9366_v39  ;;  %v9328_v17 = vld [vmem:[#allocation10 + $0x50] sm:$0xf0] }
 0x7a0   :  { %6984 = vmatpush.bf16.msra.mxu3 %v9367_v42 }
 0x7a1   :  { %v5078_v23 = vpop.f32.mrf.mxu0 }
 0x7a2   :  { %v12027_v53 = vadd.f32 %v5078_v23, %v11508_v9  ;;  %v12035_v9 = vpop.f32.mrf.mxu2  ;;  %v12037_v23 = vpop.f32.mrf.mxu3 }
 0x7a3   :  { %13805 = vst [vmem:[#allocation207_spill] sm:$0xff] %v12035_v9 }
 0x7a4   :  { %13801 = vst [vmem:[#allocation205_spill] sm:$0xff] %v12027_v53  ;;  %5826 = vmatmul.bf16.gmra.mxu0 %v13802_v63  ;;  %v9358_v63 = vld [vmem:[#allocation10 + $0x80] sm:$0xf] }
 0x7a5   :  { %13806 = vst [vmem:[#allocation208_spill] sm:$0xff] %v12037_v23  ;;  %v9359_v19 = vor.u32 %v9670_v24, %v9358_v63  ;;  %v9350_v63 = vld [vmem:[#allocation10 + $0x68] sm:$0xf]  ;;  %v9667_v24 = vld [vmem:[#allocation10 + $0x74] sm:$0xf0] }
 0x7a6   :  { %v9351_v9 = vor.u32 %v9667_v24, %v9350_v63  ;;  %v9310_v63 = vld [vmem:[#allocation10 + $0x20] sm:$0xf] }
 0x7a7   :  { %6646 = vmatpush.bf16.msra.mxu1 %v9359_v19  ;;  %v9660_v19 = vld [vmem:[#allocation10 + $0x44] sm:$0xf] }
 0x7a8   :  { %6985 = vmatpush.bf16.msra.mxu3 %v9351_v9  ;;  %v9331_v42 = vor.u32 %v9660_v19, %v9328_v17 }
 0x7a9   :  { %v5080_v21 = vpop.f32.mrf.mxu0 }
 0x7aa   :  { %v12033_v20 = vadd.f32 %v5080_v21, %v11518_v46  ;;  %v9342_v46 = vld [vmem:[#allocation10 + $0x60] sm:$0xf]  ;;  %v9666_v21 = vld [vmem:[#allocation10 + $0x6c] sm:$0xf0]  ;;  %v12041_v55 = vpop.f32.mrf.mxu2  ;;  %v12043_v38 = vpop.f32.mrf.mxu3 }
 0x7ab   :  { %v9343_v53 = vor.u32 %v9666_v21, %v9342_v46  ;;  %13807 = vst [vmem:[#allocation209_spill] sm:$0xff] %v12043_v38  ;;  %v9663_v46 = vld [vmem:[#allocation10 + $0x54] sm:$0xf0]  ;;  %v5254_v21 = vpop.f32.mrf.mxu1 }
 0x7ac   :  { %13804 = vst [vmem:[#allocation206_spill] sm:$0xff] %v12033_v20  ;;  %v9664_v20 = vld [vmem:[#allocation10 + $0x64] sm:$0xf] }
 0x7ad   :  { %v9347_v23 = vor.u32 %v9664_v20, %v9344_v48  ;;  %6647 = vmatpush.bf16.msra.mxu1 %v9343_v53  ;;  %v9658_v53 = vld [vmem:[#allocation10 + $0x2c] sm:$0xf0] }
 0x7af   :  { %6816 = vmatpush.bf16.msra.mxu2 %v9347_v23  ;;  %v9656_v23 = vld [vmem:[#allocation10 + $0x24] sm:$0xf] }
 0x7b1   :  { %v5083_v2 = vpop.f32.mrf.mxu0 }
 0x7b2   :  { %v5084_v0 = vadd.f32 %v5083_v2, %v11528_v28  ;;  %v9326_v28 = vld [vmem:[#allocation10 + $0x40] sm:$0xf] }
 0x7b3   :  { %v9327_v39 = vor.u32 %v9662_v45, %v9326_v28  ;;  %6817 = vmatpush.bf16.msra.mxu2 %v9331_v42  ;;  %v9318_v28 = vld [vmem:[#allocation10 + $0x28] sm:$0xf]  ;;  %v9659_v45 = vld [vmem:[#allocation10 + $0x34] sm:$0xf0]  ;;  %v12050_v42 = vpop.f32.mrf.mxu3 }
 0x7b4   :  { %5831 = vmatmul.bf16.gmra.mxu0 %v13516_v57  ;;  %v5253_v36 = vadd.f32 %v5252_v15, %v5084_v0  ;;  %v9334_v57 = vld [vmem:[#allocation10 + $0x48] sm:$0xf]  ;;  %v9311_v15 = vor.u32 %v9658_v53, %v9310_v63  ;;  %v9312_v0 = vld [vmem:[#allocation10 + $0x30] sm:$0xf0]  ;;  %v9319_v19 = vor.u32 %v9659_v45, %v9318_v28  ;;  %v13809_v28 = vld [vmem:[#allocation112_spill] sm:$0xff] }
 0x7b5   :  { %6648 = vmatpush.bf16.msra.mxu1 %v9327_v39  ;;  %v9335_v20 = vor.u32 %v9663_v46, %v9334_v57  ;;  %v9315_v38 = vor.u32 %v9656_v23, %v9312_v0  ;;  %v9654_v39 = vld [vmem:[#allocation10 + $0xc] sm:$0xf0]  ;;  %v9652_v57 = vld [vmem:[#allocation10 + $0x4] sm:$0xf]  ;;  %v9655_v23 = vld [vmem:[#allocation10 + $0x14] sm:$0xf0]  ;;  %v4929_v45 = vadd.f32 %v11538_v33, %v13809_v28  ;;  %v5636_v33 = vadd.f32 %v11572_v44, %v11403_v29 }
 0x7b6   :  { %v6343_v9 = vadd.f32 %v11838_v5, %v5253_v36  ;;  %v13811_v29 = vld [vmem:[#allocation60_spill] sm:$0xff] }
 0x7b7   :  { %6986 = vmatpush.bf16.msra.mxu3 %v9335_v20  ;;  %6818 = vmatpush.bf16.msra.mxu2 %v9315_v38  ;;  %v9296_v20 = vld [vmem:[#allocation10 + $0x10] sm:$0xf0]  ;;  %v5103_v44 = vadd.f32 %v13811_v29, %v11555_v34  ;;  %v9669_v34 = vld [vmem:[#allocation10 + $0x8c] sm:$0xf] }
 0x7b8   :  { %v6407_v36 = vmax.f32 %v6343_v9, 0.0  ;;  %v9299_v53 = vor.u32 %v9652_v57, %v9296_v20 }
 0x7b9   :  { %v5085_v2 = vpop.f32.mrf.mxu0  ;;  %6649 = vmatpush.bf16.msra.mxu1 %v9311_v15 }
 0x7ba   :  { %v5086_v48 = vadd.f32 %v5085_v2, %v11536_v58  ;;  %v9294_v58 = vld [vmem:[#allocation10] sm:$0xf]  ;;  %v12048_v2 = vpop.f32.mrf.mxu2 }
 0x7bb   :  { %6987 = vmatpush.bf16.msra.mxu3 %v9319_v19  ;;  %6819 = vmatpush.bf16.msra.mxu2 %v9299_v53  ;;  %v12057_v9 = vpop.f32.mrf.mxu3  ;;  %v5634_v19 = vadd.f32 %v11563_v52, %v11395_v40 }
 0x7bc   :  { %v5255_v24 = vadd.f32 %v5254_v21, %v5086_v48  ;;  %v9295_v48 = vor.u32 %v9654_v39, %v9294_v58  ;;  %v9302_v21 = vld [vmem:[#allocation10 + $0x8] sm:$0xf]  ;;  %v5098_v58 = vadd.f32 %v11371_v16, %v4929_v45 }
 0x7be   :  { %v6344_v17 = vadd.f32 %v11838_v5, %v5255_v24  ;;  %6650 = vmatpush.bf16.msra.mxu1 %v9295_v48  ;;  %v9303_v24 = vor.u32 %v9655_v23, %v9302_v21 }
 0x7c0   :  { %v6408_v46 = vmax.f32 %v6344_v17, 0.0  ;;  %6988 = vmatpush.bf16.msra.mxu3 %v9303_v24 }
 0x7c1   :  { %v5797_v63 = vpop.f32.mrf.mxu0 }
 0x7c2   :  { %v12052_v15 = vpack.c.bf16 %v6408_v46, %v6407_v36  ;;  %v12055_v0 = vpop.f32.mrf.mxu2  ;;  %v13810_v46 = vld [vmem:[#allocation113_spill] sm:$0xff] }
 0x7c3   :  { %v12066_v36 = vpop.f32.mrf.mxu3  ;;  %v4931_v48 = vadd.f32 %v11548_v8, %v13810_v46  ;;  %v13813_v46 = vld [vmem:[#allocation59_spill] sm:$0xff] }
 0x7c4   :  { %13808 = vst [vmem:[#allocation210_spill] sm:$0xff] %v12052_v15  ;;  %5836 = vmatmul.bf16.gmra.mxu0 %v13519_v50 }
 0x7c5   :  { %v5100_v40 = vadd.f32 %v11379_v18, %v4931_v48 }
 0x7c9   :  { %v5799_v38 = vpop.f32.mrf.mxu0 }
 0x7ca   :  { %v12064_v57 = vpop.f32.mrf.mxu2 }
 0x7cb   :  { %v12077_v53 = vpop.f32.mrf.mxu3 }
 0x7d1   :  { %v5802_v17 = vpop.f32.mrf.mxu0 }
 0x7d2   :  { %v5803_v39 = vadd.f32 %v5802_v17, %v5634_v19  ;;  %v12075_v63 = vpop.f32.mrf.mxu2  ;;  %v13812_v19 = vld [vmem:[#allocation62_spill] sm:$0xff] }
 0x7d3   :  { %v12094_v17 = vpop.f32.mrf.mxu3 }
 0x7d4   :  { %v6213_v50 = vadd.f32 %v5803_v39, %v5098_v58  ;;  %5841 = vmatmul.bf16.gmra.mxu0 %v13523_v56  ;;  %v5639_v56 = vadd.f32 %v11583_v3, %v11415_v6  ;;  %v5641_v6 = vadd.f32 %v11594_v1, %v13812_v19  ;;  %v9368_v58 = vld [vmem:[#allocation10 + $0x98] sm:$0xf0]  ;;  %v5644_v1 = vadd.f32 %v11605_v59, %v11435_v25 }
 0x7d5   :  { %v5646_v25 = vadd.f32 %v11616_v61, %v11443_v37  ;;  %v13815_v59 = vld [vmem:[#allocation63_spill] sm:$0xff]  ;;  %v13816_v61 = vld [vmem:[#allocation37_spill] sm:$0xff] }
 0x7d6   :  { %v6281_v16 = vadd.f32 %v11838_v5, %v6213_v50  ;;  %v9371_v50 = vor.u32 %v9669_v34, %v9368_v58  ;;  %v5649_v58 = vadd.f32 %v11625_v12, %v11455_v14  ;;  %v13817_v12 = vld [vmem:[#allocation69_spill] sm:$0xff] }
 0x7d8   :  { %v6345_v8 = vmax.f32 %v6281_v16, 0.0  ;;  %7153 = vmatpush.bf16.msra.mxu0 %v9371_v50 }
 0x7d9   :  { %v5804_v20 = vpop.f32.mrf.mxu0 }
 0x7da   :  { %v5805_v52 = vadd.f32 %v5804_v20, %v5636_v33  ;;  %v12092_v3 = vpop.f32.mrf.mxu2 }
 0x7dc   :  { %v6214_v21 = vadd.f32 %v5805_v52, %v5100_v40 }
 0x7de   :  { %v6282_v23 = vadd.f32 %v11838_v5, %v6214_v21 }
 0x7e0   :  { %v6346_v24 = vmax.f32 %v6282_v23, 0.0  ;;  %v13814_v23 = vld [vmem:[#allocation111_spill] sm:$0xff] }
 0x7e1   :  { %v5807_v38 = vpop.f32.mrf.mxu0 }
 0x7e2   :  { %v12084_v18 = vpack.c.bf16 %v6346_v24, %v6345_v8  ;;  %v5808_v28 = vadd.f32 %v5807_v38, %v5639_v56  ;;  %v5108_v56 = vadd.f32 %v13814_v23, %v11577_v49  ;;  %v12104_v8 = vpop.f32.mrf.mxu2  ;;  %v12106_v24 = vpop.f32.mrf.mxu3 }
 0x7e4   :  { %v6215_v45 = vadd.f32 %v5808_v28, %v5103_v44  ;;  %5846 = vmatmul.bf16.gmra.mxu0 %v13528_v27  ;;  %6651 = vmatmul.bf16.vlgmr.msra.gmra.mxu1 %v12084_v18  ;;  %v5105_v27 = vadd.f32 %v13813_v46, %v11568_v31  ;;  %v5110_v44 = vadd.f32 %v13815_v59, %v11590_v51 }
 0x7e5   :  { %6820 = vmatmul.bf16.vlgmr.msra.gmra.mxu2 %v12084_v18  ;;  %6989 = vmatmul.bf16.vlgmr.msra.gmra.mxu3 %v12084_v18  ;;  %v5113_v46 = vadd.f32 %v13816_v61, %v11597_v26  ;;  %v13827_v61 = vld [vmem:[#allocation78_spill] sm:$0xff] }
 0x7e6   :  { %v6283_v33 = vadd.f32 %v11838_v5, %v6215_v45 }
 0x7e8   :  { %v6347_v52 = vmax.f32 %v6283_v33, 0.0 }
 0x7e9   :  { %v5809_v39 = vpop.f32.mrf.mxu0 }
 0x7ea   :  { %v5810_v48 = vadd.f32 %v5809_v39, %v5641_v6  ;;  %v12118_v45 = vpop.f32.mrf.mxu2  ;;  %v12120_v19 = vpop.f32.mrf.mxu3 }
 0x7ec   :  { %v6216_v20 = vadd.f32 %v5810_v48, %v5105_v27 }
 0x7ee   :  { %v6284_v40 = vadd.f32 %v11838_v5, %v6216_v20  ;;  %v13818_v20 = vld [vmem:[#allocation150_spill] sm:$0xff] }
 0x7f0   :  { %v6348_v16 = vmax.f32 %v6284_v40, 0.0  ;;  %v5651_v40 = vadd.f32 %v13818_v20, %v13817_v12  ;;  %v13830_v20 = vld [vmem:[#allocation31_spill] sm:$0xff] }
 0x7f1   :  { %v5812_v21 = vpop.f32.mrf.mxu0 }
 0x7f2   :  { %v5813_v31 = vadd.f32 %v5812_v21, %v5644_v1  ;;  %v12108_v38 = vpack.c.bf16 %v6348_v16, %v6347_v52  ;;  %v12134_v33 = vpop.f32.mrf.mxu2  ;;  %v12136_v14 = vpop.f32.mrf.mxu3  ;;  %v13819_v1 = vld [vmem:[#allocation70_spill] sm:$0xff] }
 0x7f3   :  { %v13820_v52 = vld [vmem:[#allocation66_spill] sm:$0xff] }
 0x7f4   :  { %v6217_v29 = vadd.f32 %v5813_v31, %v5108_v56  ;;  %5851 = vmatmul.bf16.gmra.mxu0 %v13534_v7  ;;  %6656 = vmatmul.bf16.gmra.mxu1 %v12108_v38  ;;  %v5115_v16 = vadd.f32 %v13820_v52, %v13819_v1  ;;  %v13821_v31 = vld [vmem:[#allocation43_spill] sm:$0xff] }
 0x7f5   :  { %6825 = vmatmul.bf16.gmra.mxu2 %v12108_v38  ;;  %6994 = vmatmul.bf16.gmra.mxu3 %v12108_v38 }
 0x7f6   :  { %v6285_v7 = vadd.f32 %v11838_v5, %v6217_v29  ;;  %v13822_v29 = vld [vmem:[#allocation76_spill] sm:$0xff] }
 0x7f8   :  { %v6349_v39 = vmax.f32 %v6285_v7, 0.0 }
 0x7f9   :  { %v5814_v49 = vpop.f32.mrf.mxu0 }
 0x7fa   :  { %v5815_v28 = vadd.f32 %v5814_v49, %v5646_v25  ;;  %v5654_v25 = vadd.f32 %v13822_v29, %v13821_v31  ;;  %v12146_v49 = vpop.f32.mrf.mxu2  ;;  %v12148_v59 = vpop.f32.mrf.mxu3  ;;  %v13835_v31 = vld [vmem:[#allocation156_spill] sm:$0xff] }
 0x7fb   :  { %13823 = vst [vmem:[#allocation112_spill] sm:$0xff] %v12146_v49  ;;  %v13948_v49 = vld [vmem:[#allocation134_spill] sm:$0xff] }
 0x7fc   :  { %v6218_v6 = vadd.f32 %v5815_v28, %v5110_v44  ;;  %13824 = vst [vmem:[#allocation113_spill] sm:$0xff] %v12148_v59 }
 0x7fe   :  { %v6286_v34 = vadd.f32 %v11838_v5, %v6218_v6  ;;  %v13825_v6 = vld [vmem:[#allocation74_spill] sm:$0xff] }
 0x800   :  { %v6350_v50 = vmax.f32 %v6286_v34, 0.0  ;;  %v13826_v34 = vld [vmem:[#allocation65_spill] sm:$0xff] }
 0x801   :  { %v5817_v37 = vpop.f32.mrf.mxu0 }
 0x802   :  { %v5818_v51 = vadd.f32 %v5817_v37, %v5649_v58  ;;  %v12128_v27 = vpack.c.bf16 %v6350_v50, %v6349_v39  ;;  %v5118_v58 = vadd.f32 %v13826_v34, %v13825_v6  ;;  %v12162_v1 = vpop.f32.mrf.mxu2  ;;  %v12164_v52 = vpop.f32.mrf.mxu3  ;;  %v13837_v6 = vld [vmem:[#allocation68_spill] sm:$0xff] }
 0x803   :  { %13832 = vst [vmem:[#allocation60_spill] sm:$0xff] %v12162_v1 }
 0x804   :  { %v6219_v48 = vadd.f32 %v5818_v51, %v5113_v46  ;;  %5856 = vmatmul.bf16.gmra.mxu0 %v13538_v35  ;;  %6661 = vmatmul.bf16.gmra.mxu1 %v12128_v27  ;;  %v13828_v46 = vld [vmem:[#allocation46_spill] sm:$0xff]  ;;  %13833 = vst [vmem:[#allocation62_spill] sm:$0xff] %v12164_v52 }
 0x805   :  { %6830 = vmatmul.bf16.gmra.mxu2 %v12128_v27  ;;  %6999 = vmatmul.bf16.gmra.mxu3 %v12128_v27  ;;  %v13829_v51 = vld [vmem:[#allocation154_spill] sm:$0xff] }
 0x806   :  { %v6287_v35 = vadd.f32 %v11838_v5, %v6219_v48  ;;  %v5656_v48 = vadd.f32 %v13829_v51, %v13828_v46  ;;  %v13841_v51 = vld [vmem:[#allocation81_spill] sm:$0xff] }
 0x808   :  { %v6351_v44 = vmax.f32 %v6287_v35, 0.0 }
 0x809   :  { %v5819_v26 = vpop.f32.mrf.mxu0 }
 0x80a   :  { %v5820_v21 = vadd.f32 %v5819_v26, %v5651_v40  ;;  %v13831_v40 = vld [vmem:[#allocation40_spill] sm:$0xff]  ;;  %v12176_v46 = vpop.f32.mrf.mxu3 }
 0x80b   :  { %v5120_v26 = vadd.f32 %v13831_v40, %v13830_v20  ;;  %13840 = vst [vmem:[#allocation63_spill] sm:$0xff] %v12176_v46  ;;  %v9665_v40 = vld [vmem:[#allocation10 + $0x6c] sm:$0xf] }
 0x80c   :  { %v6220_v23 = vadd.f32 %v5820_v21, %v5115_v16 }
 0x80e   :  { %v6288_v56 = vadd.f32 %v11838_v5, %v6220_v23 }
 0x810   :  { %v6352_v28 = vmax.f32 %v6288_v56, 0.0  ;;  %v13834_v56 = vld [vmem:[#allocation49_spill] sm:$0xff] }
 0x811   :  { %v5822_v7 = vpop.f32.mrf.mxu0  ;;  %v5659_v29 = vadd.f32 %v13835_v31, %v13834_v56 }
 0x812   :  { %v5823_v39 = vadd.f32 %v5822_v7, %v5654_v25  ;;  %v12152_v50 = vpack.c.bf16 %v6352_v28, %v6351_v44  ;;  %v13836_v7 = vld [vmem:[#allocation77_spill] sm:$0xff] }
 0x813   :  { %v5123_v34 = vadd.f32 %v13837_v6, %v13836_v7  ;;  %v13848_v6 = vld [vmem:[#allocation55_spill] sm:$0xff] }
 0x814   :  { %v6221_v37 = vadd.f32 %v5823_v39, %v5118_v58  ;;  %5861 = vmatmul.bf16.gmra.mxu0 %v13827_v61  ;;  %6666 = vmatmul.bf16.gmra.mxu1 %v12152_v50  ;;  %v12174_v61 = vpop.f32.mrf.mxu2 }
 0x815   :  { %6835 = vmatmul.bf16.gmra.mxu2 %v12152_v50  ;;  %7004 = vmatmul.bf16.gmra.mxu3 %v12152_v50  ;;  %13839 = vst [vmem:[#allocation111_spill] sm:$0xff] %v12174_v61 }
 0x816   :  { %v6289_v21 = vadd.f32 %v11838_v5, %v6221_v37 }
 0x818   :  { %v6353_v25 = vmax.f32 %v6289_v21, 0.0 }
 0x819   :  { %v5824_v12 = vpop.f32.mrf.mxu0 }
 0x81a   :  { %v5825_v16 = vadd.f32 %v5824_v12, %v5656_v48  ;;  %v13842_v48 = vld [vmem:[#allocation52_spill] sm:$0xff]  ;;  %v13843_v12 = vld [vmem:[#allocation157_spill] sm:$0xff] }
 0x81b   :  { %v5661_v20 = vadd.f32 %v13843_v12, %v13842_v48 }
 0x81c   :  { %v6222_v35 = vadd.f32 %v5825_v16, %v5120_v26  ;;  %v9352_v26 = vld [vmem:[#allocation10 + $0x78] sm:$0xf0] }
 0x81d   :  { %v9355_v21 = vor.u32 %v9665_v40, %v9352_v26  ;;  %v13850_v40 = vld [vmem:[#allocation80_spill] sm:$0xff]  ;;  %v13851_v26 = vld [vmem:[#allocation75_spill] sm:$0xff] }
 0x81e   :  { %v6290_v23 = vadd.f32 %v11838_v5, %v6222_v35  ;;  %v13844_v35 = vld [vmem:[#allocation101_spill] sm:$0xff] }
 0x81f   :  { %7154 = vmatpush.bf16.msra.mxu0 %v9355_v21  ;;  %v13853_v21 = vld [vmem:[#allocation84_spill] sm:$0xff] }
 0x820   :  { %v6354_v44 = vmax.f32 %v6290_v23, 0.0  ;;  %v13845_v23 = vld [vmem:[#allocation72_spill] sm:$0xff] }
 0x821   :  { %v5827_v28 = vpop.f32.mrf.mxu0  ;;  %v5125_v56 = vadd.f32 %v13845_v23, %v13844_v35  ;;  %v5128_v35 = vadd.f32 %v13851_v26, %v13850_v40  ;;  %v13854_v23 = vld [vmem:[#allocation143_spill] sm:$0xff]  ;;  %v13860_v26 = vld [vmem:[#allocation144_spill] sm:$0xff] }
 0x822   :  { %v5828_v58 = vadd.f32 %v5827_v28, %v5659_v29  ;;  %v12172_v39 = vpack.c.bf16 %v6354_v44, %v6353_v25  ;;  %v12187_v44 = vpop.f32.mrf.mxu2  ;;  %v12189_v28 = vpop.f32.mrf.mxu3 }
 0x823   :  { %13846 = vst [vmem:[#allocation37_spill] sm:$0xff] %v12187_v44  ;;  %v13898_v44 = vld [vmem:[#allocation148_spill] sm:$0xff] }
 0x824   :  { %13838 = vst [vmem:[#allocation59_spill] sm:$0xff] %v12172_v39  ;;  %v6223_v37 = vadd.f32 %v5828_v58, %v5123_v34  ;;  %5866 = vmatmul.bf16.gmra.mxu0 %v13841_v51  ;;  %6671 = vmatmul.bf16.gmra.mxu1 %v12172_v39  ;;  %v13849_v34 = vld [vmem:[#allocation82_spill] sm:$0xff] }
 0x825   :  { %6840 = vmatmul.bf16.gmra.mxu2 %v12172_v39  ;;  %7009 = vmatmul.bf16.gmra.mxu3 %v12172_v39  ;;  %13847 = vst [vmem:[#allocation69_spill] sm:$0xff] %v12189_v28  ;;  %v5664_v58 = vadd.f32 %v13849_v34, %v13848_v6  ;;  %v13858_v6 = vld [vmem:[#allocation102_spill] sm:$0xff]  ;;  %v13859_v34 = vld [vmem:[#allocation141_spill] sm:$0xff] }
 0x826   :  { %v6291_v29 = vadd.f32 %v11838_v5, %v6223_v37 }
 0x828   :  { %v6355_v51 = vmax.f32 %v6291_v29, 0.0 }
 0x829   :  { %v5829_v16 = vpop.f32.mrf.mxu0 }
 0x82a   :  { %v5830_v31 = vadd.f32 %v5829_v16, %v5661_v20  ;;  %v12204_v29 = vpop.f32.mrf.mxu2 }
 0x82b   :  { %13856 = vst [vmem:[#allocation70_spill] sm:$0xff] %v12204_v29  ;;  %v13863_v29 = vld [vmem:[#allocation142_spill] sm:$0xff] }
 0x82c   :  { %v6224_v25 = vadd.f32 %v5830_v31, %v5125_v56  ;;  %v13855_v56 = vld [vmem:[#allocation160_spill] sm:$0xff] }
 0x82d   :  { %v5666_v31 = vadd.f32 %v13855_v56, %v13854_v23  ;;  %v13862_v56 = vld [vmem:[#allocation83_spill] sm:$0xff] }
 0x82e   :  { %v6292_v7 = vadd.f32 %v11838_v5, %v6224_v25  ;;  %v12206_v25 = vpop.f32.mrf.mxu3 }
 0x82f   :  { %13857 = vst [vmem:[#allocation66_spill] sm:$0xff] %v12206_v25 }
 0x830   :  { %v6356_v48 = vmax.f32 %v6292_v7, 0.0 }
 0x831   :  { %v5832_v12 = vpop.f32.mrf.mxu0 }
 0x832   :  { %v5833_v20 = vadd.f32 %v5832_v12, %v5664_v58  ;;  %v12196_v16 = vpack.c.bf16 %v6356_v48, %v6355_v51  ;;  %v5130_v58 = vadd.f32 %v13859_v34, %v13858_v6  ;;  %v12216_v25 = vpop.f32.mrf.mxu2  ;;  %v13868_v34 = vld [vmem:[#allocation146_spill] sm:$0xff] }
 0x833   :  { %13864 = vst [vmem:[#allocation43_spill] sm:$0xff] %v12216_v25 }
 0x834   :  { %13852 = vst [vmem:[#allocation150_spill] sm:$0xff] %v12196_v16  ;;  %v6225_v37 = vadd.f32 %v5833_v20, %v5128_v35  ;;  %5871 = vmatmul.bf16.gmra.mxu0 %v13853_v21  ;;  %6676 = vmatmul.bf16.gmra.mxu1 %v12196_v16  ;;  %v13861_v35 = vld [vmem:[#allocation85_spill] sm:$0xff] }
 0x835   :  { %6845 = vmatmul.bf16.gmra.mxu2 %v12196_v16  ;;  %7014 = vmatmul.bf16.gmra.mxu3 %v12196_v16  ;;  %v5669_v20 = vadd.f32 %v13861_v35, %v13860_v26  ;;  %v5133_v16 = vadd.f32 %v13863_v29, %v13862_v56  ;;  %v13875_v56 = vld [vmem:[#allocation88_spill] sm:$0xff] }
 0x836   :  { %v6293_v48 = vadd.f32 %v11838_v5, %v6225_v37  ;;  %v12218_v28 = vpop.f32.mrf.mxu3 }
 0x837   :  { %13865 = vst [vmem:[#allocation76_spill] sm:$0xff] %v12218_v28  ;;  %v13877_v28 = vld [vmem:[#allocation145_spill] sm:$0xff] }
 0x838   :  { %v6357_v21 = vmax.f32 %v6293_v48, 0.0  ;;  %v13870_v48 = vld [vmem:[#allocation122_spill] sm:$0xff] }
 0x839   :  { %v5834_v7 = vpop.f32.mrf.mxu0 }
 0x83a   :  { %v5835_v51 = vadd.f32 %v5834_v7, %v5666_v31  ;;  %v13867_v7 = vld [vmem:[#allocation87_spill] sm:$0xff]  ;;  %v12230_v35 = vpop.f32.mrf.mxu2 }
 0x83b   :  { %13872 = vst [vmem:[#allocation65_spill] sm:$0xff] %v12230_v35  ;;  %v13893_v35 = vld [vmem:[#allocation93_spill] sm:$0xff] }
 0x83c   :  { %v6226_v12 = vadd.f32 %v5835_v51, %v5130_v58  ;;  %v13869_v58 = vld [vmem:[#allocation123_spill] sm:$0xff] }
 0x83d   :  { %v5671_v51 = vadd.f32 %v13869_v58, %v13868_v34  ;;  %v13876_v58 = vld [vmem:[#allocation86_spill] sm:$0xff] }
 0x83e   :  { %v6294_v40 = vadd.f32 %v11838_v5, %v6226_v12  ;;  %v13871_v12 = vld [vmem:[#allocation58_spill] sm:$0xff]  ;;  %v5138_v25 = vadd.f32 %v13877_v28, %v13876_v58  ;;  %v13886_v58 = vld [vmem:[#allocation115_spill] sm:$0xff] }
 0x840   :  { %v6358_v15 = vmax.f32 %v6294_v40, 0.0  ;;  %v5135_v40 = vadd.f32 %v13871_v12, %v13870_v48  ;;  %v13879_v12 = vld [vmem:[#allocation90_spill] sm:$0xff] }
 0x841   :  { %v5837_v23 = vpop.f32.mrf.mxu0 }
 0x842   :  { %v5838_v6 = vadd.f32 %v5837_v23, %v5669_v20  ;;  %v12220_v31 = vpack.c.bf16 %v6358_v15, %v6357_v21  ;;  %v12232_v15 = vpop.f32.mrf.mxu3  ;;  %v13874_v23 = vld [vmem:[#allocation61_spill] sm:$0xff] }
 0x843   :  { %13873 = vst [vmem:[#allocation78_spill] sm:$0xff] %v12232_v15 }
 0x844   :  { %13866 = vst [vmem:[#allocation74_spill] sm:$0xff] %v12220_v31  ;;  %v6227_v37 = vadd.f32 %v5838_v6, %v5133_v16  ;;  %5876 = vmatmul.bf16.gmra.mxu0 %v13867_v7  ;;  %6681 = vmatmul.bf16.gmra.mxu1 %v12220_v31  ;;  %v5674_v6 = vadd.f32 %v13875_v56, %v13874_v23 }
 0x845   :  { %6850 = vmatmul.bf16.gmra.mxu2 %v12220_v31  ;;  %7019 = vmatmul.bf16.gmra.mxu3 %v12220_v31 }
 0x846   :  { %v6295_v16 = vadd.f32 %v11838_v5, %v6227_v37  ;;  %v12246_v37 = vpop.f32.mrf.mxu2 }
 0x847   :  { %13880 = vst [vmem:[#allocation154_spill] sm:$0xff] %v12246_v37 }
 0x848   :  { %v6359_v7 = vmax.f32 %v6295_v16, 0.0  ;;  %v13883_v16 = vld [vmem:[#allocation124_spill] sm:$0xff] }
 0x849   :  { %v5839_v29 = vpop.f32.mrf.mxu0 }
 0x84a   :  { %v5840_v26 = vadd.f32 %v5839_v29, %v5671_v51 }
 0x84c   :  { %v6228_v20 = vadd.f32 %v5840_v26, %v5135_v40  ;;  %v12248_v40 = vpop.f32.mrf.mxu3  ;;  %v13882_v26 = vld [vmem:[#allocation114_spill] sm:$0xff] }
 0x84d   :  { %13881 = vst [vmem:[#allocation31_spill] sm:$0xff] %v12248_v40 }
 0x84e   :  { %v6296_v21 = vadd.f32 %v11838_v5, %v6228_v20  ;;  %v5676_v20 = vadd.f32 %v13883_v16, %v13882_v26 }
 0x850   :  { %v6360_v31 = vmax.f32 %v6296_v21, 0.0  ;;  %v13884_v21 = vld [vmem:[#allocation104_spill] sm:$0xff] }
 0x851   :  { %v5842_v34 = vpop.f32.mrf.mxu0 }
 0x852   :  { %v5843_v48 = vadd.f32 %v5842_v34, %v5674_v6  ;;  %v12240_v51 = vpack.c.bf16 %v6360_v31, %v6359_v7  ;;  %v13885_v31 = vld [vmem:[#allocation147_spill] sm:$0xff] }
 0x853   :  { %v5140_v23 = vadd.f32 %v13885_v31, %v13884_v21  ;;  %v6473_v34 = vld [vmem:[%s13058_s6] sm:$0xf] }
 0x854   :  { %13878 = vst [vmem:[#allocation46_spill] sm:$0xff] %v12240_v51  ;;  %v6229_v29 = vadd.f32 %v5843_v48, %v5138_v25  ;;  %5881 = vmatmul.bf16.gmra.mxu0 %v13879_v12  ;;  %6686 = vmatmul.bf16.gmra.mxu1 %v12240_v51  ;;  %v13887_v48 = vld [vmem:[#allocation91_spill] sm:$0xff]  ;;  %v12263_v26 = vpop.f32.mrf.mxu3  ;;  %v13891_v31 = vld [vmem:[#allocation64_spill] sm:$0xff] }
 0x855   :  { %6855 = vmatmul.bf16.gmra.mxu2 %v12240_v51  ;;  %7024 = vmatmul.bf16.gmra.mxu3 %v12240_v51  ;;  %v5679_v12 = vadd.f32 %v13887_v48, %v13886_v58  ;;  %v12261_v51 = vpop.f32.mrf.mxu2  ;;  %13889 = vst [vmem:[#allocation49_spill] sm:$0xff] %v12263_v26  ;;  %v9336_v26 = vld [vmem:[#allocation10 + $0x58] sm:$0xf0] }
 0x856   :  { %v6297_v56 = vadd.f32 %v11838_v5, %v6229_v29  ;;  %13888 = vst [vmem:[#allocation40_spill] sm:$0xff] %v12261_v51  ;;  %v13897_v51 = vld [vmem:[#allocation105_spill] sm:$0xff] }
 0x857   :  { %v5145_v46 = vadd.f32 %v13898_v44, %v13897_v51  ;;  %v13899_v44 = vld [vmem:[#allocation95_spill] sm:$0xff]  ;;  %v13900_v51 = vld [vmem:[#allocation165_spill] sm:$0xff] }
 0x858   :  { %v6361_v16 = vmax.f32 %v6297_v56, 0.0 }
 0x859   :  { %v5844_v28 = vpop.f32.mrf.mxu0 }
 0x85a   :  { %v5845_v25 = vadd.f32 %v5844_v28, %v5676_v20  ;;  %v12265_v20 = vperm.slane %v6473_v34, 0  ;;  %v13890_v28 = vld [vmem:[#allocation89_spill] sm:$0xff] }
 0x85c   :  { %v6230_v6 = vadd.f32 %v5845_v25, %v5140_v23  ;;  %v5143_v23 = vadd.f32 %v13891_v31, %v13890_v28  ;;  %v13894_v28 = vld [vmem:[#allocation116_spill] sm:$0xff] }
 0x85e   :  { %v6298_v7 = vadd.f32 %v11838_v5, %v6230_v6  ;;  %v103_v6 = vld [vmem:[#allocation2] sm:$0xff] }
 0x85f   :  { %v7319_v56 = vunpack.c.l.bf16 %v103_v6  ;;  %v7320_v48 = vunpack.c.h.bf16 %v103_v6 }
 0x860   :  { %v6362_v40 = vmax.f32 %v6298_v7, 0.0  ;;  %v12276_v7 = vperm.slane %v6473_v34, 1  ;;  %v105_v34 = vld [vmem:[#allocation2 + $0x10] sm:$0xff] }
 0x861   :  { %v5847_v21 = vpop.f32.mrf.mxu0  ;;  %v6652_v29 = vpop.f32.mrf.mxu1  ;;  %v7324_v59 = vunpack.c.h.bf16 %v105_v34 }
 0x862   :  { %v5848_v25 = vadd.f32 %v5847_v21, %v5679_v12  ;;  %v12269_v37 = vpack.c.bf16 %v6362_v40, %v6361_v16  ;;  %v6653_v58 = vadd.f32 %v6652_v29, %v12265_v20  ;;  %v13895_v12 = vld [vmem:[#allocation163_spill] sm:$0xff]  ;;  %v9661_v29 = vld [vmem:[#allocation10 + $0x4c] sm:$0xf] }
 0x863   :  { %v5681_v21 = vadd.f32 %v13895_v12, %v13894_v28  ;;  %v9339_v61 = vor.u32 %v9661_v29, %v9336_v26 }
 0x864   :  { %13892 = vst [vmem:[#allocation156_spill] sm:$0xff] %v12269_v37  ;;  %v6231_v15 = vadd.f32 %v5848_v25, %v5143_v23  ;;  %5886 = vmatmul.bf16.gmra.mxu0 %v13893_v35  ;;  %6691 = vmatmul.bf16.gmra.mxu1 %v12269_v37  ;;  %v7575_v31 = vadd.f32 %v7319_v56, %v6653_v58  ;;  %v7323_v56 = vunpack.c.l.bf16 %v105_v34 }
 0x865   :  { %6860 = vmatmul.bf16.gmra.mxu2 %v12269_v37  ;;  %7029 = vmatmul.bf16.gmra.mxu3 %v12269_v37 }
 0x866   :  { %v6299_v39 = vadd.f32 %v11838_v5, %v6231_v15  ;;  %7155 = vmatpush.bf16.msra.mxu0 %v9339_v61  ;;  %v7831_v12 = vmax.f32 %v7575_v31, 0.0  ;;  %v13902_v31 = vld [vmem:[#allocation92_spill] sm:$0xff] }
 0x868   :  { %v6821_v40 = vpop.f32.mrf.mxu2  ;;  %v12280_v16 = vpop.f32.mrf.mxu3  ;;  %v6363_v26 = vmax.f32 %v6299_v39, 0.0  ;;  %v13905_v39 = vld [vmem:[#allocation96_spill] sm:$0xff] }
 0x869   :  { %13896 = vst [vmem:[#allocation77_spill] sm:$0xff] %v12280_v16  ;;  %v6822_v35 = vadd.f32 %v6821_v40, %v12276_v7  ;;  %v5849_v23 = vpop.f32.mrf.mxu0  ;;  %v6654_v25 = vpop.f32.mrf.mxu1  ;;  %v12287_v40 = vld [vmem:[#allocation8] ss:$0 sm:$0xff] }
 0x86a   :  { %v5850_v37 = vadd.f32 %v5849_v23, %v5681_v21  ;;  %v6655_v58 = vadd.f32 %v6654_v25, %v12265_v20  ;;  %v5684_v21 = vadd.f32 %v13900_v51, %v13899_v44  ;;  %v13903_v23 = vld [vmem:[#allocation67_spill] sm:$0xff]  ;;  %v13906_v51 = vld [vmem:[#allocation117_spill] sm:$0xff] }
 0x86b   :  { %v7576_v6 = vadd.f32 %v7320_v48, %v6822_v35  ;;  %v5148_v25 = vadd.f32 %v13903_v23, %v13902_v31  ;;  %v13910_v31 = vld [vmem:[#allocation71_spill] sm:$0xff] }
 0x86c   :  { %v6232_v28 = vadd.f32 %v5850_v37, %v5145_v46  ;;  %v7579_v61 = vadd.f32 %v7323_v56, %v6655_v58 }
 0x86d   :  { %v7832_v16 = vmax.f32 %v7576_v6, 0.0 }
 0x86e   :  { %v6300_v52 = vadd.f32 %v12287_v40, %v6232_v28 }
 0x86f   :  { %v8087_v1 = vpack.c.bf16 %v7832_v16, %v7831_v12  ;;  %v107_v16 = vld [vmem:[#allocation2 + $0x20] sm:$0xff] }
 0x870   :  { %v6364_v48 = vmax.f32 %v6300_v52, 0.0  ;;  %v6823_v35 = vpop.f32.mrf.mxu2  ;;  %v12292_v5 = vpop.f32.mrf.mxu3  ;;  %v7835_v52 = vmax.f32 %v7579_v61, 0.0  ;;  %v7327_v58 = vunpack.c.l.bf16 %v107_v16  ;;  %v7328_v44 = vunpack.c.h.bf16 %v107_v16 }
 0x871   :  { %13901 = vst [vmem:[#allocation68_spill] sm:$0xff] %v12292_v5  ;;  %v6824_v46 = vadd.f32 %v6823_v35, %v12276_v7  ;;  %v5852_v15 = vpop.f32.mrf.mxu0  ;;  %v6657_v37 = vpop.f32.mrf.mxu1 }
 0x872   :  { %8215 = vst [vmem:[#allocation11] sm:$0xff] %v8087_v1  ;;  %v5853_v29 = vadd.f32 %v5852_v15, %v5684_v21  ;;  %v12297_v34 = vpack.c.bf16 %v6364_v48, %v6363_v26  ;;  %v6658_v12 = vadd.f32 %v6657_v37, %v12265_v20  ;;  %v13907_v21 = vld [vmem:[#allocation127_spill] sm:$0xff]  ;;  %v13909_v37 = vld [vmem:[#allocation106_spill] sm:$0xff] }
 0x873   :  { %v7580_v6 = vadd.f32 %v7324_v59, %v6824_v46  ;;  %v5686_v26 = vadd.f32 %v13907_v21, %v13906_v51  ;;  %v5150_v23 = vadd.f32 %v13910_v31, %v13909_v37  ;;  %v13915_v31 = vld [vmem:[#allocation118_spill] sm:$0xff] }
 0x874   :  { %13904 = vst [vmem:[#allocation81_spill] sm:$0xff] %v12297_v34  ;;  %v6233_v28 = vadd.f32 %v5853_v29, %v5148_v25  ;;  %5891 = vmatmul.bf16.gmra.mxu0 %v13905_v39  ;;  %6696 = vmatmul.bf16.gmra.mxu1 %v12297_v34  ;;  %v7583_v35 = vadd.f32 %v7327_v58, %v6658_v12  ;;  %v109_v29 = vld [vmem:[#allocation2 + $0x30] sm:$0xff] }
 0x875   :  { %v7836_v1 = vmax.f32 %v7580_v6, 0.0  ;;  %6865 = vmatmul.bf16.gmra.mxu2 %v12297_v34  ;;  %7034 = vmatmul.bf16.gmra.mxu3 %v12297_v34  ;;  %v7331_v21 = vunpack.c.l.bf16 %v109_v29  ;;  %v13912_v34 = vld [vmem:[#allocation97_spill] sm:$0xff] }
 0x876   :  { %v6301_v16 = vadd.f32 %v12287_v40, %v6233_v28 }
 0x877   :  { %v8089_v56 = vpack.c.bf16 %v7836_v1, %v7835_v52  ;;  %v7839_v52 = vmax.f32 %v7583_v35, 0.0 }
 0x878   :  { %v6826_v59 = vpop.f32.mrf.mxu2  ;;  %v12306_v48 = vpop.f32.mrf.mxu3  ;;  %v6365_v5 = vmax.f32 %v6301_v16, 0.0  ;;  %v13917_v16 = vld [vmem:[#allocation99_spill] sm:$0xff] }
 0x879   :  { %13908 = vst [vmem:[#allocation52_spill] sm:$0xff] %v12306_v48  ;;  %v6827_v61 = vadd.f32 %v6826_v59, %v12276_v7  ;;  %v5854_v46 = vpop.f32.mrf.mxu0  ;;  %v6659_v15 = vpop.f32.mrf.mxu1  ;;  %v13911_v59 = vld [vmem:[#allocation98_spill] sm:$0xff] }
 0x87a   :  { %8217 = vst [vmem:[#allocation11 + $0x10] sm:$0xff] %v8089_v56  ;;  %v5855_v25 = vadd.f32 %v5854_v46, %v5686_v26  ;;  %v6660_v51 = vadd.f32 %v6659_v15, %v12265_v20  ;;  %v7332_v56 = vunpack.c.h.bf16 %v109_v29  ;;  %v5689_v48 = vadd.f32 %v13912_v34, %v13911_v59  ;;  %v13914_v15 = vld [vmem:[#allocation126_spill] sm:$0xff] }
 0x87b   :  { %v7584_v6 = vadd.f32 %v7328_v44, %v6827_v61 }
 0x87c   :  { %v6234_v39 = vadd.f32 %v5855_v25, %v5150_v23  ;;  %v7587_v28 = vadd.f32 %v7331_v21, %v6660_v51  ;;  %v5153_v23 = vadd.f32 %v13915_v31, %v13914_v15  ;;  %v13922_v15 = vld [vmem:[#allocation73_spill] sm:$0xff] }
 0x87d   :  { %v7840_v1 = vmax.f32 %v7584_v6, 0.0  ;;  %v111_v6 = vld [vmem:[#allocation2 + $0x40] sm:$0xff] }
 0x87e   :  { %v6302_v12 = vadd.f32 %v12287_v40, %v6234_v39  ;;  %v7335_v21 = vunpack.c.l.bf16 %v111_v6 }
 0x87f   :  { %v8091_v58 = vpack.c.bf16 %v7840_v1, %v7839_v52  ;;  %v7843_v52 = vmax.f32 %v7587_v28, 0.0 }
 0x880   :  { %v6366_v37 = vmax.f32 %v6302_v12, 0.0  ;;  %v6828_v26 = vpop.f32.mrf.mxu2  ;;  %v12316_v46 = vpop.f32.mrf.mxu3 }
 0x881   :  { %13913 = vst [vmem:[#allocation157_spill] sm:$0xff] %v12316_v46  ;;  %v6829_v44 = vadd.f32 %v6828_v26, %v12276_v7  ;;  %v5857_v35 = vpop.f32.mrf.mxu0  ;;  %v6662_v61 = vpop.f32.mrf.mxu1 }
 0x882   :  { %8219 = vst [vmem:[#allocation11 + $0x20] sm:$0xff] %v8091_v58  ;;  %v5858_v25 = vadd.f32 %v5857_v35, %v5689_v48  ;;  %v12321_v29 = vpack.c.bf16 %v6366_v37, %v6365_v5  ;;  %v6663_v51 = vadd.f32 %v6662_v61, %v12265_v20  ;;  %v7336_v48 = vunpack.c.h.bf16 %v111_v6  ;;  %v13918_v58 = vld [vmem:[#allocation149_spill] sm:$0xff]  ;;  %v13921_v61 = vld [vmem:[#allocation107_spill] sm:$0xff] }
 0x883   :  { %v7588_v39 = vadd.f32 %v7332_v56, %v6829_v44  ;;  %v13919_v5 = vld [vmem:[#allocation169_spill] sm:$0xff]  ;;  %v5155_v31 = vadd.f32 %v13922_v15, %v13921_v61  ;;  %v13927_v15 = vld [vmem:[#allocation151_spill] sm:$0xff] }
 0x884   :  { %13916 = vst [vmem:[#allocation101_spill] sm:$0xff] %v12321_v29  ;;  %v6235_v34 = vadd.f32 %v5858_v25, %v5153_v23  ;;  %5896 = vmatmul.bf16.gmra.mxu0 %v13917_v16  ;;  %6701 = vmatmul.bf16.gmra.mxu1 %v12321_v29  ;;  %v5691_v59 = vadd.f32 %v13919_v5, %v13918_v58  ;;  %v113_v25 = vld [vmem:[#allocation2 + $0x50] sm:$0xff] }
 0x885   :  { %v7844_v1 = vmax.f32 %v7588_v39, 0.0  ;;  %6870 = vmatmul.bf16.gmra.mxu2 %v12321_v29  ;;  %7039 = vmatmul.bf16.gmra.mxu3 %v12321_v29  ;;  %v7591_v26 = vadd.f32 %v7335_v21, %v6663_v51  ;;  %v7339_v5 = vunpack.c.l.bf16 %v113_v25  ;;  %v13924_v29 = vld [vmem:[#allocation29_spill] sm:$0xff] }
 0x886   :  { %v6303_v6 = vadd.f32 %v12287_v40, %v6235_v34 }
 0x887   :  { %v8093_v12 = vpack.c.bf16 %v7844_v1, %v7843_v52  ;;  %v7847_v52 = vmax.f32 %v7591_v26, 0.0 }
 0x888   :  { %v6831_v56 = vpop.f32.mrf.mxu2  ;;  %v12330_v37 = vpop.f32.mrf.mxu3  ;;  %v6367_v46 = vmax.f32 %v6303_v6, 0.0  ;;  %v13929_v6 = vld [vmem:[#allocation100_spill] sm:$0xff] }
 0x889   :  { %13920 = vst [vmem:[#allocation72_spill] sm:$0xff] %v12330_v37  ;;  %v6832_v28 = vadd.f32 %v6831_v56, %v12276_v7  ;;  %v5859_v44 = vpop.f32.mrf.mxu0  ;;  %v6664_v35 = vpop.f32.mrf.mxu1  ;;  %v13923_v56 = vld [vmem:[#allocation119_spill] sm:$0xff] }
 0x88a   :  { %8221 = vst [vmem:[#allocation11 + $0x30] sm:$0xff] %v8093_v12  ;;  %v5860_v23 = vadd.f32 %v5859_v44, %v5691_v59  ;;  %v6665_v58 = vadd.f32 %v6664_v35, %v12265_v20  ;;  %v7340_v12 = vunpack.c.h.bf16 %v113_v25  ;;  %v5694_v37 = vadd.f32 %v13924_v29, %v13923_v56  ;;  %v13926_v35 = vld [vmem:[#allocation128_spill] sm:$0xff] }
 0x88b   :  { %v7592_v39 = vadd.f32 %v7336_v48, %v6832_v28 }
 0x88c   :  { %v6236_v16 = vadd.f32 %v5860_v23, %v5155_v31  ;;  %v7595_v34 = vadd.f32 %v7339_v5, %v6665_v58  ;;  %v5158_v31 = vadd.f32 %v13927_v15, %v13926_v35  ;;  %v13934_v35 = vld [vmem:[#allocation153_spill] sm:$0xff] }
 0x88d   :  { %v7848_v1 = vmax.f32 %v7592_v39, 0.0  ;;  %v115_v39 = vld [vmem:[#allocation2 + $0x60] sm:$0xff] }
 0x88e   :  { %v6304_v51 = vadd.f32 %v12287_v40, %v6236_v16  ;;  %v7343_v5 = vunpack.c.l.bf16 %v115_v39 }
 0x88f   :  { %v8095_v21 = vpack.c.bf16 %v7848_v1, %v7847_v52  ;;  %v7851_v52 = vmax.f32 %v7595_v34, 0.0 }
 0x890   :  { %v6368_v61 = vmax.f32 %v6304_v51, 0.0  ;;  %v6833_v59 = vpop.f32.mrf.mxu2  ;;  %v12340_v44 = vpop.f32.mrf.mxu3 }
 0x891   :  { %13925 = vst [vmem:[#allocation55_spill] sm:$0xff] %v12340_v44  ;;  %v6834_v48 = vadd.f32 %v6833_v59, %v12276_v7  ;;  %v5862_v26 = vpop.f32.mrf.mxu0  ;;  %v6667_v28 = vpop.f32.mrf.mxu1 }
 0x892   :  { %8223 = vst [vmem:[#allocation11 + $0x40] sm:$0xff] %v8095_v21  ;;  %v5863_v23 = vadd.f32 %v5862_v26, %v5694_v37  ;;  %v12345_v25 = vpack.c.bf16 %v6368_v61, %v6367_v46  ;;  %v6668_v58 = vadd.f32 %v6667_v28, %v12265_v20  ;;  %v7344_v37 = vunpack.c.h.bf16 %v115_v39  ;;  %v13930_v21 = vld [vmem:[#allocation152_spill] sm:$0xff]  ;;  %v13931_v46 = vld [vmem:[#allocation173_spill] sm:$0xff] }
 0x893   :  { %v7596_v16 = vadd.f32 %v7340_v12, %v6834_v48  ;;  %v5696_v56 = vadd.f32 %v13931_v46, %v13930_v21  ;;  %v13933_v28 = vld [vmem:[#allocation129_spill] sm:$0xff] }
 0x894   :  { %13928 = vst [vmem:[#allocation82_spill] sm:$0xff] %v12345_v25  ;;  %v6237_v29 = vadd.f32 %v5863_v23, %v5158_v31  ;;  %5901 = vmatmul.bf16.gmra.mxu0 %v13929_v6  ;;  %6706 = vmatmul.bf16.gmra.mxu1 %v12345_v25  ;;  %v7599_v59 = vadd.f32 %v7343_v5, %v6668_v58  ;;  %v117_v23 = vld [vmem:[#allocation2 + $0x70] sm:$0xff] }
 0x895   :  { %v7852_v1 = vmax.f32 %v7596_v16, 0.0  ;;  %6875 = vmatmul.bf16.gmra.mxu2 %v12345_v25  ;;  %7044 = vmatmul.bf16.gmra.mxu3 %v12345_v25  ;;  %v5160_v15 = vadd.f32 %v13934_v35, %v13933_v28  ;;  %v7347_v46 = vunpack.c.l.bf16 %v117_v23  ;;  %v13936_v25 = vld [vmem:[#allocation33_spill] sm:$0xff]  ;;  %v13939_v35 = vld [vmem:[#allocation79_spill] sm:$0xff] }
 0x896   :  { %v6305_v39 = vadd.f32 %v12287_v40, %v6237_v29 }
 0x897   :  { %v8097_v51 = vpack.c.bf16 %v7852_v1, %v7851_v52  ;;  %v7855_v52 = vmax.f32 %v7599_v59, 0.0 }
 0x898   :  { %v6836_v12 = vpop.f32.mrf.mxu2  ;;  %v12354_v61 = vpop.f32.mrf.mxu3  ;;  %v6369_v44 = vmax.f32 %v6305_v39, 0.0  ;;  %v13941_v39 = vld [vmem:[#allocation16_spill] sm:$0xff] }
 0x899   :  { %13932 = vst [vmem:[#allocation80_spill] sm:$0xff] %v12354_v61  ;;  %v6837_v34 = vadd.f32 %v6836_v12, %v12276_v7  ;;  %v5864_v48 = vpop.f32.mrf.mxu0  ;;  %v6669_v26 = vpop.f32.mrf.mxu1  ;;  %v13935_v12 = vld [vmem:[#allocation120_spill] sm:$0xff] }
 0x89a   :  { %8225 = vst [vmem:[#allocation11 + $0x50] sm:$0xff] %v8097_v51  ;;  %v5865_v31 = vadd.f32 %v5864_v48, %v5696_v56  ;;  %v6670_v21 = vadd.f32 %v6669_v26, %v12265_v20  ;;  %v7348_v51 = vunpack.c.h.bf16 %v117_v23  ;;  %v5699_v61 = vadd.f32 %v13936_v25, %v13935_v12  ;;  %v13938_v26 = vld [vmem:[#allocation130_spill] sm:$0xff] }
 0x89b   :  { %v7600_v16 = vadd.f32 %v7344_v37, %v6837_v34 }
 0x89c   :  { %v6238_v6 = vadd.f32 %v5865_v31, %v5160_v15  ;;  %v7603_v29 = vadd.f32 %v7347_v46, %v6670_v21  ;;  %v5163_v15 = vadd.f32 %v13939_v35, %v13938_v26  ;;  %v9320_v26 = vld [vmem:[#allocation10 + $0x38] sm:$0xf0]  ;;  %v13945_v35 = vld [vmem:[#allocation34_spill] sm:$0xff] }
 0x89d   :  { %v7856_v1 = vmax.f32 %v7600_v16, 0.0  ;;  %v119_v16 = vld [vmem:[#allocation2 + $0x80] sm:$0xff] }
 0x89e   :  { %v6306_v58 = vadd.f32 %v12287_v40, %v6238_v6  ;;  %v7351_v46 = vunpack.c.l.bf16 %v119_v16 }
 0x89f   :  { %v8099_v5 = vpack.c.bf16 %v7856_v1, %v7855_v52  ;;  %v7859_v52 = vmax.f32 %v7603_v29, 0.0 }
 0x8a0   :  { %v6370_v28 = vmax.f32 %v6306_v58, 0.0  ;;  %v6838_v56 = vpop.f32.mrf.mxu2  ;;  %v12364_v48 = vpop.f32.mrf.mxu3 }
 0x8a1   :  { %13937 = vst [vmem:[#allocation75_spill] sm:$0xff] %v12364_v48  ;;  %v6839_v37 = vadd.f32 %v6838_v56, %v12276_v7  ;;  %v5867_v59 = vpop.f32.mrf.mxu0  ;;  %v6672_v34 = vpop.f32.mrf.mxu1  ;;  %v13947_v48 = vld [vmem:[#allocation121_spill] sm:$0xff] }
 0x8a2   :  { %8227 = vst [vmem:[#allocation11 + $0x60] sm:$0xff] %v8099_v5  ;;  %v5868_v31 = vadd.f32 %v5867_v59, %v5699_v61  ;;  %v12369_v23 = vpack.c.bf16 %v6370_v28, %v6369_v44  ;;  %v6673_v21 = vadd.f32 %v6672_v34, %v12265_v20  ;;  %v7352_v61 = vunpack.c.h.bf16 %v119_v16  ;;  %v13942_v5 = vld [vmem:[#allocation155_spill] sm:$0xff]  ;;  %v13943_v44 = vld [vmem:[#allocation176_spill] sm:$0xff]  ;;  %v9657_v34 = vld [vmem:[#allocation10 + $0x2c] sm:$0xf] }
 0x8a3   :  { %v7604_v6 = vadd.f32 %v7348_v51, %v6839_v37  ;;  %v5701_v12 = vadd.f32 %v13943_v44, %v13942_v5  ;;  %v9323_v16 = vor.u32 %v9657_v34, %v9320_v26 }
 0x8a4   :  { %13940 = vst [vmem:[#allocation84_spill] sm:$0xff] %v12369_v23  ;;  %v6239_v25 = vadd.f32 %v5868_v31, %v5163_v15  ;;  %5906 = vmatmul.bf16.gmra.mxu0 %v13941_v39  ;;  %6711 = vmatmul.bf16.gmra.mxu1 %v12369_v23  ;;  %v7607_v56 = vadd.f32 %v7351_v46, %v6673_v21  ;;  %v13946_v15 = vld [vmem:[#allocation158_spill] sm:$0xff] }
 0x8a5   :  { %v7860_v1 = vmax.f32 %v7604_v6, 0.0  ;;  %6880 = vmatmul.bf16.gmra.mxu2 %v12369_v23  ;;  %7049 = vmatmul.bf16.gmra.mxu3 %v12369_v23  ;;  %v5165_v31 = vadd.f32 %v13946_v15, %v13945_v35  ;;  %v121_v39 = vld [vmem:[#allocation2 + $0x90] sm:$0xff]  ;;  %v5704_v35 = vadd.f32 %v13948_v49, %v13947_v48  ;;  %v13950_v15 = vld [vmem:[#allocation103_spill] sm:$0xff] }
 0x8a6   :  { %7156 = vmatpush.bf16.msra.mxu0 %v9323_v16  ;;  %v7863_v44 = vmax.f32 %v7607_v56, 0.0  ;;  %v7355_v46 = vunpack.c.l.bf16 %v121_v39  ;;  %v123_v16 = vld [vmem:[#allocation2 + $0xa0] sm:$0xff]  ;;  %v13952_v48 = vld [vmem:[#allocation18_spill] sm:$0xff] }
 0x8a7   :  { %v8101_v58 = vpack.c.bf16 %v7860_v1, %v7859_v52  ;;  %v6307_v1 = vadd.f32 %v12287_v40, %v6239_v25 }
 0x8a8   :  { %v6841_v51 = vpop.f32.mrf.mxu2  ;;  %v12378_v28 = vpop.f32.mrf.mxu3 }
 0x8a9   :  { %13944 = vst [vmem:[#allocation143_spill] sm:$0xff] %v12378_v28  ;;  %v6842_v29 = vadd.f32 %v6841_v51, %v12276_v7  ;;  %v5869_v37 = vpop.f32.mrf.mxu0  ;;  %v6674_v59 = vpop.f32.mrf.mxu1  ;;  %v7356_v28 = vunpack.c.h.bf16 %v121_v39 }
 0x8aa   :  { %8229 = vst [vmem:[#allocation11 + $0x70] sm:$0xff] %v8101_v58  ;;  %v5870_v6 = vadd.f32 %v5869_v37, %v5701_v12  ;;  %v6675_v21 = vadd.f32 %v6674_v59, %v12265_v20  ;;  %v6371_v12 = vmax.f32 %v6307_v1, 0.0  ;;  %v13949_v59 = vld [vmem:[#allocation132_spill] sm:$0xff] }
 0x8ab   :  { %v7608_v52 = vadd.f32 %v7352_v61, %v6842_v29 }
 0x8ac   :  { %v6240_v5 = vadd.f32 %v5870_v6, %v5165_v31  ;;  %v7611_v25 = vadd.f32 %v7355_v46, %v6675_v21  ;;  %v5168_v31 = vadd.f32 %v13950_v15, %v13949_v59  ;;  %v7360_v21 = vunpack.c.h.bf16 %v123_v16  ;;  %v13953_v46 = vld [vmem:[#allocation159_spill] sm:$0xff] }
 0x8ad   :  { %v7864_v58 = vmax.f32 %v7608_v52, 0.0 }
 0x8ae   :  { %v6308_v51 = vadd.f32 %v12287_v40, %v6240_v5  ;;  %v7867_v1 = vmax.f32 %v7611_v25, 0.0 }
 0x8af   :  { %v8103_v23 = vpack.c.bf16 %v7864_v58, %v7863_v44  ;;  %v7359_v44 = vunpack.c.l.bf16 %v123_v16 }
 0x8b0   :  { %v6372_v37 = vmax.f32 %v6308_v51, 0.0  ;;  %v6843_v34 = vpop.f32.mrf.mxu2  ;;  %v12388_v61 = vpop.f32.mrf.mxu3  ;;  %v13954_v51 = vld [vmem:[#allocation17_spill] sm:$0xff] }
 0x8b1   :  { %8231 = vst [vmem:[#allocation11 + $0x80] sm:$0xff] %v8103_v23  ;;  %v6844_v56 = vadd.f32 %v6843_v34, %v12276_v7  ;;  %v5872_v29 = vpop.f32.mrf.mxu0  ;;  %v6677_v26 = vpop.f32.mrf.mxu1 }
 0x8b2   :  { %v5873_v6 = vadd.f32 %v5872_v29, %v5704_v35  ;;  %v12393_v39 = vpack.c.bf16 %v6372_v37, %v6371_v12  ;;  %v6678_v5 = vadd.f32 %v6677_v26, %v12265_v20  ;;  %v5706_v35 = vadd.f32 %v13954_v51, %v13953_v46  ;;  %v13956_v29 = vld [vmem:[#allocation133_spill] sm:$0xff] }
 0x8b3   :  { %v7612_v52 = vadd.f32 %v7356_v28, %v6844_v56  ;;  %v13957_v26 = vld [vmem:[#allocation161_spill] sm:$0xff] }
 0x8b4   :  { %13951 = vst [vmem:[#allocation160_spill] sm:$0xff] %v12393_v39  ;;  %v6241_v49 = vadd.f32 %v5873_v6, %v5168_v31  ;;  %5911 = vmatmul.bf16.gmra.mxu0 %v13952_v48  ;;  %6716 = vmatmul.bf16.gmra.mxu1 %v12393_v39  ;;  %v7615_v37 = vadd.f32 %v7359_v44, %v6678_v5  ;;  %v125_v31 = vld [vmem:[#allocation2 + $0xb0] sm:$0xff] }
 0x8b5   :  { %v7868_v23 = vmax.f32 %v7612_v52, 0.0  ;;  %6885 = vmatmul.bf16.gmra.mxu2 %v12393_v39  ;;  %7054 = vmatmul.bf16.gmra.mxu3 %v12393_v39  ;;  %v5170_v59 = vadd.f32 %v13957_v26, %v13956_v29  ;;  %v7363_v46 = vunpack.c.l.bf16 %v125_v31  ;;  %v13959_v29 = vld [vmem:[#allocation20_spill] sm:$0xff] }
 0x8b6   :  { %v6309_v16 = vadd.f32 %v12287_v40, %v6241_v49  ;;  %v7871_v48 = vmax.f32 %v7615_v37, 0.0  ;;  %v127_v37 = vld [vmem:[#allocation2 + $0xc0] sm:$0xff] }
 0x8b7   :  { %v8105_v58 = vpack.c.bf16 %v7868_v23, %v7867_v1 }
 0x8b8   :  { %v6846_v28 = vpop.f32.mrf.mxu2  ;;  %v12402_v12 = vpop.f32.mrf.mxu3  ;;  %v6373_v51 = vmax.f32 %v6309_v16, 0.0 }
 0x8b9   :  { %13955 = vst [vmem:[#allocation102_spill] sm:$0xff] %v12402_v12  ;;  %v6847_v34 = vadd.f32 %v6846_v28, %v12276_v7  ;;  %v5874_v25 = vpop.f32.mrf.mxu0  ;;  %v6679_v56 = vpop.f32.mrf.mxu1 }
 0x8ba   :  { %8233 = vst [vmem:[#allocation11 + $0x90] sm:$0xff] %v8105_v58  ;;  %v5875_v15 = vadd.f32 %v5874_v25, %v5706_v35  ;;  %v6680_v23 = vadd.f32 %v6679_v56, %v12265_v20  ;;  %v7364_v58 = vunpack.c.h.bf16 %v125_v31  ;;  %v7367_v31 = vunpack.c.l.bf16 %v127_v37 }
 0x8bb   :  { %v7616_v6 = vadd.f32 %v7360_v21, %v6847_v34 }
 0x8bc   :  { %v6242_v52 = vadd.f32 %v5875_v15, %v5170_v59  ;;  %v7619_v35 = vadd.f32 %v7363_v46, %v6680_v23 }
 0x8bd   :  { %v7872_v1 = vmax.f32 %v7616_v6, 0.0  ;;  %v7368_v6 = vunpack.c.h.bf16 %v127_v37 }
 0x8be   :  { %v6310_v5 = vadd.f32 %v12287_v40, %v6242_v52  ;;  %v7875_v26 = vmax.f32 %v7619_v35, 0.0 }
 0x8bf   :  { %v8107_v44 = vpack.c.bf16 %v7872_v1, %v7871_v48 }
 0x8c0   :  { %v6374_v28 = vmax.f32 %v6310_v5, 0.0  ;;  %v6848_v39 = vpop.f32.mrf.mxu2  ;;  %v12410_v12 = vpop.f32.mrf.mxu3  ;;  %v129_v5 = vld [vmem:[#allocation2 + $0xd0] sm:$0xff] }
 0x8c1   :  { %8235 = vst [vmem:[#allocation11 + $0xa0] sm:$0xff] %v8107_v44  ;;  %v6849_v21 = vadd.f32 %v6848_v39, %v12276_v7  ;;  %v5877_v49 = vpop.f32.mrf.mxu0  ;;  %v6682_v34 = vpop.f32.mrf.mxu1  ;;  %v7371_v35 = vunpack.c.l.bf16 %v129_v5 }
 0x8c2   :  { %v12413_v25 = vpack.c.bf16 %v6374_v28, %v6373_v51  ;;  %v6683_v15 = vadd.f32 %v6682_v34, %v12265_v20  ;;  %v13962_v49 = vld [vmem:[#allocation35_spill] sm:$0xff] }
 0x8c3   :  { %v7620_v56 = vadd.f32 %v7364_v58, %v6849_v21  ;;  %v13961_v21 = vld [vmem:[#allocation135_spill] sm:$0xff] }
 0x8c4   :  { %13958 = vst [vmem:[#allocation141_spill] sm:$0xff] %v12413_v25  ;;  %5916 = vmatmul.bf16.gmra.mxu0 %v13959_v29  ;;  %6721 = vmatmul.bf16.gmra.mxu1 %v12413_v25  ;;  %v7623_v48 = vadd.f32 %v7367_v31, %v6683_v15  ;;  %v5009_v34 = vadd.f32 %v13962_v49, %v13961_v21  ;;  %v13963_v29 = vld [vmem:[#allocation164_spill] sm:$0xff] }
 0x8c5   :  { %v7876_v59 = vmax.f32 %v7620_v56, 0.0  ;;  %6890 = vmatmul.bf16.gmra.mxu2 %v12413_v25  ;;  %7059 = vmatmul.bf16.gmra.mxu3 %v12413_v25  ;;  %v7372_v56 = vunpack.c.h.bf16 %v129_v5  ;;  %v13968_v5 = vld [vmem:[#allocation177_spill] sm:$0xff] }
 0x8c6   :  { %v7879_v58 = vmax.f32 %v7623_v48, 0.0 }
 0x8c7   :  { %v8109_v39 = vpack.c.bf16 %v7876_v59, %v7875_v26  ;;  %v13964_v26 = vld [vmem:[#allocation180_spill] sm:$0xff] }
 0x8c8   :  { %v6851_v16 = vpop.f32.mrf.mxu2  ;;  %v12420_v52 = vpop.f32.mrf.mxu3  ;;  %v5714_v59 = vadd.f32 %v13964_v26, %v13963_v29 }
 0x8c9   :  { %13960 = vst [vmem:[#allocation144_spill] sm:$0xff] %v12420_v52  ;;  %v6852_v1 = vadd.f32 %v6851_v16, %v12276_v7  ;;  %v5879_v23 = vpop.f32.mrf.mxu0  ;;  %v6684_v46 = vpop.f32.mrf.mxu1 }
 0x8ca   :  { %8237 = vst [vmem:[#allocation11 + $0xb0] sm:$0xff] %v8109_v39  ;;  %v6685_v28 = vadd.f32 %v6684_v46, %v12265_v20 }
 0x8cb   :  { %v7624_v44 = vadd.f32 %v7368_v6, %v6852_v1  ;;  %v13966_v1 = vld [vmem:[#allocation162_spill] sm:$0xff] }
 0x8cc   :  { %v7627_v39 = vadd.f32 %v7371_v35, %v6685_v28  ;;  %v5178_v23 = vadd.f32 %v13966_v1, %v5009_v34  ;;  %v13969_v28 = vld [vmem:[#allocation41_spill] sm:$0xff]  ;;  %v13970_v35 = vld [vmem:[#allocation19_spill] sm:$0xff] }
 0x8cd   :  { %v7880_v51 = vmax.f32 %v7624_v44, 0.0  ;;  %v131_v44 = vld [vmem:[#allocation2 + $0xe0] sm:$0xff]  ;;  %v5011_v34 = vadd.f32 %v13970_v35, %v13969_v28 }
 0x8cf   :  { %v8111_v37 = vpack.c.bf16 %v7880_v51, %v7879_v58  ;;  %v13967_v58 = vld [vmem:[#allocation22_spill] sm:$0xff]  ;;  %v7883_v51 = vmax.f32 %v7627_v39, 0.0 }
 0x8d0   :  { %v6853_v15 = vpop.f32.mrf.mxu2  ;;  %v12428_v31 = vpop.f32.mrf.mxu3 }
 0x8d1   :  { %13965 = vst [vmem:[#allocation85_spill] sm:$0xff] %v12428_v31  ;;  %v6854_v6 = vadd.f32 %v6853_v15, %v12276_v7  ;;  %v5882_v16 = vpop.f32.mrf.mxu0  ;;  %v6687_v48 = vpop.f32.mrf.mxu1  ;;  %v13972_v15 = vld [vmem:[#allocation181_spill] sm:$0xff] }
 0x8d2   :  { %8239 = vst [vmem:[#allocation11 + $0xc0] sm:$0xff] %v8111_v37  ;;  %v5883_v46 = vadd.f32 %v5882_v16, %v5714_v59  ;;  %v6688_v29 = vadd.f32 %v6687_v48, %v12265_v20  ;;  %v7375_v37 = vunpack.c.l.bf16 %v131_v44  ;;  %v7376_v59 = vunpack.c.h.bf16 %v131_v44  ;;  %v133_v31 = vld [vmem:[#allocation2 + $0xf0] sm:$0xff] }
 0x8d3   :  { %v7628_v25 = vadd.f32 %v7372_v56, %v6854_v6  ;;  %v13971_v56 = vld [vmem:[#allocation167_spill] sm:$0xff] }
 0x8d4   :  { %v6245_v21 = vadd.f32 %v5883_v46, %v5178_v23  ;;  %5921 = vmatmul.bf16.gmra.mxu0 %v13967_v58  ;;  %6726 = vmatmul.bf16.gmra.mxu1 %v13968_v5  ;;  %v5716_v6 = vadd.f32 %v13972_v15, %v13971_v56  ;;  %v7631_v1 = vadd.f32 %v7375_v37, %v6688_v29  ;;  %v13973_v23 = vld [vmem:[#allocation125_spill] sm:$0xff]  ;;  %v7380_v56 = vunpack.c.h.bf16 %v133_v31  ;;  %v13974_v15 = vld [vmem:[#allocation168_spill] sm:$0xff] }
 0x8d5   :  { %v7884_v49 = vmax.f32 %v7628_v25, 0.0  ;;  %6895 = vmatmul.bf16.gmra.mxu2 %v13968_v5  ;;  %7064 = vmatmul.bf16.gmra.mxu3 %v13968_v5  ;;  %v5180_v46 = vadd.f32 %v13973_v23, %v5011_v34  ;;  %v5719_v34 = vadd.f32 %v11909_v41, %v13974_v15 }
 0x8d7   :  { %v8113_v26 = vpack.c.bf16 %v7884_v49, %v7883_v51  ;;  %v6313_v51 = vadd.f32 %v12287_v40, %v6245_v21  ;;  %v7887_v49 = vmax.f32 %v7631_v1, 0.0 }
 0x8d8   :  { %v6856_v16 = vpop.f32.mrf.mxu2  ;;  %v12443_v58 = vpop.f32.mrf.mxu3 }
 0x8d9   :  { %8241 = vst [vmem:[#allocation11 + $0xd0] sm:$0xff] %v8113_v26  ;;  %v6857_v25 = vadd.f32 %v6856_v16, %v12276_v7  ;;  %v5884_v39 = vpop.f32.mrf.mxu0  ;;  %v6689_v48 = vpop.f32.mrf.mxu1  ;;  %v7379_v26 = vunpack.c.l.bf16 %v133_v31  ;;  %v6377_v16 = vmax.f32 %v6313_v51, 0.0  ;;  %v13979_v51 = vld [vmem:[#allocation24_spill] sm:$0xff] }
 0x8da   :  { %v5885_v5 = vadd.f32 %v5884_v39, %v5716_v6  ;;  %v6690_v35 = vadd.f32 %v6689_v48, %v12265_v20 }
 0x8db   :  { %v7632_v52 = vadd.f32 %v7376_v59, %v6857_v25  ;;  %v13976_v25 = vld [vmem:[#allocation94_spill] sm:$0xff] }
 0x8dc   :  { %v6246_v44 = vadd.f32 %v5885_v5, %v5180_v46  ;;  %v7635_v59 = vadd.f32 %v7379_v26, %v6690_v35  ;;  %v135_v46 = vld [vmem:[#allocation2 + $0x100] sm:$0xff] }
 0x8dd   :  { %v7888_v28 = vmax.f32 %v7632_v52, 0.0  ;;  %v13975_v52 = vld [vmem:[#allocation136_spill] sm:$0xff]  ;;  %v7384_v15 = vunpack.c.h.bf16 %v135_v46 }
 0x8de   :  { %v6314_v29 = vadd.f32 %v12287_v40, %v6246_v44  ;;  %v5183_v39 = vadd.f32 %v13976_v25, %v13975_v52  ;;  %v9304_v52 = vld [vmem:[#allocation10 + $0x18] sm:$0xf0]  ;;  %v13982_v25 = vld [vmem:[#allocation166_spill] sm:$0xff] }
 0x8df   :  { %v8115_v37 = vpack.c.bf16 %v7888_v28, %v7887_v49  ;;  %v7891_v28 = vmax.f32 %v7635_v59, 0.0 }
 0x8e0   :  { %v6378_v23 = vmax.f32 %v6314_v29, 0.0  ;;  %v6858_v6 = vpop.f32.mrf.mxu2  ;;  %v12455_v49 = vpop.f32.mrf.mxu3  ;;  %v7383_v29 = vunpack.c.l.bf16 %v135_v46 }
 0x8e1   :  { %8243 = vst [vmem:[#allocation11 + $0xe0] sm:$0xff] %v8115_v37  ;;  %v6859_v21 = vadd.f32 %v6858_v6, %v12276_v7  ;;  %v5887_v5 = vpop.f32.mrf.mxu0  ;;  %v6692_v1 = vpop.f32.mrf.mxu1 }
 0x8e2   :  { %v5888_v48 = vadd.f32 %v5887_v5, %v5719_v34  ;;  %v12453_v44 = vpack.c.bf16 %v6378_v23, %v6377_v16  ;;  %13978 = vst [vmem:[#allocation142_spill] sm:$0xff] %v12455_v49  ;;  %v6693_v26 = vadd.f32 %v6692_v1, %v12265_v20  ;;  %v13980_v34 = vld [vmem:[#allocation171_spill] sm:$0xff]  ;;  %v9653_v5 = vld [vmem:[#allocation10 + $0xc] sm:$0xf]  ;;  %v13981_v1 = vld [vmem:[#allocation44_spill] sm:$0xff] }
 0x8e3   :  { %v7636_v31 = vadd.f32 %v7380_v56, %v6859_v21  ;;  %v5721_v56 = vadd.f32 %v11916_v32, %v13980_v34 }
 0x8e4   :  { %13977 = vst [vmem:[#allocation83_spill] sm:$0xff] %v12453_v44  ;;  %v6247_v41 = vadd.f32 %v5888_v48, %v5183_v39  ;;  %5926 = vmatmul.bf16.gmra.mxu0 %v13979_v51  ;;  %6731 = vmatmul.bf16.gmra.mxu1 %v12453_v44  ;;  %v7639_v23 = vadd.f32 %v7383_v29, %v6693_v26 }
 0x8e5   :  { %v7892_v35 = vmax.f32 %v7636_v31, 0.0  ;;  %6900 = vmatmul.bf16.gmra.mxu2 %v12453_v44  ;;  %7069 = vmatmul.bf16.gmra.mxu3 %v12453_v44  ;;  %v5185_v39 = vadd.f32 %v13982_v25, %v13981_v1  ;;  %v137_v31 = vld [vmem:[#allocation2 + $0x110] sm:$0xff]  ;;  %v9307_v51 = vor.u32 %v9653_v5, %v9304_v52  ;;  %v13983_v1 = vld [vmem:[#allocation172_spill] sm:$0xff] }
 0x8e6   :  { %v6315_v46 = vadd.f32 %v12287_v40, %v6247_v41  ;;  %v7895_v32 = vmax.f32 %v7639_v23, 0.0  ;;  %v7387_v29 = vunpack.c.l.bf16 %v137_v31  ;;  %v7388_v49 = vunpack.c.h.bf16 %v137_v31  ;;  %v13985_v25 = vld [vmem:[#allocation108_spill] sm:$0xff] }
 0x8e7   :  { %v8117_v37 = vpack.c.bf16 %v7892_v35, %v7891_v28  ;;  %7157 = vmatpush.bf16.msra.mxu0 %v9307_v51  ;;  %v139_v51 = vld [vmem:[#allocation2 + $0x120] sm:$0xff] }
 0x8e8   :  { %v6861_v16 = vpop.f32.mrf.mxu2  ;;  %v12469_v34 = vpop.f32.mrf.mxu3 }
 0x8e9   :  { %8245 = vst [vmem:[#allocation11 + $0xf0] sm:$0xff] %v8117_v37  ;;  %v6862_v6 = vadd.f32 %v6861_v16, %v12276_v7  ;;  %v5889_v21 = vpop.f32.mrf.mxu0  ;;  %v6694_v59 = vpop.f32.mrf.mxu1 }
 0x8ea   :  { %v5890_v48 = vadd.f32 %v5889_v21, %v5721_v56  ;;  %v6695_v26 = vadd.f32 %v6694_v59, %v12265_v20  ;;  %v5724_v56 = vadd.f32 %v11925_v47, %v13983_v1  ;;  %v6379_v21 = vmax.f32 %v6315_v46, 0.0  ;;  %v13984_v59 = vld [vmem:[#allocation137_spill] sm:$0xff] }
 0x8eb   :  { %v7640_v28 = vadd.f32 %v7384_v15, %v6862_v6 }
 0x8ec   :  { %v6248_v35 = vadd.f32 %v5890_v48, %v5185_v39  ;;  %v7643_v41 = vadd.f32 %v7387_v29, %v6695_v26  ;;  %v5188_v39 = vadd.f32 %v13985_v25, %v13984_v59  ;;  %v7392_v29 = vunpack.c.h.bf16 %v139_v51  ;;  %v141_v25 = vld [vmem:[#allocation2 + $0x130] sm:$0xff] }
 0x8ed   :  { %v7896_v37 = vmax.f32 %v7640_v28, 0.0 }
 0x8ee   :  { %v6316_v16 = vadd.f32 %v12287_v40, %v6248_v35  ;;  %v7899_v47 = vmax.f32 %v7643_v41, 0.0 }
 0x8ef   :  { %v8119_v44 = vpack.c.bf16 %v7896_v37, %v7895_v32  ;;  %v13986_v32 = vld [vmem:[#allocation26_spill] sm:$0xff]  ;;  %v7391_v37 = vunpack.c.l.bf16 %v139_v51 }
 0x8f0   :  { %v6380_v15 = vmax.f32 %v6316_v16, 0.0  ;;  %v6863_v6 = vpop.f32.mrf.mxu2  ;;  %v13987_v16 = vld [vmem:[#allocation175_spill] sm:$0xff] }
 0x8f1   :  { %8247 = vst [vmem:[#allocation11 + $0x100] sm:$0xff] %v8119_v44  ;;  %v6864_v23 = vadd.f32 %v6863_v6, %v12276_v7  ;;  %v5892_v5 = vpop.f32.mrf.mxu0  ;;  %v6697_v52 = vpop.f32.mrf.mxu1  ;;  %v5726_v1 = vadd.f32 %v11935_v30, %v13987_v16 }
 0x8f2   :  { %v5893_v48 = vadd.f32 %v5892_v5, %v5724_v56  ;;  %v12477_v28 = vpack.c.bf16 %v6380_v15, %v6379_v21  ;;  %v6698_v46 = vadd.f32 %v6697_v52, %v12265_v20  ;;  %v13989_v5 = vld [vmem:[#allocation170_spill] sm:$0xff] }
 0x8f3   :  { %v7644_v31 = vadd.f32 %v7388_v49, %v6864_v23  ;;  %v12486_v49 = vpop.f32.mrf.mxu3  ;;  %v13988_v23 = vld [vmem:[#allocation47_spill] sm:$0xff] }
 0x8f4   :  { %v6249_v35 = vadd.f32 %v5893_v48, %v5188_v39  ;;  %5931 = vmatmul.bf16.gmra.mxu0 %v13986_v32  ;;  %6736 = vmatmul.bf16.gmra.mxu1 %v12477_v28  ;;  %v7647_v21 = vadd.f32 %v7391_v37, %v6698_v46  ;;  %v5190_v52 = vadd.f32 %v13989_v5, %v13988_v23  ;;  %v7396_v37 = vunpack.c.h.bf16 %v141_v25  ;;  %v13991_v23 = vld [vmem:[#allocation131_spill] sm:$0xff] }
 0x8f5   :  { %v7900_v44 = vmax.f32 %v7644_v31, 0.0  ;;  %6905 = vmatmul.bf16.gmra.mxu2 %v12477_v28  ;;  %7074 = vmatmul.bf16.gmra.mxu3 %v12477_v28 }
 0x8f6   :  { %v6317_v48 = vadd.f32 %v12287_v40, %v6249_v35  ;;  %v7903_v31 = vmax.f32 %v7647_v21, 0.0 }
 0x8f7   :  { %v8121_v26 = vpack.c.bf16 %v7900_v44, %v7899_v47  ;;  %v7395_v47 = vunpack.c.l.bf16 %v141_v25 }
 0x8f8   :  { %v6866_v56 = vpop.f32.mrf.mxu2  ;;  %v6381_v16 = vmax.f32 %v6317_v48, 0.0 }
 0x8f9   :  { %8249 = vst [vmem:[#allocation11 + $0x110] sm:$0xff] %v8121_v26  ;;  %v6867_v15 = vadd.f32 %v6866_v56, %v12276_v7  ;;  %v5894_v6 = vpop.f32.mrf.mxu0  ;;  %v6699_v41 = vpop.f32.mrf.mxu1  ;;  %v5729_v26 = vadd.f32 %v11983_v10, %v11981_v60  ;;  %v13992_v10 = vld [vmem:[#allocation28_spill] sm:$0xff] }
 0x8fa   :  { %v5895_v59 = vadd.f32 %v5894_v6, %v5726_v1  ;;  %v6700_v32 = vadd.f32 %v6699_v41, %v12265_v20  ;;  %v13990_v6 = vld [vmem:[#allocation138_spill] sm:$0xff] }
 0x8fb   :  { %v7648_v39 = vadd.f32 %v7392_v29, %v6867_v15  ;;  %v5193_v41 = vadd.f32 %v13991_v23, %v13990_v6  ;;  %v12499_v5 = vpop.f32.mrf.mxu3 }
 0x8fc   :  { %v6250_v51 = vadd.f32 %v5895_v59, %v5190_v52  ;;  %v7651_v29 = vadd.f32 %v7395_v47, %v6700_v32  ;;  %v143_v59 = vld [vmem:[#allocation2 + $0x140] sm:$0xff] }
 0x8fd   :  { %v7904_v30 = vmax.f32 %v7648_v39, 0.0  ;;  %v7400_v47 = vunpack.c.h.bf16 %v143_v59 }
 0x8fe   :  { %v6318_v44 = vadd.f32 %v12287_v40, %v6250_v51  ;;  %v7907_v48 = vmax.f32 %v7651_v29, 0.0  ;;  %v13994_v29 = vld [vmem:[#allocation174_spill] sm:$0xff] }
 0x8ff   :  { %v8123_v46 = vpack.c.bf16 %v7904_v30, %v7903_v31  ;;  %v7399_v30 = vunpack.c.l.bf16 %v143_v59 }
 0x900   :  { %v6382_v56 = vmax.f32 %v6318_v44, 0.0  ;;  %v6868_v1 = vpop.f32.mrf.mxu2  ;;  %v5731_v44 = vadd.f32 %v11995_v62, %v11993_v43 }
 0x901   :  { %8251 = vst [vmem:[#allocation11 + $0x120] sm:$0xff] %v8123_v46  ;;  %v6869_v35 = vadd.f32 %v6868_v1, %v12276_v7  ;;  %v5897_v15 = vpop.f32.mrf.mxu0  ;;  %v6702_v21 = vpop.f32.mrf.mxu1  ;;  %v13993_v1 = vld [vmem:[#allocation25_spill] sm:$0xff] }
 0x902   :  { %v5898_v52 = vadd.f32 %v5897_v15, %v5729_v26  ;;  %v12501_v25 = vpack.c.bf16 %v6382_v56, %v6381_v16  ;;  %v6703_v31 = vadd.f32 %v6702_v21, %v12265_v20  ;;  %v145_v21 = vld [vmem:[#allocation2 + $0x150] sm:$0xff] }
 0x903   :  { %v7652_v39 = vadd.f32 %v7396_v37, %v6869_v35  ;;  %v5195_v35 = vadd.f32 %v13994_v29, %v13993_v1  ;;  %v12513_v23 = vpop.f32.mrf.mxu3  ;;  %v147_v29 = vld [vmem:[#allocation2 + $0x160] sm:$0xff] }
 0x904   :  { %v6251_v60 = vadd.f32 %v5898_v52, %v5193_v41  ;;  %5936 = vmatmul.bf16.gmra.mxu0 %v13992_v10  ;;  %6741 = vmatmul.bf16.gmra.mxu1 %v12501_v25  ;;  %v7655_v37 = vadd.f32 %v7399_v30, %v6703_v31  ;;  %v5734_v31 = vadd.f32 %v12005_v22, %v12003_v11 }
 0x905   :  { %v7908_v51 = vmax.f32 %v7652_v39, 0.0  ;;  %6910 = vmatmul.bf16.gmra.mxu2 %v12501_v25  ;;  %7079 = vmatmul.bf16.gmra.mxu3 %v12501_v25  ;;  %v7403_v39 = vunpack.c.l.bf16 %v145_v21 }
 0x906   :  { %v6319_v41 = vadd.f32 %v12287_v40, %v6251_v60  ;;  %v7911_v59 = vmax.f32 %v7655_v37, 0.0 }
 0x907   :  { %v8125_v32 = vpack.c.bf16 %v7908_v51, %v7907_v48  ;;  %v7404_v51 = vunpack.c.h.bf16 %v145_v21 }
 0x908   :  { %v6871_v46 = vpop.f32.mrf.mxu2  ;;  %v6383_v30 = vmax.f32 %v6319_v41, 0.0 }
 0x909   :  { %8253 = vst [vmem:[#allocation11 + $0x130] sm:$0xff] %v8125_v32  ;;  %v6872_v26 = vadd.f32 %v6871_v46, %v12276_v7  ;;  %v5899_v16 = vpop.f32.mrf.mxu0  ;;  %v6704_v56 = vpop.f32.mrf.mxu1 }
 0x90a   :  { %v5900_v15 = vadd.f32 %v5899_v16, %v5731_v44  ;;  %v6705_v62 = vadd.f32 %v6704_v56, %v12265_v20  ;;  %v13996_v16 = vld [vmem:[#allocation21_spill] sm:$0xff] }
 0x90b   :  { %v7656_v6 = vadd.f32 %v7400_v47, %v6872_v26  ;;  %v13995_v26 = vld [vmem:[#allocation139_spill] sm:$0xff] }
 0x90c   :  { %v6252_v52 = vadd.f32 %v5900_v15, %v5195_v35  ;;  %v7659_v44 = vadd.f32 %v7403_v39, %v6705_v62  ;;  %v5198_v56 = vadd.f32 %v13996_v16, %v13995_v26  ;;  %v7408_v62 = vunpack.c.h.bf16 %v147_v29 }
 0x90d   :  { %v7912_v43 = vmax.f32 %v7656_v6, 0.0  ;;  %v13997_v6 = vld [vmem:[#allocation32_spill] sm:$0xff]  ;;  %v5736_v39 = vadd.f32 %v12015_v4, %v12013_v13 }
 0x90e   :  { %v6320_v10 = vadd.f32 %v12287_v40, %v6252_v52  ;;  %v7915_v11 = vmax.f32 %v7659_v44, 0.0  ;;  %v7407_v52 = vunpack.c.l.bf16 %v147_v29  ;;  %v12539_v29 = vld [vmem:[#allocation8] ss:$0 sm:$0xff] }
 0x90f   :  { %v8127_v48 = vpack.c.bf16 %v7912_v43, %v7911_v59  ;;  %v12530_v59 = vpop.f32.mrf.mxu3 }
 0x910   :  { %v6384_v32 = vmax.f32 %v6320_v10, 0.0  ;;  %v6873_v47 = vpop.f32.mrf.mxu2 }
 0x911   :  { %8255 = vst [vmem:[#allocation11 + $0x140] sm:$0xff] %v8127_v48  ;;  %v6874_v60 = vadd.f32 %v6873_v47, %v12276_v7  ;;  %v5902_v46 = vpop.f32.mrf.mxu0  ;;  %v6707_v37 = vpop.f32.mrf.mxu1  ;;  %v13999_v47 = vld [vmem:[#allocation178_spill] sm:$0xff] }
 0x912   :  { %v5903_v1 = vadd.f32 %v5902_v46, %v5734_v31  ;;  %v12523_v35 = vpack.c.bf16 %v6384_v32, %v6383_v30  ;;  %v6708_v41 = vadd.f32 %v6707_v37, %v12265_v20  ;;  %v13998_v32 = vld [vmem:[#allocation53_spill] sm:$0xff] }
 0x913   :  { %v7660_v15 = vadd.f32 %v7404_v51, %v6874_v60  ;;  %v5200_v44 = vadd.f32 %v13999_v47, %v13998_v32  ;;  %v149_v46 = vld [vmem:[#allocation2 + $0x170] sm:$0xff]  ;;  %v151_v47 = vld [vmem:[#allocation2 + $0x180] sm:$0xff] }
 0x914   :  { %v6253_v21 = vadd.f32 %v5903_v1, %v5198_v56  ;;  %5941 = vmatmul.bf16.gmra.mxu0 %v13997_v6  ;;  %6746 = vmatmul.bf16.gmra.mxu1 %v12523_v35  ;;  %v7663_v48 = vadd.f32 %v7407_v52, %v6708_v41  ;;  %v7411_v4 = vunpack.c.l.bf16 %v149_v46 }
 0x915   :  { %v7916_v22 = vmax.f32 %v7660_v15, 0.0  ;;  %6915 = vmatmul.bf16.gmra.mxu2 %v12523_v35  ;;  %7084 = vmatmul.bf16.gmra.mxu3 %v12523_v35 }
 0x916   :  { %v6321_v26 = vadd.f32 %v12287_v40, %v6253_v21  ;;  %v7919_v56 = vmax.f32 %v7663_v48, 0.0 }
 0x917   :  { %v8129_v43 = vpack.c.bf16 %v7916_v22, %v7915_v11  ;;  %v7412_v11 = vunpack.c.h.bf16 %v149_v46  ;;  %v14000_v22 = vld [vmem:[#allocation204_spill] sm:$0xff]  ;;  %v12544_v52 = vpop.f32.mrf.mxu3  ;;  %v14003_v46 = vld [vmem:[#allocation110_spill] sm:$0xff] }
 0x918   :  { %v6876_v10 = vpop.f32.mrf.mxu2  ;;  %v5739_v41 = vadd.f32 %v14000_v22, %v12022_v54 }
 0x919   :  { %8257 = vst [vmem:[#allocation11 + $0x150] sm:$0xff] %v8129_v43  ;;  %v6877_v51 = vadd.f32 %v6876_v10, %v12276_v7  ;;  %v5904_v31 = vpop.f32.mrf.mxu0  ;;  %v6709_v30 = vpop.f32.mrf.mxu1  ;;  %v6385_v43 = vmax.f32 %v6321_v26, 0.0 }
 0x91a   :  { %v5905_v60 = vadd.f32 %v5904_v31, %v5736_v39  ;;  %v6710_v13 = vadd.f32 %v6709_v30, %v12265_v20  ;;  %v14002_v31 = vld [vmem:[#allocation23_spill] sm:$0xff] }
 0x91b   :  { %v7664_v37 = vadd.f32 %v7408_v62, %v6877_v51  ;;  %v14001_v51 = vld [vmem:[#allocation140_spill] sm:$0xff] }
 0x91c   :  { %v6254_v16 = vadd.f32 %v5905_v60, %v5200_v44  ;;  %v7667_v21 = vadd.f32 %v7411_v4, %v6710_v13  ;;  %v5203_v30 = vadd.f32 %v14002_v31, %v14001_v51  ;;  %v7416_v13 = vunpack.c.h.bf16 %v151_v47  ;;  %v14004_v4 = vld [vmem:[#allocation207_spill] sm:$0xff]  ;;  %v153_v51 = vld [vmem:[#allocation2 + $0x190] sm:$0xff] }
 0x91d   :  { %v7920_v1 = vmax.f32 %v7664_v37, 0.0 }
 0x91e   :  { %v6322_v15 = vadd.f32 %v12539_v29, %v6254_v16  ;;  %v7923_v37 = vmax.f32 %v7667_v21, 0.0  ;;  %v14007_v21 = vld [vmem:[#allocation179_spill] sm:$0xff] }
 0x91f   :  { %v8131_v6 = vpack.c.bf16 %v7920_v1, %v7919_v56  ;;  %v7415_v56 = vunpack.c.l.bf16 %v151_v47 }
 0x920   :  { %v6386_v62 = vmax.f32 %v6322_v15, 0.0  ;;  %v6878_v40 = vpop.f32.mrf.mxu2  ;;  %v14005_v15 = vld [vmem:[#allocation208_spill] sm:$0xff] }
 0x921   :  { %8259 = vst [vmem:[#allocation11 + $0x160] sm:$0xff] %v8131_v6  ;;  %v6879_v39 = vadd.f32 %v6878_v40, %v12276_v7  ;;  %v5907_v10 = vpop.f32.mrf.mxu0  ;;  %v6712_v48 = vpop.f32.mrf.mxu1  ;;  %v5741_v6 = vadd.f32 %v14005_v15, %v14004_v4  ;;  %v14006_v40 = vld [vmem:[#allocation30_spill] sm:$0xff] }
 0x922   :  { %v5908_v32 = vadd.f32 %v5907_v10, %v5739_v41  ;;  %v12549_v44 = vpack.c.bf16 %v6386_v62, %v6385_v43  ;;  %v6713_v16 = vadd.f32 %v6712_v48, %v12265_v20  ;;  %v12561_v10 = vpop.f32.mrf.mxu3 }
 0x923   :  { %v7668_v60 = vadd.f32 %v7412_v11, %v6879_v39  ;;  %v5205_v39 = vadd.f32 %v14007_v21, %v14006_v40  ;;  %v14010_v40 = vld [vmem:[#allocation50_spill] sm:$0xff] }
 0x924   :  { %v6255_v54 = vadd.f32 %v5908_v32, %v5203_v30  ;;  %5946 = vmatmul.bf16.gmra.mxu0 %v14003_v46  ;;  %6751 = vmatmul.bf16.gmra.mxu1 %v12549_v44  ;;  %v7671_v22 = vadd.f32 %v7415_v56, %v6713_v16  ;;  %v7420_v56 = vunpack.c.h.bf16 %v153_v51 }
 0x925   :  { %v7924_v26 = vmax.f32 %v7668_v60, 0.0  ;;  %6920 = vmatmul.bf16.gmra.mxu2 %v12549_v44  ;;  %7089 = vmatmul.bf16.gmra.mxu3 %v12549_v44 }
 0x926   :  { %v6323_v30 = vadd.f32 %v12539_v29, %v6255_v54  ;;  %v7927_v47 = vmax.f32 %v7671_v22, 0.0 }
 0x927   :  { %v8133_v1 = vpack.c.bf16 %v7924_v26, %v7923_v37  ;;  %v7419_v37 = vunpack.c.l.bf16 %v153_v51 }
 0x928   :  { %v6881_v11 = vpop.f32.mrf.mxu2  ;;  %v6387_v15 = vmax.f32 %v6323_v30, 0.0  ;;  %v14011_v30 = vld [vmem:[#allocation38_spill] sm:$0xff] }
 0x929   :  { %8261 = vst [vmem:[#allocation11 + $0x170] sm:$0xff] %v8133_v1  ;;  %v6882_v41 = vadd.f32 %v6881_v11, %v12276_v7  ;;  %v5909_v43 = vpop.f32.mrf.mxu0  ;;  %v6714_v62 = vpop.f32.mrf.mxu1  ;;  %v14008_v1 = vld [vmem:[#allocation209_spill] sm:$0xff] }
 0x92a   :  { %v5910_v48 = vadd.f32 %v5909_v43, %v5741_v6  ;;  %v6715_v46 = vadd.f32 %v6714_v62, %v12265_v20  ;;  %v5744_v4 = vadd.f32 %v14008_v1, %v12041_v55  ;;  %v14009_v43 = vld [vmem:[#allocation183_spill] sm:$0xff] }
 0x92b   :  { %v7672_v31 = vadd.f32 %v7416_v13, %v6882_v41  ;;  %v5208_v62 = vadd.f32 %v14010_v40, %v14009_v43 }
 0x92c   :  { %v6256_v32 = vadd.f32 %v5910_v48, %v5205_v39  ;;  %v7675_v13 = vadd.f32 %v7419_v37, %v6715_v46  ;;  %v155_v39 = vld [vmem:[#allocation2 + $0x1a0] sm:$0xff] }
 0x92d   :  { %v7928_v60 = vmax.f32 %v7672_v31, 0.0  ;;  %v12573_v31 = vpop.f32.mrf.mxu3  ;;  %v7423_v46 = vunpack.c.l.bf16 %v155_v39 }
 0x92e   :  { %v6324_v26 = vadd.f32 %v12539_v29, %v6256_v32  ;;  %v7931_v32 = vmax.f32 %v7675_v13, 0.0  ;;  %v14013_v13 = vld [vmem:[#allocation27_spill] sm:$0xff] }
 0x92f   :  { %v8135_v16 = vpack.c.bf16 %v7928_v60, %v7927_v47 }
 0x930   :  { %v6388_v11 = vmax.f32 %v6324_v26, 0.0  ;;  %v6883_v6 = vpop.f32.mrf.mxu2  ;;  %v7424_v26 = vunpack.c.h.bf16 %v155_v39 }
 0x931   :  { %8263 = vst [vmem:[#allocation11 + $0x180] sm:$0xff] %v8135_v16  ;;  %v6884_v54 = vadd.f32 %v6883_v6, %v12276_v7  ;;  %v5912_v41 = vpop.f32.mrf.mxu0  ;;  %v6717_v22 = vpop.f32.mrf.mxu1  ;;  %v5746_v16 = vadd.f32 %v12050_v42, %v12048_v2  ;;  %v14012_v6 = vld [vmem:[#allocation184_spill] sm:$0xff] }
 0x932   :  { %v5913_v21 = vadd.f32 %v5912_v41, %v5744_v4  ;;  %v12571_v48 = vpack.c.bf16 %v6388_v11, %v6387_v15  ;;  %v6718_v60 = vadd.f32 %v6717_v22, %v12265_v20  ;;  %v157_v22 = vld [vmem:[#allocation2 + $0x1b0] sm:$0xff] }
 0x933   :  { %v7676_v51 = vadd.f32 %v7420_v56, %v6884_v54  ;;  %v5210_v54 = vadd.f32 %v14013_v13, %v14012_v6  ;;  %v7427_v42 = vunpack.c.l.bf16 %v157_v22  ;;  %v159_v13 = vld [vmem:[#allocation2 + $0x1c0] sm:$0xff] }
 0x934   :  { %v6257_v55 = vadd.f32 %v5913_v21, %v5208_v62  ;;  %5951 = vmatmul.bf16.gmra.mxu0 %v14011_v30  ;;  %6756 = vmatmul.bf16.gmra.mxu1 %v12571_v48  ;;  %v7679_v1 = vadd.f32 %v7423_v46, %v6718_v60  ;;  %v5749_v60 = vadd.f32 %v12057_v9, %v12055_v0 }
 0x935   :  { %v7932_v47 = vmax.f32 %v7676_v51, 0.0  ;;  %6925 = vmatmul.bf16.gmra.mxu2 %v12571_v48  ;;  %7094 = vmatmul.bf16.gmra.mxu3 %v12571_v48  ;;  %v12587_v51 = vpop.f32.mrf.mxu3 }
 0x936   :  { %v6325_v40 = vadd.f32 %v12539_v29, %v6257_v55  ;;  %v7935_v21 = vmax.f32 %v7679_v1, 0.0 }
 0x937   :  { %v8137_v37 = vpack.c.bf16 %v7932_v47, %v7931_v32  ;;  %v7428_v47 = vunpack.c.h.bf16 %v157_v22 }
 0x938   :  { %v6886_v56 = vpop.f32.mrf.mxu2  ;;  %v6389_v46 = vmax.f32 %v6325_v40, 0.0  ;;  %v7431_v40 = vunpack.c.l.bf16 %v159_v13 }
 0x939   :  { %8265 = vst [vmem:[#allocation11 + $0x190] sm:$0xff] %v8137_v37  ;;  %v6887_v4 = vadd.f32 %v6886_v56, %v12276_v7  ;;  %v5914_v15 = vpop.f32.mrf.mxu0  ;;  %v6719_v11 = vpop.f32.mrf.mxu1 }
 0x93a   :  { %v5915_v41 = vadd.f32 %v5914_v15, %v5746_v16  ;;  %v6720_v2 = vadd.f32 %v6719_v11, %v12265_v20  ;;  %v14015_v15 = vld [vmem:[#allocation182_spill] sm:$0xff] }
 0x93b   :  { %v7680_v43 = vadd.f32 %v7424_v26, %v6887_v4  ;;  %v14014_v4 = vld [vmem:[#allocation186_spill] sm:$0xff] }
 0x93c   :  { %v6258_v62 = vadd.f32 %v5915_v41, %v5210_v54  ;;  %v7683_v55 = vadd.f32 %v7427_v42, %v6720_v2  ;;  %v5213_v11 = vadd.f32 %v14015_v15, %v14014_v4 }
 0x93d   :  { %v7936_v39 = vmax.f32 %v7680_v43, 0.0  ;;  %v12604_v2 = vpop.f32.mrf.mxu3 }
 0x93e   :  { %v6326_v30 = vadd.f32 %v12539_v29, %v6258_v62  ;;  %v7939_v0 = vmax.f32 %v7683_v55, 0.0  ;;  %v161_v55 = vld [vmem:[#allocation2 + $0x1d0] sm:$0xff] }
 0x93f   :  { %v8139_v32 = vpack.c.bf16 %v7936_v39, %v7935_v21  ;;  %v7432_v21 = vunpack.c.h.bf16 %v159_v13  ;;  %v5751_v39 = vadd.f32 %v12066_v36, %v12064_v57  ;;  %v7435_v15 = vunpack.c.l.bf16 %v161_v55 }
 0x940   :  { %v6390_v37 = vmax.f32 %v6326_v30, 0.0  ;;  %v6888_v26 = vpop.f32.mrf.mxu2  ;;  %v7436_v13 = vunpack.c.h.bf16 %v161_v55 }
 0x941   :  { %8267 = vst [vmem:[#allocation11 + $0x1a0] sm:$0xff] %v8139_v32  ;;  %v6889_v16 = vadd.f32 %v6888_v26, %v12276_v7  ;;  %v5917_v56 = vpop.f32.mrf.mxu0  ;;  %v6722_v1 = vpop.f32.mrf.mxu1 }
 0x942   :  { %v5918_v6 = vadd.f32 %v5917_v56, %v5749_v60  ;;  %v12595_v54 = vpack.c.bf16 %v6390_v37, %v6389_v46  ;;  %v6723_v43 = vadd.f32 %v6722_v1, %v12265_v20  ;;  %v14016_v60 = vld [vmem:[#allocation187_spill] sm:$0xff]  ;;  %v14017_v46 = vld [vmem:[#allocation56_spill] sm:$0xff] }
 0x943   :  { %v7684_v41 = vadd.f32 %v7428_v47, %v6889_v16  ;;  %v5215_v37 = vadd.f32 %v14017_v46, %v14016_v60 }
 0x944   :  { %v6259_v22 = vadd.f32 %v5918_v6, %v5213_v11  ;;  %6761 = vmatmul.bf16.gmra.mxu1 %v12595_v54  ;;  %7158 = vmatmul.bf16.vlgmr.msra.gmra.mxu0 %v12084_v18  ;;  %v7687_v30 = vadd.f32 %v7431_v40, %v6723_v43 }
 0x945   :  { %v7940_v9 = vmax.f32 %v7684_v41, 0.0  ;;  %6930 = vmatmul.bf16.gmra.mxu2 %v12595_v54  ;;  %7099 = vmatmul.bf16.gmra.mxu3 %v12595_v54  ;;  %v5754_v41 = vadd.f32 %v12077_v53, %v12075_v63 }
 0x946   :  { %v6327_v56 = vadd.f32 %v12539_v29, %v6259_v22  ;;  %v7943_v4 = vmax.f32 %v7687_v30, 0.0 }
 0x947   :  { %v8141_v62 = vpack.c.bf16 %v7940_v9, %v7939_v0 }
 0x948   :  { %v6891_v42 = vpop.f32.mrf.mxu2  ;;  %v6391_v0 = vmax.f32 %v6327_v56, 0.0 }
 0x949   :  { %8269 = vst [vmem:[#allocation11 + $0x1b0] sm:$0xff] %v8141_v62  ;;  %v6892_v18 = vadd.f32 %v6891_v42, %v12276_v7  ;;  %v5919_v32 = vpop.f32.mrf.mxu0  ;;  %v6724_v47 = vpop.f32.mrf.mxu1  ;;  %v14019_v42 = vld [vmem:[#allocation109_spill] sm:$0xff] }
 0x94a   :  { %v5920_v26 = vadd.f32 %v5919_v32, %v5751_v39  ;;  %v6725_v36 = vadd.f32 %v6724_v47, %v12265_v20  ;;  %v14018_v39 = vld [vmem:[#allocation188_spill] sm:$0xff] }
 0x94b   :  { %v7688_v16 = vadd.f32 %v7432_v21, %v6892_v18  ;;  %v5218_v30 = vadd.f32 %v14019_v42, %v14018_v39  ;;  %v12617_v18 = vpop.f32.mrf.mxu3  ;;  %v163_v47 = vld [vmem:[#allocation2 + $0x1e0] sm:$0xff] }
 0x94c   :  { %v6260_v1 = vadd.f32 %v5920_v26, %v5215_v37  ;;  %v7691_v40 = vadd.f32 %v7435_v15, %v6725_v36  ;;  %v7439_v55 = vunpack.c.l.bf16 %v163_v47  ;;  %v7440_v56 = vunpack.c.h.bf16 %v163_v47 }
 0x94d   :  { %v7944_v57 = vmax.f32 %v7688_v16, 0.0 }
 0x94e   :  { %v6328_v11 = vadd.f32 %v12539_v29, %v6260_v1  ;;  %v7947_v53 = vmax.f32 %v7691_v40, 0.0  ;;  %v5756_v1 = vadd.f32 %v12094_v17, %v12092_v3 }
 0x94f   :  { %v8143_v6 = vpack.c.bf16 %v7944_v57, %v7943_v4 }
 0x950   :  { %v6392_v9 = vmax.f32 %v6328_v11, 0.0  ;;  %v6893_v43 = vpop.f32.mrf.mxu2  ;;  %v14020_v11 = vld [vmem:[#allocation39_spill] sm:$0xff] }
 0x951   :  { %8271 = vst [vmem:[#allocation11 + $0x1c0] sm:$0xff] %v8143_v6  ;;  %v6894_v22 = vadd.f32 %v6893_v43, %v12276_v7  ;;  %v5922_v62 = vpop.f32.mrf.mxu0  ;;  %v6727_v21 = vpop.f32.mrf.mxu1  ;;  %v14021_v6 = vld [vmem:[#allocation185_spill] sm:$0xff] }
 0x952   :  { %v5923_v32 = vadd.f32 %v5922_v62, %v5754_v41  ;;  %v12619_v60 = vpack.c.bf16 %v6392_v9, %v6391_v0  ;;  %v6728_v26 = vadd.f32 %v6727_v21, %v12265_v20  ;;  %v165_v0 = vld [vmem:[#allocation2 + $0x1f0] sm:$0xff] }
 0x953   :  { %v7692_v46 = vadd.f32 %v7436_v13, %v6894_v22  ;;  %v5220_v13 = vadd.f32 %v14021_v6, %v14020_v11  ;;  %v12631_v43 = vpop.f32.mrf.mxu3  ;;  %v7443_v21 = vunpack.c.l.bf16 %v165_v0 }
 0x954   :  { %v6261_v63 = vadd.f32 %v5923_v32, %v5218_v30  ;;  %6766 = vmatmul.bf16.gmra.mxu1 %v12619_v60  ;;  %7163 = vmatmul.bf16.gmra.mxu0 %v12108_v38  ;;  %v7695_v57 = vadd.f32 %v7439_v55, %v6728_v26  ;;  %v7444_v30 = vunpack.c.h.bf16 %v165_v0  ;;  %v5759_v32 = vadd.f32 %v12106_v24, %v12104_v8 }
 0x955   :  { %v7948_v37 = vmax.f32 %v7692_v46, 0.0  ;;  %6935 = vmatmul.bf16.gmra.mxu2 %v12619_v60  ;;  %7104 = vmatmul.bf16.gmra.mxu3 %v12619_v60 }
 0x956   :  { %v6329_v40 = vadd.f32 %v12539_v29, %v6261_v63  ;;  %v7951_v62 = vmax.f32 %v7695_v57, 0.0  ;;  %v167_v57 = vld [vmem:[#allocation2 + $0x200] sm:$0xff] }
 0x957   :  { %v8145_v16 = vpack.c.bf16 %v7948_v37, %v7947_v53  ;;  %v7447_v6 = vunpack.c.l.bf16 %v167_v57  ;;  %v7448_v0 = vunpack.c.h.bf16 %v167_v57 }
 0x958   :  { %v6896_v4 = vpop.f32.mrf.mxu2  ;;  %v6393_v47 = vmax.f32 %v6329_v40, 0.0 }
 0x959   :  { %8273 = vst [vmem:[#allocation11 + $0x1d0] sm:$0xff] %v8145_v16  ;;  %v6897_v36 = vadd.f32 %v6896_v4, %v12276_v7  ;;  %v5924_v38 = vpop.f32.mrf.mxu0  ;;  %v6729_v15 = vpop.f32.mrf.mxu1  ;;  %v14022_v16 = vld [vmem:[#allocation191_spill] sm:$0xff] }
 0x95a   :  { %v5925_v41 = vadd.f32 %v5924_v38, %v5756_v1  ;;  %v6730_v17 = vadd.f32 %v6729_v15, %v12265_v20 }
 0x95b   :  { %v7696_v9 = vadd.f32 %v7440_v56, %v6897_v36  ;;  %v14023_v56 = vld [vmem:[#allocation36_spill] sm:$0xff] }
 0x95c   :  { %v6262_v22 = vadd.f32 %v5925_v41, %v5220_v13  ;;  %v7699_v37 = vadd.f32 %v7443_v21, %v6730_v17  ;;  %v5223_v1 = vadd.f32 %v14023_v56, %v14022_v16  ;;  %v12648_v13 = vpop.f32.mrf.mxu3  ;;  %v14024_v17 = vld [vmem:[#allocation192_spill] sm:$0xff]  ;;  %v14025_v21 = vld [vmem:[#allocation189_spill] sm:$0xff]  ;;  %v5764_v16 = vadd.f32 %v12136_v14, %v12134_v33 }
 0x95d   :  { %v7952_v3 = vmax.f32 %v7696_v9, 0.0  ;;  %v5761_v9 = vadd.f32 %v12120_v19, %v12118_v45 }
 0x95e   :  { %v6330_v39 = vadd.f32 %v12539_v29, %v6262_v22  ;;  %v7955_v8 = vmax.f32 %v7699_v37, 0.0 }
 0x95f   :  { %v8147_v42 = vpack.c.bf16 %v7952_v3, %v7951_v62 }
 0x960   :  { %v6394_v46 = vmax.f32 %v6330_v39, 0.0  ;;  %v6898_v53 = vpop.f32.mrf.mxu2  ;;  %v5225_v39 = vadd.f32 %v14025_v21, %v14024_v17 }
 0x961   :  { %8275 = vst [vmem:[#allocation11 + $0x1e0] sm:$0xff] %v8147_v42  ;;  %v6899_v63 = vadd.f32 %v6898_v53, %v12276_v7  ;;  %v5927_v26 = vpop.f32.mrf.mxu0  ;;  %v6732_v55 = vpop.f32.mrf.mxu1 }
 0x962   :  { %v5928_v4 = vadd.f32 %v5927_v26, %v5759_v32  ;;  %v12641_v36 = vpack.c.bf16 %v6394_v46, %v6393_v47  ;;  %v6733_v11 = vadd.f32 %v6732_v55, %v12265_v20 }
 0x963   :  { %v7700_v38 = vadd.f32 %v7444_v30, %v6899_v63  ;;  %v169_v30 = vld [vmem:[#allocation2 + $0x210] sm:$0xff] }
 0x964   :  { %v6263_v15 = vadd.f32 %v5928_v4, %v5223_v1  ;;  %6771 = vmatmul.bf16.gmra.mxu1 %v12641_v36  ;;  %7168 = vmatmul.bf16.gmra.mxu0 %v12128_v27  ;;  %v7703_v22 = vadd.f32 %v7447_v6, %v6733_v11  ;;  %v7451_v19 = vunpack.c.l.bf16 %v169_v30  ;;  %v7452_v55 = vunpack.c.h.bf16 %v169_v30  ;;  %v12660_v56 = vpop.f32.mrf.mxu3  ;;  %v14026_v11 = vld [vmem:[#allocation194_spill] sm:$0xff] }
 0x965   :  { %v7956_v24 = vmax.f32 %v7700_v38, 0.0  ;;  %6940 = vmatmul.bf16.gmra.mxu2 %v12641_v36  ;;  %7109 = vmatmul.bf16.gmra.mxu3 %v12641_v36  ;;  %v14027_v6 = vld [vmem:[#allocation190_spill] sm:$0xff] }
 0x966   :  { %v6331_v47 = vadd.f32 %v12539_v29, %v6263_v15  ;;  %v7959_v53 = vmax.f32 %v7703_v22, 0.0 }
 0x967   :  { %v8149_v41 = vpack.c.bf16 %v7956_v24, %v7955_v8 }
 0x968   :  { %v6901_v40 = vpop.f32.mrf.mxu2  ;;  %v6395_v1 = vmax.f32 %v6331_v47, 0.0 }
 0x969   :  { %8277 = vst [vmem:[#allocation11 + $0x1f0] sm:$0xff] %v8149_v41  ;;  %v6902_v27 = vadd.f32 %v6901_v40, %v12276_v7  ;;  %v5929_v62 = vpop.f32.mrf.mxu0  ;;  %v6734_v3 = vpop.f32.mrf.mxu1  ;;  %v5228_v41 = vadd.f32 %v14027_v6, %v14026_v11 }
 0x96a   :  { %v5930_v42 = vadd.f32 %v5929_v62, %v5761_v9  ;;  %v6735_v45 = vadd.f32 %v6734_v3, %v12265_v20  ;;  %v171_v9 = vld [vmem:[#allocation2 + $0x220] sm:$0xff] }
 0x96b   :  { %v7704_v32 = vadd.f32 %v7448_v0, %v6902_v27  ;;  %v7455_v3 = vunpack.c.l.bf16 %v171_v9  ;;  %v7456_v21 = vunpack.c.h.bf16 %v171_v9 }
 0x96c   :  { %v6264_v46 = vadd.f32 %v5930_v42, %v5225_v39  ;;  %v7707_v38 = vadd.f32 %v7451_v19, %v6735_v45  ;;  %v14028_v39 = vld [vmem:[#allocation112_spill] sm:$0xff]  ;;  %v14029_v42 = vld [vmem:[#allocation113_spill] sm:$0xff]  ;;  %v14031_v45 = vld [vmem:[#allocation42_spill] sm:$0xff] }
 0x96d   :  { %v7960_v37 = vmax.f32 %v7704_v32, 0.0  ;;  %v5766_v30 = vadd.f32 %v14029_v42, %v14028_v39  ;;  %v14035_v39 = vld [vmem:[#allocation193_spill] sm:$0xff] }
 0x96e   :  { %v6332_v63 = vadd.f32 %v12539_v29, %v6264_v46  ;;  %v7963_v14 = vmax.f32 %v7707_v38, 0.0 }
 0x96f   :  { %v8151_v26 = vpack.c.bf16 %v7960_v37, %v7959_v53  ;;  %v14030_v37 = vld [vmem:[#allocation45_spill] sm:$0xff] }
 0x970   :  { %v6396_v4 = vmax.f32 %v6332_v63, 0.0  ;;  %v6903_v57 = vpop.f32.mrf.mxu2  ;;  %v5230_v19 = vadd.f32 %v14031_v45, %v14030_v37  ;;  %v12677_v63 = vpop.f32.mrf.mxu3  ;;  %v14036_v37 = vld [vmem:[#allocation59_spill] sm:$0xff] }
 0x971   :  { %8279 = vst [vmem:[#allocation11 + $0x200] sm:$0xff] %v8151_v26  ;;  %v6904_v15 = vadd.f32 %v6903_v57, %v12276_v7  ;;  %v5932_v8 = vpop.f32.mrf.mxu0  ;;  %v6737_v24 = vpop.f32.mrf.mxu1 }
 0x972   :  { %v5933_v0 = vadd.f32 %v5932_v8, %v5764_v16  ;;  %v12665_v40 = vpack.c.bf16 %v6396_v4, %v6395_v1  ;;  %v6738_v62 = vadd.f32 %v6737_v24, %v12265_v20 }
 0x973   :  { %v7708_v22 = vadd.f32 %v7452_v55, %v6904_v15  ;;  %v173_v55 = vld [vmem:[#allocation2 + $0x230] sm:$0xff] }
 0x974   :  { %v6265_v33 = vadd.f32 %v5933_v0, %v5228_v41  ;;  %6776 = vmatmul.bf16.gmra.mxu1 %v12665_v40  ;;  %7173 = vmatmul.bf16.gmra.mxu0 %v12152_v50  ;;  %v7711_v47 = vadd.f32 %v7455_v3, %v6738_v62  ;;  %v7459_v8 = vunpack.c.l.bf16 %v173_v55  ;;  %v7460_v6 = vunpack.c.h.bf16 %v173_v55  ;;  %v14032_v41 = vld [vmem:[#allocation60_spill] sm:$0xff]  ;;  %v14033_v0 = vld [vmem:[#allocation62_spill] sm:$0xff] }
 0x975   :  { %v7964_v27 = vmax.f32 %v7708_v22, 0.0  ;;  %6945 = vmatmul.bf16.gmra.mxu2 %v12665_v40  ;;  %7114 = vmatmul.bf16.gmra.mxu3 %v12665_v40  ;;  %v5769_v9 = vadd.f32 %v14033_v0, %v14032_v41  ;;  %v14039_v41 = vld [vmem:[#allocation197_spill] sm:$0xff]  ;;  %v14040_v0 = vld [vmem:[#allocation195_spill] sm:$0xff] }
 0x976   :  { %v6333_v1 = vadd.f32 %v12539_v29, %v6265_v33  ;;  %v7967_v57 = vmax.f32 %v7711_v47, 0.0 }
 0x977   :  { %v8153_v17 = vpack.c.bf16 %v7964_v27, %v7963_v14 }
 0x978   :  { %v6906_v32 = vpop.f32.mrf.mxu2  ;;  %v6397_v22 = vmax.f32 %v6333_v1, 0.0 }
 0x979   :  { %8281 = vst [vmem:[#allocation11 + $0x210] sm:$0xff] %v8153_v17  ;;  %v6907_v46 = vadd.f32 %v6906_v32, %v12276_v7  ;;  %v5934_v50 = vpop.f32.mrf.mxu0  ;;  %v6739_v53 = vpop.f32.mrf.mxu1  ;;  %v175_v32 = vld [vmem:[#allocation2 + $0x240] sm:$0xff] }
 0x97a   :  { %v5935_v26 = vadd.f32 %v5934_v50, %v5766_v30  ;;  %v6740_v15 = vadd.f32 %v6739_v53, %v12265_v20  ;;  %v12689_v50 = vpop.f32.mrf.mxu3  ;;  %v7463_v55 = vunpack.c.l.bf16 %v175_v32  ;;  %v7464_v1 = vunpack.c.h.bf16 %v175_v32 }
 0x97b   :  { %v7712_v16 = vadd.f32 %v7456_v21, %v6907_v46  ;;  %v14034_v21 = vld [vmem:[#allocation196_spill] sm:$0xff] }
 0x97c   :  { %v6266_v4 = vadd.f32 %v5935_v26, %v5230_v19  ;;  %v7715_v62 = vadd.f32 %v7459_v8, %v6740_v15  ;;  %v5233_v42 = vadd.f32 %v14035_v39, %v14034_v21 }
 0x97d   :  { %v7968_v38 = vmax.f32 %v7712_v16, 0.0 }
 0x97e   :  { %v6334_v24 = vadd.f32 %v12539_v29, %v6266_v4  ;;  %v7971_v45 = vmax.f32 %v7715_v62, 0.0  ;;  %v14037_v4 = vld [vmem:[#allocation111_spill] sm:$0xff] }
 0x97f   :  { %v8155_v11 = vpack.c.bf16 %v7968_v38, %v7967_v57  ;;  %v14038_v57 = vld [vmem:[#allocation63_spill] sm:$0xff] }
 0x980   :  { %v6398_v14 = vmax.f32 %v6334_v24, 0.0  ;;  %v6908_v27 = vpop.f32.mrf.mxu2  ;;  %v5771_v38 = vadd.f32 %v14038_v57, %v14037_v4 }
 0x981   :  { %8283 = vst [vmem:[#allocation11 + $0x220] sm:$0xff] %v8155_v11  ;;  %v6909_v33 = vadd.f32 %v6908_v27, %v12276_v7  ;;  %v5937_v3 = vpop.f32.mrf.mxu0  ;;  %v6742_v17 = vpop.f32.mrf.mxu1 }
 0x982   :  { %v5938_v30 = vadd.f32 %v5937_v3, %v5769_v9  ;;  %v12687_v47 = vpack.c.bf16 %v6398_v14, %v6397_v22  ;;  %v6743_v26 = vadd.f32 %v6742_v17, %v12265_v20  ;;  %v5235_v9 = vadd.f32 %v14040_v0, %v14039_v41  ;;  %v177_v14 = vld [vmem:[#allocation2 + $0x250] sm:$0xff] }
 0x983   :  { %v7716_v46 = vadd.f32 %v7460_v6, %v6909_v33  ;;  %v7467_v39 = vunpack.c.l.bf16 %v177_v14 }
 0x984   :  { %v6267_v53 = vadd.f32 %v5938_v30, %v5233_v42  ;;  %6781 = vmatmul.bf16.gmra.mxu1 %v12687_v47  ;;  %7178 = vmatmul.bf16.gmra.mxu0 %v14036_v37  ;;  %v7719_v8 = vadd.f32 %v7463_v55, %v6743_v26  ;;  %v12703_v42 = vpop.f32.mrf.mxu3  ;;  %v14041_v37 = vld [vmem:[#allocation37_spill] sm:$0xff] }
 0x985   :  { %v7972_v19 = vmax.f32 %v7716_v46, 0.0  ;;  %6950 = vmatmul.bf16.gmra.mxu2 %v12687_v47  ;;  %7119 = vmatmul.bf16.gmra.mxu3 %v12687_v47  ;;  %v7468_v46 = vunpack.c.h.bf16 %v177_v14 }
 0x986   :  { %v6335_v62 = vadd.f32 %v12539_v29, %v6267_v53  ;;  %v7975_v3 = vmax.f32 %v7719_v8, 0.0 }
 0x987   :  { %v8157_v16 = vpack.c.bf16 %v7972_v19, %v7971_v45  ;;  %v14042_v45 = vld [vmem:[#allocation69_spill] sm:$0xff] }
 0x988   :  { %v6911_v15 = vpop.f32.mrf.mxu2  ;;  %v5774_v19 = vadd.f32 %v14042_v45, %v14041_v37  ;;  %v6399_v26 = vmax.f32 %v6335_v62, 0.0 }
 0x989   :  { %8285 = vst [vmem:[#allocation11 + $0x230] sm:$0xff] %v8157_v16  ;;  %v6912_v24 = vadd.f32 %v6911_v15, %v12276_v7  ;;  %v5939_v11 = vpop.f32.mrf.mxu0  ;;  %v6744_v6 = vpop.f32.mrf.mxu1  ;;  %v14044_v15 = vld [vmem:[#allocation48_spill] sm:$0xff] }
 0x98a   :  { %v5940_v22 = vadd.f32 %v5939_v11, %v5771_v38  ;;  %v6745_v21 = vadd.f32 %v6744_v6, %v12265_v20  ;;  %v14043_v38 = vld [vmem:[#allocation199_spill] sm:$0xff] }
 0x98b   :  { %v7720_v27 = vadd.f32 %v7464_v1, %v6912_v24  ;;  %v5238_v8 = vadd.f32 %v14044_v15, %v14043_v38  ;;  %v179_v11 = vld [vmem:[#allocation2 + $0x260] sm:$0xff] }
 0x98c   :  { %v6268_v33 = vadd.f32 %v5940_v22, %v5235_v9  ;;  %v7723_v53 = vadd.f32 %v7467_v39, %v6745_v21  ;;  %v14046_v9 = vld [vmem:[#allocation150_spill] sm:$0xff]  ;;  %v7471_v62 = vunpack.c.l.bf16 %v179_v11 }
 0x98d   :  { %v7976_v17 = vmax.f32 %v7720_v27, 0.0  ;;  %v14048_v21 = vld [vmem:[#allocation66_spill] sm:$0xff] }
 0x98e   :  { %v6336_v30 = vadd.f32 %v12539_v29, %v6268_v33  ;;  %v7979_v22 = vmax.f32 %v7723_v53, 0.0 }
 0x98f   :  { %v8159_v32 = vpack.c.bf16 %v7976_v17, %v7975_v3  ;;  %v7472_v3 = vunpack.c.h.bf16 %v179_v11  ;;  %v14047_v17 = vld [vmem:[#allocation70_spill] sm:$0xff] }
 0x990   :  { %v6400_v55 = vmax.f32 %v6336_v30, 0.0  ;;  %v6913_v16 = vpop.f32.mrf.mxu2  ;;  %v5776_v39 = vadd.f32 %v14048_v21, %v14047_v17  ;;  %v12720_v30 = vpop.f32.mrf.mxu3 }
 0x991   :  { %8287 = vst [vmem:[#allocation11 + $0x240] sm:$0xff] %v8159_v32  ;;  %v6914_v1 = vadd.f32 %v6913_v16, %v12276_v7  ;;  %v5942_v4 = vpop.f32.mrf.mxu0  ;;  %v6747_v57 = vpop.f32.mrf.mxu1 }
 0x992   :  { %v5943_v24 = vadd.f32 %v5942_v4, %v5774_v19  ;;  %v12711_v6 = vpack.c.bf16 %v6400_v55, %v6399_v26  ;;  %v6748_v27 = vadd.f32 %v6747_v57, %v12265_v20  ;;  %v14049_v26 = vld [vmem:[#allocation200_spill] sm:$0xff]  ;;  %v14050_v55 = vld [vmem:[#allocation198_spill] sm:$0xff] }
 0x993   :  { %v7724_v41 = vadd.f32 %v7468_v46, %v6914_v1  ;;  %v5240_v16 = vadd.f32 %v14050_v55, %v14049_v26  ;;  %v181_v1 = vld [vmem:[#allocation2 + $0x270] sm:$0xff]  ;;  %v183_v55 = vld [vmem:[#allocation2 + $0x280] sm:$0xff] }
 0x994   :  { %14045 = vst [vmem:[#allocation87_spill] sm:$0xff] %v12711_v6  ;;  %v6269_v0 = vadd.f32 %v5943_v24, %v5238_v8  ;;  %6786 = vmatmul.bf16.gmra.mxu1 %v12711_v6  ;;  %7183 = vmatmul.bf16.gmra.mxu0 %v14046_v9  ;;  %v7727_v46 = vadd.f32 %v7471_v62, %v6748_v27  ;;  %v7475_v11 = vunpack.c.l.bf16 %v181_v1  ;;  %v14052_v27 = vld [vmem:[#allocation76_spill] sm:$0xff] }
 0x995   :  { %v7980_v14 = vmax.f32 %v7724_v41, 0.0  ;;  %6955 = vmatmul.bf16.gmra.mxu2 %v12711_v6  ;;  %7124 = vmatmul.bf16.gmra.mxu3 %v12711_v6  ;;  %v191_v6 = vld [vmem:[#allocation2 + $0x2c0] sm:$0xff] }
 0x996   :  { %v6337_v57 = vadd.f32 %v12539_v29, %v6269_v0  ;;  %v7983_v15 = vmax.f32 %v7727_v46, 0.0  ;;  %v14053_v46 = vld [vmem:[#allocation201_spill] sm:$0xff] }
 0x997   :  { %v8161_v33 = vpack.c.bf16 %v7980_v14, %v7979_v22  ;;  %v7476_v22 = vunpack.c.h.bf16 %v181_v1  ;;  %v14051_v14 = vld [vmem:[#allocation43_spill] sm:$0xff] }
 0x998   :  { %v6916_v32 = vpop.f32.mrf.mxu2  ;;  %v5779_v62 = vadd.f32 %v14052_v27, %v14051_v14 }
 0x999   :  { %8289 = vst [vmem:[#allocation11 + $0x250] sm:$0xff] %v8161_v33  ;;  %v6917_v37 = vadd.f32 %v6916_v32, %v12276_v7  ;;  %v5944_v45 = vpop.f32.mrf.mxu0  ;;  %v6749_v19 = vpop.f32.mrf.mxu1  ;;  %v6401_v33 = vmax.f32 %v6337_v57, 0.0 }
 0x99a   :  { %v5945_v53 = vadd.f32 %v5944_v45, %v5776_v39  ;;  %v6750_v24 = vadd.f32 %v6749_v19, %v12265_v20  ;;  %v12733_v19 = vpop.f32.mrf.mxu3 }
 0x99b   :  { %v7728_v4 = vadd.f32 %v7472_v3, %v6917_v37  ;;  %v14054_v37 = vld [vmem:[#allocation51_spill] sm:$0xff] }
 0x99c   :  { %v6270_v38 = vadd.f32 %v5945_v53, %v5240_v16  ;;  %v7731_v3 = vadd.f32 %v7475_v11, %v6750_v24  ;;  %v5243_v45 = vadd.f32 %v14054_v37, %v14053_v46  ;;  %v7480_v11 = vunpack.c.h.bf16 %v183_v55 }
 0x99d   :  { %v7984_v8 = vmax.f32 %v7728_v4, 0.0  ;;  %v14056_v4 = vld [vmem:[#allocation74_spill] sm:$0xff] }
 0x99e   :  { %v6338_v41 = vadd.f32 %v12539_v29, %v6270_v38  ;;  %v7987_v57 = vmax.f32 %v7731_v3, 0.0  ;;  %v14060_v3 = vld [vmem:[#allocation202_spill] sm:$0xff] }
 0x99f   :  { %v8163_v9 = vpack.c.bf16 %v7984_v8, %v7983_v15  ;;  %v7479_v8 = vunpack.c.l.bf16 %v183_v55 }
 0x9a0   :  { %v6402_v17 = vmax.f32 %v6338_v41, 0.0  ;;  %v6918_v21 = vpop.f32.mrf.mxu2  ;;  %v14057_v41 = vld [vmem:[#allocation65_spill] sm:$0xff] }
 0x9a1   :  { %8291 = vst [vmem:[#allocation11 + $0x260] sm:$0xff] %v8163_v9  ;;  %v6919_v0 = vadd.f32 %v6918_v21, %v12276_v7  ;;  %v5947_v39 = vpop.f32.mrf.mxu0  ;;  %v6752_v32 = vpop.f32.mrf.mxu1  ;;  %v14058_v9 = vld [vmem:[#allocation78_spill] sm:$0xff] }
 0x9a2   :  { %v5948_v26 = vadd.f32 %v5947_v39, %v5779_v62  ;;  %v12735_v16 = vpack.c.bf16 %v6402_v17, %v6401_v33  ;;  %v6753_v15 = vadd.f32 %v6752_v32, %v12265_v20  ;;  %v5781_v14 = vadd.f32 %v14058_v9, %v14057_v41  ;;  %v14059_v21 = vld [vmem:[#allocation54_spill] sm:$0xff]  ;;  %v12747_v37 = vpop.f32.mrf.mxu3  ;;  %v14062_v41 = vld [vmem:[#allocation31_spill] sm:$0xff] }
 0x9a3   :  { %v7732_v53 = vadd.f32 %v7476_v22, %v6919_v0  ;;  %v5245_v0 = vadd.f32 %v14060_v3, %v14059_v21  ;;  %v185_v32 = vld [vmem:[#allocation2 + $0x290] sm:$0xff]  ;;  %v14064_v3 = vld [vmem:[#allocation203_spill] sm:$0xff] }
 0x9a4   :  { %14055 = vst [vmem:[#allocation146_spill] sm:$0xff] %v12735_v16  ;;  %v6271_v1 = vadd.f32 %v5948_v26, %v5243_v45  ;;  %6791 = vmatmul.bf16.gmra.mxu1 %v12735_v16  ;;  %7188 = vmatmul.bf16.gmra.mxu0 %v14056_v4  ;;  %v7735_v27 = vadd.f32 %v7479_v8, %v6753_v15  ;;  %v7484_v8 = vunpack.c.h.bf16 %v185_v32  ;;  %v14063_v21 = vld [vmem:[#allocation205_spill] sm:$0xff] }
 0x9a5   :  { %v7988_v38 = vmax.f32 %v7732_v53, 0.0  ;;  %6960 = vmatmul.bf16.gmra.mxu2 %v12735_v16  ;;  %7129 = vmatmul.bf16.gmra.mxu3 %v12735_v16 }
 0x9a6   :  { %v6339_v45 = vadd.f32 %v12539_v29, %v6271_v1  ;;  %v7991_v55 = vmax.f32 %v7735_v27, 0.0 }
 0x9a7   :  { %v8165_v24 = vpack.c.bf16 %v7988_v38, %v7987_v57  ;;  %v7483_v57 = vunpack.c.l.bf16 %v185_v32 }
 0x9a8   :  { %v6921_v22 = vpop.f32.mrf.mxu2 }
 0x9a9   :  { %8293 = vst [vmem:[#allocation11 + $0x270] sm:$0xff] %v8165_v24  ;;  %v6922_v62 = vadd.f32 %v6921_v22, %v12276_v7  ;;  %v5949_v33 = vpop.f32.mrf.mxu0  ;;  %v6754_v17 = vpop.f32.mrf.mxu1  ;;  %v14061_v24 = vld [vmem:[#allocation154_spill] sm:$0xff] }
 0x9aa   :  { %v5950_v39 = vadd.f32 %v5949_v33, %v5781_v14  ;;  %v6755_v4 = vadd.f32 %v6754_v17, %v12265_v20  ;;  %v5784_v9 = vadd.f32 %v14062_v41, %v14061_v24  ;;  %v6403_v14 = vmax.f32 %v6339_v45, 0.0  ;;  %v14066_v45 = vld [vmem:[#allocation46_spill] sm:$0xff]  ;;  %v14067_v41 = vld [vmem:[#allocation40_spill] sm:$0xff] }
 0x9ab   :  { %v7736_v46 = vadd.f32 %v7480_v11, %v6922_v62  ;;  %v5248_v17 = vadd.f32 %v14064_v3, %v14063_v21  ;;  %v9725_v3 = vld [vmem:[%s13058_s6] sm:$0xf]  ;;  %s9887_s6 = smov [#allocation11]  }
 0x9ac   :  { %v6272_v26 = vadd.f32 %v5950_v39, %v5245_v0  ;;  %v7739_v62 = vadd.f32 %v7483_v57, %v6755_v4  ;;  %v187_v39 = vld [vmem:[#allocation2 + $0x2a0] sm:$0xff]  ;;  %s8347_s13 = sshll.u32 %s9887_s6, 4  ;;  %s8348_s13 = int_to_ptr.vmem [resolvable:$true] %s8347_s13 }
 0x9ad   :  { %v7992_v53 = vmax.f32 %v7736_v46, 0.0  ;;  %v7487_v57 = vunpack.c.l.bf16 %v187_v39  ;;  %v7488_v24 = vunpack.c.h.bf16 %v187_v39  ;;  %v189_v39 = vld [vmem:[#allocation2 + $0x2b0] sm:$0xff] }
 0x9ae   :  { %v6340_v38 = vadd.f32 %v12539_v29, %v6272_v26 }
 0x9af   :  { %v8167_v15 = vpack.c.bf16 %v7992_v53, %v7991_v55  ;;  %v7995_v55 = vmax.f32 %v7739_v62, 0.0 }
 0x9b0   :  { %v6404_v22 = vmax.f32 %v6340_v38, 0.0  ;;  %v6923_v11 = vpop.f32.mrf.mxu2  ;;  %v12764_v38 = vpop.f32.mrf.mxu3 }
 0x9b1   :  { %8295 = vst [vmem:[#allocation11 + $0x280] sm:$0xff] %v8167_v15  ;;  %v6924_v1 = vadd.f32 %v6923_v11, %v12276_v7  ;;  %v5952_v33 = vpop.f32.mrf.mxu0  ;;  %v6757_v27 = vpop.f32.mrf.mxu1 }
 0x9b2   :  { %v5953_v0 = vadd.f32 %v5952_v33, %v5784_v9  ;;  %v12757_v46 = vpack.c.bf16 %v6404_v22, %v6403_v14  ;;  %v6758_v4 = vadd.f32 %v6757_v27, %v12265_v20  ;;  %v14069_v33 = vld [vmem:[#allocation206_spill] sm:$0xff]  ;;  %v14070_v27 = vld [vmem:[#allocation57_spill] sm:$0xff] }
 0x9b3   :  { %v7740_v32 = vadd.f32 %v7484_v8, %v6924_v1  ;;  %v14068_v8 = vld [vmem:[#allocation49_spill] sm:$0xff]  ;;  %v5250_v21 = vadd.f32 %v14070_v27, %v14069_v33 }
 0x9b4   :  { %14065 = vst [vmem:[#allocation123_spill] sm:$0xff] %v12757_v46  ;;  %v6273_v26 = vadd.f32 %v5953_v0, %v5248_v17  ;;  %6796 = vmatmul.bf16.gmra.mxu1 %v12757_v46  ;;  %7193 = vmatmul.bf16.gmra.mxu0 %v14066_v45  ;;  %v5786_v9 = vadd.f32 %v14068_v8, %v14067_v41  ;;  %v12774_v17 = vperm.slane %v9725_v3, 2  ;;  %v7491_v41 = vunpack.c.l.bf16 %v189_v39  ;;  %v14071_v8 = vld [vmem:[#allocation77_spill] sm:$0xff] }
 0x9b5   :  { %v7996_v53 = vmax.f32 %v7740_v32, 0.0  ;;  %6965 = vmatmul.bf16.gmra.mxu2 %v12757_v46  ;;  %7134 = vmatmul.bf16.gmra.mxu3 %v12757_v46  ;;  %v7743_v22 = vadd.f32 %v7487_v57, %v6758_v4  ;;  %v104_v32 = vld [vmem:[#allocation2 + $0x8] sm:$0xff]  ;;  %v12781_v46 = vperm.slane %v9725_v3, 3 }
 0x9b6   :  { %v7321_v33 = vunpack.c.l.bf16 %v104_v32 }
 0x9b7   :  { %v8169_v15 = vpack.c.bf16 %v7996_v53, %v7995_v55  ;;  %v6341_v55 = vadd.f32 %v12539_v29, %v6273_v26  ;;  %v7999_v4 = vmax.f32 %v7743_v22, 0.0  ;;  %v7322_v22 = vunpack.c.h.bf16 %v104_v32 }
 0x9b8   :  { %v6926_v14 = vpop.f32.mrf.mxu2  ;;  %v12783_v16 = vpop.f32.mrf.mxu3 }
 0x9b9   :  { %8297 = vst [vmem:[#allocation11 + $0x290] sm:$0xff] %v8169_v15  ;;  %v6927_v11 = vadd.f32 %v6926_v14, %v12276_v7  ;;  %v5954_v62 = vpop.f32.mrf.mxu0  ;;  %v6759_v1 = vpop.f32.mrf.mxu1  ;;  %v6991_v14 = vadd.f32 %v14071_v8, %v12774_v17 }
 0x9ba   :  { %v5955_v0 = vadd.f32 %v5954_v62, %v5786_v9  ;;  %v6760_v15 = vadd.f32 %v6759_v1, %v12265_v20  ;;  %v7492_v62 = vunpack.c.h.bf16 %v189_v39  ;;  %14072 = vst [vmem:[#allocation122_spill] sm:$0xff] %v12783_v16 }
 0x9bb   :  { %v7744_v45 = vadd.f32 %v7488_v24, %v6927_v11  ;;  %v6405_v24 = vmax.f32 %v6341_v55, 0.0  ;;  %v7577_v8 = vadd.f32 %v7321_v33, %v6991_v14  ;;  %v14074_v55 = vld [vmem:[#allocation156_spill] sm:$0xff] }
 0x9bc   :  { %v6274_v53 = vadd.f32 %v5955_v0, %v5250_v21  ;;  %v7747_v21 = vadd.f32 %v7491_v41, %v6760_v15  ;;  %v7495_v41 = vunpack.c.l.bf16 %v191_v6  ;;  %v14075_v33 = vld [vmem:[#allocation68_spill] sm:$0xff] }
 0x9bd   :  { %v8000_v57 = vmax.f32 %v7744_v45, 0.0  ;;  %v7833_v14 = vmax.f32 %v7577_v8, 0.0 }
 0x9be   :  { %v6342_v27 = vadd.f32 %v12539_v29, %v6274_v53  ;;  %v106_v53 = vld [vmem:[#allocation2 + $0x18] sm:$0xff]  ;;  %v8003_v32 = vmax.f32 %v7747_v21, 0.0 }
 0x9bf   :  { %v8171_v9 = vpack.c.bf16 %v8000_v57, %v7999_v4 }
 0x9c0   :  { %v6406_v26 = vmax.f32 %v6342_v27, 0.0  ;;  %v6928_v11 = vpop.f32.mrf.mxu2  ;;  %v6993_v27 = vadd.f32 %v14075_v33, %v12774_v17  ;;  %v12798_v33 = vpop.f32.mrf.mxu3 }
 0x9c1   :  { %8299 = vst [vmem:[#allocation11 + $0x2a0] sm:$0xff] %v8171_v9  ;;  %v6929_v1 = vadd.f32 %v6928_v11, %v12276_v7  ;;  %v6762_v0 = vpop.f32.mrf.mxu1  ;;  %v7159_v45 = vpop.f32.mrf.mxu0  ;;  %v7325_v9 = vunpack.c.l.bf16 %v106_v53 }
 0x9c2   :  { %v7160_v29 = vadd.f32 %v7159_v45, %v12781_v46  ;;  %v12787_v3 = vpack.c.bf16 %v6406_v26, %v6405_v24  ;;  %v6763_v15 = vadd.f32 %v6762_v0, %v12265_v20  ;;  %v7496_v26 = vunpack.c.h.bf16 %v191_v6  ;;  %14076 = vst [vmem:[#allocation61_spill] sm:$0xff] %v12798_v33 }
 0x9c3   :  { %v7748_v39 = vadd.f32 %v7492_v62, %v6929_v1  ;;  %v7326_v1 = vunpack.c.h.bf16 %v106_v53 }
 0x9c4   :  { %14073 = vst [vmem:[#allocation58_spill] sm:$0xff] %v12787_v3  ;;  %v7578_v4 = vadd.f32 %v7322_v22, %v7160_v29  ;;  %6801 = vmatmul.bf16.gmra.mxu1 %v12787_v3  ;;  %7198 = vmatmul.bf16.gmra.mxu0 %v14074_v55  ;;  %v7751_v21 = vadd.f32 %v7495_v41, %v6763_v15  ;;  %v193_v55 = vld [vmem:[#allocation2 + $0x2d0] sm:$0xff]  ;;  %v14077_v41 = vld [vmem:[#allocation52_spill] sm:$0xff] }
 0x9c5   :  { %v8004_v57 = vmax.f32 %v7748_v39, 0.0  ;;  %6970 = vmatmul.bf16.gmra.mxu2 %v12787_v3  ;;  %7139 = vmatmul.bf16.gmra.mxu3 %v12787_v3  ;;  %v7581_v39 = vadd.f32 %v7325_v9, %v6993_v27  ;;  %v108_v3 = vld [vmem:[#allocation2 + $0x28] sm:$0xff] }
 0x9c6   :  { %v7834_v62 = vmax.f32 %v7578_v4, 0.0  ;;  %v8007_v6 = vmax.f32 %v7751_v21, 0.0  ;;  %v7330_v16 = vunpack.c.h.bf16 %v108_v3 }
 0x9c7   :  { %v8173_v24 = vpack.c.bf16 %v8004_v57, %v8003_v32  ;;  %v7837_v15 = vmax.f32 %v7581_v39, 0.0 }
 0x9c8   :  { %v8088_v11 = vpack.c.bf16 %v7834_v62, %v7833_v14  ;;  %v6931_v22 = vpop.f32.mrf.mxu2  ;;  %v7499_v14 = vunpack.c.l.bf16 %v193_v55  ;;  %v6996_v62 = vadd.f32 %v14077_v41, %v12774_v17 }
 0x9c9   :  { %8301 = vst [vmem:[#allocation11 + $0x2b0] sm:$0xff] %v8173_v24  ;;  %v6932_v0 = vadd.f32 %v6931_v22, %v12276_v7  ;;  %v6764_v45 = vpop.f32.mrf.mxu1  ;;  %v7161_v29 = vpop.f32.mrf.mxu0  ;;  %v7329_v24 = vunpack.c.l.bf16 %v108_v3 }
 0x9ca   :  { %8216 = vst [vmem:[#allocation11 + $0x8] sm:$0xff] %v8088_v11  ;;  %v7162_v8 = vadd.f32 %v7161_v29, %v12781_v46  ;;  %v6765_v53 = vadd.f32 %v6764_v45, %v12265_v20  ;;  %v7500_v11 = vunpack.c.h.bf16 %v193_v55  ;;  %v195_v45 = vld [vmem:[#allocation2 + $0x2e0] sm:$0xff]  ;;  %v14079_v55 = vld [vmem:[#allocation81_spill] sm:$0xff] }
 0x9cb   :  { %v7752_v4 = vadd.f32 %v7496_v26, %v6932_v0  ;;  %v7585_v0 = vadd.f32 %v7329_v24, %v6996_v62  ;;  %v14081_v62 = vld [vmem:[#allocation157_spill] sm:$0xff] }
 0x9cc   :  { %v7582_v32 = vadd.f32 %v7326_v1, %v7162_v8  ;;  %v7755_v33 = vadd.f32 %v7499_v14, %v6765_v53  ;;  %v110_v8 = vld [vmem:[#allocation2 + $0x38] sm:$0xff]  ;;  %v7503_v14 = vunpack.c.l.bf16 %v195_v45  ;;  %v6998_v24 = vadd.f32 %v14081_v62, %v12774_v17 }
 0x9cd   :  { %v8008_v57 = vmax.f32 %v7752_v4, 0.0 }
 0x9ce   :  { %v7838_v27 = vmax.f32 %v7582_v32, 0.0  ;;  %v14078_v32 = vld [vmem:[#allocation210_spill] sm:$0xff]  ;;  %v8011_v3 = vmax.f32 %v7755_v33, 0.0 }
 0x9cf   :  { %v8175_v9 = vpack.c.bf16 %v8008_v57, %v8007_v6  ;;  %v12807_v6 = vpop.f32.mrf.mxu3 }
 0x9d0   :  { %v8090_v22 = vpack.c.bf16 %v7838_v27, %v7837_v15  ;;  %v6933_v29 = vpop.f32.mrf.mxu2  ;;  %14080 = vst [vmem:[#allocation88_spill] sm:$0xff] %v12807_v6  ;;  %v7841_v15 = vmax.f32 %v7585_v0, 0.0 }
 0x9d1   :  { %8303 = vst [vmem:[#allocation11 + $0x2c0] sm:$0xff] %v8175_v9  ;;  %v6934_v26 = vadd.f32 %v6933_v29, %v12276_v7  ;;  %v6767_v1 = vpop.f32.mrf.mxu1  ;;  %v7164_v21 = vpop.f32.mrf.mxu0 }
 0x9d2   :  { %8218 = vst [vmem:[#allocation11 + $0x18] sm:$0xff] %v8090_v22  ;;  %v7165_v39 = vadd.f32 %v7164_v21, %v12781_v46  ;;  %v6768_v53 = vadd.f32 %v6767_v1, %v12265_v20 }
 0x9d3   :  { %v7756_v4 = vadd.f32 %v7500_v11, %v6934_v26  ;;  %v7504_v11 = vunpack.c.h.bf16 %v195_v45  ;;  %v7334_v26 = vunpack.c.h.bf16 %v110_v8 }
 0x9d4   :  { %v7586_v41 = vadd.f32 %v7330_v16, %v7165_v39  ;;  %6806 = vmatmul.bf16.gmra.mxu1 %v14078_v32  ;;  %7203 = vmatmul.bf16.gmra.mxu0 %v14079_v55  ;;  %v7333_v16 = vunpack.c.l.bf16 %v110_v8  ;;  %v7759_v33 = vadd.f32 %v7503_v14, %v6768_v53  ;;  %v197_v55 = vld [vmem:[#allocation2 + $0x2f0] sm:$0xff]  ;;  %v14082_v53 = vld [vmem:[#allocation72_spill] sm:$0xff] }
 0x9d5   :  { %v8012_v57 = vmax.f32 %v7756_v4, 0.0  ;;  %6975 = vmatmul.bf16.gmra.mxu2 %v14078_v32  ;;  %7144 = vmatmul.bf16.gmra.mxu3 %v14078_v32  ;;  %v112_v32 = vld [vmem:[#allocation2 + $0x48] sm:$0xff]  ;;  %v7001_v14 = vadd.f32 %v14082_v53, %v12774_v17 }
 0x9d6   :  { %v7842_v27 = vmax.f32 %v7586_v41, 0.0  ;;  %v7589_v4 = vadd.f32 %v7333_v16, %v6998_v24  ;;  %v8015_v41 = vmax.f32 %v7759_v33, 0.0  ;;  %v7508_v24 = vunpack.c.h.bf16 %v197_v55 }
 0x9d7   :  { %v8177_v9 = vpack.c.bf16 %v8012_v57, %v8011_v3  ;;  %v7507_v57 = vunpack.c.l.bf16 %v197_v55 }
 0x9d8   :  { %v8092_v22 = vpack.c.bf16 %v7842_v27, %v7841_v15  ;;  %v6936_v29 = vpop.f32.mrf.mxu2  ;;  %v7845_v8 = vmax.f32 %v7589_v4, 0.0  ;;  %v7337_v15 = vunpack.c.l.bf16 %v112_v32 }
 0x9d9   :  { %8305 = vst [vmem:[#allocation11 + $0x2d0] sm:$0xff] %v8177_v9  ;;  %v6937_v1 = vadd.f32 %v6936_v29, %v12276_v7  ;;  %v6769_v21 = vpop.f32.mrf.mxu1  ;;  %v7166_v39 = vpop.f32.mrf.mxu0  ;;  %v7338_v29 = vunpack.c.h.bf16 %v112_v32 }
 0x9da   :  { %8220 = vst [vmem:[#allocation11 + $0x28] sm:$0xff] %v8092_v22  ;;  %v7167_v0 = vadd.f32 %v7166_v39, %v12781_v46  ;;  %v6770_v45 = vadd.f32 %v6769_v21, %v12265_v20  ;;  %v199_v21 = vld [vmem:[#allocation2 + $0x300] sm:$0xff] }
 0x9db   :  { %v7760_v62 = vadd.f32 %v7504_v11, %v6937_v1  ;;  %v7593_v1 = vadd.f32 %v7337_v15, %v7001_v14 }
 0x9dc   :  { %v7590_v6 = vadd.f32 %v7334_v26, %v7167_v0  ;;  %v7763_v39 = vadd.f32 %v7507_v57, %v6770_v45  ;;  %v114_v0 = vld [vmem:[#allocation2 + $0x58] sm:$0xff] }
 0x9dd   :  { %v8016_v3 = vmax.f32 %v7760_v62, 0.0  ;;  %v7849_v45 = vmax.f32 %v7593_v1, 0.0  ;;  %v14084_v57 = vld [vmem:[#allocation55_spill] sm:$0xff] }
 0x9de   :  { %v7846_v27 = vmax.f32 %v7590_v6, 0.0  ;;  %v14083_v6 = vld [vmem:[#allocation101_spill] sm:$0xff]  ;;  %v8019_v55 = vmax.f32 %v7763_v39, 0.0 }
 0x9df   :  { %v8179_v9 = vpack.c.bf16 %v8016_v3, %v8015_v41  ;;  %v7511_v3 = vunpack.c.l.bf16 %v199_v21 }
 0x9e0   :  { %v8094_v16 = vpack.c.bf16 %v7846_v27, %v7845_v8  ;;  %v6938_v22 = vpop.f32.mrf.mxu2  ;;  %v7003_v8 = vadd.f32 %v14084_v57, %v12774_v17  ;;  %v7341_v27 = vunpack.c.l.bf16 %v114_v0 }
 0x9e1   :  { %8307 = vst [vmem:[#allocation11 + $0x2e0] sm:$0xff] %v8179_v9  ;;  %v6939_v11 = vadd.f32 %v6938_v22, %v12276_v7  ;;  %v6772_v26 = vpop.f32.mrf.mxu1  ;;  %v7169_v33 = vpop.f32.mrf.mxu0  ;;  %v7512_v9 = vunpack.c.h.bf16 %v199_v21 }
 0x9e2   :  { %8222 = vst [vmem:[#allocation11 + $0x38] sm:$0xff] %v8094_v16  ;;  %v7170_v4 = vadd.f32 %v7169_v33, %v12781_v46  ;;  %v6773_v32 = vadd.f32 %v6772_v26, %v12265_v20  ;;  %v7342_v33 = vunpack.c.h.bf16 %v114_v0  ;;  %v201_v26 = vld [vmem:[#allocation2 + $0x310] sm:$0xff] }
 0x9e3   :  { %v7764_v62 = vadd.f32 %v7508_v24, %v6939_v11 }
 0x9e4   :  { %v7594_v53 = vadd.f32 %v7338_v29, %v7170_v4  ;;  %7208 = vmatmul.bf16.gmra.mxu0 %v14083_v6  ;;  %v7767_v24 = vadd.f32 %v7511_v3, %v6773_v32  ;;  %v7597_v4 = vadd.f32 %v7341_v27, %v7003_v8  ;;  %v14085_v32 = vld [vmem:[#allocation80_spill] sm:$0xff]  ;;  %v7516_v8 = vunpack.c.h.bf16 %v201_v26 }
 0x9e5   :  { %v8020_v41 = vmax.f32 %v7764_v62, 0.0  ;;  %v116_v62 = vld [vmem:[#allocation2 + $0x68] sm:$0xff]  ;;  %v7006_v3 = vadd.f32 %v14085_v32, %v12774_v17 }
 0x9e6   :  { %v7850_v14 = vmax.f32 %v7594_v53, 0.0  ;;  %v8023_v53 = vmax.f32 %v7767_v24, 0.0  ;;  %v7853_v0 = vmax.f32 %v7597_v4, 0.0 }
 0x9e7   :  { %v8181_v15 = vpack.c.bf16 %v8020_v41, %v8019_v55  ;;  %v7515_v41 = vunpack.c.l.bf16 %v201_v26 }
 0x9e8   :  { %v8096_v16 = vpack.c.bf16 %v7850_v14, %v7849_v45  ;;  %v6941_v22 = vpop.f32.mrf.mxu2  ;;  %v7345_v45 = vunpack.c.l.bf16 %v116_v62 }
 0x9e9   :  { %8309 = vst [vmem:[#allocation11 + $0x2f0] sm:$0xff] %v8181_v15  ;;  %v6942_v29 = vadd.f32 %v6941_v22, %v12276_v7  ;;  %v6774_v39 = vpop.f32.mrf.mxu1  ;;  %v7171_v11 = vpop.f32.mrf.mxu0  ;;  %v7346_v22 = vunpack.c.h.bf16 %v116_v62 }
 0x9ea   :  { %8224 = vst [vmem:[#allocation11 + $0x48] sm:$0xff] %v8096_v16  ;;  %v7172_v1 = vadd.f32 %v7171_v11, %v12781_v46  ;;  %v6775_v21 = vadd.f32 %v6774_v39, %v12265_v20  ;;  %v203_v39 = vld [vmem:[#allocation2 + $0x320] sm:$0xff] }
 0x9eb   :  { %v7768_v6 = vadd.f32 %v7512_v9, %v6942_v29  ;;  %v7601_v29 = vadd.f32 %v7345_v45, %v7006_v3 }
 0x9ec   :  { %v7598_v57 = vadd.f32 %v7342_v33, %v7172_v1  ;;  %v7771_v11 = vadd.f32 %v7515_v41, %v6775_v21  ;;  %v118_v1 = vld [vmem:[#allocation2 + $0x78] sm:$0xff] }
 0x9ed   :  { %v8024_v55 = vmax.f32 %v7768_v6, 0.0  ;;  %v7857_v21 = vmax.f32 %v7601_v29, 0.0  ;;  %v14087_v41 = vld [vmem:[#allocation75_spill] sm:$0xff] }
 0x9ee   :  { %v7854_v14 = vmax.f32 %v7598_v57, 0.0  ;;  %v14086_v57 = vld [vmem:[#allocation82_spill] sm:$0xff]  ;;  %v8027_v26 = vmax.f32 %v7771_v11, 0.0 }
 0x9ef   :  { %v8183_v15 = vpack.c.bf16 %v8024_v55, %v8023_v53  ;;  %v7519_v55 = vunpack.c.l.bf16 %v203_v39 }
 0x9f0   :  { %v8098_v27 = vpack.c.bf16 %v7854_v14, %v7853_v0  ;;  %v6943_v16 = vpop.f32.mrf.mxu2  ;;  %v7008_v0 = vadd.f32 %v14087_v41, %v12774_v17  ;;  %v7349_v14 = vunpack.c.l.bf16 %v118_v1 }
 0x9f1   :  { %8311 = vst [vmem:[#allocation11 + $0x300] sm:$0xff] %v8183_v15  ;;  %v6944_v9 = vadd.f32 %v6943_v16, %v12276_v7  ;;  %v6777_v33 = vpop.f32.mrf.mxu1  ;;  %v7174_v24 = vpop.f32.mrf.mxu0  ;;  %v7520_v15 = vunpack.c.h.bf16 %v203_v39 }
 0x9f2   :  { %8226 = vst [vmem:[#allocation11 + $0x58] sm:$0xff] %v8098_v27  ;;  %v7175_v4 = vadd.f32 %v7174_v24, %v12781_v46  ;;  %v6778_v62 = vadd.f32 %v6777_v33, %v12265_v20  ;;  %v7350_v24 = vunpack.c.h.bf16 %v118_v1  ;;  %v205_v33 = vld [vmem:[#allocation2 + $0x330] sm:$0xff] }
 0x9f3   :  { %v7772_v6 = vadd.f32 %v7516_v8, %v6944_v9 }
 0x9f4   :  { %v7602_v32 = vadd.f32 %v7346_v22, %v7175_v4  ;;  %7213 = vmatmul.bf16.gmra.mxu0 %v14086_v57  ;;  %v7775_v8 = vadd.f32 %v7519_v55, %v6778_v62  ;;  %v7605_v4 = vadd.f32 %v7349_v14, %v7008_v0  ;;  %v14088_v62 = vld [vmem:[#allocation143_spill] sm:$0xff]  ;;  %v7524_v0 = vunpack.c.h.bf16 %v205_v33 }
 0x9f5   :  { %v8028_v53 = vmax.f32 %v7772_v6, 0.0  ;;  %v120_v6 = vld [vmem:[#allocation2 + $0x88] sm:$0xff]  ;;  %v7011_v55 = vadd.f32 %v14088_v62, %v12774_v17 }
 0x9f6   :  { %v7858_v3 = vmax.f32 %v7602_v32, 0.0  ;;  %v8031_v32 = vmax.f32 %v7775_v8, 0.0  ;;  %v7861_v1 = vmax.f32 %v7605_v4, 0.0 }
 0x9f7   :  { %v8185_v45 = vpack.c.bf16 %v8028_v53, %v8027_v26  ;;  %v7523_v53 = vunpack.c.l.bf16 %v205_v33 }
 0x9f8   :  { %v8100_v27 = vpack.c.bf16 %v7858_v3, %v7857_v21  ;;  %v6946_v16 = vpop.f32.mrf.mxu2  ;;  %v7353_v21 = vunpack.c.l.bf16 %v120_v6 }
 0x9f9   :  { %8313 = vst [vmem:[#allocation11 + $0x310] sm:$0xff] %v8185_v45  ;;  %v6947_v22 = vadd.f32 %v6946_v16, %v12276_v7  ;;  %v6779_v11 = vpop.f32.mrf.mxu1  ;;  %v7176_v9 = vpop.f32.mrf.mxu0  ;;  %v7354_v16 = vunpack.c.h.bf16 %v120_v6 }
 0x9fa   :  { %8228 = vst [vmem:[#allocation11 + $0x68] sm:$0xff] %v8100_v27  ;;  %v7177_v29 = vadd.f32 %v7176_v9, %v12781_v46  ;;  %v6780_v39 = vadd.f32 %v6779_v11, %v12265_v20  ;;  %v207_v11 = vld [vmem:[#allocation2 + $0x340] sm:$0xff] }
 0x9fb   :  { %v7776_v57 = vadd.f32 %v7520_v15, %v6947_v22  ;;  %v7609_v22 = vadd.f32 %v7353_v21, %v7011_v55 }
 0x9fc   :  { %v7606_v41 = vadd.f32 %v7350_v24, %v7177_v29  ;;  %v7779_v9 = vadd.f32 %v7523_v53, %v6780_v39  ;;  %v122_v29 = vld [vmem:[#allocation2 + $0x98] sm:$0xff]  ;;  %v7013_v53 = vadd.f32 %v12388_v61, %v12774_v17 }
 0x9fd   :  { %v8032_v26 = vmax.f32 %v7776_v57, 0.0  ;;  %v7865_v39 = vmax.f32 %v7609_v22, 0.0 }
 0x9fe   :  { %v7862_v3 = vmax.f32 %v7606_v41, 0.0  ;;  %v14089_v41 = vld [vmem:[#allocation84_spill] sm:$0xff]  ;;  %v8035_v33 = vmax.f32 %v7779_v9, 0.0 }
 0x9ff   :  { %v8187_v45 = vpack.c.bf16 %v8032_v26, %v8031_v32  ;;  %v7527_v26 = vunpack.c.l.bf16 %v207_v11 }
 0xa00   :  { %v8102_v14 = vpack.c.bf16 %v7862_v3, %v7861_v1  ;;  %v6948_v27 = vpop.f32.mrf.mxu2  ;;  %v7357_v1 = vunpack.c.l.bf16 %v122_v29  ;;  %v7528_v3 = vunpack.c.h.bf16 %v207_v11 }
 0xa01   :  { %8315 = vst [vmem:[#allocation11 + $0x320] sm:$0xff] %v8187_v45  ;;  %v6949_v15 = vadd.f32 %v6948_v27, %v12276_v7  ;;  %v6782_v24 = vpop.f32.mrf.mxu1  ;;  %v7179_v8 = vpop.f32.mrf.mxu0  ;;  %v7358_v27 = vunpack.c.h.bf16 %v122_v29 }
 0xa02   :  { %8230 = vst [vmem:[#allocation11 + $0x78] sm:$0xff] %v8102_v14  ;;  %v7180_v4 = vadd.f32 %v7179_v8, %v12781_v46  ;;  %v6783_v6 = vadd.f32 %v6782_v24, %v12265_v20  ;;  %v7613_v8 = vadd.f32 %v7357_v1, %v7013_v53  ;;  %v209_v24 = vld [vmem:[#allocation2 + $0x350] sm:$0xff] }
 0xa03   :  { %v7780_v57 = vadd.f32 %v7524_v0, %v6949_v15  ;;  %v7532_v53 = vunpack.c.h.bf16 %v209_v24 }
 0xa04   :  { %v7610_v62 = vadd.f32 %v7354_v16, %v7180_v4  ;;  %7218 = vmatmul.bf16.gmra.mxu0 %v14089_v41  ;;  %v7783_v0 = vadd.f32 %v7527_v26, %v6783_v6  ;;  %v124_v4 = vld [vmem:[#allocation2 + $0xa8] sm:$0xff]  ;;  %v7869_v29 = vmax.f32 %v7613_v8, 0.0  ;;  %v126_v8 = vld [vmem:[#allocation2 + $0xb8] sm:$0xff] }
 0xa05   :  { %v8036_v32 = vmax.f32 %v7780_v57, 0.0  ;;  %v7361_v26 = vunpack.c.l.bf16 %v124_v4 }
 0xa06   :  { %v7866_v55 = vmax.f32 %v7610_v62, 0.0  ;;  %v8039_v62 = vmax.f32 %v7783_v0, 0.0 }
 0xa07   :  { %v8189_v21 = vpack.c.bf16 %v8036_v32, %v8035_v33  ;;  %v7531_v33 = vunpack.c.l.bf16 %v209_v24  ;;  %v14090_v32 = vld [vmem:[#allocation102_spill] sm:$0xff] }
 0xa08   :  { %v8104_v45 = vpack.c.bf16 %v7866_v55, %v7865_v39  ;;  %v6951_v14 = vpop.f32.mrf.mxu2  ;;  %v7016_v6 = vadd.f32 %v14090_v32, %v12774_v17 }
 0xa09   :  { %8317 = vst [vmem:[#allocation11 + $0x330] sm:$0xff] %v8189_v21  ;;  %v6952_v16 = vadd.f32 %v6951_v14, %v12276_v7  ;;  %v6784_v9 = vpop.f32.mrf.mxu1  ;;  %v7181_v15 = vpop.f32.mrf.mxu0 }
 0xa0a   :  { %8232 = vst [vmem:[#allocation11 + $0x88] sm:$0xff] %v8104_v45  ;;  %v7182_v22 = vadd.f32 %v7181_v15, %v12781_v46  ;;  %v6785_v11 = vadd.f32 %v6784_v9, %v12265_v20  ;;  %v7362_v45 = vunpack.c.h.bf16 %v124_v4  ;;  %v211_v9 = vld [vmem:[#allocation2 + $0x360] sm:$0xff] }
 0xa0b   :  { %v7784_v61 = vadd.f32 %v7528_v3, %v6952_v16  ;;  %v7617_v16 = vadd.f32 %v7361_v26, %v7016_v6  ;;  %v7536_v26 = vunpack.c.h.bf16 %v211_v9 }
 0xa0c   :  { %v7614_v57 = vadd.f32 %v7358_v27, %v7182_v22  ;;  %v7787_v14 = vadd.f32 %v7531_v33, %v6785_v11  ;;  %v7018_v33 = vadd.f32 %v12410_v12, %v12774_v17 }
 0xa0d   :  { %v8040_v41 = vmax.f32 %v7784_v61, 0.0  ;;  %v7873_v11 = vmax.f32 %v7617_v16, 0.0  ;;  %v128_v16 = vld [vmem:[#allocation2 + $0xc8] sm:$0xff] }
 0xa0e   :  { %v7870_v39 = vmax.f32 %v7614_v57, 0.0  ;;  %v14091_v57 = vld [vmem:[#allocation160_spill] sm:$0xff]  ;;  %v8043_v24 = vmax.f32 %v7787_v14, 0.0 }
 0xa0f   :  { %v8191_v55 = vpack.c.bf16 %v8040_v41, %v8039_v62  ;;  %v7535_v41 = vunpack.c.l.bf16 %v211_v9 }
 0xa10   :  { %v8106_v1 = vpack.c.bf16 %v7870_v39, %v7869_v29  ;;  %v6953_v21 = vpop.f32.mrf.mxu2  ;;  %v7365_v29 = vunpack.c.l.bf16 %v126_v8 }
 0xa11   :  { %8319 = vst [vmem:[#allocation11 + $0x340] sm:$0xff] %v8191_v55  ;;  %v6954_v3 = vadd.f32 %v6953_v21, %v12276_v7  ;;  %v6787_v27 = vpop.f32.mrf.mxu1  ;;  %v7184_v0 = vpop.f32.mrf.mxu0 }
 0xa12   :  { %8234 = vst [vmem:[#allocation11 + $0x98] sm:$0xff] %v8106_v1  ;;  %v7185_v15 = vadd.f32 %v7184_v0, %v12781_v46  ;;  %v6788_v4 = vadd.f32 %v6787_v27, %v12265_v20  ;;  %v7366_v1 = vunpack.c.h.bf16 %v126_v8  ;;  %v213_v27 = vld [vmem:[#allocation2 + $0x370] sm:$0xff] }
 0xa13   :  { %v7788_v22 = vadd.f32 %v7532_v53, %v6954_v3  ;;  %v7621_v3 = vadd.f32 %v7365_v29, %v7018_v33  ;;  %v7540_v33 = vunpack.c.h.bf16 %v213_v27 }
 0xa14   :  { %v7618_v61 = vadd.f32 %v7362_v45, %v7185_v15  ;;  %7223 = vmatmul.bf16.gmra.mxu0 %v14091_v57  ;;  %v7791_v53 = vadd.f32 %v7535_v41, %v6788_v4  ;;  %v7539_v57 = vunpack.c.l.bf16 %v213_v27  ;;  %v7369_v4 = vunpack.c.l.bf16 %v128_v16 }
 0xa15   :  { %v8044_v62 = vmax.f32 %v7788_v22, 0.0  ;;  %v7877_v8 = vmax.f32 %v7621_v3, 0.0 }
 0xa16   :  { %v7874_v32 = vmax.f32 %v7618_v61, 0.0  ;;  %v8047_v22 = vmax.f32 %v7791_v53, 0.0 }
 0xa17   :  { %v8193_v6 = vpack.c.bf16 %v8044_v62, %v8043_v24  ;;  %v14092_v24 = vld [vmem:[#allocation144_spill] sm:$0xff] }
 0xa18   :  { %v8108_v39 = vpack.c.bf16 %v7874_v32, %v7873_v11  ;;  %v6956_v55 = vpop.f32.mrf.mxu2  ;;  %v7021_v62 = vadd.f32 %v14092_v24, %v12774_v17 }
 0xa19   :  { %8321 = vst [vmem:[#allocation11 + $0x350] sm:$0xff] %v8193_v6  ;;  %v6957_v21 = vadd.f32 %v6956_v55, %v12276_v7  ;;  %v6789_v45 = vpop.f32.mrf.mxu1  ;;  %v7186_v14 = vpop.f32.mrf.mxu0  ;;  %v7370_v6 = vunpack.c.h.bf16 %v128_v16 }
 0xa1a   :  { %8236 = vst [vmem:[#allocation11 + $0xa8] sm:$0xff] %v8108_v39  ;;  %v7187_v0 = vadd.f32 %v7186_v14, %v12781_v46  ;;  %v6790_v9 = vadd.f32 %v6789_v45, %v12265_v20  ;;  %v7625_v53 = vadd.f32 %v7369_v4, %v7021_v62  ;;  %v130_v14 = vld [vmem:[#allocation2 + $0xd8] sm:$0xff] }
 0xa1b   :  { %v7792_v12 = vadd.f32 %v7536_v26, %v6957_v21  ;;  %v215_v21 = vld [vmem:[#allocation2 + $0x380] sm:$0xff] }
 0xa1c   :  { %v7622_v15 = vadd.f32 %v7366_v1, %v7187_v0  ;;  %v7795_v39 = vadd.f32 %v7539_v57, %v6790_v9  ;;  %v14094_v9 = vld [vmem:[#allocation85_spill] sm:$0xff]  ;;  %v7544_v4 = vunpack.c.h.bf16 %v215_v21 }
 0xa1d   :  { %v8048_v61 = vmax.f32 %v7792_v12, 0.0  ;;  %v14093_v12 = vld [vmem:[#allocation141_spill] sm:$0xff]  ;;  %v7023_v57 = vadd.f32 %v14094_v9, %v12774_v17 }
 0xa1e   :  { %v7878_v41 = vmax.f32 %v7622_v15, 0.0  ;;  %v8051_v27 = vmax.f32 %v7795_v39, 0.0 }
 0xa1f   :  { %v8195_v11 = vpack.c.bf16 %v8048_v61, %v8047_v22  ;;  %v7543_v22 = vunpack.c.l.bf16 %v215_v21  ;;  %v7881_v61 = vmax.f32 %v7625_v53, 0.0  ;;  %v132_v53 = vld [vmem:[#allocation2 + $0xe8] sm:$0xff] }
 0xa20   :  { %v8110_v29 = vpack.c.bf16 %v7878_v41, %v7877_v8  ;;  %v6958_v32 = vpop.f32.mrf.mxu2  ;;  %v7373_v8 = vunpack.c.l.bf16 %v130_v14 }
 0xa21   :  { %8323 = vst [vmem:[#allocation11 + $0x360] sm:$0xff] %v8195_v11  ;;  %v6959_v26 = vadd.f32 %v6958_v32, %v12276_v7  ;;  %v6792_v55 = vpop.f32.mrf.mxu1  ;;  %v7189_v1 = vpop.f32.mrf.mxu0 }
 0xa22   :  { %8238 = vst [vmem:[#allocation11 + $0xb8] sm:$0xff] %v8110_v29  ;;  %v7190_v45 = vadd.f32 %v7189_v1, %v12781_v46  ;;  %v6793_v16 = vadd.f32 %v6792_v55, %v12265_v20  ;;  %v7374_v29 = vunpack.c.h.bf16 %v130_v14  ;;  %v217_v55 = vld [vmem:[#allocation2 + $0x390] sm:$0xff] }
 0xa23   :  { %v7796_v3 = vadd.f32 %v7540_v33, %v6959_v26  ;;  %v7629_v26 = vadd.f32 %v7373_v8, %v7023_v57  ;;  %v7548_v9 = vunpack.c.h.bf16 %v217_v55 }
 0xa24   :  { %v7626_v0 = vadd.f32 %v7370_v6, %v7190_v45  ;;  %7228 = vmatmul.bf16.gmra.mxu0 %v14093_v12  ;;  %v7799_v33 = vadd.f32 %v7543_v22, %v6793_v16  ;;  %v7377_v16 = vunpack.c.l.bf16 %v132_v53 }
 0xa25   :  { %v8052_v15 = vmax.f32 %v7796_v3, 0.0  ;;  %v7885_v14 = vmax.f32 %v7629_v26, 0.0  ;;  %v14095_v26 = vld [vmem:[#allocation177_spill] sm:$0xff] }
 0xa26   :  { %v7882_v24 = vmax.f32 %v7626_v0, 0.0  ;;  %v8055_v0 = vmax.f32 %v7799_v33, 0.0  ;;  %v219_v33 = vld [vmem:[#allocation2 + $0x3a0] sm:$0xff] }
 0xa27   :  { %v8197_v62 = vpack.c.bf16 %v8052_v15, %v8051_v27  ;;  %v7547_v27 = vunpack.c.l.bf16 %v217_v55  ;;  %v7026_v15 = vadd.f32 %v12443_v58, %v12774_v17 }
 0xa28   :  { %v8112_v41 = vpack.c.bf16 %v7882_v24, %v7881_v61  ;;  %v6961_v11 = vpop.f32.mrf.mxu2  ;;  %v7378_v24 = vunpack.c.h.bf16 %v132_v53 }
 0xa29   :  { %8325 = vst [vmem:[#allocation11 + $0x370] sm:$0xff] %v8197_v62  ;;  %v6962_v32 = vadd.f32 %v6961_v11, %v12276_v7  ;;  %v6794_v6 = vpop.f32.mrf.mxu1  ;;  %v7191_v39 = vpop.f32.mrf.mxu0 }
 0xa2a   :  { %8240 = vst [vmem:[#allocation11 + $0xc8] sm:$0xff] %v8112_v41  ;;  %v7192_v1 = vadd.f32 %v7191_v39, %v12781_v46  ;;  %v6795_v21 = vadd.f32 %v6794_v6, %v12265_v20  ;;  %v134_v6 = vld [vmem:[#allocation2 + $0xf8] sm:$0xff] }
 0xa2b   :  { %v7800_v45 = vadd.f32 %v7544_v4, %v6962_v32 }
 0xa2c   :  { %v7630_v3 = vadd.f32 %v7374_v29, %v7192_v1  ;;  %v7803_v62 = vadd.f32 %v7547_v27, %v6795_v21  ;;  %v7633_v29 = vadd.f32 %v7377_v16, %v7026_v15  ;;  %v7381_v21 = vunpack.c.l.bf16 %v134_v6 }
 0xa2d   :  { %v8056_v12 = vmax.f32 %v7800_v45, 0.0  ;;  %v7551_v45 = vunpack.c.l.bf16 %v219_v33  ;;  %v7552_v15 = vunpack.c.h.bf16 %v219_v33 }
 0xa2e   :  { %v7886_v22 = vmax.f32 %v7630_v3, 0.0  ;;  %v8059_v55 = vmax.f32 %v7803_v62, 0.0  ;;  %v7889_v3 = vmax.f32 %v7633_v29, 0.0 }
 0xa2f   :  { %v8199_v61 = vpack.c.bf16 %v8056_v12, %v8055_v0  ;;  %v14096_v0 = vld [vmem:[#allocation142_spill] sm:$0xff] }
 0xa30   :  { %v8114_v57 = vpack.c.bf16 %v7886_v22, %v7885_v14  ;;  %v6963_v8 = vpop.f32.mrf.mxu2  ;;  %v7028_v12 = vadd.f32 %v14096_v0, %v12774_v17 }
 0xa31   :  { %8327 = vst [vmem:[#allocation11 + $0x380] sm:$0xff] %v8199_v61  ;;  %v6964_v4 = vadd.f32 %v6963_v8, %v12276_v7  ;;  %v6797_v41 = vpop.f32.mrf.mxu1  ;;  %v7194_v11 = vpop.f32.mrf.mxu0  ;;  %v7382_v61 = vunpack.c.h.bf16 %v134_v6 }
 0xa32   :  { %8242 = vst [vmem:[#allocation11 + $0xd8] sm:$0xff] %v8114_v57  ;;  %v7195_v32 = vadd.f32 %v7194_v11, %v12781_v46  ;;  %v6798_v53 = vadd.f32 %v6797_v41, %v12265_v20  ;;  %v7637_v62 = vadd.f32 %v7381_v21, %v7028_v12  ;;  %v136_v11 = vld [vmem:[#allocation2 + $0x108] sm:$0xff] }
 0xa33   :  { %v7804_v58 = vadd.f32 %v7548_v9, %v6964_v4  ;;  %v221_v4 = vld [vmem:[#allocation2 + $0x3b0] sm:$0xff]  ;;  %v7386_v21 = vunpack.c.h.bf16 %v136_v11 }
 0xa34   :  { %v7634_v39 = vadd.f32 %v7378_v24, %v7195_v32  ;;  %7233 = vmatmul.bf16.gmra.mxu0 %v14095_v26  ;;  %v7807_v9 = vadd.f32 %v7551_v45, %v6798_v53  ;;  %v7555_v26 = vunpack.c.l.bf16 %v221_v4  ;;  %v7893_v6 = vmax.f32 %v7637_v62, 0.0 }
 0xa35   :  { %v8060_v1 = vmax.f32 %v7804_v58, 0.0 }
 0xa36   :  { %v7890_v27 = vmax.f32 %v7634_v39, 0.0  ;;  %v8063_v58 = vmax.f32 %v7807_v9, 0.0 }
 0xa37   :  { %v8201_v14 = vpack.c.bf16 %v8060_v1, %v8059_v55  ;;  %v7031_v55 = vadd.f32 %v12469_v34, %v12774_v17  ;;  %v7385_v1 = vunpack.c.l.bf16 %v136_v11 }
 0xa38   :  { %v8116_v16 = vpack.c.bf16 %v7890_v27, %v7889_v3  ;;  %v6966_v22 = vpop.f32.mrf.mxu2  ;;  %v7556_v3 = vunpack.c.h.bf16 %v221_v4 }
 0xa39   :  { %8329 = vst [vmem:[#allocation11 + $0x390] sm:$0xff] %v8201_v14  ;;  %v6967_v57 = vadd.f32 %v6966_v22, %v12276_v7  ;;  %v6799_v8 = vpop.f32.mrf.mxu1  ;;  %v7196_v24 = vpop.f32.mrf.mxu0  ;;  %v7641_v22 = vadd.f32 %v7385_v1, %v7031_v55 }
 0xa3a   :  { %8244 = vst [vmem:[#allocation11 + $0xe8] sm:$0xff] %v8116_v16  ;;  %v7197_v41 = vadd.f32 %v7196_v24, %v12781_v46  ;;  %v6800_v33 = vadd.f32 %v6799_v8, %v12265_v20  ;;  %v14097_v24 = vld [vmem:[#allocation83_spill] sm:$0xff] }
 0xa3b   :  { %v7808_v29 = vadd.f32 %v7552_v15, %v6967_v57  ;;  %v138_v57 = vld [vmem:[#allocation2 + $0x118] sm:$0xff] }
 0xa3c   :  { %v7638_v32 = vadd.f32 %v7382_v61, %v7197_v41  ;;  %v7811_v27 = vadd.f32 %v7555_v26, %v6800_v33  ;;  %v223_v61 = vld [vmem:[#allocation2 + $0x3c0] sm:$0xff]  ;;  %v7390_v1 = vunpack.c.h.bf16 %v138_v57 }
 0xa3d   :  { %v8064_v39 = vmax.f32 %v7808_v29, 0.0  ;;  %v7559_v11 = vunpack.c.l.bf16 %v223_v61  ;;  %v7897_v29 = vmax.f32 %v7641_v22, 0.0  ;;  %v7560_v26 = vunpack.c.h.bf16 %v223_v61 }
 0xa3e   :  { %v7894_v53 = vmax.f32 %v7638_v32, 0.0  ;;  %v8067_v62 = vmax.f32 %v7811_v27, 0.0  ;;  %v7033_v32 = vadd.f32 %v12486_v49, %v12774_v17 }
 0xa3f   :  { %v8203_v45 = vpack.c.bf16 %v8064_v39, %v8063_v58  ;;  %v7389_v58 = vunpack.c.l.bf16 %v138_v57 }
 0xa40   :  { %v8118_v0 = vpack.c.bf16 %v7894_v53, %v7893_v6  ;;  %v6968_v12 = vpop.f32.mrf.mxu2 }
 0xa41   :  { %8331 = vst [vmem:[#allocation11 + $0x3a0] sm:$0xff] %v8203_v45  ;;  %v6969_v14 = vadd.f32 %v6968_v12, %v12276_v7  ;;  %v6802_v15 = vpop.f32.mrf.mxu1  ;;  %v7199_v16 = vpop.f32.mrf.mxu0  ;;  %v7645_v12 = vadd.f32 %v7389_v58, %v7033_v32 }
 0xa42   :  { %8246 = vst [vmem:[#allocation11 + $0xf8] sm:$0xff] %v8118_v0  ;;  %v7200_v9 = vadd.f32 %v7199_v16, %v12781_v46  ;;  %v6803_v41 = vadd.f32 %v6802_v15, %v12265_v20 }
 0xa43   :  { %v7812_v34 = vadd.f32 %v7556_v3, %v6969_v14  ;;  %v140_v14 = vld [vmem:[#allocation2 + $0x128] sm:$0xff]  ;;  %v7901_v57 = vmax.f32 %v7645_v12, 0.0 }
 0xa44   :  { %v7642_v8 = vadd.f32 %v7386_v21, %v7200_v9  ;;  %7238 = vmatmul.bf16.gmra.mxu0 %v14097_v24  ;;  %v7815_v53 = vadd.f32 %v7559_v11, %v6803_v41  ;;  %v225_v21 = vld [vmem:[#allocation2 + $0x3d0] sm:$0xff] }
 0xa45   :  { %v8068_v4 = vmax.f32 %v7812_v34, 0.0  ;;  %v7563_v9 = vunpack.c.l.bf16 %v225_v21  ;;  %v7036_v34 = vadd.f32 %v12499_v5, %v12774_v17 }
 0xa46   :  { %v7898_v39 = vmax.f32 %v7642_v8, 0.0  ;;  %v8071_v16 = vmax.f32 %v7815_v53, 0.0  ;;  %v7393_v8 = vunpack.c.l.bf16 %v140_v14 }
 0xa47   :  { %v8205_v33 = vpack.c.bf16 %v8068_v4, %v8067_v62  ;;  %v7564_v4 = vunpack.c.h.bf16 %v225_v21 }
 0xa48   :  { %v8120_v6 = vpack.c.bf16 %v7898_v39, %v7897_v29  ;;  %v6971_v55 = vpop.f32.mrf.mxu2  ;;  %v7394_v29 = vunpack.c.h.bf16 %v140_v14 }
 0xa49   :  { %8333 = vst [vmem:[#allocation11 + $0x3b0] sm:$0xff] %v8205_v33  ;;  %v6972_v45 = vadd.f32 %v6971_v55, %v12276_v7  ;;  %v6804_v3 = vpop.f32.mrf.mxu1  ;;  %v7201_v0 = vpop.f32.mrf.mxu0 }
 0xa4a   :  { %8248 = vst [vmem:[#allocation11 + $0x108] sm:$0xff] %v8120_v6  ;;  %v7202_v27 = vadd.f32 %v7201_v0, %v12781_v46  ;;  %v6805_v61 = vadd.f32 %v6804_v3, %v12265_v20  ;;  %v227_v6 = vld [vmem:[#allocation2 + $0x3e0] sm:$0xff] }
 0xa4b   :  { %v7816_v49 = vadd.f32 %v7560_v26, %v6972_v45  ;;  %v7649_v26 = vadd.f32 %v7393_v8, %v7036_v34  ;;  %v7567_v12 = vunpack.c.l.bf16 %v227_v6 }
 0xa4c   :  { %v7646_v15 = vadd.f32 %v7390_v1, %v7202_v27  ;;  %v7819_v32 = vadd.f32 %v7563_v9, %v6805_v61  ;;  %v142_v1 = vld [vmem:[#allocation2 + $0x138] sm:$0xff]  ;;  %v7038_v27 = vadd.f32 %v12513_v23, %v12774_v17 }
 0xa4d   :  { %v8072_v22 = vmax.f32 %v7816_v49, 0.0  ;;  %v7905_v21 = vmax.f32 %v7649_v26, 0.0  ;;  %v7397_v14 = vunpack.c.l.bf16 %v142_v1  ;;  %v7398_v9 = vunpack.c.h.bf16 %v142_v1 }
 0xa4e   :  { %v7902_v24 = vmax.f32 %v7646_v15, 0.0  ;;  %v8075_v45 = vmax.f32 %v7819_v32, 0.0  ;;  %v7041_v26 = vadd.f32 %v12530_v59, %v12774_v17 }
 0xa4f   :  { %v8207_v62 = vpack.c.bf16 %v8072_v22, %v8071_v16  ;;  %v7568_v16 = vunpack.c.h.bf16 %v227_v6  ;;  %v7653_v8 = vadd.f32 %v7397_v14, %v7038_v27  ;;  %v146_v14 = vld [vmem:[#allocation2 + $0x158] sm:$0xff] }
 0xa50   :  { %v8122_v41 = vpack.c.bf16 %v7902_v24, %v7901_v57  ;;  %v6973_v11 = vpop.f32.mrf.mxu2  ;;  %v229_v24 = vld [vmem:[#allocation2 + $0x3f0] sm:$0xff] }
 0xa51   :  { %8335 = vst [vmem:[#allocation11 + $0x3c0] sm:$0xff] %v8207_v62  ;;  %v6974_v58 = vadd.f32 %v6973_v11, %v12276_v7  ;;  %v6807_v39 = vpop.f32.mrf.mxu1  ;;  %v7204_v33 = vpop.f32.mrf.mxu0 }
 0xa52   :  { %8250 = vst [vmem:[#allocation11 + $0x118] sm:$0xff] %v8122_v41  ;;  %v7205_v55 = vadd.f32 %v7204_v33, %v12781_v46  ;;  %v6808_v0 = vadd.f32 %v6807_v39, %v12265_v20  ;;  %v144_v41 = vld [vmem:[#allocation2 + $0x148] sm:$0xff]  ;;  %v7571_v39 = vunpack.c.l.bf16 %v229_v24  ;;  %v7909_v33 = vmax.f32 %v7653_v8, 0.0 }
 0xa53   :  { %v7820_v5 = vadd.f32 %v7564_v4, %v6974_v58  ;;  %v7401_v6 = vunpack.c.l.bf16 %v144_v41 }
 0xa54   :  { %v7650_v53 = vadd.f32 %v7394_v29, %v7205_v55  ;;  %7243 = vmatmul.bf16.gmra.mxu0 %v12477_v28  ;;  %v7823_v57 = vadd.f32 %v7567_v12, %v6808_v0 }
 0xa55   :  { %v8076_v3 = vmax.f32 %v7820_v5, 0.0  ;;  %v7572_v5 = vunpack.c.h.bf16 %v229_v24  ;;  %v7657_v27 = vadd.f32 %v7401_v6, %v7041_v26  ;;  %v150_v26 = vld [vmem:[#allocation2 + $0x178] sm:$0xff] }
 0xa56   :  { %v7906_v49 = vmax.f32 %v7650_v53, 0.0  ;;  %v8079_v29 = vmax.f32 %v7823_v57, 0.0 }
 0xa57   :  { %v8209_v15 = vpack.c.bf16 %v8076_v3, %v8075_v45  ;;  %v7402_v3 = vunpack.c.h.bf16 %v144_v41 }
 0xa58   :  { %v8124_v22 = vpack.c.bf16 %v7906_v49, %v7905_v21  ;;  %v6976_v61 = vpop.f32.mrf.mxu2 }
 0xa59   :  { %8337 = vst [vmem:[#allocation11 + $0x3d0] sm:$0xff] %v8209_v15  ;;  %v6977_v28 = vadd.f32 %v6976_v61, %v12276_v7  ;;  %v7206_v34 = vpop.f32.mrf.mxu0  ;;  %v6809_v62 = vpop.f32.mrf.mxu1  ;;  %v7043_v61 = vadd.f32 %v12544_v52, %v12774_v17 }
 0xa5a   :  { %8252 = vst [vmem:[#allocation11 + $0x128] sm:$0xff] %v8124_v22  ;;  %v7207_v4 = vadd.f32 %v7206_v34, %v12781_v46  ;;  %v6810_v58 = vadd.f32 %v6809_v62, %v12265_v20  ;;  %v7913_v22 = vmax.f32 %v7657_v27, 0.0  ;;  %v7406_v34 = vunpack.c.h.bf16 %v146_v14 }
 0xa5b   :  { %v7824_v23 = vadd.f32 %v7568_v16, %v6977_v28 }
 0xa5c   :  { %v7654_v11 = vadd.f32 %v7398_v9, %v7207_v4  ;;  %v7827_v0 = vadd.f32 %v7571_v39, %v6810_v58  ;;  %v7405_v9 = vunpack.c.l.bf16 %v146_v14  ;;  %v148_v4 = vld [vmem:[#allocation2 + $0x168] sm:$0xff]  ;;  %v7051_v14 = vadd.f32 %v12587_v51, %v12774_v17 }
 0xa5d   :  { %v8080_v32 = vmax.f32 %v7824_v23, 0.0  ;;  %v7046_v23 = vadd.f32 %v12561_v10, %v12774_v17 }
 0xa5e   :  { %v7910_v55 = vmax.f32 %v7654_v11, 0.0  ;;  %v8083_v59 = vmax.f32 %v7827_v0, 0.0  ;;  %v7661_v24 = vadd.f32 %v7405_v9, %v7043_v61  ;;  %v7409_v11 = vunpack.c.l.bf16 %v148_v4  ;;  %v154_v61 = vld [vmem:[#allocation2 + $0x198] sm:$0xff] }
 0xa5f   :  { %v8211_v1 = vpack.c.bf16 %v8080_v32, %v8079_v29  ;;  %v7410_v32 = vunpack.c.h.bf16 %v148_v4 }
 0xa60   :  { %v8126_v53 = vpack.c.bf16 %v7910_v55, %v7909_v33  ;;  %v6978_v45 = vpop.f32.mrf.mxu2  ;;  %v7665_v39 = vadd.f32 %v7409_v11, %v7046_v23  ;;  %v7056_v11 = vadd.f32 %v12617_v18, %v12774_v17 }
 0xa61   :  { %8339 = vst [vmem:[#allocation11 + $0x3e0] sm:$0xff] %v8211_v1  ;;  %v6979_v12 = vadd.f32 %v6978_v45, %v12276_v7  ;;  %v7209_v21 = vpop.f32.mrf.mxu0  ;;  %v7048_v1 = vadd.f32 %v12573_v31, %v12774_v17  ;;  %v7414_v45 = vunpack.c.h.bf16 %v150_v26 }
 0xa62   :  { %8254 = vst [vmem:[#allocation11 + $0x138] sm:$0xff] %v8126_v53  ;;  %v7210_v20 = vadd.f32 %v7209_v21, %v12781_v46  ;;  %v7921_v55 = vmax.f32 %v7665_v39, 0.0  ;;  %v152_v21 = vld [vmem:[#allocation2 + $0x188] sm:$0xff] }
 0xa63   :  { %v7828_v49 = vadd.f32 %v7572_v5, %v6979_v12  ;;  %v7413_v5 = vunpack.c.l.bf16 %v150_v26 }
 0xa64   :  { %v7658_v15 = vadd.f32 %v7402_v3, %v7210_v20  ;;  %7248 = vmatmul.bf16.gmra.mxu0 %v12501_v25  ;;  %v7917_v25 = vmax.f32 %v7661_v24, 0.0 }
 0xa65   :  { %v8084_v16 = vmax.f32 %v7828_v49, 0.0  ;;  %v7669_v0 = vadd.f32 %v7413_v5, %v7048_v1 }
 0xa66   :  { %v7914_v57 = vmax.f32 %v7658_v15, 0.0 }
 0xa67   :  { %v8213_v28 = vpack.c.bf16 %v8084_v16, %v8083_v59  ;;  %v7925_v20 = vmax.f32 %v7669_v0, 0.0  ;;  %v7418_v59 = vunpack.c.h.bf16 %v152_v21  ;;  %v160_v0 = vld [vmem:[#allocation2 + $0x1c8] sm:$0xff] }
 0xa68   :  { %v8128_v7 = vpack.c.bf16 %v7914_v57, %v7913_v22 }
 0xa69   :  { %8341 = vst [vmem:[#allocation11 + $0x3f0] sm:$0xff] %v8213_v28  ;;  %v7211_v8 = vpop.f32.mrf.mxu0  ;;  %v7053_v28 = vadd.f32 %v12604_v2, %v12774_v17 }
 0xa6a   :  { %8256 = vst [vmem:[#allocation11 + $0x148] sm:$0xff] %v8128_v7  ;;  %v7212_v62 = vadd.f32 %v7211_v8, %v12781_v46  ;;  %v7421_v7 = vunpack.c.l.bf16 %v154_v61  ;;  %v7422_v8 = vunpack.c.h.bf16 %v154_v61 }
 0xa6c   :  { %v7662_v41 = vadd.f32 %v7406_v34, %v7212_v62  ;;  %v7677_v62 = vadd.f32 %v7421_v7, %v7053_v28 }
 0xa6e   :  { %v7918_v29 = vmax.f32 %v7662_v41, 0.0  ;;  %v156_v41 = vld [vmem:[#allocation2 + $0x1a8] sm:$0xff]  ;;  %v7933_v23 = vmax.f32 %v7677_v62, 0.0  ;;  %v7066_v62 = vadd.f32 %v12677_v63, %v12774_v17 }
 0xa70   :  { %v8130_v52 = vpack.c.bf16 %v7918_v29, %v7917_v25 }
 0xa71   :  { %v7214_v58 = vpop.f32.mrf.mxu0 }
 0xa72   :  { %8258 = vst [vmem:[#allocation11 + $0x158] sm:$0xff] %v8130_v52  ;;  %v7215_v33 = vadd.f32 %v7214_v58, %v12781_v46 }
 0xa74   :  { %v7666_v6 = vadd.f32 %v7410_v32, %v7215_v33  ;;  %7253 = vmatmul.bf16.gmra.mxu0 %v12523_v35  ;;  %v7417_v35 = vunpack.c.l.bf16 %v152_v21  ;;  %v7426_v32 = vunpack.c.h.bf16 %v156_v41  ;;  %v158_v33 = vld [vmem:[#allocation2 + $0x1b8] sm:$0xff] }
 0xa75   :  { %v7429_v1 = vunpack.c.l.bf16 %v158_v33 }
 0xa76   :  { %v7922_v53 = vmax.f32 %v7666_v6, 0.0  ;;  %v7673_v16 = vadd.f32 %v7417_v35, %v7051_v14  ;;  %v7434_v35 = vunpack.c.h.bf16 %v160_v0 }
 0xa78   :  { %v8132_v10 = vpack.c.bf16 %v7922_v53, %v7921_v55  ;;  %v7929_v57 = vmax.f32 %v7673_v16, 0.0  ;;  %v7058_v55 = vadd.f32 %v12631_v43, %v12774_v17  ;;  %v7430_v53 = vunpack.c.h.bf16 %v158_v33 }
 0xa79   :  { %v7216_v3 = vpop.f32.mrf.mxu0 }
 0xa7a   :  { %8260 = vst [vmem:[#allocation11 + $0x168] sm:$0xff] %v8132_v10  ;;  %v7217_v12 = vadd.f32 %v7216_v3, %v12781_v46 }
 0xa7c   :  { %v7670_v27 = vadd.f32 %v7414_v45, %v7217_v12  ;;  %v7685_v45 = vadd.f32 %v7429_v1, %v7058_v55  ;;  %v168_v55 = vld [vmem:[#allocation2 + $0x208] sm:$0xff] }
 0xa7e   :  { %v7926_v49 = vmax.f32 %v7670_v27, 0.0  ;;  %v7941_v21 = vmax.f32 %v7685_v45, 0.0  ;;  %v7061_v27 = vadd.f32 %v12648_v13, %v12774_v17  ;;  %v7450_v45 = vunpack.c.h.bf16 %v168_v55 }
 0xa80   :  { %v8134_v15 = vpack.c.bf16 %v7926_v49, %v7925_v20 }
 0xa81   :  { %v7219_v31 = vpop.f32.mrf.mxu0 }
 0xa82   :  { %8262 = vst [vmem:[#allocation11 + $0x178] sm:$0xff] %v8134_v15  ;;  %v7220_v22 = vadd.f32 %v7219_v31, %v12781_v46 }
 0xa84   :  { %v7674_v9 = vadd.f32 %v7418_v59, %v7220_v22  ;;  %7258 = vmatmul.bf16.gmra.mxu0 %v12549_v44  ;;  %v7425_v44 = vunpack.c.l.bf16 %v156_v41  ;;  %v162_v59 = vld [vmem:[#allocation2 + $0x1d8] sm:$0xff]  ;;  %v7063_v22 = vadd.f32 %v12660_v56, %v12774_v17 }
 0xa85   :  { %v7437_v61 = vunpack.c.l.bf16 %v162_v59 }
 0xa86   :  { %v7930_v34 = vmax.f32 %v7674_v9, 0.0  ;;  %v7681_v58 = vadd.f32 %v7425_v44, %v7056_v11  ;;  %v166_v44 = vld [vmem:[#allocation2 + $0x1f8] sm:$0xff] }
 0xa87   :  { %v7693_v7 = vadd.f32 %v7437_v61, %v7063_v22 }
 0xa88   :  { %v8136_v51 = vpack.c.bf16 %v7930_v34, %v7929_v57  ;;  %v7937_v6 = vmax.f32 %v7681_v58, 0.0  ;;  %v7438_v57 = vunpack.c.h.bf16 %v162_v59  ;;  %v172_v59 = vld [vmem:[#allocation2 + $0x228] sm:$0xff] }
 0xa89   :  { %v7221_v24 = vpop.f32.mrf.mxu0  ;;  %v7457_v61 = vunpack.c.l.bf16 %v172_v59 }
 0xa8a   :  { %8264 = vst [vmem:[#allocation11 + $0x188] sm:$0xff] %v8136_v51  ;;  %v7222_v4 = vadd.f32 %v7221_v24, %v12781_v46  ;;  %v164_v51 = vld [vmem:[#allocation2 + $0x1e8] sm:$0xff]  ;;  %v7949_v24 = vmax.f32 %v7693_v7, 0.0 }
 0xa8c   :  { %v7678_v25 = vadd.f32 %v7422_v8, %v7222_v4 }
 0xa8e   :  { %v7934_v29 = vmax.f32 %v7678_v25, 0.0  ;;  %v7442_v25 = vunpack.c.h.bf16 %v164_v51 }
 0xa90   :  { %v8138_v52 = vpack.c.bf16 %v7934_v29, %v7933_v23 }
 0xa91   :  { %v7224_v2 = vpop.f32.mrf.mxu0 }
 0xa92   :  { %8266 = vst [vmem:[#allocation11 + $0x198] sm:$0xff] %v8138_v52  ;;  %v7225_v39 = vadd.f32 %v7224_v2, %v12781_v46  ;;  %v7445_v2 = vunpack.c.l.bf16 %v166_v44 }
 0xa94   :  { %v7682_v26 = vadd.f32 %v7426_v32, %v7225_v39  ;;  %7263 = vmatmul.bf16.gmra.mxu0 %v12571_v48  ;;  %v7433_v48 = vunpack.c.l.bf16 %v160_v0  ;;  %v7068_v32 = vadd.f32 %v12689_v50, %v12774_v17  ;;  %v7446_v39 = vunpack.c.h.bf16 %v166_v44 }
 0xa96   :  { %v7938_v5 = vmax.f32 %v7682_v26, 0.0  ;;  %v7689_v49 = vadd.f32 %v7433_v48, %v7061_v27  ;;  %v7701_v26 = vadd.f32 %v7445_v2, %v7068_v32  ;;  %v7073_v48 = vadd.f32 %v12720_v30, %v12774_v17 }
 0xa98   :  { %v8140_v18 = vpack.c.bf16 %v7938_v5, %v7937_v6  ;;  %v7945_v16 = vmax.f32 %v7689_v49, 0.0  ;;  %v7957_v5 = vmax.f32 %v7701_v26, 0.0  ;;  %v178_v26 = vld [vmem:[#allocation2 + $0x258] sm:$0xff] }
 0xa99   :  { %v7226_v10 = vpop.f32.mrf.mxu0 }
 0xa9a   :  { %8268 = vst [vmem:[#allocation11 + $0x1a8] sm:$0xff] %v8140_v18  ;;  %v7227_v3 = vadd.f32 %v7226_v10, %v12781_v46  ;;  %v7071_v18 = vadd.f32 %v12703_v42, %v12774_v17 }
 0xa9c   :  { %v7686_v12 = vadd.f32 %v7430_v53, %v7227_v3 }
 0xa9e   :  { %v7942_v20 = vmax.f32 %v7686_v12, 0.0  ;;  %v170_v12 = vld [vmem:[#allocation2 + $0x218] sm:$0xff] }
 0xaa0   :  { %v8142_v14 = vpack.c.bf16 %v7942_v20, %v7941_v21  ;;  %v7453_v20 = vunpack.c.l.bf16 %v170_v12 }
 0xaa1   :  { %v7229_v43 = vpop.f32.mrf.mxu0 }
 0xaa2   :  { %8270 = vst [vmem:[#allocation11 + $0x1b8] sm:$0xff] %v8142_v14  ;;  %v7230_v15 = vadd.f32 %v7229_v43, %v12781_v46  ;;  %v7709_v49 = vadd.f32 %v7453_v20, %v7073_v48 }
 0xaa4   :  { %v7690_v31 = vadd.f32 %v7434_v35, %v7230_v15  ;;  %7268 = vmatmul.bf16.gmra.mxu0 %v12595_v54  ;;  %v7441_v54 = vunpack.c.l.bf16 %v164_v51  ;;  %v7454_v35 = vunpack.c.h.bf16 %v170_v12  ;;  %v7965_v22 = vmax.f32 %v7709_v49, 0.0 }
 0xaa6   :  { %v7946_v9 = vmax.f32 %v7690_v31, 0.0  ;;  %v7697_v23 = vadd.f32 %v7441_v54, %v7066_v62 }
 0xaa8   :  { %v8144_v13 = vpack.c.bf16 %v7946_v9, %v7945_v16  ;;  %v7953_v52 = vmax.f32 %v7697_v23, 0.0  ;;  %v12955_v16 = vpop.f32.mrf.mxu3 }
 0xaa9   :  { %v7231_v28 = vpop.f32.mrf.mxu0 }
 0xaaa   :  { %8272 = vst [vmem:[#allocation11 + $0x1c8] sm:$0xff] %v8144_v13  ;;  %v7232_v34 = vadd.f32 %v7231_v28, %v12781_v46  ;;  %v7458_v13 = vunpack.c.h.bf16 %v172_v59 }
 0xaac   :  { %v7694_v8 = vadd.f32 %v7438_v57, %v7232_v34  ;;  %v174_v34 = vld [vmem:[#allocation2 + $0x238] sm:$0xff] }
 0xaad   :  { %v7461_v62 = vunpack.c.l.bf16 %v174_v34 }
 0xaae   :  { %v7950_v4 = vmax.f32 %v7694_v8, 0.0 }
 0xab0   :  { %v8146_v41 = vpack.c.bf16 %v7950_v4, %v7949_v24  ;;  %v7078_v24 = vadd.f32 %v12747_v37, %v12774_v17 }
 0xab1   :  { %v7234_v56 = vpop.f32.mrf.mxu0 }
 0xab2   :  { %8274 = vst [vmem:[#allocation11 + $0x1d8] sm:$0xff] %v8146_v41  ;;  %v7235_v11 = vadd.f32 %v7234_v56, %v12781_v46  ;;  %v7462_v41 = vunpack.c.h.bf16 %v174_v34  ;;  %v7717_v56 = vadd.f32 %v7461_v62, %v7078_v24 }
 0xab4   :  { %v7698_v29 = vadd.f32 %v7442_v25, %v7235_v11  ;;  %7273 = vmatmul.bf16.gmra.mxu0 %v12619_v60  ;;  %v7449_v60 = vunpack.c.l.bf16 %v168_v55  ;;  %v176_v11 = vld [vmem:[#allocation2 + $0x248] sm:$0xff] }
 0xab5   :  { %v7466_v2 = vunpack.c.h.bf16 %v176_v11 }
 0xab6   :  { %v7954_v58 = vmax.f32 %v7698_v29, 0.0  ;;  %v7705_v3 = vadd.f32 %v7449_v60, %v7071_v18  ;;  %v7973_v29 = vmax.f32 %v7717_v56, 0.0 }
 0xab8   :  { %v8148_v63 = vpack.c.bf16 %v7954_v58, %v7953_v52  ;;  %v7961_v27 = vmax.f32 %v7705_v3, 0.0  ;;  %v7465_v52 = vunpack.c.l.bf16 %v176_v11  ;;  %v180_v3 = vld [vmem:[#allocation2 + $0x268] sm:$0xff] }
 0xab9   :  { %v7236_v33 = vpop.f32.mrf.mxu0  ;;  %v7473_v48 = vunpack.c.l.bf16 %v180_v3 }
 0xaba   :  { %8276 = vst [vmem:[#allocation11 + $0x1e8] sm:$0xff] %v8148_v63  ;;  %v7237_v6 = vadd.f32 %v7236_v33, %v12781_v46 }
 0xabc   :  { %v7702_v1 = vadd.f32 %v7446_v39, %v7237_v6 }
 0xabe   :  { %v7958_v53 = vmax.f32 %v7702_v1, 0.0  ;;  %v14098_v1 = vld [vmem:[#allocation122_spill] sm:$0xff] }
 0xac0   :  { %v8150_v10 = vpack.c.bf16 %v7958_v53, %v7957_v5  ;;  %v7083_v5 = vadd.f32 %v14098_v1, %v12774_v17  ;;  %v7470_v53 = vunpack.c.h.bf16 %v178_v26 }
 0xac1   :  { %v7239_v50 = vpop.f32.mrf.mxu0 }
 0xac2   :  { %8278 = vst [vmem:[#allocation11 + $0x1f8] sm:$0xff] %v8150_v10  ;;  %v7240_v0 = vadd.f32 %v7239_v50, %v12781_v46 }
 0xac4   :  { %v7706_v21 = vadd.f32 %v7450_v45, %v7240_v0  ;;  %7278 = vmatmul.bf16.gmra.mxu0 %v12641_v36  ;;  %v7076_v36 = vadd.f32 %v12733_v19, %v12774_v17  ;;  %v12963_v19 = vpop.f32.mrf.mxu3 }
 0xac6   :  { %v7962_v14 = vmax.f32 %v7706_v21, 0.0  ;;  %v7713_v28 = vadd.f32 %v7457_v61, %v7076_v36  ;;  %v14101_v61 = vld [vmem:[#allocation88_spill] sm:$0xff] }
 0xac8   :  { %v8152_v42 = vpack.c.bf16 %v7962_v14, %v7961_v27  ;;  %v7969_v8 = vmax.f32 %v7713_v28, 0.0 }
 0xac9   :  { %v7241_v43 = vpop.f32.mrf.mxu0 }
 0xaca   :  { %8280 = vst [vmem:[#allocation11 + $0x208] sm:$0xff] %v8152_v42  ;;  %v7242_v15 = vadd.f32 %v7241_v43, %v12781_v46  ;;  %v7474_v42 = vunpack.c.h.bf16 %v180_v3 }
 0xacc   :  { %v7710_v31 = vadd.f32 %v7454_v35, %v7242_v15  ;;  %v12968_v58 = vpop.f32.mrf.mxu3  ;;  %v182_v15 = vld [vmem:[#allocation2 + $0x278] sm:$0xff] }
 0xacd   :  { %v7478_v28 = vunpack.c.h.bf16 %v182_v15 }
 0xace   :  { %v7966_v9 = vmax.f32 %v7710_v31, 0.0  ;;  %v14100_v31 = vld [vmem:[#allocation87_spill] sm:$0xff] }
 0xad0   :  { %v8154_v30 = vpack.c.bf16 %v7966_v9, %v7965_v22  ;;  %v7088_v9 = vadd.f32 %v14101_v61, %v12774_v17 }
 0xad1   :  { %v7244_v57 = vpop.f32.mrf.mxu0 }
 0xad2   :  { %8282 = vst [vmem:[#allocation11 + $0x218] sm:$0xff] %v8154_v30  ;;  %v7245_v7 = vadd.f32 %v7244_v57, %v12781_v46  ;;  %v7477_v30 = vunpack.c.l.bf16 %v182_v15 }
 0xad4   :  { %v7714_v51 = vadd.f32 %v7458_v13, %v7245_v7  ;;  %7283 = vmatmul.bf16.gmra.mxu0 %v12665_v40  ;;  %v7081_v40 = vadd.f32 %v12764_v38, %v12774_v17  ;;  %v7469_v38 = vunpack.c.l.bf16 %v178_v26  ;;  %v12975_v0 = vpop.f32.mrf.mxu3  ;;  %v7733_v34 = vadd.f32 %v7477_v30, %v7088_v9 }
 0xad6   :  { %v7970_v54 = vmax.f32 %v7714_v51, 0.0  ;;  %v7721_v39 = vadd.f32 %v7465_v52, %v7081_v40  ;;  %v7725_v45 = vadd.f32 %v7469_v38, %v7083_v5  ;;  %v7989_v62 = vmax.f32 %v7733_v34, 0.0  ;;  %v186_v40 = vld [vmem:[#allocation2 + $0x298] sm:$0xff]  ;;  %v188_v5 = vld [vmem:[#allocation2 + $0x2a8] sm:$0xff] }
 0xad8   :  { %v8156_v4 = vpack.c.bf16 %v7970_v54, %v7969_v8  ;;  %v7977_v55 = vmax.f32 %v7721_v39, 0.0  ;;  %v7981_v21 = vmax.f32 %v7725_v45, 0.0  ;;  %v184_v8 = vld [vmem:[#allocation2 + $0x288] sm:$0xff]  ;;  %v7091_v54 = vadd.f32 %v12955_v16, %v12774_v17 }
 0xad9   :  { %v7246_v25 = vpop.f32.mrf.mxu0  ;;  %v7485_v16 = vunpack.c.l.bf16 %v186_v40 }
 0xada   :  { %8284 = vst [vmem:[#allocation11 + $0x228] sm:$0xff] %v8156_v4  ;;  %v7247_v23 = vadd.f32 %v7246_v25, %v12781_v46  ;;  %v7481_v4 = vunpack.c.l.bf16 %v184_v8 }
 0xadc   :  { %v7718_v44 = vadd.f32 %v7462_v41, %v7247_v23  ;;  %v12981_v22 = vpop.f32.mrf.mxu3  ;;  %v7482_v23 = vunpack.c.h.bf16 %v184_v8  ;;  %v194_v8 = vld [vmem:[#allocation2 + $0x2d8] sm:$0xff] }
 0xadd   :  { %v7101_v30 = vadd.f32 %v12981_v22, %v12774_v17 }
 0xade   :  { %v7974_v32 = vmax.f32 %v7718_v44, 0.0  ;;  %v7737_v44 = vadd.f32 %v7481_v4, %v7091_v54 }
 0xae0   :  { %v8158_v37 = vpack.c.bf16 %v7974_v32, %v7973_v29  ;;  %v14102_v32 = vld [vmem:[#allocation146_spill] sm:$0xff] }
 0xae1   :  { %v7249_v63 = vpop.f32.mrf.mxu0 }
 0xae2   :  { %8286 = vst [vmem:[#allocation11 + $0x238] sm:$0xff] %v8158_v37  ;;  %v7250_v33 = vadd.f32 %v7249_v63, %v12781_v46  ;;  %v7993_v37 = vmax.f32 %v7737_v44, 0.0 }
 0xae4   :  { %v7722_v6 = vadd.f32 %v7466_v2, %v7250_v33  ;;  %7288 = vmatmul.bf16.gmra.mxu0 %v12687_v47  ;;  %v14099_v47 = vld [vmem:[#allocation61_spill] sm:$0xff]  ;;  %v12988_v25 = vpop.f32.mrf.mxu3  ;;  %v7093_v2 = vadd.f32 %v12963_v19, %v12774_v17  ;;  %v7486_v33 = vunpack.c.h.bf16 %v186_v40  ;;  %v7490_v19 = vunpack.c.h.bf16 %v188_v5 }
 0xae5   :  { %v7086_v27 = vadd.f32 %v14099_v47, %v12774_v17  ;;  %v7103_v4 = vadd.f32 %v12988_v25, %v12774_v17 }
 0xae6   :  { %v7978_v18 = vmax.f32 %v7722_v6, 0.0 }
 0xae7   :  { %v7729_v43 = vadd.f32 %v7473_v48, %v7086_v27  ;;  %v14103_v48 = vld [vmem:[#allocation123_spill] sm:$0xff] }
 0xae8   :  { %v8160_v60 = vpack.c.bf16 %v7978_v18, %v7977_v55  ;;  %v7741_v55 = vadd.f32 %v7485_v16, %v7093_v2 }
 0xae9   :  { %v7251_v10 = vpop.f32.mrf.mxu0  ;;  %v7985_v36 = vmax.f32 %v7729_v43, 0.0 }
 0xaea   :  { %8288 = vst [vmem:[#allocation11 + $0x248] sm:$0xff] %v8160_v60  ;;  %v7252_v50 = vadd.f32 %v7251_v10, %v12781_v46  ;;  %v7997_v18 = vmax.f32 %v7741_v55, 0.0  ;;  %v7096_v60 = vadd.f32 %v12968_v58, %v12774_v17 }
 0xaec   :  { %v7726_v12 = vadd.f32 %v7470_v53, %v7252_v50  ;;  %v7105_v26 = vpop.f32.mrf.mxu3  ;;  %v7489_v53 = vunpack.c.l.bf16 %v188_v5  ;;  %v198_v5 = vld [vmem:[#allocation2 + $0x2f8] sm:$0xff] }
 0xaed   :  { %v7106_v2 = vadd.f32 %v7105_v26, %v12774_v17 }
 0xaee   :  { %v7982_v20 = vmax.f32 %v7726_v12, 0.0  ;;  %v7745_v3 = vadd.f32 %v7489_v53, %v7096_v60 }
 0xaf0   :  { %v8162_v14 = vpack.c.bf16 %v7982_v20, %v7981_v21  ;;  %v190_v21 = vld [vmem:[#allocation2 + $0x2b8] sm:$0xff]  ;;  %v8001_v20 = vmax.f32 %v7745_v3, 0.0 }
 0xaf1   :  { %v7254_v35 = vpop.f32.mrf.mxu0  ;;  %v7494_v43 = vunpack.c.h.bf16 %v190_v21 }
 0xaf2   :  { %8290 = vst [vmem:[#allocation11 + $0x258] sm:$0xff] %v8162_v14  ;;  %v7255_v49 = vadd.f32 %v7254_v35, %v12781_v46  ;;  %v7098_v14 = vadd.f32 %v12975_v0, %v12774_v17 }
 0xaf4   :  { %v7730_v59 = vadd.f32 %v7474_v42, %v7255_v49  ;;  %7293 = vmatmul.bf16.gmra.mxu0 %v14100_v31  ;;  %v7107_v47 = vpop.f32.mrf.mxu3  ;;  %v7493_v42 = vunpack.c.l.bf16 %v190_v21  ;;  %v192_v31 = vld [vmem:[#allocation2 + $0x2c8] sm:$0xff] }
 0xaf5   :  { %v7498_v0 = vunpack.c.h.bf16 %v192_v31  ;;  %v7108_v53 = vadd.f32 %v7107_v47, %v12774_v17  ;;  %v200_v21 = vld [vmem:[#allocation2 + $0x308] sm:$0xff] }
 0xaf6   :  { %v7986_v13 = vmax.f32 %v7730_v59, 0.0  ;;  %v7749_v15 = vadd.f32 %v7493_v42, %v7098_v14  ;;  %v7513_v42 = vunpack.c.l.bf16 %v200_v21 }
 0xaf8   :  { %v8164_v57 = vpack.c.bf16 %v7986_v13, %v7985_v36  ;;  %v8005_v9 = vmax.f32 %v7749_v15, 0.0  ;;  %v7497_v13 = vunpack.c.l.bf16 %v192_v31 }
 0xaf9   :  { %v7256_v7 = vpop.f32.mrf.mxu0 }
 0xafa   :  { %8292 = vst [vmem:[#allocation11 + $0x268] sm:$0xff] %v8164_v57  ;;  %v7257_v51 = vadd.f32 %v7256_v7, %v12781_v46  ;;  %v7753_v34 = vadd.f32 %v7497_v13, %v7101_v30 }
 0xafc   :  { %v7734_v24 = vadd.f32 %v7478_v28, %v7257_v51  ;;  %v7110_v61 = vpop.f32.mrf.mxu3  ;;  %v8009_v54 = vmax.f32 %v7753_v34, 0.0 }
 0xafd   :  { %v7111_v14 = vadd.f32 %v7110_v61, %v12774_v17 }
 0xafe   :  { %v7990_v41 = vmax.f32 %v7734_v24, 0.0 }
 0xb00   :  { %v8166_v56 = vpack.c.bf16 %v7990_v41, %v7989_v62  ;;  %v14104_v62 = vld [vmem:[#allocation58_spill] sm:$0xff]  ;;  %v7501_v41 = vunpack.c.l.bf16 %v194_v8 }
 0xb01   :  { %v7259_v11 = vpop.f32.mrf.mxu0 }
 0xb02   :  { %8294 = vst [vmem:[#allocation11 + $0x278] sm:$0xff] %v8166_v56  ;;  %v7260_v29 = vadd.f32 %v7259_v11, %v12781_v46  ;;  %v7502_v11 = vunpack.c.h.bf16 %v194_v8 }
 0xb04   :  { %v7738_v52 = vadd.f32 %v7482_v23, %v7260_v29  ;;  %7298 = vmatmul.bf16.gmra.mxu0 %v14102_v32  ;;  %v7112_v22 = vpop.f32.mrf.mxu3  ;;  %v7757_v29 = vadd.f32 %v7501_v41, %v7103_v4 }
 0xb05   :  { %v7113_v30 = vadd.f32 %v7112_v22, %v12774_v17 }
 0xb06   :  { %v7994_v63 = vmax.f32 %v7738_v52, 0.0  ;;  %v196_v52 = vld [vmem:[#allocation2 + $0x2e8] sm:$0xff] }
 0xb07   :  { %v7505_v16 = vunpack.c.l.bf16 %v196_v52 }
 0xb08   :  { %v8168_v39 = vpack.c.bf16 %v7994_v63, %v7993_v37  ;;  %v8013_v37 = vmax.f32 %v7757_v29, 0.0  ;;  %v206_v29 = vld [vmem:[#allocation2 + $0x338] sm:$0xff] }
 0xb09   :  { %v7261_v6 = vpop.f32.mrf.mxu0  ;;  %v7761_v55 = vadd.f32 %v7505_v16, %v7106_v2 }
 0xb0a   :  { %8296 = vst [vmem:[#allocation11 + $0x288] sm:$0xff] %v8168_v39  ;;  %v7262_v1 = vadd.f32 %v7261_v6, %v12781_v46 }
 0xb0b   :  { %v8017_v60 = vmax.f32 %v7761_v55, 0.0  ;;  %v208_v55 = vld [vmem:[#allocation2 + $0x348] sm:$0xff] }
 0xb0c   :  { %v7742_v38 = vadd.f32 %v7486_v33, %v7262_v1  ;;  %v7506_v33 = vunpack.c.h.bf16 %v196_v52  ;;  %v7115_v25 = vpop.f32.mrf.mxu3 }
 0xb0e   :  { %v7998_v10 = vmax.f32 %v7742_v38, 0.0 }
 0xb10   :  { %v8170_v45 = vpack.c.bf16 %v7998_v10, %v7997_v18  ;;  %v14105_v18 = vld [vmem:[#allocation210_spill] sm:$0xff]  ;;  %v7509_v10 = vunpack.c.l.bf16 %v198_v5 }
 0xb11   :  { %v7264_v50 = vpop.f32.mrf.mxu0 }
 0xb12   :  { %8298 = vst [vmem:[#allocation11 + $0x298] sm:$0xff] %v8170_v45  ;;  %v7265_v12 = vadd.f32 %v7264_v50, %v12781_v46  ;;  %v7765_v3 = vadd.f32 %v7509_v10, %v7108_v53  ;;  %v7530_v10 = vunpack.c.h.bf16 %v208_v55 }
 0xb14   :  { %v7746_v27 = vadd.f32 %v7490_v19, %v7265_v12  ;;  %7303 = vmatmul.bf16.gmra.mxu0 %v14103_v48  ;;  %v7510_v19 = vunpack.c.h.bf16 %v198_v5 }
 0xb16   :  { %v8002_v58 = vmax.f32 %v7746_v27, 0.0  ;;  %v7117_v27 = vpop.f32.mrf.mxu3 }
 0xb18   :  { %v8172_v35 = vpack.c.bf16 %v8002_v58, %v8001_v20  ;;  %v8021_v20 = vmax.f32 %v7765_v3, 0.0 }
 0xb19   :  { %v7266_v49 = vpop.f32.mrf.mxu0 }
 0xb1a   :  { %8300 = vst [vmem:[#allocation11 + $0x2a8] sm:$0xff] %v8172_v35  ;;  %v7267_v59 = vadd.f32 %v7266_v49, %v12781_v46  ;;  %v7769_v49 = vadd.f32 %v7513_v42, %v7111_v14 }
 0xb1c   :  { %v7750_v36 = vadd.f32 %v7494_v43, %v7267_v59  ;;  %v7514_v43 = vunpack.c.h.bf16 %v200_v21  ;;  %v202_v59 = vld [vmem:[#allocation2 + $0x318] sm:$0xff] }
 0xb1d   :  { %v7517_v13 = vunpack.c.l.bf16 %v202_v59 }
 0xb1e   :  { %v8006_v57 = vmax.f32 %v7750_v36, 0.0  ;;  %v7120_v36 = vpop.f32.mrf.mxu3 }
 0xb20   :  { %v8174_v28 = vpack.c.bf16 %v8006_v57, %v8005_v9  ;;  %v8025_v9 = vmax.f32 %v7769_v49, 0.0 }
 0xb21   :  { %v7269_v7 = vpop.f32.mrf.mxu0 }
 0xb22   :  { %8302 = vst [vmem:[#allocation11 + $0x2b8] sm:$0xff] %v8174_v28  ;;  %v7270_v51 = vadd.f32 %v7269_v7, %v12781_v46  ;;  %v7773_v7 = vadd.f32 %v7517_v13, %v7113_v30 }
 0xb24   :  { %v7754_v24 = vadd.f32 %v7498_v0, %v7270_v51  ;;  %7308 = vmatmul.bf16.gmra.mxu0 %v14104_v62  ;;  %v7518_v0 = vunpack.c.h.bf16 %v202_v59  ;;  %v204_v51 = vld [vmem:[#allocation2 + $0x328] sm:$0xff]  ;;  %v7116_v62 = vadd.f32 %v7115_v25, %v12774_v17 }
 0xb26   :  { %v8010_v56 = vmax.f32 %v7754_v24, 0.0  ;;  %v8029_v24 = vmax.f32 %v7773_v7, 0.0  ;;  %v7122_v41 = vpop.f32.mrf.mxu3 }
 0xb28   :  { %v8176_v23 = vpack.c.bf16 %v8010_v56, %v8009_v54  ;;  %v7521_v54 = vunpack.c.l.bf16 %v204_v51 }
 0xb29   :  { %v7271_v44 = vpop.f32.mrf.mxu0 }
 0xb2a   :  { %8304 = vst [vmem:[#allocation11 + $0x2c8] sm:$0xff] %v8176_v23  ;;  %v7272_v40 = vadd.f32 %v7271_v44, %v12781_v46  ;;  %v7522_v23 = vunpack.c.h.bf16 %v204_v51 }
 0xb2c   :  { %v7758_v32 = vadd.f32 %v7502_v11, %v7272_v40  ;;  %v7777_v11 = vadd.f32 %v7521_v54, %v7116_v62 }
 0xb2e   :  { %v8014_v63 = vmax.f32 %v7758_v32, 0.0  ;;  %v8033_v52 = vmax.f32 %v7777_v11, 0.0  ;;  %v7118_v32 = vadd.f32 %v7117_v27, %v12774_v17  ;;  %v7123_v27 = vadd.f32 %v7122_v41, %v12774_v17 }
 0xb30   :  { %v8178_v39 = vpack.c.bf16 %v8014_v63, %v8013_v37  ;;  %v7525_v37 = vunpack.c.l.bf16 %v206_v29  ;;  %v7526_v63 = vunpack.c.h.bf16 %v206_v29 }
 0xb31   :  { %v7274_v6 = vpop.f32.mrf.mxu0 }
 0xb32   :  { %8306 = vst [vmem:[#allocation11 + $0x2d8] sm:$0xff] %v8178_v39  ;;  %v7275_v1 = vadd.f32 %v7274_v6, %v12781_v46  ;;  %v7125_v39 = vpop.f32.mrf.mxu3  ;;  %v7781_v25 = vadd.f32 %v7525_v37, %v7118_v32 }
 0xb34   :  { %v7762_v38 = vadd.f32 %v7506_v33, %v7275_v1  ;;  %7313 = vmatmul.bf16.gmra.mxu0 %v14105_v18  ;;  %v8037_v5 = vmax.f32 %v7781_v25, 0.0  ;;  %v7529_v18 = vunpack.c.l.bf16 %v208_v55 }
 0xb36   :  { %v8018_v45 = vmax.f32 %v7762_v38, 0.0  ;;  %v7121_v38 = vadd.f32 %v7120_v36, %v12774_v17 }
 0xb38   :  { %v8180_v26 = vpack.c.bf16 %v8018_v45, %v8017_v60 }
 0xb39   :  { %v7276_v50 = vpop.f32.mrf.mxu0 }
 0xb3a   :  { %8308 = vst [vmem:[#allocation11 + $0x2e8] sm:$0xff] %v8180_v26  ;;  %v7277_v12 = vadd.f32 %v7276_v50, %v12781_v46  ;;  %v7785_v26 = vadd.f32 %v7529_v18, %v7121_v38  ;;  %v210_v50 = vld [vmem:[#allocation2 + $0x358] sm:$0xff]  ;;  %v7127_v3 = vpop.f32.mrf.mxu3 }
 0xb3b   :  { %v7534_v42 = vunpack.c.h.bf16 %v210_v50  ;;  %v7128_v51 = vadd.f32 %v7127_v3, %v12774_v17 }
 0xb3c   :  { %v7766_v48 = vadd.f32 %v7510_v19, %v7277_v12  ;;  %v8041_v21 = vmax.f32 %v7785_v26, 0.0 }
 0xb3e   :  { %v8022_v58 = vmax.f32 %v7766_v48, 0.0  ;;  %v7533_v48 = vunpack.c.l.bf16 %v210_v50 }
 0xb40   :  { %v8182_v35 = vpack.c.bf16 %v8022_v58, %v8021_v20 }
 0xb41   :  { %v7279_v47 = vpop.f32.mrf.mxu0 }
 0xb42   :  { %8310 = vst [vmem:[#allocation11 + $0x2f8] sm:$0xff] %v8182_v35  ;;  %v7280_v15 = vadd.f32 %v7279_v47, %v12781_v46  ;;  %v7789_v35 = vadd.f32 %v7533_v48, %v7123_v27  ;;  %v212_v47 = vld [vmem:[#allocation2 + $0x368] sm:$0xff] }
 0xb43   :  { %v7537_v36 = vunpack.c.l.bf16 %v212_v47  ;;  %v7538_v13 = vunpack.c.h.bf16 %v212_v47 }
 0xb44   :  { %v7770_v31 = vadd.f32 %v7514_v43, %v7280_v15  ;;  %v7130_v15 = vpop.f32.mrf.mxu3  ;;  %v8045_v59 = vmax.f32 %v7789_v35, 0.0 }
 0xb45   :  { %v7131_v29 = vadd.f32 %v7130_v15, %v12774_v17 }
 0xb46   :  { %v8026_v57 = vmax.f32 %v7770_v31, 0.0  ;;  %v7126_v31 = vadd.f32 %v7125_v39, %v12774_v17 }
 0xb48   :  { %v8184_v28 = vpack.c.bf16 %v8026_v57, %v8025_v9 }
 0xb49   :  { %v7281_v61 = vpop.f32.mrf.mxu0 }
 0xb4a   :  { %8312 = vst [vmem:[#allocation11 + $0x308] sm:$0xff] %v8184_v28  ;;  %v7282_v34 = vadd.f32 %v7281_v61, %v12781_v46  ;;  %v7793_v28 = vadd.f32 %v7537_v36, %v7126_v31  ;;  %v214_v61 = vld [vmem:[#allocation2 + $0x378] sm:$0xff] }
 0xb4c   :  { %v7774_v8 = vadd.f32 %v7518_v0, %v7282_v34  ;;  %v8049_v34 = vmax.f32 %v7793_v28, 0.0  ;;  %v7132_v62 = vpop.f32.mrf.mxu3 }
 0xb4d   :  { %v7133_v55 = vadd.f32 %v7132_v62, %v12774_v17 }
 0xb4e   :  { %v8030_v4 = vmax.f32 %v7774_v8, 0.0  ;;  %v7541_v8 = vunpack.c.l.bf16 %v214_v61 }
 0xb50   :  { %v8186_v56 = vpack.c.bf16 %v8030_v4, %v8029_v24  ;;  %v7542_v4 = vunpack.c.h.bf16 %v214_v61 }
 0xb51   :  { %v7284_v22 = vpop.f32.mrf.mxu0 }
 0xb52   :  { %8314 = vst [vmem:[#allocation11 + $0x318] sm:$0xff] %v8186_v56  ;;  %v7285_v44 = vadd.f32 %v7284_v22, %v12781_v46  ;;  %v7797_v56 = vadd.f32 %v7541_v8, %v7128_v51  ;;  %v216_v22 = vld [vmem:[#allocation2 + $0x388] sm:$0xff] }
 0xb53   :  { %v7546_v37 = vunpack.c.h.bf16 %v216_v22 }
 0xb54   :  { %v7778_v40 = vadd.f32 %v7522_v23, %v7285_v44  ;;  %v8053_v44 = vmax.f32 %v7797_v56, 0.0 }
 0xb56   :  { %v8034_v2 = vmax.f32 %v7778_v40, 0.0  ;;  %v7545_v40 = vunpack.c.l.bf16 %v216_v22 }
 0xb58   :  { %v8188_v16 = vpack.c.bf16 %v8034_v2, %v8033_v52  ;;  %v7135_v2 = vpop.f32.mrf.mxu3 }
 0xb59   :  { %v7286_v33 = vpop.f32.mrf.mxu0  ;;  %v7136_v3 = vadd.f32 %v7135_v2, %v12774_v17 }
 0xb5a   :  { %8316 = vst [vmem:[#allocation11 + $0x328] sm:$0xff] %v8188_v16  ;;  %v7287_v6 = vadd.f32 %v7286_v33, %v12781_v46  ;;  %v218_v33 = vld [vmem:[#allocation2 + $0x398] sm:$0xff] }
 0xb5b   :  { %v7550_v18 = vunpack.c.h.bf16 %v218_v33 }
 0xb5c   :  { %v7782_v1 = vadd.f32 %v7526_v63, %v7287_v6  ;;  %v7801_v63 = vadd.f32 %v7545_v40, %v7131_v29 }
 0xb5e   :  { %v8038_v60 = vmax.f32 %v7782_v1, 0.0  ;;  %v8057_v6 = vmax.f32 %v7801_v63, 0.0  ;;  %v7549_v1 = vunpack.c.l.bf16 %v218_v33 }
 0xb60   :  { %v8190_v53 = vpack.c.bf16 %v8038_v60, %v8037_v5  ;;  %v7137_v26 = vpop.f32.mrf.mxu3 }
 0xb61   :  { %v7289_v45 = vpop.f32.mrf.mxu0 }
 0xb62   :  { %8318 = vst [vmem:[#allocation11 + $0x338] sm:$0xff] %v8190_v53  ;;  %v7290_v19 = vadd.f32 %v7289_v45, %v12781_v46  ;;  %v7805_v53 = vadd.f32 %v7549_v1, %v7133_v55  ;;  %v220_v45 = vld [vmem:[#allocation2 + $0x3a8] sm:$0xff] }
 0xb63   :  { %v7554_v48 = vunpack.c.h.bf16 %v220_v45 }
 0xb64   :  { %v7786_v12 = vadd.f32 %v7530_v10, %v7290_v19  ;;  %v8061_v50 = vmax.f32 %v7805_v53, 0.0 }
 0xb66   :  { %v8042_v20 = vmax.f32 %v7786_v12, 0.0  ;;  %v7553_v12 = vunpack.c.l.bf16 %v220_v45 }
 0xb68   :  { %v8192_v14 = vpack.c.bf16 %v8042_v20, %v8041_v21 }
 0xb69   :  { %v7291_v58 = vpop.f32.mrf.mxu0 }
 0xb6a   :  { %8320 = vst [vmem:[#allocation11 + $0x348] sm:$0xff] %v8192_v14  ;;  %v7292_v43 = vadd.f32 %v7291_v58, %v12781_v46  ;;  %v7809_v14 = vadd.f32 %v7553_v12, %v7136_v3  ;;  %v222_v58 = vld [vmem:[#allocation2 + $0x3b8] sm:$0xff] }
 0xb6b   :  { %v7557_v15 = vunpack.c.l.bf16 %v222_v58  ;;  %v7558_v36 = vunpack.c.h.bf16 %v222_v58 }
 0xb6c   :  { %v7790_v49 = vadd.f32 %v7534_v42, %v7292_v43  ;;  %v7140_v43 = vpop.f32.mrf.mxu3  ;;  %v8065_v47 = vmax.f32 %v7809_v14, 0.0 }
 0xb6d   :  { %v7141_v61 = vadd.f32 %v7140_v43, %v12774_v17 }
 0xb6e   :  { %v8046_v9 = vmax.f32 %v7790_v49, 0.0  ;;  %v7138_v49 = vadd.f32 %v7137_v26, %v12774_v17 }
 0xb70   :  { %v8194_v30 = vpack.c.bf16 %v8046_v9, %v8045_v59 }
 0xb71   :  { %v7294_v57 = vpop.f32.mrf.mxu0 }
 0xb72   :  { %8322 = vst [vmem:[#allocation11 + $0x358] sm:$0xff] %v8194_v30  ;;  %v7295_v0 = vadd.f32 %v7294_v57, %v12781_v46  ;;  %v7813_v30 = vadd.f32 %v7557_v15, %v7138_v49  ;;  %v224_v57 = vld [vmem:[#allocation2 + $0x3c8] sm:$0xff] }
 0xb74   :  { %v7794_v7 = vadd.f32 %v7538_v13, %v7295_v0  ;;  %v8069_v0 = vmax.f32 %v7813_v30, 0.0  ;;  %v7142_v51 = vpop.f32.mrf.mxu3 }
 0xb75   :  { %v7143_v22 = vadd.f32 %v7142_v51, %v12774_v17 }
 0xb76   :  { %v8050_v24 = vmax.f32 %v7794_v7, 0.0  ;;  %v7561_v7 = vunpack.c.l.bf16 %v224_v57 }
 0xb78   :  { %v8196_v54 = vpack.c.bf16 %v8050_v24, %v8049_v34  ;;  %v7562_v24 = vunpack.c.h.bf16 %v224_v57 }
 0xb79   :  { %v7296_v41 = vpop.f32.mrf.mxu0 }
 0xb7a   :  { %8324 = vst [vmem:[#allocation11 + $0x368] sm:$0xff] %v8196_v54  ;;  %v7297_v23 = vadd.f32 %v7296_v41, %v12781_v46  ;;  %v7817_v54 = vadd.f32 %v7561_v7, %v7141_v61  ;;  %v226_v41 = vld [vmem:[#allocation2 + $0x3d8] sm:$0xff] }
 0xb7b   :  { %v7566_v40 = vunpack.c.h.bf16 %v226_v41 }
 0xb7c   :  { %v7798_v11 = vadd.f32 %v7542_v4, %v7297_v23  ;;  %v8073_v23 = vmax.f32 %v7817_v54, 0.0 }
 0xb7e   :  { %v8054_v52 = vmax.f32 %v7798_v11, 0.0  ;;  %v7565_v11 = vunpack.c.l.bf16 %v226_v41 }
 0xb80   :  { %v8198_v32 = vpack.c.bf16 %v8054_v52, %v8053_v44  ;;  %v7145_v52 = vpop.f32.mrf.mxu3 }
 0xb81   :  { %v7299_v16 = vpop.f32.mrf.mxu0  ;;  %v7146_v33 = vadd.f32 %v7145_v52, %v12774_v17 }
 0xb82   :  { %8326 = vst [vmem:[#allocation11 + $0x378] sm:$0xff] %v8198_v32  ;;  %v7300_v39 = vadd.f32 %v7299_v16, %v12781_v46  ;;  %v228_v16 = vld [vmem:[#allocation2 + $0x3e8] sm:$0xff] }
 0xb83   :  { %v7570_v1 = vunpack.c.h.bf16 %v228_v16 }
 0xb84   :  { %v7802_v25 = vadd.f32 %v7546_v37, %v7300_v39  ;;  %v7821_v37 = vadd.f32 %v7565_v11, %v7143_v22 }
 0xb86   :  { %v8058_v5 = vmax.f32 %v7802_v25, 0.0  ;;  %v8077_v39 = vmax.f32 %v7821_v37, 0.0  ;;  %v7569_v25 = vunpack.c.l.bf16 %v228_v16 }
 0xb88   :  { %v8200_v38 = vpack.c.bf16 %v8058_v5, %v8057_v6  ;;  %v7147_v53 = vpop.f32.mrf.mxu3 }
 0xb89   :  { %v7301_v60 = vpop.f32.mrf.mxu0  ;;  %v7148_v26 = vadd.f32 %v7147_v53, %v12774_v17 }
 0xb8a   :  { %8328 = vst [vmem:[#allocation11 + $0x388] sm:$0xff] %v8200_v38  ;;  %v7302_v10 = vadd.f32 %v7301_v60, %v12781_v46  ;;  %v7825_v38 = vadd.f32 %v7569_v25, %v7146_v33  ;;  %v230_v60 = vld [vmem:[#allocation2 + $0x3f8] sm:$0xff] }
 0xb8b   :  { %v7574_v12 = vunpack.c.h.bf16 %v230_v60 }
 0xb8c   :  { %v7806_v19 = vadd.f32 %v7550_v18, %v7302_v10  ;;  %v8081_v45 = vmax.f32 %v7825_v38, 0.0 }
 0xb8e   :  { %v8062_v21 = vmax.f32 %v7806_v19, 0.0  ;;  %v7573_v19 = vunpack.c.l.bf16 %v230_v60 }
 0xb90   :  { %v8202_v27 = vpack.c.bf16 %v8062_v21, %v8061_v50 }
 0xb91   :  { %v7304_v20 = vpop.f32.mrf.mxu0 }
 0xb92   :  { %8330 = vst [vmem:[#allocation11 + $0x398] sm:$0xff] %v8202_v27  ;;  %v7305_v42 = vadd.f32 %v7304_v20, %v12781_v46  ;;  %v7829_v27 = vadd.f32 %v7573_v19, %v7148_v26 }
 0xb94   :  { %v7810_v35 = vadd.f32 %v7554_v48, %v7305_v42  ;;  %v8085_v14 = vmax.f32 %v7829_v27, 0.0 }
 0xb96   :  { %v8066_v59 = vmax.f32 %v7810_v35, 0.0 }
 0xb98   :  { %v8204_v31 = vpack.c.bf16 %v8066_v59, %v8065_v47 }
 0xb99   :  { %v7306_v9 = vpop.f32.mrf.mxu0 }
 0xb9a   :  { %8332 = vst [vmem:[#allocation11 + $0x3a8] sm:$0xff] %v8204_v31  ;;  %v7307_v13 = vadd.f32 %v7306_v9, %v12781_v46 }
 0xb9c   :  { %v7814_v28 = vadd.f32 %v7558_v36, %v7307_v13 }
 0xb9e   :  { %v8070_v34 = vmax.f32 %v7814_v28, 0.0 }
 0xba0   :  { %v8206_v8 = vpack.c.bf16 %v8070_v34, %v8069_v0 }
 0xba1   :  { %v7309_v62 = vpop.f32.mrf.mxu0 }
 0xba2   :  { %8334 = vst [vmem:[#allocation11 + $0x3b8] sm:$0xff] %v8206_v8  ;;  %v7310_v4 = vadd.f32 %v7309_v62, %v12781_v46 }
 0xba4   :  { %v7818_v56 = vadd.f32 %v7562_v24, %v7310_v4 }
 0xba6   :  { %v8074_v44 = vmax.f32 %v7818_v56, 0.0 }
 0xba8   :  { %v8208_v29 = vpack.c.bf16 %v8074_v44, %v8073_v23 }
 0xba9   :  { %v7311_v32 = vpop.f32.mrf.mxu0 }
 0xbaa   :  { %8336 = vst [vmem:[#allocation11 + $0x3c8] sm:$0xff] %v8208_v29  ;;  %v7312_v2 = vadd.f32 %v7311_v32, %v12781_v46 }
 0xbac   :  { %v7822_v63 = vadd.f32 %v7566_v40, %v7312_v2 }
 0xbae   :  { %v8078_v6 = vmax.f32 %v7822_v63, 0.0 }
 0xbb0   :  { %v8210_v55 = vpack.c.bf16 %v8078_v6, %v8077_v39 }
 0xbb1   :  { %v7314_v5 = vpop.f32.mrf.mxu0 }
 0xbb2   :  { %8338 = vst [vmem:[#allocation11 + $0x3d8] sm:$0xff] %v8210_v55  ;;  %v7315_v18 = vadd.f32 %v7314_v5, %v12781_v46 }
 0xbb4   :  { %v7826_v10 = vadd.f32 %v7570_v1, %v7315_v18 }
 0xbb6   :  { %v8082_v50 = vmax.f32 %v7826_v10, 0.0 }
 0xbb8   :  { %v8212_v3 = vpack.c.bf16 %v8082_v50, %v8081_v45 }
 0xbb9   :  { %v7316_v21 = vpop.f32.mrf.mxu0 }
 0xbba   :  { %8340 = vst [vmem:[#allocation11 + $0x3e8] sm:$0xff] %v8212_v3  ;;  %v7317_v48 = vadd.f32 %v7316_v21, %v12781_v46 }
 0xbbc   :  { %v7830_v20 = vadd.f32 %v7574_v12, %v7317_v48 }
 0xbbe   :  { %v8086_v42 = vmax.f32 %v7830_v20, 0.0 }
 0xbc0   :  { %v8214_v58 = vpack.c.bf16 %v8086_v42, %v8085_v14 }
 0xbc2   :  { %8342 = vst [vmem:[#allocation11 + $0x3f8] sm:$0xff] %v8214_v58 }
 0xbc3   :  { %8355 = dma.vmem_to_hbm [thread:$0]  %s8348_s13, 16384, %s8350_s1, [#allocation4], %s9883_s19, %s9883_s19, %s9884_s20  }
 0xbc4   :  { %9876 = dma.done.wait [#allocation4], 16384  }
 0xbc5   :  { %9877 = vsyncadd [#allocation4], 4294950912 }
 0xbc6   :  { %8360 = vsyncpa [#allocation3], 1 }
 0xbc7   :  { %8361 = vsyncpa [#allocation6], 1 }
 0xbc8   :  { %8362 = vsyncpa [#allocation9], 1 }
 0xbc9   :  { %8363 = vsyncpa [#allocation4], 1 }

</bundles_post_ra>
